<compile_context>
chip_gen: v5e
topology: v5e:2x2
jax: 0.10.0
libtpu: 0.0.40
codegen_flags: <defaults>
</compile_context>

<pallas_src>
import functools
import math

import jax
import jax.numpy as jnp
from jax.experimental import pallas as pl
from jax.experimental.pallas import tpu as pltpu

F32 = jnp.float32
BF16 = jnp.bfloat16
_INV_SQRT2 = 1.0 / math.sqrt(2.0)

# ---------------- small synthetic config (HuBERT-like, tiny) ----------------
# TODO(synk): the original module loads a json config + torch checkpoint; here the
# architecture is a fixed tiny config and the weights are synthetic/deterministic.
B = 2            # batch
SAMPLES = 320    # raw audio samples
C_EX = 64        # feature-extractor channels
HID = 64         # transformer hidden dim
NH = 4           # attention heads
DH = HID // NH   # head dim
FF = 128         # feed-forward dim
NLAYERS = 2      # encoder layers
POS_K = 4        # conv positional embedding kernel (even -> trim last frame)
POS_G = 2        # conv positional embedding groups
LN_EPS = 1e-5

K0, S0 = 10, 5                    # conv0 kernel / stride
K1, S1 = 3, 2                     # conv1 kernel / stride
R0 = SAMPLES // S0                # 64 rows after the (R0, S0) waveform reshape
T0 = (SAMPLES - K0) // S0 + 1     # 63 frames after conv0
T1 = (T0 - K1) // S1 + 1          # 31 frames after conv1
VEC_W = 128                       # lane width of the packed f32 vector buffer

# ------- packed f32 vector-parameter rows (biases / norm gammas & betas) -----
VR_GN_G, VR_GN_B, VR_FPLN_G, VR_FPLN_B, VR_FP_B, VR_POS_B = range(6)
_NG = 6
_RPL = 3 * NH + 7                 # rows per encoder layer


def _vr_qkv(l, i, h):             # q/k/v bias row (i: 0=q, 1=k, 2=v)
    return _NG + l * _RPL + i * NH + h


def _vr_lay(l, off):              # 0 bo, 1 ln1_g, 2 ln1_b, 3 ff1_b, 4 ff2_b, 5 ln2_g, 6 ln2_b
    return _NG + l * _RPL + 3 * NH + off


N_VROWS = _NG + NLAYERS * _RPL


# ============================ in-kernel helpers ==============================

def _gelu(x):
    # exact (erf-based) GELU, matching torch.nn.functional.gelu default
    return 0.5 * x * (1.0 + jax.lax.erf(x * _INV_SQRT2))


def _ln(x, g, b, eps):
    m = jnp.mean(x, axis=-1, keepdims=True)
    v = jnp.mean(jnp.square(x - m), axis=-1, keepdims=True)
    return (x - m) * jax.lax.rsqrt(v + eps) * g + b


# ============================ fused Pallas kernel ============================

def _aves_kernel(wave_ref, vec_ref, fe0_ref, sel1_ref, fe1_ref, fpw_ref,
                 psel_ref, posw_ref, wqkv_ref, wo_ref, ff1_ref, ff2_ref,
                 out_ref, *, nlayers, nheads, eps):
    """Whole AVES forward for one batch element; everything resident in VMEM."""

    def vrow(r, w):
        return vec_ref[r:r + 1, 0:w]                       # (1, w) f32, static slice

    # ---- feature extractor: conv0 (k=10, s=5) + GroupNorm(C, C) + GELU ------
    xw = wave_ref[0].astype(BF16)                          # (R0, S0) = (64, 5)
    y = (jnp.dot(xw[0:T0, :], fe0_ref[0], preferred_element_type=F32) +
         jnp.dot(xw[1:T0 + 1, :], fe0_ref[1], preferred_element_type=F32))  # (T0, C)
    # GroupNorm(num_groups=C): per-channel statistics over the time axis.
    mu = jnp.mean(y, axis=0, keepdims=True)
    var = jnp.mean(jnp.square(y - mu), axis=0, keepdims=True)
    y = (y - mu) * jax.lax.rsqrt(var + eps)
    y = y * vrow(VR_GN_G, C_EX) + vrow(VR_GN_B, C_EX)
    y16 = _gelu(y).astype(BF16)                            # (T0, C)

    # ---- conv1 (k=3, s=2): stride-2 taps via constant 0/1 selection matmuls -
    c1 = jnp.zeros((T1, C_EX), F32)
    for j in range(K1):
        tap = jnp.dot(sel1_ref[j], y16, preferred_element_type=F32)   # exact row pick
        c1 = c1 + jnp.dot(tap.astype(BF16), fe1_ref[j],
                          preferred_element_type=F32)
    y1 = _gelu(c1)                                         # (T1, C)

    # ---- feature projection: LayerNorm -> Linear -----------------------------
    y1 = _ln(y1, vrow(VR_FPLN_G, C_EX), vrow(VR_FPLN_B, C_EX), eps)
    h = jnp.dot(y1.astype(BF16), fpw_ref[...],
                preferred_element_type=F32) + vrow(VR_FP_B, HID)       # (T1, H)

    # ---- convolutional positional embedding (k=4, pad=2, trim last) + res ---
    h16 = h.astype(BF16)
    pos = jnp.zeros((T1, HID), F32)
    for j in range(POS_K):
        if j == POS_K // 2:                                # zero-shift tap: identity
            z = h16
        else:                                              # banded shift selection
            z = jnp.dot(psel_ref[j], h16, preferred_element_type=F32).astype(BF16)
        pos = pos + jnp.dot(z, posw_ref[j], preferred_element_type=F32)
    pos = pos + vrow(VR_POS_B, HID)
    x = h + _gelu(pos)                                     # (T1, H)

    # ---- transformer encoder layers (layer_norm_first=False, post-LN) -------
    for l in range(nlayers):
        x16 = x.astype(BF16)
        attn = jnp.zeros((T1, HID), F32)
        wbase = (l * 3) * nheads
        for hh in range(nheads):
            q = jnp.dot(x16, wqkv_ref[wbase + hh],
                        preferred_element_type=F32) + vrow(_vr_qkv(l, 0, hh), DH)
            k = jnp.dot(x16, wqkv_ref[wbase + nheads + hh],
                        preferred_element_type=F32) + vrow(_vr_qkv(l, 1, hh), DH)
            v = jnp.dot(x16, wqkv_ref[wbase + 2 * nheads + hh],
                        preferred_element_type=F32) + vrow(_vr_qkv(l, 2, hh), DH)
            # scores: bf16 MXU inputs, f32 accumulation; 1/sqrt(dh) pre-folded in wq/bq
            s = jax.lax.dot_general(q.astype(BF16), k.astype(BF16),
                                    (((1,), (1,)), ((), ())),
                                    preferred_element_type=F32)        # (T1, T1)
            s = s - jnp.max(s, axis=-1, keepdims=True)
            p = jnp.exp(s)
            p = p * pl.reciprocal(jnp.sum(p, axis=-1, keepdims=True), approx=True)
            ctx = jnp.dot(p.astype(BF16), v.astype(BF16),
                          preferred_element_type=F32)                  # (T1, DH)
            # per-head output projection rows, accumulated (no lane concat)
            attn = attn + jnp.dot(ctx.astype(BF16), wo_ref[l * nheads + hh],
                                  preferred_element_type=F32)
        attn = attn + vrow(_vr_lay(l, 0), HID)

        yl = _ln(x + attn, vrow(_vr_lay(l, 1), HID), vrow(_vr_lay(l, 2), HID), eps)
        ff = _gelu(jnp.dot(yl.astype(BF16), ff1_ref[l],
                           preferred_element_type=F32) + vrow(_vr_lay(l, 3), FF))
        ff = jnp.dot(ff.astype(BF16), ff2_ref[l],
                     preferred_element_type=F32) + vrow(_vr_lay(l, 4), HID)
        yl = _ln(yl + ff, vrow(_vr_lay(l, 5), HID), vrow(_vr_lay(l, 6), HID), eps)
        out_ref[0, l] = yl.astype(out_ref.dtype)
        x = yl


# ============================ pallas_call wrapper ============================

def aves_fused(wave3d, prep):
    """wave3d: (B, R0, S0) f32 -> (B, NLAYERS, T1, HID) f32 per-layer outputs."""
    bsz = wave3d.shape[0]
    weights = (prep["vecs"], prep["fe0_w"], prep["sel1"], prep["fe1_w"],
               prep["fp_w"], prep["pos_sel"], prep["pos_w"], prep["wqkv"],
               prep["wo"], prep["ff1_w"], prep["ff2_w"])
    in_specs = [pl.BlockSpec((1, R0, S0), lambda i: (i, 0, 0))]
    for a in weights:                                     # weights: whole-array blocks,
        in_specs.append(pl.BlockSpec(a.shape,             # constant index -> resident
                                     lambda i, nd=a.ndim: (0,) * nd))
    return pl.pallas_call(
        functools.partial(_aves_kernel, nlayers=NLAYERS, nheads=NH, eps=LN_EPS),
        out_shape=jax.ShapeDtypeStruct((bsz, NLAYERS, T1, HID), F32),
        grid=(bsz,),
        in_specs=in_specs,
        out_specs=pl.BlockSpec((1, NLAYERS, T1, HID), lambda i: (i, 0, 0, 0)),
        compiler_params=pltpu.CompilerParams(dimension_semantics=("parallel",)),
    )(wave3d, *weights)


def aves_forward(waveform, prep, layers=-1):
    """Mirrors AVESTorchaudioWrapper.forward: (B, num_samples) -> features."""
    if waveform.ndim == 1:
        waveform = waveform[None, :]
    # TODO(synk): the in-kernel patch trick assumes num_samples is a multiple of the
    # conv0 stride; general lengths need a trim/pad in this wrapper.
    wave3d = waveform.astype(F32).reshape(waveform.shape[0], R0, S0)
    out = aves_fused(wave3d, prep)                         # (B, NLAYERS, T1, HID)
    outs = [out[:, l] for l in range(NLAYERS)]
    if layers is not None and isinstance(layers, int):
        return outs[layers]
    if layers and isinstance(layers, list):
        return [outs[l] for l in layers]
    return outs


# ============================ parameter init =================================

def init_params(key):
    keys = iter(jax.random.split(key, 64))

    def nrm(shape, scale=0.02):
        return scale * jax.random.normal(next(keys), shape, dtype=F32)

    hg = HID // POS_G
    p = {
        "fe0_w": nrm((C_EX, 1, K0)),                       # (Cout, Cin, k)
        "gn_g": jnp.ones((C_EX,), F32), "gn_b": jnp.zeros((C_EX,), F32),
        "fe1_w": nrm((C_EX, C_EX, K1)),
        "fp_ln_g": jnp.ones((C_EX,), F32), "fp_ln_b": jnp.zeros((C_EX,), F32),
        "fp_w": nrm((C_EX, HID)), "fp_b": nrm((HID,), 0.01),
        "pos_w": nrm((HID, hg, POS_K)),                    # grouped conv (out, in/g, k)
        "pos_b": nrm((HID,), 0.01),
        "layers": [],
    }
    for _ in range(NLAYERS):
        p["layers"].append({
            "q_w": nrm((HID, HID)), "q_b": nrm((HID,), 0.01),
            "k_w": nrm((HID, HID)), "k_b": nrm((HID,), 0.01),
            "v_w": nrm((HID, HID)), "v_b": nrm((HID,), 0.01),
            "o_w": nrm((HID, HID)), "o_b": nrm((HID,), 0.01),
            "ln1_g": jnp.ones((HID,), F32), "ln1_b": jnp.zeros((HID,), F32),
            "ff1_w": nrm((HID, FF)), "ff1_b": nrm((FF,), 0.01),
            "ff2_w": nrm((FF, HID)), "ff2_b": nrm((HID,), 0.01),
            "ln2_g": jnp.ones((HID,), F32), "ln2_b": jnp.zeros((HID,), F32),
        })
    return p


def _row(v):
    v = jnp.asarray(v, F32).reshape(-1)
    return jnp.pad(v, (0, VEC_W - v.shape[0]))


def prepare_params(p):
    """One-time host-side weight fusion / layout prep (outside the kernel):
    - conv0/conv1/pos-conv weights -> per-tap (Cin, Cout) bf16 matmul layouts,
      grouped pos-conv made dense block-diagonal per tap
    - constant 0/1 selection matrices for conv1's stride-2 taps and the pos-conv
      shifts (so the kernel needs no unaligned sublane slices / concats)
    - q/k/v/out-proj split per head ((L*3*NH,H,DH) / (L*NH,DH,H)), attention
      scale folded into the q weight & bias
    - every small f32 vector packed into one (N_VROWS, 128) buffer
    """
    scale = DH ** -0.5
    hg = HID // POS_G

    # conv0: two tap groups of 5 samples each (patch t = rows t, t+1 of (R0,S0))
    w0 = p["fe0_w"][:, 0, :]                               # (C, K0)
    fe0 = jnp.stack([w0[:, 0:S0].T, w0[:, S0:K0].T]).astype(BF16)     # (2, S0, C)

    # conv1 per-tap weights (Cin, Cout)
    fe1 = jnp.stack([p["fe1_w"][:, :, j].T for j in range(K1)]).astype(BF16)

    # stride-2 row-selection matrices for conv1 taps: sel1[j, t, 2t+j] = 1
    r1 = jnp.arange(T1)[:, None]
    c0 = jnp.arange(T0)[None, :]
    sel1 = jnp.stack([(c0 == S1 * r1 + j) for j in range(K1)]).astype(BF16)

    # pos-conv banded shift matrices: psel[j, t, t + j - pad] = 1 (zero at borders)
    c1 = jnp.arange(T1)[None, :]
    pos_sel = jnp.stack([(c1 == r1 + (j - POS_K // 2))
                         for j in range(POS_K)]).astype(BF16)

    # grouped pos-conv -> dense block-diagonal per-tap weights (in, out)
    posw = jnp.zeros((POS_K, HID, HID), F32)
    for t in range(POS_K):
        for g in range(POS_G):
            blk = p["pos_w"][g * hg:(g + 1) * hg, :, t]    # (out_local, in_local)
            posw = posw.at[t, g * hg:(g + 1) * hg, g * hg:(g + 1) * hg].set(blk.T)
    posw = posw.astype(BF16)

    # per-head attention weights, stacked across layers
    wqkv_list, wo_list = [], []
    for lp in p["layers"]:
        for m in (lp["q_w"] * scale, lp["k_w"], lp["v_w"]):
            for h in range(NH):
                wqkv_list.append(m[:, h * DH:(h + 1) * DH])
        for h in range(NH):
            wo_list.append(lp["o_w"][h * DH:(h + 1) * DH, :])
    wqkv = jnp.stack(wqkv_list).astype(BF16)               # (L*3*NH, HID, DH)
    wo = jnp.stack(wo_list).astype(BF16)                   # (L*NH, DH, HID)

    ff1 = jnp.stack([lp["ff1_w"] for lp in p["layers"]]).astype(BF16)
    ff2 = jnp.stack([lp["ff2_w"] for lp in p["layers"]]).astype(BF16)

    # packed f32 vector parameters
    rows = [None] * N_VROWS
    rows[VR_GN_G] = _row(p["gn_g"]); rows[VR_GN_B] = _row(p["gn_b"])
    rows[VR_FPLN_G] = _row(p["fp_ln_g"]); rows[VR_FPLN_B] = _row(p["fp_ln_b"])
    rows[VR_FP_B] = _row(p["fp_b"]); rows[VR_POS_B] = _row(p["pos_b"])
    for l, lp in enumerate(p["layers"]):
        bias3 = (lp["q_b"] * scale, lp["k_b"], lp["v_b"])
        for i in range(3):
            for h in range(NH):
                rows[_vr_qkv(l, i, h)] = _row(bias3[i][h * DH:(h + 1) * DH])
        rows[_vr_lay(l, 0)] = _row(lp["o_b"])
        rows[_vr_lay(l, 1)] = _row(lp["ln1_g"]); rows[_vr_lay(l, 2)] = _row(lp["ln1_b"])
        rows[_vr_lay(l, 3)] = _row(lp["ff1_b"]); rows[_vr_lay(l, 4)] = _row(lp["ff2_b"])
        rows[_vr_lay(l, 5)] = _row(lp["ln2_g"]); rows[_vr_lay(l, 6)] = _row(lp["ln2_b"])
    vecs = jnp.stack(rows)                                 # (N_VROWS, 128) f32

    return {"vecs": vecs, "fe0_w": fe0, "sel1": sel1, "fe1_w": fe1,
            "fp_w": p["fp_w"].astype(BF16), "pos_sel": pos_sel, "pos_w": posw,
            "wqkv": wqkv, "wo": wo, "ff1_w": ff1, "ff2_w": ff2}


if __name__ == "__main__":
    key = jax.random.PRNGKey(0)
    k_wav, k_par = jax.random.split(key)
    waveform = jax.random.normal(k_wav, (B, SAMPLES), dtype=F32)
    prep = prepare_params(init_params(k_par))

    out = aves_forward(waveform, prep, layers=-1)          # default: last layer
    out = jax.block_until_ready(out)

    # expected frames: (320-10)//5+1 = 63 ; (63-3)//2+1 = 31
    assert out.shape == (B, T1, HID), out.shape
    assert out.dtype == F32
    assert bool(jnp.all(jnp.isfinite(out)))
    print("KERNEL_OK")
</pallas_src>

<mosaic_0001>
module attributes {stable_mosaic.version = 11 : i64} {
  func.func @_aves_kernel(%arg0: i32, %arg1: memref<1x64x5xf32, #tpu.memory_space<vmem>>, %arg2: memref<44x128xf32, #tpu.memory_space<vmem>>, %arg3: memref<2x5x64xbf16, #tpu.memory_space<vmem>>, %arg4: memref<3x31x63xbf16, #tpu.memory_space<vmem>>, %arg5: memref<3x64x64xbf16, #tpu.memory_space<vmem>>, %arg6: memref<64x64xbf16, #tpu.memory_space<vmem>>, %arg7: memref<4x31x31xbf16, #tpu.memory_space<vmem>>, %arg8: memref<4x64x64xbf16, #tpu.memory_space<vmem>>, %arg9: memref<24x64x16xbf16, #tpu.memory_space<vmem>>, %arg10: memref<8x16x64xbf16, #tpu.memory_space<vmem>>, %arg11: memref<2x64x128xbf16, #tpu.memory_space<vmem>>, %arg12: memref<2x128x64xbf16, #tpu.memory_space<vmem>>, %arg13: memref<1x2x31x64xf32, #tpu.memory_space<vmem>>) attributes {dimension_semantics = [#tpu.dimension_semantics<parallel>], iteration_bounds = array<i64: 2>, scalar_prefetch = 0 : i64, scratch_operands = 0 : i64, tpu.core_type = #tpu.core_type<tc>, window_params = [{transform_indices = @transform_0, window_bounds = array<i64: 1, 64, 5>}, {pipeline_mode = #tpu.pipeline_mode<synchronous>, transform_indices = @transform_1, window_bounds = array<i64: 44, 128>}, {pipeline_mode = #tpu.pipeline_mode<synchronous>, transform_indices = @transform_2, window_bounds = array<i64: 2, 5, 64>}, {pipeline_mode = #tpu.pipeline_mode<synchronous>, transform_indices = @transform_3, window_bounds = array<i64: 3, 31, 63>}, {pipeline_mode = #tpu.pipeline_mode<synchronous>, transform_indices = @transform_4, window_bounds = array<i64: 3, 64, 64>}, {pipeline_mode = #tpu.pipeline_mode<synchronous>, transform_indices = @transform_5, window_bounds = array<i64: 64, 64>}, {pipeline_mode = #tpu.pipeline_mode<synchronous>, transform_indices = @transform_6, window_bounds = array<i64: 4, 31, 31>}, {pipeline_mode = #tpu.pipeline_mode<synchronous>, transform_indices = @transform_7, window_bounds = array<i64: 4, 64, 64>}, {pipeline_mode = #tpu.pipeline_mode<synchronous>, transform_indices = @transform_8, window_bounds = array<i64: 24, 64, 16>}, {pipeline_mode = #tpu.pipeline_mode<synchronous>, transform_indices = @transform_9, window_bounds = array<i64: 8, 16, 64>}, {pipeline_mode = #tpu.pipeline_mode<synchronous>, transform_indices = @transform_10, window_bounds = array<i64: 2, 64, 128>}, {pipeline_mode = #tpu.pipeline_mode<synchronous>, transform_indices = @transform_11, window_bounds = array<i64: 2, 128, 64>}, {transform_indices = @transform_12, window_bounds = array<i64: 1, 2, 31, 64>}]} {
    %c0 = arith.constant 0 : index
    %c0_0 = arith.constant 0 : index
    %c0_1 = arith.constant 0 : index
    %0 = vector.load %arg1[%c0, %c0_0, %c0_1] : memref<1x64x5xf32, #tpu.memory_space<vmem>>, vector<1x64x5xf32>
    %1 = vector.shape_cast %0 : vector<1x64x5xf32> to vector<64x5xf32>
    %2 = arith.truncf %1 : vector<64x5xf32> to vector<64x5xbf16>
    %3 = vector.extract_strided_slice %2 {offsets = [0, 0], sizes = [63, 5], strides = [1, 1]} : vector<64x5xbf16> to vector<63x5xbf16>
    %c0_2 = arith.constant 0 : index
    %c0_3 = arith.constant 0 : index
    %c0_4 = arith.constant 0 : index
    %4 = vector.load %arg3[%c0_2, %c0_3, %c0_4] : memref<2x5x64xbf16, #tpu.memory_space<vmem>>, vector<1x5x64xbf16>
    %5 = vector.shape_cast %4 : vector<1x5x64xbf16> to vector<5x64xbf16>
    %cst = arith.constant dense<0.000000e+00> : vector<63x64xf32>
    %6 = tpu.matmul %3, %5, %cst {dimension_numbers = #tpu.dot_dimension_numbers<[1], [0], [0], [1], [0, 0, 1, 1], [], []>} : vector<63x5xbf16>, vector<5x64xbf16>, vector<63x64xf32> -> vector<63x64xf32>
    %7 = vector.extract_strided_slice %2 {offsets = [1, 0], sizes = [63, 5], strides = [1, 1]} : vector<64x5xbf16> to vector<63x5xbf16>
    %c1 = arith.constant 1 : index
    %c0_5 = arith.constant 0 : index
    %c0_6 = arith.constant 0 : index
    %8 = vector.load %arg3[%c1, %c0_5, %c0_6] : memref<2x5x64xbf16, #tpu.memory_space<vmem>>, vector<1x5x64xbf16>
    %9 = vector.shape_cast %8 : vector<1x5x64xbf16> to vector<5x64xbf16>
    %cst_7 = arith.constant dense<0.000000e+00> : vector<63x64xf32>
    %10 = tpu.matmul %7, %9, %cst_7 {dimension_numbers = #tpu.dot_dimension_numbers<[1], [0], [0], [1], [0, 0, 1, 1], [], []>} : vector<63x5xbf16>, vector<5x64xbf16>, vector<63x64xf32> -> vector<63x64xf32>
    %11 = arith.addf %6, %10 : vector<63x64xf32>
    %cst_8 = arith.constant dense<0.000000e+00> : vector<64xf32>
    %12 = vector.multi_reduction <add>, %11, %cst_8 [0] : vector<63x64xf32> to vector<64xf32>
    %13 = vector.shape_cast %12 : vector<64xf32> to vector<1x64xf32>
    %cst_9 = arith.constant 6.300000e+01 : f32
    %14 = vector.broadcast %cst_9 : f32 to vector<1x64xf32>
    %15 = arith.divf %13, %14 : vector<1x64xf32>
    %16 = vector.broadcast %15 : vector<1x64xf32> to vector<63x64xf32>
    %17 = arith.subf %11, %16 : vector<63x64xf32>
    %18 = arith.mulf %17, %17 : vector<63x64xf32>
    %cst_10 = arith.constant dense<0.000000e+00> : vector<64xf32>
    %19 = vector.multi_reduction <add>, %18, %cst_10 [0] : vector<63x64xf32> to vector<64xf32>
    %20 = vector.shape_cast %19 : vector<64xf32> to vector<1x64xf32>
    %cst_11 = arith.constant 6.300000e+01 : f32
    %21 = vector.broadcast %cst_11 : f32 to vector<1x64xf32>
    %22 = arith.divf %20, %21 : vector<1x64xf32>
    %23 = vector.broadcast %15 : vector<1x64xf32> to vector<63x64xf32>
    %24 = arith.subf %11, %23 : vector<63x64xf32>
    %cst_12 = arith.constant 9.99999974E-6 : f32
    %25 = vector.broadcast %cst_12 : f32 to vector<1x64xf32>
    %26 = arith.addf %22, %25 : vector<1x64xf32>
    %27 = math.rsqrt %26 : vector<1x64xf32>
    %28 = vector.broadcast %27 : vector<1x64xf32> to vector<63x64xf32>
    %29 = arith.mulf %24, %28 : vector<63x64xf32>
    %c0_13 = arith.constant 0 : index
    %c0_14 = arith.constant 0 : index
    %30 = vector.load %arg2[%c0_13, %c0_14] : memref<44x128xf32, #tpu.memory_space<vmem>>, vector<1x64xf32>
    %31 = vector.broadcast %30 : vector<1x64xf32> to vector<63x64xf32>
    %32 = arith.mulf %29, %31 : vector<63x64xf32>
    %c1_15 = arith.constant 1 : index
    %c0_16 = arith.constant 0 : index
    %33 = vector.load %arg2[%c1_15, %c0_16] : memref<44x128xf32, #tpu.memory_space<vmem>>, vector<1x64xf32>
    %34 = vector.broadcast %33 : vector<1x64xf32> to vector<63x64xf32>
    %35 = arith.addf %32, %34 : vector<63x64xf32>
    %cst_17 = arith.constant 5.000000e-01 : f32
    %36 = vector.broadcast %cst_17 : f32 to vector<63x64xf32>
    %37 = arith.mulf %36, %35 : vector<63x64xf32>
    %cst_18 = arith.constant 0.707106769 : f32
    %38 = vector.broadcast %cst_18 : f32 to vector<63x64xf32>
    %39 = arith.mulf %35, %38 : vector<63x64xf32>
    %40 = math.erf %39 : vector<63x64xf32>
    %cst_19 = arith.constant 1.000000e+00 : f32
    %41 = vector.broadcast %cst_19 : f32 to vector<63x64xf32>
    %42 = arith.addf %41, %40 : vector<63x64xf32>
    %43 = arith.mulf %37, %42 : vector<63x64xf32>
    %44 = arith.truncf %43 : vector<63x64xf32> to vector<63x64xbf16>
    %cst_20 = arith.constant 0.000000e+00 : f32
    %45 = vector.broadcast %cst_20 : f32 to vector<31x64xf32>
    %c0_21 = arith.constant 0 : index
    %c0_22 = arith.constant 0 : index
    %c0_23 = arith.constant 0 : index
    %46 = vector.load %arg4[%c0_21, %c0_22, %c0_23] : memref<3x31x63xbf16, #tpu.memory_space<vmem>>, vector<1x31x63xbf16>
    %47 = vector.shape_cast %46 : vector<1x31x63xbf16> to vector<31x63xbf16>
    %cst_24 = arith.constant dense<0.000000e+00> : vector<31x64xf32>
    %48 = tpu.matmul %47, %44, %cst_24 {dimension_numbers = #tpu.dot_dimension_numbers<[1], [0], [0], [1], [0, 0, 1, 1], [], []>} : vector<31x63xbf16>, vector<63x64xbf16>, vector<31x64xf32> -> vector<31x64xf32>
    %49 = arith.truncf %48 : vector<31x64xf32> to vector<31x64xbf16>
    %c0_25 = arith.constant 0 : index
    %c0_26 = arith.constant 0 : index
    %c0_27 = arith.constant 0 : index
    %50 = vector.load %arg5[%c0_25, %c0_26, %c0_27] : memref<3x64x64xbf16, #tpu.memory_space<vmem>>, vector<1x64x64xbf16>
    %51 = vector.shape_cast %50 : vector<1x64x64xbf16> to vector<64x64xbf16>
    %cst_28 = arith.constant dense<0.000000e+00> : vector<31x64xf32>
    %52 = tpu.matmul %49, %51, %cst_28 {dimension_numbers = #tpu.dot_dimension_numbers<[1], [0], [0], [1], [0, 0, 1, 1], [], []>} : vector<31x64xbf16>, vector<64x64xbf16>, vector<31x64xf32> -> vector<31x64xf32>
    %53 = arith.addf %45, %52 : vector<31x64xf32>
    %c1_29 = arith.constant 1 : index
    %c0_30 = arith.constant 0 : index
    %c0_31 = arith.constant 0 : index
    %54 = vector.load %arg4[%c1_29, %c0_30, %c0_31] : memref<3x31x63xbf16, #tpu.memory_space<vmem>>, vector<1x31x63xbf16>
    %55 = vector.shape_cast %54 : vector<1x31x63xbf16> to vector<31x63xbf16>
    %cst_32 = arith.constant dense<0.000000e+00> : vector<31x64xf32>
    %56 = tpu.matmul %55, %44, %cst_32 {dimension_numbers = #tpu.dot_dimension_numbers<[1], [0], [0], [1], [0, 0, 1, 1], [], []>} : vector<31x63xbf16>, vector<63x64xbf16>, vector<31x64xf32> -> vector<31x64xf32>
    %57 = arith.truncf %56 : vector<31x64xf32> to vector<31x64xbf16>
    %c1_33 = arith.constant 1 : index
    %c0_34 = arith.constant 0 : index
    %c0_35 = arith.constant 0 : index
    %58 = vector.load %arg5[%c1_33, %c0_34, %c0_35] : memref<3x64x64xbf16, #tpu.memory_space<vmem>>, vector<1x64x64xbf16>
    %59 = vector.shape_cast %58 : vector<1x64x64xbf16> to vector<64x64xbf16>
    %cst_36 = arith.constant dense<0.000000e+00> : vector<31x64xf32>
    %60 = tpu.matmul %57, %59, %cst_36 {dimension_numbers = #tpu.dot_dimension_numbers<[1], [0], [0], [1], [0, 0, 1, 1], [], []>} : vector<31x64xbf16>, vector<64x64xbf16>, vector<31x64xf32> -> vector<31x64xf32>
    %61 = arith.addf %53, %60 : vector<31x64xf32>
    %c2 = arith.constant 2 : index
    %c0_37 = arith.constant 0 : index
    %c0_38 = arith.constant 0 : index
    %62 = vector.load %arg4[%c2, %c0_37, %c0_38] : memref<3x31x63xbf16, #tpu.memory_space<vmem>>, vector<1x31x63xbf16>
    %63 = vector.shape_cast %62 : vector<1x31x63xbf16> to vector<31x63xbf16>
    %cst_39 = arith.constant dense<0.000000e+00> : vector<31x64xf32>
    %64 = tpu.matmul %63, %44, %cst_39 {dimension_numbers = #tpu.dot_dimension_numbers<[1], [0], [0], [1], [0, 0, 1, 1], [], []>} : vector<31x63xbf16>, vector<63x64xbf16>, vector<31x64xf32> -> vector<31x64xf32>
    %65 = arith.truncf %64 : vector<31x64xf32> to vector<31x64xbf16>
    %c2_40 = arith.constant 2 : index
    %c0_41 = arith.constant 0 : index
    %c0_42 = arith.constant 0 : index
    %66 = vector.load %arg5[%c2_40, %c0_41, %c0_42] : memref<3x64x64xbf16, #tpu.memory_space<vmem>>, vector<1x64x64xbf16>
    %67 = vector.shape_cast %66 : vector<1x64x64xbf16> to vector<64x64xbf16>
    %cst_43 = arith.constant dense<0.000000e+00> : vector<31x64xf32>
    %68 = tpu.matmul %65, %67, %cst_43 {dimension_numbers = #tpu.dot_dimension_numbers<[1], [0], [0], [1], [0, 0, 1, 1], [], []>} : vector<31x64xbf16>, vector<64x64xbf16>, vector<31x64xf32> -> vector<31x64xf32>
    %69 = arith.addf %61, %68 : vector<31x64xf32>
    %cst_44 = arith.constant 5.000000e-01 : f32
    %70 = vector.broadcast %cst_44 : f32 to vector<31x64xf32>
    %71 = arith.mulf %70, %69 : vector<31x64xf32>
    %cst_45 = arith.constant 0.707106769 : f32
    %72 = vector.broadcast %cst_45 : f32 to vector<31x64xf32>
    %73 = arith.mulf %69, %72 : vector<31x64xf32>
    %74 = math.erf %73 : vector<31x64xf32>
    %cst_46 = arith.constant 1.000000e+00 : f32
    %75 = vector.broadcast %cst_46 : f32 to vector<31x64xf32>
    %76 = arith.addf %75, %74 : vector<31x64xf32>
    %77 = arith.mulf %71, %76 : vector<31x64xf32>
    %c2_47 = arith.constant 2 : index
    %c0_48 = arith.constant 0 : index
    %78 = vector.load %arg2[%c2_47, %c0_48] : memref<44x128xf32, #tpu.memory_space<vmem>>, vector<1x64xf32>
    %c3 = arith.constant 3 : index
    %c0_49 = arith.constant 0 : index
    %79 = vector.load %arg2[%c3, %c0_49] : memref<44x128xf32, #tpu.memory_space<vmem>>, vector<1x64xf32>
    %cst_50 = arith.constant dense<0.000000e+00> : vector<31xf32>
    %80 = vector.multi_reduction <add>, %77, %cst_50 [1] : vector<31x64xf32> to vector<31xf32>
    %81 = vector.shape_cast %80 : vector<31xf32> to vector<31x1xf32>
    %cst_51 = arith.constant 6.400000e+01 : f32
    %82 = vector.broadcast %cst_51 : f32 to vector<31x1xf32>
    %83 = arith.divf %81, %82 : vector<31x1xf32>
    %84 = vector.broadcast %83 : vector<31x1xf32> to vector<31x64xf32>
    %85 = arith.subf %77, %84 : vector<31x64xf32>
    %86 = arith.mulf %85, %85 : vector<31x64xf32>
    %cst_52 = arith.constant dense<0.000000e+00> : vector<31xf32>
    %87 = vector.multi_reduction <add>, %86, %cst_52 [1] : vector<31x64xf32> to vector<31xf32>
    %88 = vector.shape_cast %87 : vector<31xf32> to vector<31x1xf32>
    %cst_53 = arith.constant 6.400000e+01 : f32
    %89 = vector.broadcast %cst_53 : f32 to vector<31x1xf32>
    %90 = arith.divf %88, %89 : vector<31x1xf32>
    %91 = vector.broadcast %83 : vector<31x1xf32> to vector<31x64xf32>
    %92 = arith.subf %77, %91 : vector<31x64xf32>
    %cst_54 = arith.constant 9.99999974E-6 : f32
    %93 = vector.broadcast %cst_54 : f32 to vector<31x1xf32>
    %94 = arith.addf %90, %93 : vector<31x1xf32>
    %95 = math.rsqrt %94 : vector<31x1xf32>
    %96 = vector.broadcast %95 : vector<31x1xf32> to vector<31x64xf32>
    %97 = arith.mulf %92, %96 : vector<31x64xf32>
    %98 = vector.broadcast %78 : vector<1x64xf32> to vector<31x64xf32>
    %99 = arith.mulf %97, %98 : vector<31x64xf32>
    %100 = vector.broadcast %79 : vector<1x64xf32> to vector<31x64xf32>
    %101 = arith.addf %99, %100 : vector<31x64xf32>
    %102 = arith.truncf %101 : vector<31x64xf32> to vector<31x64xbf16>
    %c0_55 = arith.constant 0 : index
    %c0_56 = arith.constant 0 : index
    %103 = vector.load %arg6[%c0_55, %c0_56] : memref<64x64xbf16, #tpu.memory_space<vmem>>, vector<64x64xbf16>
    %cst_57 = arith.constant dense<0.000000e+00> : vector<31x64xf32>
    %104 = tpu.matmul %102, %103, %cst_57 {dimension_numbers = #tpu.dot_dimension_numbers<[1], [0], [0], [1], [0, 0, 1, 1], [], []>} : vector<31x64xbf16>, vector<64x64xbf16>, vector<31x64xf32> -> vector<31x64xf32>
    %c4 = arith.constant 4 : index
    %c0_58 = arith.constant 0 : index
    %105 = vector.load %arg2[%c4, %c0_58] : memref<44x128xf32, #tpu.memory_space<vmem>>, vector<1x64xf32>
    %106 = vector.broadcast %105 : vector<1x64xf32> to vector<31x64xf32>
    %107 = arith.addf %104, %106 : vector<31x64xf32>
    %108 = arith.truncf %107 : vector<31x64xf32> to vector<31x64xbf16>
    %cst_59 = arith.constant 0.000000e+00 : f32
    %109 = vector.broadcast %cst_59 : f32 to vector<31x64xf32>
    %c0_60 = arith.constant 0 : index
    %c0_61 = arith.constant 0 : index
    %c0_62 = arith.constant 0 : index
    %110 = vector.load %arg7[%c0_60, %c0_61, %c0_62] : memref<4x31x31xbf16, #tpu.memory_space<vmem>>, vector<1x31x31xbf16>
    %111 = vector.shape_cast %110 : vector<1x31x31xbf16> to vector<31x31xbf16>
    %cst_63 = arith.constant dense<0.000000e+00> : vector<31x64xf32>
    %112 = tpu.matmul %111, %108, %cst_63 {dimension_numbers = #tpu.dot_dimension_numbers<[1], [0], [0], [1], [0, 0, 1, 1], [], []>} : vector<31x31xbf16>, vector<31x64xbf16>, vector<31x64xf32> -> vector<31x64xf32>
    %113 = arith.truncf %112 : vector<31x64xf32> to vector<31x64xbf16>
    %c0_64 = arith.constant 0 : index
    %c0_65 = arith.constant 0 : index
    %c0_66 = arith.constant 0 : index
    %114 = vector.load %arg8[%c0_64, %c0_65, %c0_66] : memref<4x64x64xbf16, #tpu.memory_space<vmem>>, vector<1x64x64xbf16>
    %115 = vector.shape_cast %114 : vector<1x64x64xbf16> to vector<64x64xbf16>
    %cst_67 = arith.constant dense<0.000000e+00> : vector<31x64xf32>
    %116 = tpu.matmul %113, %115, %cst_67 {dimension_numbers = #tpu.dot_dimension_numbers<[1], [0], [0], [1], [0, 0, 1, 1], [], []>} : vector<31x64xbf16>, vector<64x64xbf16>, vector<31x64xf32> -> vector<31x64xf32>
    %117 = arith.addf %109, %116 : vector<31x64xf32>
    %c1_68 = arith.constant 1 : index
    %c0_69 = arith.constant 0 : index
    %c0_70 = arith.constant 0 : index
    %118 = vector.load %arg7[%c1_68, %c0_69, %c0_70] : memref<4x31x31xbf16, #tpu.memory_space<vmem>>, vector<1x31x31xbf16>
    %119 = vector.shape_cast %118 : vector<1x31x31xbf16> to vector<31x31xbf16>
    %cst_71 = arith.constant dense<0.000000e+00> : vector<31x64xf32>
    %120 = tpu.matmul %119, %108, %cst_71 {dimension_numbers = #tpu.dot_dimension_numbers<[1], [0], [0], [1], [0, 0, 1, 1], [], []>} : vector<31x31xbf16>, vector<31x64xbf16>, vector<31x64xf32> -> vector<31x64xf32>
    %121 = arith.truncf %120 : vector<31x64xf32> to vector<31x64xbf16>
    %c1_72 = arith.constant 1 : index
    %c0_73 = arith.constant 0 : index
    %c0_74 = arith.constant 0 : index
    %122 = vector.load %arg8[%c1_72, %c0_73, %c0_74] : memref<4x64x64xbf16, #tpu.memory_space<vmem>>, vector<1x64x64xbf16>
    %123 = vector.shape_cast %122 : vector<1x64x64xbf16> to vector<64x64xbf16>
    %cst_75 = arith.constant dense<0.000000e+00> : vector<31x64xf32>
    %124 = tpu.matmul %121, %123, %cst_75 {dimension_numbers = #tpu.dot_dimension_numbers<[1], [0], [0], [1], [0, 0, 1, 1], [], []>} : vector<31x64xbf16>, vector<64x64xbf16>, vector<31x64xf32> -> vector<31x64xf32>
    %125 = arith.addf %117, %124 : vector<31x64xf32>
    %c2_76 = arith.constant 2 : index
    %c0_77 = arith.constant 0 : index
    %c0_78 = arith.constant 0 : index
    %126 = vector.load %arg8[%c2_76, %c0_77, %c0_78] : memref<4x64x64xbf16, #tpu.memory_space<vmem>>, vector<1x64x64xbf16>
    %127 = vector.shape_cast %126 : vector<1x64x64xbf16> to vector<64x64xbf16>
    %cst_79 = arith.constant dense<0.000000e+00> : vector<31x64xf32>
    %128 = tpu.matmul %108, %127, %cst_79 {dimension_numbers = #tpu.dot_dimension_numbers<[1], [0], [0], [1], [0, 0, 1, 1], [], []>} : vector<31x64xbf16>, vector<64x64xbf16>, vector<31x64xf32> -> vector<31x64xf32>
    %129 = arith.addf %125, %128 : vector<31x64xf32>
    %c3_80 = arith.constant 3 : index
    %c0_81 = arith.constant 0 : index
    %c0_82 = arith.constant 0 : index
    %130 = vector.load %arg7[%c3_80, %c0_81, %c0_82] : memref<4x31x31xbf16, #tpu.memory_space<vmem>>, vector<1x31x31xbf16>
    %131 = vector.shape_cast %130 : vector<1x31x31xbf16> to vector<31x31xbf16>
    %cst_83 = arith.constant dense<0.000000e+00> : vector<31x64xf32>
    %132 = tpu.matmul %131, %108, %cst_83 {dimension_numbers = #tpu.dot_dimension_numbers<[1], [0], [0], [1], [0, 0, 1, 1], [], []>} : vector<31x31xbf16>, vector<31x64xbf16>, vector<31x64xf32> -> vector<31x64xf32>
    %133 = arith.truncf %132 : vector<31x64xf32> to vector<31x64xbf16>
    %c3_84 = arith.constant 3 : index
    %c0_85 = arith.constant 0 : index
    %c0_86 = arith.constant 0 : index
    %134 = vector.load %arg8[%c3_84, %c0_85, %c0_86] : memref<4x64x64xbf16, #tpu.memory_space<vmem>>, vector<1x64x64xbf16>
    %135 = vector.shape_cast %134 : vector<1x64x64xbf16> to vector<64x64xbf16>
    %cst_87 = arith.constant dense<0.000000e+00> : vector<31x64xf32>
    %136 = tpu.matmul %133, %135, %cst_87 {dimension_numbers = #tpu.dot_dimension_numbers<[1], [0], [0], [1], [0, 0, 1, 1], [], []>} : vector<31x64xbf16>, vector<64x64xbf16>, vector<31x64xf32> -> vector<31x64xf32>
    %137 = arith.addf %129, %136 : vector<31x64xf32>
    %c5 = arith.constant 5 : index
    %c0_88 = arith.constant 0 : index
    %138 = vector.load %arg2[%c5, %c0_88] : memref<44x128xf32, #tpu.memory_space<vmem>>, vector<1x64xf32>
    %139 = vector.broadcast %138 : vector<1x64xf32> to vector<31x64xf32>
    %140 = arith.addf %137, %139 : vector<31x64xf32>
    %cst_89 = arith.constant 5.000000e-01 : f32
    %141 = vector.broadcast %cst_89 : f32 to vector<31x64xf32>
    %142 = arith.mulf %141, %140 : vector<31x64xf32>
    %cst_90 = arith.constant 0.707106769 : f32
    %143 = vector.broadcast %cst_90 : f32 to vector<31x64xf32>
    %144 = arith.mulf %140, %143 : vector<31x64xf32>
    %145 = math.erf %144 : vector<31x64xf32>
    %cst_91 = arith.constant 1.000000e+00 : f32
    %146 = vector.broadcast %cst_91 : f32 to vector<31x64xf32>
    %147 = arith.addf %146, %145 : vector<31x64xf32>
    %148 = arith.mulf %142, %147 : vector<31x64xf32>
    %149 = arith.addf %107, %148 : vector<31x64xf32>
    %150 = arith.truncf %149 : vector<31x64xf32> to vector<31x64xbf16>
    %cst_92 = arith.constant 0.000000e+00 : f32
    %151 = vector.broadcast %cst_92 : f32 to vector<31x64xf32>
    %c0_93 = arith.constant 0 : index
    %c0_94 = arith.constant 0 : index
    %c0_95 = arith.constant 0 : index
    %152 = vector.load %arg9[%c0_93, %c0_94, %c0_95] : memref<24x64x16xbf16, #tpu.memory_space<vmem>>, vector<1x64x16xbf16>
    %153 = vector.shape_cast %152 : vector<1x64x16xbf16> to vector<64x16xbf16>
    %cst_96 = arith.constant dense<0.000000e+00> : vector<31x16xf32>
    %154 = tpu.matmul %150, %153, %cst_96 {dimension_numbers = #tpu.dot_dimension_numbers<[1], [0], [0], [1], [0, 0, 1, 1], [], []>} : vector<31x64xbf16>, vector<64x16xbf16>, vector<31x16xf32> -> vector<31x16xf32>
    %c6 = arith.constant 6 : index
    %c0_97 = arith.constant 0 : index
    %155 = vector.load %arg2[%c6, %c0_97] : memref<44x128xf32, #tpu.memory_space<vmem>>, vector<1x16xf32>
    %156 = vector.broadcast %155 : vector<1x16xf32> to vector<31x16xf32>
    %157 = arith.addf %154, %156 : vector<31x16xf32>
    %c4_98 = arith.constant 4 : index
    %c0_99 = arith.constant 0 : index
    %c0_100 = arith.constant 0 : index
    %158 = vector.load %arg9[%c4_98, %c0_99, %c0_100] : memref<24x64x16xbf16, #tpu.memory_space<vmem>>, vector<1x64x16xbf16>
    %159 = vector.shape_cast %158 : vector<1x64x16xbf16> to vector<64x16xbf16>
    %cst_101 = arith.constant dense<0.000000e+00> : vector<31x16xf32>
    %160 = tpu.matmul %150, %159, %cst_101 {dimension_numbers = #tpu.dot_dimension_numbers<[1], [0], [0], [1], [0, 0, 1, 1], [], []>} : vector<31x64xbf16>, vector<64x16xbf16>, vector<31x16xf32> -> vector<31x16xf32>
    %c10 = arith.constant 10 : index
    %c0_102 = arith.constant 0 : index
    %161 = vector.load %arg2[%c10, %c0_102] : memref<44x128xf32, #tpu.memory_space<vmem>>, vector<1x16xf32>
    %162 = vector.broadcast %161 : vector<1x16xf32> to vector<31x16xf32>
    %163 = arith.addf %160, %162 : vector<31x16xf32>
    %c8 = arith.constant 8 : index
    %c0_103 = arith.constant 0 : index
    %c0_104 = arith.constant 0 : index
    %164 = vector.load %arg9[%c8, %c0_103, %c0_104] : memref<24x64x16xbf16, #tpu.memory_space<vmem>>, vector<1x64x16xbf16>
    %165 = vector.shape_cast %164 : vector<1x64x16xbf16> to vector<64x16xbf16>
    %cst_105 = arith.constant dense<0.000000e+00> : vector<31x16xf32>
    %166 = tpu.matmul %150, %165, %cst_105 {dimension_numbers = #tpu.dot_dimension_numbers<[1], [0], [0], [1], [0, 0, 1, 1], [], []>} : vector<31x64xbf16>, vector<64x16xbf16>, vector<31x16xf32> -> vector<31x16xf32>
    %c14 = arith.constant 14 : index
    %c0_106 = arith.constant 0 : index
    %167 = vector.load %arg2[%c14, %c0_106] : memref<44x128xf32, #tpu.memory_space<vmem>>, vector<1x16xf32>
    %168 = vector.broadcast %167 : vector<1x16xf32> to vector<31x16xf32>
    %169 = arith.addf %166, %168 : vector<31x16xf32>
    %170 = arith.truncf %157 : vector<31x16xf32> to vector<31x16xbf16>
    %171 = arith.truncf %163 : vector<31x16xf32> to vector<31x16xbf16>
    %cst_107 = arith.constant dense<0.000000e+00> : vector<31x31xf32>
    %172 = tpu.matmul %170, %171, %cst_107 {dimension_numbers = #tpu.dot_dimension_numbers<[1], [1], [0], [0], [0, 0, 1, 0], [], []>} : vector<31x16xbf16>, vector<31x16xbf16>, vector<31x31xf32> -> vector<31x31xf32>
    %cst_108 = arith.constant dense<0xFF800000> : vector<31xf32>
    %173 = vector.multi_reduction <maximumf>, %172, %cst_108 [1] : vector<31x31xf32> to vector<31xf32>
    %174 = vector.shape_cast %173 : vector<31xf32> to vector<31x1xf32>
    %175 = vector.broadcast %174 : vector<31x1xf32> to vector<31x31xf32>
    %176 = arith.subf %172, %175 : vector<31x31xf32>
    %177 = math.exp %176 : vector<31x31xf32>
    %cst_109 = arith.constant dense<0.000000e+00> : vector<31xf32>
    %178 = vector.multi_reduction <add>, %177, %cst_109 [1] : vector<31x31xf32> to vector<31xf32>
    %179 = vector.shape_cast %178 : vector<31xf32> to vector<31x1xf32>
    %180 = tpu.reciprocal %179 {approx = true} : vector<31x1xf32> -> vector<31x1xf32>
    %181 = vector.broadcast %180 : vector<31x1xf32> to vector<31x31xf32>
    %182 = arith.mulf %177, %181 : vector<31x31xf32>
    %183 = arith.truncf %182 : vector<31x31xf32> to vector<31x31xbf16>
    %184 = arith.truncf %169 : vector<31x16xf32> to vector<31x16xbf16>
    %cst_110 = arith.constant dense<0.000000e+00> : vector<31x16xf32>
    %185 = tpu.matmul %183, %184, %cst_110 {dimension_numbers = #tpu.dot_dimension_numbers<[1], [0], [0], [1], [0, 0, 1, 1], [], []>} : vector<31x31xbf16>, vector<31x16xbf16>, vector<31x16xf32> -> vector<31x16xf32>
    %186 = arith.truncf %185 : vector<31x16xf32> to vector<31x16xbf16>
    %c0_111 = arith.constant 0 : index
    %c0_112 = arith.constant 0 : index
    %c0_113 = arith.constant 0 : index
    %187 = vector.load %arg10[%c0_111, %c0_112, %c0_113] : memref<8x16x64xbf16, #tpu.memory_space<vmem>>, vector<1x16x64xbf16>
    %188 = vector.shape_cast %187 : vector<1x16x64xbf16> to vector<16x64xbf16>
    %cst_114 = arith.constant dense<0.000000e+00> : vector<31x64xf32>
    %189 = tpu.matmul %186, %188, %cst_114 {dimension_numbers = #tpu.dot_dimension_numbers<[1], [0], [0], [1], [0, 0, 1, 1], [], []>} : vector<31x16xbf16>, vector<16x64xbf16>, vector<31x64xf32> -> vector<31x64xf32>
    %190 = arith.addf %151, %189 : vector<31x64xf32>
    %c1_115 = arith.constant 1 : index
    %c0_116 = arith.constant 0 : index
    %c0_117 = arith.constant 0 : index
    %191 = vector.load %arg9[%c1_115, %c0_116, %c0_117] : memref<24x64x16xbf16, #tpu.memory_space<vmem>>, vector<1x64x16xbf16>
    %192 = vector.shape_cast %191 : vector<1x64x16xbf16> to vector<64x16xbf16>
    %cst_118 = arith.constant dense<0.000000e+00> : vector<31x16xf32>
    %193 = tpu.matmul %150, %192, %cst_118 {dimension_numbers = #tpu.dot_dimension_numbers<[1], [0], [0], [1], [0, 0, 1, 1], [], []>} : vector<31x64xbf16>, vector<64x16xbf16>, vector<31x16xf32> -> vector<31x16xf32>
    %c7 = arith.constant 7 : index
    %c0_119 = arith.constant 0 : index
    %194 = vector.load %arg2[%c7, %c0_119] : memref<44x128xf32, #tpu.memory_space<vmem>>, vector<1x16xf32>
    %195 = vector.broadcast %194 : vector<1x16xf32> to vector<31x16xf32>
    %196 = arith.addf %193, %195 : vector<31x16xf32>
    %c5_120 = arith.constant 5 : index
    %c0_121 = arith.constant 0 : index
    %c0_122 = arith.constant 0 : index
    %197 = vector.load %arg9[%c5_120, %c0_121, %c0_122] : memref<24x64x16xbf16, #tpu.memory_space<vmem>>, vector<1x64x16xbf16>
    %198 = vector.shape_cast %197 : vector<1x64x16xbf16> to vector<64x16xbf16>
    %cst_123 = arith.constant dense<0.000000e+00> : vector<31x16xf32>
    %199 = tpu.matmul %150, %198, %cst_123 {dimension_numbers = #tpu.dot_dimension_numbers<[1], [0], [0], [1], [0, 0, 1, 1], [], []>} : vector<31x64xbf16>, vector<64x16xbf16>, vector<31x16xf32> -> vector<31x16xf32>
    %c11 = arith.constant 11 : index
    %c0_124 = arith.constant 0 : index
    %200 = vector.load %arg2[%c11, %c0_124] : memref<44x128xf32, #tpu.memory_space<vmem>>, vector<1x16xf32>
    %201 = vector.broadcast %200 : vector<1x16xf32> to vector<31x16xf32>
    %202 = arith.addf %199, %201 : vector<31x16xf32>
    %c9 = arith.constant 9 : index
    %c0_125 = arith.constant 0 : index
    %c0_126 = arith.constant 0 : index
    %203 = vector.load %arg9[%c9, %c0_125, %c0_126] : memref<24x64x16xbf16, #tpu.memory_space<vmem>>, vector<1x64x16xbf16>
    %204 = vector.shape_cast %203 : vector<1x64x16xbf16> to vector<64x16xbf16>
    %cst_127 = arith.constant dense<0.000000e+00> : vector<31x16xf32>
    %205 = tpu.matmul %150, %204, %cst_127 {dimension_numbers = #tpu.dot_dimension_numbers<[1], [0], [0], [1], [0, 0, 1, 1], [], []>} : vector<31x64xbf16>, vector<64x16xbf16>, vector<31x16xf32> -> vector<31x16xf32>
    %c15 = arith.constant 15 : index
    %c0_128 = arith.constant 0 : index
    %206 = vector.load %arg2[%c15, %c0_128] : memref<44x128xf32, #tpu.memory_space<vmem>>, vector<1x16xf32>
    %207 = vector.broadcast %206 : vector<1x16xf32> to vector<31x16xf32>
    %208 = arith.addf %205, %207 : vector<31x16xf32>
    %209 = arith.truncf %196 : vector<31x16xf32> to vector<31x16xbf16>
    %210 = arith.truncf %202 : vector<31x16xf32> to vector<31x16xbf16>
    %cst_129 = arith.constant dense<0.000000e+00> : vector<31x31xf32>
    %211 = tpu.matmul %209, %210, %cst_129 {dimension_numbers = #tpu.dot_dimension_numbers<[1], [1], [0], [0], [0, 0, 1, 0], [], []>} : vector<31x16xbf16>, vector<31x16xbf16>, vector<31x31xf32> -> vector<31x31xf32>
    %cst_130 = arith.constant dense<0xFF800000> : vector<31xf32>
    %212 = vector.multi_reduction <maximumf>, %211, %cst_130 [1] : vector<31x31xf32> to vector<31xf32>
    %213 = vector.shape_cast %212 : vector<31xf32> to vector<31x1xf32>
    %214 = vector.broadcast %213 : vector<31x1xf32> to vector<31x31xf32>
    %215 = arith.subf %211, %214 : vector<31x31xf32>
    %216 = math.exp %215 : vector<31x31xf32>
    %cst_131 = arith.constant dense<0.000000e+00> : vector<31xf32>
    %217 = vector.multi_reduction <add>, %216, %cst_131 [1] : vector<31x31xf32> to vector<31xf32>
    %218 = vector.shape_cast %217 : vector<31xf32> to vector<31x1xf32>
    %219 = tpu.reciprocal %218 {approx = true} : vector<31x1xf32> -> vector<31x1xf32>
    %220 = vector.broadcast %219 : vector<31x1xf32> to vector<31x31xf32>
    %221 = arith.mulf %216, %220 : vector<31x31xf32>
    %222 = arith.truncf %221 : vector<31x31xf32> to vector<31x31xbf16>
    %223 = arith.truncf %208 : vector<31x16xf32> to vector<31x16xbf16>
    %cst_132 = arith.constant dense<0.000000e+00> : vector<31x16xf32>
    %224 = tpu.matmul %222, %223, %cst_132 {dimension_numbers = #tpu.dot_dimension_numbers<[1], [0], [0], [1], [0, 0, 1, 1], [], []>} : vector<31x31xbf16>, vector<31x16xbf16>, vector<31x16xf32> -> vector<31x16xf32>
    %225 = arith.truncf %224 : vector<31x16xf32> to vector<31x16xbf16>
    %c1_133 = arith.constant 1 : index
    %c0_134 = arith.constant 0 : index
    %c0_135 = arith.constant 0 : index
    %226 = vector.load %arg10[%c1_133, %c0_134, %c0_135] : memref<8x16x64xbf16, #tpu.memory_space<vmem>>, vector<1x16x64xbf16>
    %227 = vector.shape_cast %226 : vector<1x16x64xbf16> to vector<16x64xbf16>
    %cst_136 = arith.constant dense<0.000000e+00> : vector<31x64xf32>
    %228 = tpu.matmul %225, %227, %cst_136 {dimension_numbers = #tpu.dot_dimension_numbers<[1], [0], [0], [1], [0, 0, 1, 1], [], []>} : vector<31x16xbf16>, vector<16x64xbf16>, vector<31x64xf32> -> vector<31x64xf32>
    %229 = arith.addf %190, %228 : vector<31x64xf32>
    %c2_137 = arith.constant 2 : index
    %c0_138 = arith.constant 0 : index
    %c0_139 = arith.constant 0 : index
    %230 = vector.load %arg9[%c2_137, %c0_138, %c0_139] : memref<24x64x16xbf16, #tpu.memory_space<vmem>>, vector<1x64x16xbf16>
    %231 = vector.shape_cast %230 : vector<1x64x16xbf16> to vector<64x16xbf16>
    %cst_140 = arith.constant dense<0.000000e+00> : vector<31x16xf32>
    %232 = tpu.matmul %150, %231, %cst_140 {dimension_numbers = #tpu.dot_dimension_numbers<[1], [0], [0], [1], [0, 0, 1, 1], [], []>} : vector<31x64xbf16>, vector<64x16xbf16>, vector<31x16xf32> -> vector<31x16xf32>
    %c8_141 = arith.constant 8 : index
    %c0_142 = arith.constant 0 : index
    %233 = vector.load %arg2[%c8_141, %c0_142] : memref<44x128xf32, #tpu.memory_space<vmem>>, vector<1x16xf32>
    %234 = vector.broadcast %233 : vector<1x16xf32> to vector<31x16xf32>
    %235 = arith.addf %232, %234 : vector<31x16xf32>
    %c6_143 = arith.constant 6 : index
    %c0_144 = arith.constant 0 : index
    %c0_145 = arith.constant 0 : index
    %236 = vector.load %arg9[%c6_143, %c0_144, %c0_145] : memref<24x64x16xbf16, #tpu.memory_space<vmem>>, vector<1x64x16xbf16>
    %237 = vector.shape_cast %236 : vector<1x64x16xbf16> to vector<64x16xbf16>
    %cst_146 = arith.constant dense<0.000000e+00> : vector<31x16xf32>
    %238 = tpu.matmul %150, %237, %cst_146 {dimension_numbers = #tpu.dot_dimension_numbers<[1], [0], [0], [1], [0, 0, 1, 1], [], []>} : vector<31x64xbf16>, vector<64x16xbf16>, vector<31x16xf32> -> vector<31x16xf32>
    %c12 = arith.constant 12 : index
    %c0_147 = arith.constant 0 : index
    %239 = vector.load %arg2[%c12, %c0_147] : memref<44x128xf32, #tpu.memory_space<vmem>>, vector<1x16xf32>
    %240 = vector.broadcast %239 : vector<1x16xf32> to vector<31x16xf32>
    %241 = arith.addf %238, %240 : vector<31x16xf32>
    %c10_148 = arith.constant 10 : index
    %c0_149 = arith.constant 0 : index
    %c0_150 = arith.constant 0 : index
    %242 = vector.load %arg9[%c10_148, %c0_149, %c0_150] : memref<24x64x16xbf16, #tpu.memory_space<vmem>>, vector<1x64x16xbf16>
    %243 = vector.shape_cast %242 : vector<1x64x16xbf16> to vector<64x16xbf16>
    %cst_151 = arith.constant dense<0.000000e+00> : vector<31x16xf32>
    %244 = tpu.matmul %150, %243, %cst_151 {dimension_numbers = #tpu.dot_dimension_numbers<[1], [0], [0], [1], [0, 0, 1, 1], [], []>} : vector<31x64xbf16>, vector<64x16xbf16>, vector<31x16xf32> -> vector<31x16xf32>
    %c16 = arith.constant 16 : index
    %c0_152 = arith.constant 0 : index
    %245 = vector.load %arg2[%c16, %c0_152] : memref<44x128xf32, #tpu.memory_space<vmem>>, vector<1x16xf32>
    %246 = vector.broadcast %245 : vector<1x16xf32> to vector<31x16xf32>
    %247 = arith.addf %244, %246 : vector<31x16xf32>
    %248 = arith.truncf %235 : vector<31x16xf32> to vector<31x16xbf16>
    %249 = arith.truncf %241 : vector<31x16xf32> to vector<31x16xbf16>
    %cst_153 = arith.constant dense<0.000000e+00> : vector<31x31xf32>
    %250 = tpu.matmul %248, %249, %cst_153 {dimension_numbers = #tpu.dot_dimension_numbers<[1], [1], [0], [0], [0, 0, 1, 0], [], []>} : vector<31x16xbf16>, vector<31x16xbf16>, vector<31x31xf32> -> vector<31x31xf32>
    %cst_154 = arith.constant dense<0xFF800000> : vector<31xf32>
    %251 = vector.multi_reduction <maximumf>, %250, %cst_154 [1] : vector<31x31xf32> to vector<31xf32>
    %252 = vector.shape_cast %251 : vector<31xf32> to vector<31x1xf32>
    %253 = vector.broadcast %252 : vector<31x1xf32> to vector<31x31xf32>
    %254 = arith.subf %250, %253 : vector<31x31xf32>
    %255 = math.exp %254 : vector<31x31xf32>
    %cst_155 = arith.constant dense<0.000000e+00> : vector<31xf32>
    %256 = vector.multi_reduction <add>, %255, %cst_155 [1] : vector<31x31xf32> to vector<31xf32>
    %257 = vector.shape_cast %256 : vector<31xf32> to vector<31x1xf32>
    %258 = tpu.reciprocal %257 {approx = true} : vector<31x1xf32> -> vector<31x1xf32>
    %259 = vector.broadcast %258 : vector<31x1xf32> to vector<31x31xf32>
    %260 = arith.mulf %255, %259 : vector<31x31xf32>
    %261 = arith.truncf %260 : vector<31x31xf32> to vector<31x31xbf16>
    %262 = arith.truncf %247 : vector<31x16xf32> to vector<31x16xbf16>
    %cst_156 = arith.constant dense<0.000000e+00> : vector<31x16xf32>
    %263 = tpu.matmul %261, %262, %cst_156 {dimension_numbers = #tpu.dot_dimension_numbers<[1], [0], [0], [1], [0, 0, 1, 1], [], []>} : vector<31x31xbf16>, vector<31x16xbf16>, vector<31x16xf32> -> vector<31x16xf32>
    %264 = arith.truncf %263 : vector<31x16xf32> to vector<31x16xbf16>
    %c2_157 = arith.constant 2 : index
    %c0_158 = arith.constant 0 : index
    %c0_159 = arith.constant 0 : index
    %265 = vector.load %arg10[%c2_157, %c0_158, %c0_159] : memref<8x16x64xbf16, #tpu.memory_space<vmem>>, vector<1x16x64xbf16>
    %266 = vector.shape_cast %265 : vector<1x16x64xbf16> to vector<16x64xbf16>
    %cst_160 = arith.constant dense<0.000000e+00> : vector<31x64xf32>
    %267 = tpu.matmul %264, %266, %cst_160 {dimension_numbers = #tpu.dot_dimension_numbers<[1], [0], [0], [1], [0, 0, 1, 1], [], []>} : vector<31x16xbf16>, vector<16x64xbf16>, vector<31x64xf32> -> vector<31x64xf32>
    %268 = arith.addf %229, %267 : vector<31x64xf32>
    %c3_161 = arith.constant 3 : index
    %c0_162 = arith.constant 0 : index
    %c0_163 = arith.constant 0 : index
    %269 = vector.load %arg9[%c3_161, %c0_162, %c0_163] : memref<24x64x16xbf16, #tpu.memory_space<vmem>>, vector<1x64x16xbf16>
    %270 = vector.shape_cast %269 : vector<1x64x16xbf16> to vector<64x16xbf16>
    %cst_164 = arith.constant dense<0.000000e+00> : vector<31x16xf32>
    %271 = tpu.matmul %150, %270, %cst_164 {dimension_numbers = #tpu.dot_dimension_numbers<[1], [0], [0], [1], [0, 0, 1, 1], [], []>} : vector<31x64xbf16>, vector<64x16xbf16>, vector<31x16xf32> -> vector<31x16xf32>
    %c9_165 = arith.constant 9 : index
    %c0_166 = arith.constant 0 : index
    %272 = vector.load %arg2[%c9_165, %c0_166] : memref<44x128xf32, #tpu.memory_space<vmem>>, vector<1x16xf32>
    %273 = vector.broadcast %272 : vector<1x16xf32> to vector<31x16xf32>
    %274 = arith.addf %271, %273 : vector<31x16xf32>
    %c7_167 = arith.constant 7 : index
    %c0_168 = arith.constant 0 : index
    %c0_169 = arith.constant 0 : index
    %275 = vector.load %arg9[%c7_167, %c0_168, %c0_169] : memref<24x64x16xbf16, #tpu.memory_space<vmem>>, vector<1x64x16xbf16>
    %276 = vector.shape_cast %275 : vector<1x64x16xbf16> to vector<64x16xbf16>
    %cst_170 = arith.constant dense<0.000000e+00> : vector<31x16xf32>
    %277 = tpu.matmul %150, %276, %cst_170 {dimension_numbers = #tpu.dot_dimension_numbers<[1], [0], [0], [1], [0, 0, 1, 1], [], []>} : vector<31x64xbf16>, vector<64x16xbf16>, vector<31x16xf32> -> vector<31x16xf32>
    %c13 = arith.constant 13 : index
    %c0_171 = arith.constant 0 : index
    %278 = vector.load %arg2[%c13, %c0_171] : memref<44x128xf32, #tpu.memory_space<vmem>>, vector<1x16xf32>
    %279 = vector.broadcast %278 : vector<1x16xf32> to vector<31x16xf32>
    %280 = arith.addf %277, %279 : vector<31x16xf32>
    %c11_172 = arith.constant 11 : index
    %c0_173 = arith.constant 0 : index
    %c0_174 = arith.constant 0 : index
    %281 = vector.load %arg9[%c11_172, %c0_173, %c0_174] : memref<24x64x16xbf16, #tpu.memory_space<vmem>>, vector<1x64x16xbf16>
    %282 = vector.shape_cast %281 : vector<1x64x16xbf16> to vector<64x16xbf16>
    %cst_175 = arith.constant dense<0.000000e+00> : vector<31x16xf32>
    %283 = tpu.matmul %150, %282, %cst_175 {dimension_numbers = #tpu.dot_dimension_numbers<[1], [0], [0], [1], [0, 0, 1, 1], [], []>} : vector<31x64xbf16>, vector<64x16xbf16>, vector<31x16xf32> -> vector<31x16xf32>
    %c17 = arith.constant 17 : index
    %c0_176 = arith.constant 0 : index
    %284 = vector.load %arg2[%c17, %c0_176] : memref<44x128xf32, #tpu.memory_space<vmem>>, vector<1x16xf32>
    %285 = vector.broadcast %284 : vector<1x16xf32> to vector<31x16xf32>
    %286 = arith.addf %283, %285 : vector<31x16xf32>
    %287 = arith.truncf %274 : vector<31x16xf32> to vector<31x16xbf16>
    %288 = arith.truncf %280 : vector<31x16xf32> to vector<31x16xbf16>
    %cst_177 = arith.constant dense<0.000000e+00> : vector<31x31xf32>
    %289 = tpu.matmul %287, %288, %cst_177 {dimension_numbers = #tpu.dot_dimension_numbers<[1], [1], [0], [0], [0, 0, 1, 0], [], []>} : vector<31x16xbf16>, vector<31x16xbf16>, vector<31x31xf32> -> vector<31x31xf32>
    %cst_178 = arith.constant dense<0xFF800000> : vector<31xf32>
    %290 = vector.multi_reduction <maximumf>, %289, %cst_178 [1] : vector<31x31xf32> to vector<31xf32>
    %291 = vector.shape_cast %290 : vector<31xf32> to vector<31x1xf32>
    %292 = vector.broadcast %291 : vector<31x1xf32> to vector<31x31xf32>
    %293 = arith.subf %289, %292 : vector<31x31xf32>
    %294 = math.exp %293 : vector<31x31xf32>
    %cst_179 = arith.constant dense<0.000000e+00> : vector<31xf32>
    %295 = vector.multi_reduction <add>, %294, %cst_179 [1] : vector<31x31xf32> to vector<31xf32>
    %296 = vector.shape_cast %295 : vector<31xf32> to vector<31x1xf32>
    %297 = tpu.reciprocal %296 {approx = true} : vector<31x1xf32> -> vector<31x1xf32>
    %298 = vector.broadcast %297 : vector<31x1xf32> to vector<31x31xf32>
    %299 = arith.mulf %294, %298 : vector<31x31xf32>
    %300 = arith.truncf %299 : vector<31x31xf32> to vector<31x31xbf16>
    %301 = arith.truncf %286 : vector<31x16xf32> to vector<31x16xbf16>
    %cst_180 = arith.constant dense<0.000000e+00> : vector<31x16xf32>
    %302 = tpu.matmul %300, %301, %cst_180 {dimension_numbers = #tpu.dot_dimension_numbers<[1], [0], [0], [1], [0, 0, 1, 1], [], []>} : vector<31x31xbf16>, vector<31x16xbf16>, vector<31x16xf32> -> vector<31x16xf32>
    %303 = arith.truncf %302 : vector<31x16xf32> to vector<31x16xbf16>
    %c3_181 = arith.constant 3 : index
    %c0_182 = arith.constant 0 : index
    %c0_183 = arith.constant 0 : index
    %304 = vector.load %arg10[%c3_181, %c0_182, %c0_183] : memref<8x16x64xbf16, #tpu.memory_space<vmem>>, vector<1x16x64xbf16>
    %305 = vector.shape_cast %304 : vector<1x16x64xbf16> to vector<16x64xbf16>
    %cst_184 = arith.constant dense<0.000000e+00> : vector<31x64xf32>
    %306 = tpu.matmul %303, %305, %cst_184 {dimension_numbers = #tpu.dot_dimension_numbers<[1], [0], [0], [1], [0, 0, 1, 1], [], []>} : vector<31x16xbf16>, vector<16x64xbf16>, vector<31x64xf32> -> vector<31x64xf32>
    %307 = arith.addf %268, %306 : vector<31x64xf32>
    %c18 = arith.constant 18 : index
    %c0_185 = arith.constant 0 : index
    %308 = vector.load %arg2[%c18, %c0_185] : memref<44x128xf32, #tpu.memory_space<vmem>>, vector<1x64xf32>
    %309 = vector.broadcast %308 : vector<1x64xf32> to vector<31x64xf32>
    %310 = arith.addf %307, %309 : vector<31x64xf32>
    %311 = arith.addf %149, %310 : vector<31x64xf32>
    %c19 = arith.constant 19 : index
    %c0_186 = arith.constant 0 : index
    %312 = vector.load %arg2[%c19, %c0_186] : memref<44x128xf32, #tpu.memory_space<vmem>>, vector<1x64xf32>
    %c20 = arith.constant 20 : index
    %c0_187 = arith.constant 0 : index
    %313 = vector.load %arg2[%c20, %c0_187] : memref<44x128xf32, #tpu.memory_space<vmem>>, vector<1x64xf32>
    %cst_188 = arith.constant dense<0.000000e+00> : vector<31xf32>
    %314 = vector.multi_reduction <add>, %311, %cst_188 [1] : vector<31x64xf32> to vector<31xf32>
    %315 = vector.shape_cast %314 : vector<31xf32> to vector<31x1xf32>
    %cst_189 = arith.constant 6.400000e+01 : f32
    %316 = vector.broadcast %cst_189 : f32 to vector<31x1xf32>
    %317 = arith.divf %315, %316 : vector<31x1xf32>
    %318 = vector.broadcast %317 : vector<31x1xf32> to vector<31x64xf32>
    %319 = arith.subf %311, %318 : vector<31x64xf32>
    %320 = arith.mulf %319, %319 : vector<31x64xf32>
    %cst_190 = arith.constant dense<0.000000e+00> : vector<31xf32>
    %321 = vector.multi_reduction <add>, %320, %cst_190 [1] : vector<31x64xf32> to vector<31xf32>
    %322 = vector.shape_cast %321 : vector<31xf32> to vector<31x1xf32>
    %cst_191 = arith.constant 6.400000e+01 : f32
    %323 = vector.broadcast %cst_191 : f32 to vector<31x1xf32>
    %324 = arith.divf %322, %323 : vector<31x1xf32>
    %325 = vector.broadcast %317 : vector<31x1xf32> to vector<31x64xf32>
    %326 = arith.subf %311, %325 : vector<31x64xf32>
    %cst_192 = arith.constant 9.99999974E-6 : f32
    %327 = vector.broadcast %cst_192 : f32 to vector<31x1xf32>
    %328 = arith.addf %324, %327 : vector<31x1xf32>
    %329 = math.rsqrt %328 : vector<31x1xf32>
    %330 = vector.broadcast %329 : vector<31x1xf32> to vector<31x64xf32>
    %331 = arith.mulf %326, %330 : vector<31x64xf32>
    %332 = vector.broadcast %312 : vector<1x64xf32> to vector<31x64xf32>
    %333 = arith.mulf %331, %332 : vector<31x64xf32>
    %334 = vector.broadcast %313 : vector<1x64xf32> to vector<31x64xf32>
    %335 = arith.addf %333, %334 : vector<31x64xf32>
    %336 = arith.truncf %335 : vector<31x64xf32> to vector<31x64xbf16>
    %c0_193 = arith.constant 0 : index
    %c0_194 = arith.constant 0 : index
    %c0_195 = arith.constant 0 : index
    %337 = vector.load %arg11[%c0_193, %c0_194, %c0_195] : memref<2x64x128xbf16, #tpu.memory_space<vmem>>, vector<1x64x128xbf16>
    %338 = vector.shape_cast %337 : vector<1x64x128xbf16> to vector<64x128xbf16>
    %cst_196 = arith.constant dense<0.000000e+00> : vector<31x128xf32>
    %339 = tpu.matmul %336, %338, %cst_196 {dimension_numbers = #tpu.dot_dimension_numbers<[1], [0], [0], [1], [0, 0, 1, 1], [], []>} : vector<31x64xbf16>, vector<64x128xbf16>, vector<31x128xf32> -> vector<31x128xf32>
    %c21 = arith.constant 21 : index
    %c0_197 = arith.constant 0 : index
    %340 = vector.load %arg2[%c21, %c0_197] : memref<44x128xf32, #tpu.memory_space<vmem>>, vector<1x128xf32>
    %341 = vector.broadcast %340 : vector<1x128xf32> to vector<31x128xf32>
    %342 = arith.addf %339, %341 : vector<31x128xf32>
    %cst_198 = arith.constant 5.000000e-01 : f32
    %343 = vector.broadcast %cst_198 : f32 to vector<31x128xf32>
    %344 = arith.mulf %343, %342 : vector<31x128xf32>
    %cst_199 = arith.constant 0.707106769 : f32
    %345 = vector.broadcast %cst_199 : f32 to vector<31x128xf32>
    %346 = arith.mulf %342, %345 : vector<31x128xf32>
    %347 = math.erf %346 : vector<31x128xf32>
    %cst_200 = arith.constant 1.000000e+00 : f32
    %348 = vector.broadcast %cst_200 : f32 to vector<31x128xf32>
    %349 = arith.addf %348, %347 : vector<31x128xf32>
    %350 = arith.mulf %344, %349 : vector<31x128xf32>
    %351 = arith.truncf %350 : vector<31x128xf32> to vector<31x128xbf16>
    %c0_201 = arith.constant 0 : index
    %c0_202 = arith.constant 0 : index
    %c0_203 = arith.constant 0 : index
    %352 = vector.load %arg12[%c0_201, %c0_202, %c0_203] : memref<2x128x64xbf16, #tpu.memory_space<vmem>>, vector<1x128x64xbf16>
    %353 = vector.shape_cast %352 : vector<1x128x64xbf16> to vector<128x64xbf16>
    %cst_204 = arith.constant dense<0.000000e+00> : vector<31x64xf32>
    %354 = tpu.matmul %351, %353, %cst_204 {dimension_numbers = #tpu.dot_dimension_numbers<[1], [0], [0], [1], [0, 0, 1, 1], [], []>} : vector<31x128xbf16>, vector<128x64xbf16>, vector<31x64xf32> -> vector<31x64xf32>
    %c22 = arith.constant 22 : index
    %c0_205 = arith.constant 0 : index
    %355 = vector.load %arg2[%c22, %c0_205] : memref<44x128xf32, #tpu.memory_space<vmem>>, vector<1x64xf32>
    %356 = vector.broadcast %355 : vector<1x64xf32> to vector<31x64xf32>
    %357 = arith.addf %354, %356 : vector<31x64xf32>
    %358 = arith.addf %335, %357 : vector<31x64xf32>
    %c23 = arith.constant 23 : index
    %c0_206 = arith.constant 0 : index
    %359 = vector.load %arg2[%c23, %c0_206] : memref<44x128xf32, #tpu.memory_space<vmem>>, vector<1x64xf32>
    %c24 = arith.constant 24 : index
    %c0_207 = arith.constant 0 : index
    %360 = vector.load %arg2[%c24, %c0_207] : memref<44x128xf32, #tpu.memory_space<vmem>>, vector<1x64xf32>
    %cst_208 = arith.constant dense<0.000000e+00> : vector<31xf32>
    %361 = vector.multi_reduction <add>, %358, %cst_208 [1] : vector<31x64xf32> to vector<31xf32>
    %362 = vector.shape_cast %361 : vector<31xf32> to vector<31x1xf32>
    %cst_209 = arith.constant 6.400000e+01 : f32
    %363 = vector.broadcast %cst_209 : f32 to vector<31x1xf32>
    %364 = arith.divf %362, %363 : vector<31x1xf32>
    %365 = vector.broadcast %364 : vector<31x1xf32> to vector<31x64xf32>
    %366 = arith.subf %358, %365 : vector<31x64xf32>
    %367 = arith.mulf %366, %366 : vector<31x64xf32>
    %cst_210 = arith.constant dense<0.000000e+00> : vector<31xf32>
    %368 = vector.multi_reduction <add>, %367, %cst_210 [1] : vector<31x64xf32> to vector<31xf32>
    %369 = vector.shape_cast %368 : vector<31xf32> to vector<31x1xf32>
    %cst_211 = arith.constant 6.400000e+01 : f32
    %370 = vector.broadcast %cst_211 : f32 to vector<31x1xf32>
    %371 = arith.divf %369, %370 : vector<31x1xf32>
    %372 = vector.broadcast %364 : vector<31x1xf32> to vector<31x64xf32>
    %373 = arith.subf %358, %372 : vector<31x64xf32>
    %cst_212 = arith.constant 9.99999974E-6 : f32
    %374 = vector.broadcast %cst_212 : f32 to vector<31x1xf32>
    %375 = arith.addf %371, %374 : vector<31x1xf32>
    %376 = math.rsqrt %375 : vector<31x1xf32>
    %377 = vector.broadcast %376 : vector<31x1xf32> to vector<31x64xf32>
    %378 = arith.mulf %373, %377 : vector<31x64xf32>
    %379 = vector.broadcast %359 : vector<1x64xf32> to vector<31x64xf32>
    %380 = arith.mulf %378, %379 : vector<31x64xf32>
    %381 = vector.broadcast %360 : vector<1x64xf32> to vector<31x64xf32>
    %382 = arith.addf %380, %381 : vector<31x64xf32>
    %c0_213 = arith.constant 0 : index
    %c0_214 = arith.constant 0 : index
    %c0_215 = arith.constant 0 : index
    %c0_216 = arith.constant 0 : index
    %383 = vector.load %arg13[%c0_213, %c0_214, %c0_215, %c0_216] : memref<1x2x31x64xf32, #tpu.memory_space<vmem>>, vector<1x1x31x64xf32>
    %384 = vector.shape_cast %383 : vector<1x1x31x64xf32> to vector<31x64xf32>
    %385 = vector.shape_cast %382 : vector<31x64xf32> to vector<1x1x31x64xf32>
    tpu.vector_store %arg13[%c0_213, %c0_214, %c0_215, %c0_216], %385 {strides = array<i32>} : memref<1x2x31x64xf32, #tpu.memory_space<vmem>>, vector<1x1x31x64xf32>,
    %386 = arith.truncf %382 : vector<31x64xf32> to vector<31x64xbf16>
    %cst_217 = arith.constant 0.000000e+00 : f32
    %387 = vector.broadcast %cst_217 : f32 to vector<31x64xf32>
    %c12_218 = arith.constant 12 : index
    %c0_219 = arith.constant 0 : index
    %c0_220 = arith.constant 0 : index
    %388 = vector.load %arg9[%c12_218, %c0_219, %c0_220] : memref<24x64x16xbf16, #tpu.memory_space<vmem>>, vector<1x64x16xbf16>
    %389 = vector.shape_cast %388 : vector<1x64x16xbf16> to vector<64x16xbf16>
    %cst_221 = arith.constant dense<0.000000e+00> : vector<31x16xf32>
    %390 = tpu.matmul %386, %389, %cst_221 {dimension_numbers = #tpu.dot_dimension_numbers<[1], [0], [0], [1], [0, 0, 1, 1], [], []>} : vector<31x64xbf16>, vector<64x16xbf16>, vector<31x16xf32> -> vector<31x16xf32>
    %c25 = arith.constant 25 : index
    %c0_222 = arith.constant 0 : index
    %391 = vector.load %arg2[%c25, %c0_222] : memref<44x128xf32, #tpu.memory_space<vmem>>, vector<1x16xf32>
    %392 = vector.broadcast %391 : vector<1x16xf32> to vector<31x16xf32>
    %393 = arith.addf %390, %392 : vector<31x16xf32>
    %c16_223 = arith.constant 16 : index
    %c0_224 = arith.constant 0 : index
    %c0_225 = arith.constant 0 : index
    %394 = vector.load %arg9[%c16_223, %c0_224, %c0_225] : memref<24x64x16xbf16, #tpu.memory_space<vmem>>, vector<1x64x16xbf16>
    %395 = vector.shape_cast %394 : vector<1x64x16xbf16> to vector<64x16xbf16>
    %cst_226 = arith.constant dense<0.000000e+00> : vector<31x16xf32>
    %396 = tpu.matmul %386, %395, %cst_226 {dimension_numbers = #tpu.dot_dimension_numbers<[1], [0], [0], [1], [0, 0, 1, 1], [], []>} : vector<31x64xbf16>, vector<64x16xbf16>, vector<31x16xf32> -> vector<31x16xf32>
    %c29 = arith.constant 29 : index
    %c0_227 = arith.constant 0 : index
    %397 = vector.load %arg2[%c29, %c0_227] : memref<44x128xf32, #tpu.memory_space<vmem>>, vector<1x16xf32>
    %398 = vector.broadcast %397 : vector<1x16xf32> to vector<31x16xf32>
    %399 = arith.addf %396, %398 : vector<31x16xf32>
    %c20_228 = arith.constant 20 : index
    %c0_229 = arith.constant 0 : index
    %c0_230 = arith.constant 0 : index
    %400 = vector.load %arg9[%c20_228, %c0_229, %c0_230] : memref<24x64x16xbf16, #tpu.memory_space<vmem>>, vector<1x64x16xbf16>
    %401 = vector.shape_cast %400 : vector<1x64x16xbf16> to vector<64x16xbf16>
    %cst_231 = arith.constant dense<0.000000e+00> : vector<31x16xf32>
    %402 = tpu.matmul %386, %401, %cst_231 {dimension_numbers = #tpu.dot_dimension_numbers<[1], [0], [0], [1], [0, 0, 1, 1], [], []>} : vector<31x64xbf16>, vector<64x16xbf16>, vector<31x16xf32> -> vector<31x16xf32>
    %c33 = arith.constant 33 : index
    %c0_232 = arith.constant 0 : index
    %403 = vector.load %arg2[%c33, %c0_232] : memref<44x128xf32, #tpu.memory_space<vmem>>, vector<1x16xf32>
    %404 = vector.broadcast %403 : vector<1x16xf32> to vector<31x16xf32>
    %405 = arith.addf %402, %404 : vector<31x16xf32>
    %406 = arith.truncf %393 : vector<31x16xf32> to vector<31x16xbf16>
    %407 = arith.truncf %399 : vector<31x16xf32> to vector<31x16xbf16>
    %cst_233 = arith.constant dense<0.000000e+00> : vector<31x31xf32>
    %408 = tpu.matmul %406, %407, %cst_233 {dimension_numbers = #tpu.dot_dimension_numbers<[1], [1], [0], [0], [0, 0, 1, 0], [], []>} : vector<31x16xbf16>, vector<31x16xbf16>, vector<31x31xf32> -> vector<31x31xf32>
    %cst_234 = arith.constant dense<0xFF800000> : vector<31xf32>
    %409 = vector.multi_reduction <maximumf>, %408, %cst_234 [1] : vector<31x31xf32> to vector<31xf32>
    %410 = vector.shape_cast %409 : vector<31xf32> to vector<31x1xf32>
    %411 = vector.broadcast %410 : vector<31x1xf32> to vector<31x31xf32>
    %412 = arith.subf %408, %411 : vector<31x31xf32>
    %413 = math.exp %412 : vector<31x31xf32>
    %cst_235 = arith.constant dense<0.000000e+00> : vector<31xf32>
    %414 = vector.multi_reduction <add>, %413, %cst_235 [1] : vector<31x31xf32> to vector<31xf32>
    %415 = vector.shape_cast %414 : vector<31xf32> to vector<31x1xf32>
    %416 = tpu.reciprocal %415 {approx = true} : vector<31x1xf32> -> vector<31x1xf32>
    %417 = vector.broadcast %416 : vector<31x1xf32> to vector<31x31xf32>
    %418 = arith.mulf %413, %417 : vector<31x31xf32>
    %419 = arith.truncf %418 : vector<31x31xf32> to vector<31x31xbf16>
    %420 = arith.truncf %405 : vector<31x16xf32> to vector<31x16xbf16>
    %cst_236 = arith.constant dense<0.000000e+00> : vector<31x16xf32>
    %421 = tpu.matmul %419, %420, %cst_236 {dimension_numbers = #tpu.dot_dimension_numbers<[1], [0], [0], [1], [0, 0, 1, 1], [], []>} : vector<31x31xbf16>, vector<31x16xbf16>, vector<31x16xf32> -> vector<31x16xf32>
    %422 = arith.truncf %421 : vector<31x16xf32> to vector<31x16xbf16>
    %c4_237 = arith.constant 4 : index
    %c0_238 = arith.constant 0 : index
    %c0_239 = arith.constant 0 : index
    %423 = vector.load %arg10[%c4_237, %c0_238, %c0_239] : memref<8x16x64xbf16, #tpu.memory_space<vmem>>, vector<1x16x64xbf16>
    %424 = vector.shape_cast %423 : vector<1x16x64xbf16> to vector<16x64xbf16>
    %cst_240 = arith.constant dense<0.000000e+00> : vector<31x64xf32>
    %425 = tpu.matmul %422, %424, %cst_240 {dimension_numbers = #tpu.dot_dimension_numbers<[1], [0], [0], [1], [0, 0, 1, 1], [], []>} : vector<31x16xbf16>, vector<16x64xbf16>, vector<31x64xf32> -> vector<31x64xf32>
    %426 = arith.addf %387, %425 : vector<31x64xf32>
    %c13_241 = arith.constant 13 : index
    %c0_242 = arith.constant 0 : index
    %c0_243 = arith.constant 0 : index
    %427 = vector.load %arg9[%c13_241, %c0_242, %c0_243] : memref<24x64x16xbf16, #tpu.memory_space<vmem>>, vector<1x64x16xbf16>
    %428 = vector.shape_cast %427 : vector<1x64x16xbf16> to vector<64x16xbf16>
    %cst_244 = arith.constant dense<0.000000e+00> : vector<31x16xf32>
    %429 = tpu.matmul %386, %428, %cst_244 {dimension_numbers = #tpu.dot_dimension_numbers<[1], [0], [0], [1], [0, 0, 1, 1], [], []>} : vector<31x64xbf16>, vector<64x16xbf16>, vector<31x16xf32> -> vector<31x16xf32>
    %c26 = arith.constant 26 : index
    %c0_245 = arith.constant 0 : index
    %430 = vector.load %arg2[%c26, %c0_245] : memref<44x128xf32, #tpu.memory_space<vmem>>, vector<1x16xf32>
    %431 = vector.broadcast %430 : vector<1x16xf32> to vector<31x16xf32>
    %432 = arith.addf %429, %431 : vector<31x16xf32>
    %c17_246 = arith.constant 17 : index
    %c0_247 = arith.constant 0 : index
    %c0_248 = arith.constant 0 : index
    %433 = vector.load %arg9[%c17_246, %c0_247, %c0_248] : memref<24x64x16xbf16, #tpu.memory_space<vmem>>, vector<1x64x16xbf16>
    %434 = vector.shape_cast %433 : vector<1x64x16xbf16> to vector<64x16xbf16>
    %cst_249 = arith.constant dense<0.000000e+00> : vector<31x16xf32>
    %435 = tpu.matmul %386, %434, %cst_249 {dimension_numbers = #tpu.dot_dimension_numbers<[1], [0], [0], [1], [0, 0, 1, 1], [], []>} : vector<31x64xbf16>, vector<64x16xbf16>, vector<31x16xf32> -> vector<31x16xf32>
    %c30 = arith.constant 30 : index
    %c0_250 = arith.constant 0 : index
    %436 = vector.load %arg2[%c30, %c0_250] : memref<44x128xf32, #tpu.memory_space<vmem>>, vector<1x16xf32>
    %437 = vector.broadcast %436 : vector<1x16xf32> to vector<31x16xf32>
    %438 = arith.addf %435, %437 : vector<31x16xf32>
    %c21_251 = arith.constant 21 : index
    %c0_252 = arith.constant 0 : index
    %c0_253 = arith.constant 0 : index
    %439 = vector.load %arg9[%c21_251, %c0_252, %c0_253] : memref<24x64x16xbf16, #tpu.memory_space<vmem>>, vector<1x64x16xbf16>
    %440 = vector.shape_cast %439 : vector<1x64x16xbf16> to vector<64x16xbf16>
    %cst_254 = arith.constant dense<0.000000e+00> : vector<31x16xf32>
    %441 = tpu.matmul %386, %440, %cst_254 {dimension_numbers = #tpu.dot_dimension_numbers<[1], [0], [0], [1], [0, 0, 1, 1], [], []>} : vector<31x64xbf16>, vector<64x16xbf16>, vector<31x16xf32> -> vector<31x16xf32>
    %c34 = arith.constant 34 : index
    %c0_255 = arith.constant 0 : index
    %442 = vector.load %arg2[%c34, %c0_255] : memref<44x128xf32, #tpu.memory_space<vmem>>, vector<1x16xf32>
    %443 = vector.broadcast %442 : vector<1x16xf32> to vector<31x16xf32>
    %444 = arith.addf %441, %443 : vector<31x16xf32>
    %445 = arith.truncf %432 : vector<31x16xf32> to vector<31x16xbf16>
    %446 = arith.truncf %438 : vector<31x16xf32> to vector<31x16xbf16>
    %cst_256 = arith.constant dense<0.000000e+00> : vector<31x31xf32>
    %447 = tpu.matmul %445, %446, %cst_256 {dimension_numbers = #tpu.dot_dimension_numbers<[1], [1], [0], [0], [0, 0, 1, 0], [], []>} : vector<31x16xbf16>, vector<31x16xbf16>, vector<31x31xf32> -> vector<31x31xf32>
    %cst_257 = arith.constant dense<0xFF800000> : vector<31xf32>
    %448 = vector.multi_reduction <maximumf>, %447, %cst_257 [1] : vector<31x31xf32> to vector<31xf32>
    %449 = vector.shape_cast %448 : vector<31xf32> to vector<31x1xf32>
    %450 = vector.broadcast %449 : vector<31x1xf32> to vector<31x31xf32>
    %451 = arith.subf %447, %450 : vector<31x31xf32>
    %452 = math.exp %451 : vector<31x31xf32>
    %cst_258 = arith.constant dense<0.000000e+00> : vector<31xf32>
    %453 = vector.multi_reduction <add>, %452, %cst_258 [1] : vector<31x31xf32> to vector<31xf32>
    %454 = vector.shape_cast %453 : vector<31xf32> to vector<31x1xf32>
    %455 = tpu.reciprocal %454 {approx = true} : vector<31x1xf32> -> vector<31x1xf32>
    %456 = vector.broadcast %455 : vector<31x1xf32> to vector<31x31xf32>
    %457 = arith.mulf %452, %456 : vector<31x31xf32>
    %458 = arith.truncf %457 : vector<31x31xf32> to vector<31x31xbf16>
    %459 = arith.truncf %444 : vector<31x16xf32> to vector<31x16xbf16>
    %cst_259 = arith.constant dense<0.000000e+00> : vector<31x16xf32>
    %460 = tpu.matmul %458, %459, %cst_259 {dimension_numbers = #tpu.dot_dimension_numbers<[1], [0], [0], [1], [0, 0, 1, 1], [], []>} : vector<31x31xbf16>, vector<31x16xbf16>, vector<31x16xf32> -> vector<31x16xf32>
    %461 = arith.truncf %460 : vector<31x16xf32> to vector<31x16xbf16>
    %c5_260 = arith.constant 5 : index
    %c0_261 = arith.constant 0 : index
    %c0_262 = arith.constant 0 : index
    %462 = vector.load %arg10[%c5_260, %c0_261, %c0_262] : memref<8x16x64xbf16, #tpu.memory_space<vmem>>, vector<1x16x64xbf16>
    %463 = vector.shape_cast %462 : vector<1x16x64xbf16> to vector<16x64xbf16>
    %cst_263 = arith.constant dense<0.000000e+00> : vector<31x64xf32>
    %464 = tpu.matmul %461, %463, %cst_263 {dimension_numbers = #tpu.dot_dimension_numbers<[1], [0], [0], [1], [0, 0, 1, 1], [], []>} : vector<31x16xbf16>, vector<16x64xbf16>, vector<31x64xf32> -> vector<31x64xf32>
    %465 = arith.addf %426, %464 : vector<31x64xf32>
    %c14_264 = arith.constant 14 : index
    %c0_265 = arith.constant 0 : index
    %c0_266 = arith.constant 0 : index
    %466 = vector.load %arg9[%c14_264, %c0_265, %c0_266] : memref<24x64x16xbf16, #tpu.memory_space<vmem>>, vector<1x64x16xbf16>
    %467 = vector.shape_cast %466 : vector<1x64x16xbf16> to vector<64x16xbf16>
    %cst_267 = arith.constant dense<0.000000e+00> : vector<31x16xf32>
    %468 = tpu.matmul %386, %467, %cst_267 {dimension_numbers = #tpu.dot_dimension_numbers<[1], [0], [0], [1], [0, 0, 1, 1], [], []>} : vector<31x64xbf16>, vector<64x16xbf16>, vector<31x16xf32> -> vector<31x16xf32>
    %c27 = arith.constant 27 : index
    %c0_268 = arith.constant 0 : index
    %469 = vector.load %arg2[%c27, %c0_268] : memref<44x128xf32, #tpu.memory_space<vmem>>, vector<1x16xf32>
    %470 = vector.broadcast %469 : vector<1x16xf32> to vector<31x16xf32>
    %471 = arith.addf %468, %470 : vector<31x16xf32>
    %c18_269 = arith.constant 18 : index
    %c0_270 = arith.constant 0 : index
    %c0_271 = arith.constant 0 : index
    %472 = vector.load %arg9[%c18_269, %c0_270, %c0_271] : memref<24x64x16xbf16, #tpu.memory_space<vmem>>, vector<1x64x16xbf16>
    %473 = vector.shape_cast %472 : vector<1x64x16xbf16> to vector<64x16xbf16>
    %cst_272 = arith.constant dense<0.000000e+00> : vector<31x16xf32>
    %474 = tpu.matmul %386, %473, %cst_272 {dimension_numbers = #tpu.dot_dimension_numbers<[1], [0], [0], [1], [0, 0, 1, 1], [], []>} : vector<31x64xbf16>, vector<64x16xbf16>, vector<31x16xf32> -> vector<31x16xf32>
    %c31 = arith.constant 31 : index
    %c0_273 = arith.constant 0 : index
    %475 = vector.load %arg2[%c31, %c0_273] : memref<44x128xf32, #tpu.memory_space<vmem>>, vector<1x16xf32>
    %476 = vector.broadcast %475 : vector<1x16xf32> to vector<31x16xf32>
    %477 = arith.addf %474, %476 : vector<31x16xf32>
    %c22_274 = arith.constant 22 : index
    %c0_275 = arith.constant 0 : index
    %c0_276 = arith.constant 0 : index
    %478 = vector.load %arg9[%c22_274, %c0_275, %c0_276] : memref<24x64x16xbf16, #tpu.memory_space<vmem>>, vector<1x64x16xbf16>
    %479 = vector.shape_cast %478 : vector<1x64x16xbf16> to vector<64x16xbf16>
    %cst_277 = arith.constant dense<0.000000e+00> : vector<31x16xf32>
    %480 = tpu.matmul %386, %479, %cst_277 {dimension_numbers = #tpu.dot_dimension_numbers<[1], [0], [0], [1], [0, 0, 1, 1], [], []>} : vector<31x64xbf16>, vector<64x16xbf16>, vector<31x16xf32> -> vector<31x16xf32>
    %c35 = arith.constant 35 : index
    %c0_278 = arith.constant 0 : index
    %481 = vector.load %arg2[%c35, %c0_278] : memref<44x128xf32, #tpu.memory_space<vmem>>, vector<1x16xf32>
    %482 = vector.broadcast %481 : vector<1x16xf32> to vector<31x16xf32>
    %483 = arith.addf %480, %482 : vector<31x16xf32>
    %484 = arith.truncf %471 : vector<31x16xf32> to vector<31x16xbf16>
    %485 = arith.truncf %477 : vector<31x16xf32> to vector<31x16xbf16>
    %cst_279 = arith.constant dense<0.000000e+00> : vector<31x31xf32>
    %486 = tpu.matmul %484, %485, %cst_279 {dimension_numbers = #tpu.dot_dimension_numbers<[1], [1], [0], [0], [0, 0, 1, 0], [], []>} : vector<31x16xbf16>, vector<31x16xbf16>, vector<31x31xf32> -> vector<31x31xf32>
    %cst_280 = arith.constant dense<0xFF800000> : vector<31xf32>
    %487 = vector.multi_reduction <maximumf>, %486, %cst_280 [1] : vector<31x31xf32> to vector<31xf32>
    %488 = vector.shape_cast %487 : vector<31xf32> to vector<31x1xf32>
    %489 = vector.broadcast %488 : vector<31x1xf32> to vector<31x31xf32>
    %490 = arith.subf %486, %489 : vector<31x31xf32>
    %491 = math.exp %490 : vector<31x31xf32>
    %cst_281 = arith.constant dense<0.000000e+00> : vector<31xf32>
    %492 = vector.multi_reduction <add>, %491, %cst_281 [1] : vector<31x31xf32> to vector<31xf32>
    %493 = vector.shape_cast %492 : vector<31xf32> to vector<31x1xf32>
    %494 = tpu.reciprocal %493 {approx = true} : vector<31x1xf32> -> vector<31x1xf32>
    %495 = vector.broadcast %494 : vector<31x1xf32> to vector<31x31xf32>
    %496 = arith.mulf %491, %495 : vector<31x31xf32>
    %497 = arith.truncf %496 : vector<31x31xf32> to vector<31x31xbf16>
    %498 = arith.truncf %483 : vector<31x16xf32> to vector<31x16xbf16>
    %cst_282 = arith.constant dense<0.000000e+00> : vector<31x16xf32>
    %499 = tpu.matmul %497, %498, %cst_282 {dimension_numbers = #tpu.dot_dimension_numbers<[1], [0], [0], [1], [0, 0, 1, 1], [], []>} : vector<31x31xbf16>, vector<31x16xbf16>, vector<31x16xf32> -> vector<31x16xf32>
    %500 = arith.truncf %499 : vector<31x16xf32> to vector<31x16xbf16>
    %c6_283 = arith.constant 6 : index
    %c0_284 = arith.constant 0 : index
    %c0_285 = arith.constant 0 : index
    %501 = vector.load %arg10[%c6_283, %c0_284, %c0_285] : memref<8x16x64xbf16, #tpu.memory_space<vmem>>, vector<1x16x64xbf16>
    %502 = vector.shape_cast %501 : vector<1x16x64xbf16> to vector<16x64xbf16>
    %cst_286 = arith.constant dense<0.000000e+00> : vector<31x64xf32>
    %503 = tpu.matmul %500, %502, %cst_286 {dimension_numbers = #tpu.dot_dimension_numbers<[1], [0], [0], [1], [0, 0, 1, 1], [], []>} : vector<31x16xbf16>, vector<16x64xbf16>, vector<31x64xf32> -> vector<31x64xf32>
    %504 = arith.addf %465, %503 : vector<31x64xf32>
    %c15_287 = arith.constant 15 : index
    %c0_288 = arith.constant 0 : index
    %c0_289 = arith.constant 0 : index
    %505 = vector.load %arg9[%c15_287, %c0_288, %c0_289] : memref<24x64x16xbf16, #tpu.memory_space<vmem>>, vector<1x64x16xbf16>
    %506 = vector.shape_cast %505 : vector<1x64x16xbf16> to vector<64x16xbf16>
    %cst_290 = arith.constant dense<0.000000e+00> : vector<31x16xf32>
    %507 = tpu.matmul %386, %506, %cst_290 {dimension_numbers = #tpu.dot_dimension_numbers<[1], [0], [0], [1], [0, 0, 1, 1], [], []>} : vector<31x64xbf16>, vector<64x16xbf16>, vector<31x16xf32> -> vector<31x16xf32>
    %c28 = arith.constant 28 : index
    %c0_291 = arith.constant 0 : index
    %508 = vector.load %arg2[%c28, %c0_291] : memref<44x128xf32, #tpu.memory_space<vmem>>, vector<1x16xf32>
    %509 = vector.broadcast %508 : vector<1x16xf32> to vector<31x16xf32>
    %510 = arith.addf %507, %509 : vector<31x16xf32>
    %c19_292 = arith.constant 19 : index
    %c0_293 = arith.constant 0 : index
    %c0_294 = arith.constant 0 : index
    %511 = vector.load %arg9[%c19_292, %c0_293, %c0_294] : memref<24x64x16xbf16, #tpu.memory_space<vmem>>, vector<1x64x16xbf16>
    %512 = vector.shape_cast %511 : vector<1x64x16xbf16> to vector<64x16xbf16>
    %cst_295 = arith.constant dense<0.000000e+00> : vector<31x16xf32>
    %513 = tpu.matmul %386, %512, %cst_295 {dimension_numbers = #tpu.dot_dimension_numbers<[1], [0], [0], [1], [0, 0, 1, 1], [], []>} : vector<31x64xbf16>, vector<64x16xbf16>, vector<31x16xf32> -> vector<31x16xf32>
    %c32 = arith.constant 32 : index
    %c0_296 = arith.constant 0 : index
    %514 = vector.load %arg2[%c32, %c0_296] : memref<44x128xf32, #tpu.memory_space<vmem>>, vector<1x16xf32>
    %515 = vector.broadcast %514 : vector<1x16xf32> to vector<31x16xf32>
    %516 = arith.addf %513, %515 : vector<31x16xf32>
    %c23_297 = arith.constant 23 : index
    %c0_298 = arith.constant 0 : index
    %c0_299 = arith.constant 0 : index
    %517 = vector.load %arg9[%c23_297, %c0_298, %c0_299] : memref<24x64x16xbf16, #tpu.memory_space<vmem>>, vector<1x64x16xbf16>
    %518 = vector.shape_cast %517 : vector<1x64x16xbf16> to vector<64x16xbf16>
    %cst_300 = arith.constant dense<0.000000e+00> : vector<31x16xf32>
    %519 = tpu.matmul %386, %518, %cst_300 {dimension_numbers = #tpu.dot_dimension_numbers<[1], [0], [0], [1], [0, 0, 1, 1], [], []>} : vector<31x64xbf16>, vector<64x16xbf16>, vector<31x16xf32> -> vector<31x16xf32>
    %c36 = arith.constant 36 : index
    %c0_301 = arith.constant 0 : index
    %520 = vector.load %arg2[%c36, %c0_301] : memref<44x128xf32, #tpu.memory_space<vmem>>, vector<1x16xf32>
    %521 = vector.broadcast %520 : vector<1x16xf32> to vector<31x16xf32>
    %522 = arith.addf %519, %521 : vector<31x16xf32>
    %523 = arith.truncf %510 : vector<31x16xf32> to vector<31x16xbf16>
    %524 = arith.truncf %516 : vector<31x16xf32> to vector<31x16xbf16>
    %cst_302 = arith.constant dense<0.000000e+00> : vector<31x31xf32>
    %525 = tpu.matmul %523, %524, %cst_302 {dimension_numbers = #tpu.dot_dimension_numbers<[1], [1], [0], [0], [0, 0, 1, 0], [], []>} : vector<31x16xbf16>, vector<31x16xbf16>, vector<31x31xf32> -> vector<31x31xf32>
    %cst_303 = arith.constant dense<0xFF800000> : vector<31xf32>
    %526 = vector.multi_reduction <maximumf>, %525, %cst_303 [1] : vector<31x31xf32> to vector<31xf32>
    %527 = vector.shape_cast %526 : vector<31xf32> to vector<31x1xf32>
    %528 = vector.broadcast %527 : vector<31x1xf32> to vector<31x31xf32>
    %529 = arith.subf %525, %528 : vector<31x31xf32>
    %530 = math.exp %529 : vector<31x31xf32>
    %cst_304 = arith.constant dense<0.000000e+00> : vector<31xf32>
    %531 = vector.multi_reduction <add>, %530, %cst_304 [1] : vector<31x31xf32> to vector<31xf32>
    %532 = vector.shape_cast %531 : vector<31xf32> to vector<31x1xf32>
    %533 = tpu.reciprocal %532 {approx = true} : vector<31x1xf32> -> vector<31x1xf32>
    %534 = vector.broadcast %533 : vector<31x1xf32> to vector<31x31xf32>
    %535 = arith.mulf %530, %534 : vector<31x31xf32>
    %536 = arith.truncf %535 : vector<31x31xf32> to vector<31x31xbf16>
    %537 = arith.truncf %522 : vector<31x16xf32> to vector<31x16xbf16>
    %cst_305 = arith.constant dense<0.000000e+00> : vector<31x16xf32>
    %538 = tpu.matmul %536, %537, %cst_305 {dimension_numbers = #tpu.dot_dimension_numbers<[1], [0], [0], [1], [0, 0, 1, 1], [], []>} : vector<31x31xbf16>, vector<31x16xbf16>, vector<31x16xf32> -> vector<31x16xf32>
    %539 = arith.truncf %538 : vector<31x16xf32> to vector<31x16xbf16>
    %c7_306 = arith.constant 7 : index
    %c0_307 = arith.constant 0 : index
    %c0_308 = arith.constant 0 : index
    %540 = vector.load %arg10[%c7_306, %c0_307, %c0_308] : memref<8x16x64xbf16, #tpu.memory_space<vmem>>, vector<1x16x64xbf16>
    %541 = vector.shape_cast %540 : vector<1x16x64xbf16> to vector<16x64xbf16>
    %cst_309 = arith.constant dense<0.000000e+00> : vector<31x64xf32>
    %542 = tpu.matmul %539, %541, %cst_309 {dimension_numbers = #tpu.dot_dimension_numbers<[1], [0], [0], [1], [0, 0, 1, 1], [], []>} : vector<31x16xbf16>, vector<16x64xbf16>, vector<31x64xf32> -> vector<31x64xf32>
    %543 = arith.addf %504, %542 : vector<31x64xf32>
    %c37 = arith.constant 37 : index
    %c0_310 = arith.constant 0 : index
    %544 = vector.load %arg2[%c37, %c0_310] : memref<44x128xf32, #tpu.memory_space<vmem>>, vector<1x64xf32>
    %545 = vector.broadcast %544 : vector<1x64xf32> to vector<31x64xf32>
    %546 = arith.addf %543, %545 : vector<31x64xf32>
    %547 = arith.addf %382, %546 : vector<31x64xf32>
    %c38 = arith.constant 38 : index
    %c0_311 = arith.constant 0 : index
    %548 = vector.load %arg2[%c38, %c0_311] : memref<44x128xf32, #tpu.memory_space<vmem>>, vector<1x64xf32>
    %c39 = arith.constant 39 : index
    %c0_312 = arith.constant 0 : index
    %549 = vector.load %arg2[%c39, %c0_312] : memref<44x128xf32, #tpu.memory_space<vmem>>, vector<1x64xf32>
    %cst_313 = arith.constant dense<0.000000e+00> : vector<31xf32>
    %550 = vector.multi_reduction <add>, %547, %cst_313 [1] : vector<31x64xf32> to vector<31xf32>
    %551 = vector.shape_cast %550 : vector<31xf32> to vector<31x1xf32>
    %cst_314 = arith.constant 6.400000e+01 : f32
    %552 = vector.broadcast %cst_314 : f32 to vector<31x1xf32>
    %553 = arith.divf %551, %552 : vector<31x1xf32>
    %554 = vector.broadcast %553 : vector<31x1xf32> to vector<31x64xf32>
    %555 = arith.subf %547, %554 : vector<31x64xf32>
    %556 = arith.mulf %555, %555 : vector<31x64xf32>
    %cst_315 = arith.constant dense<0.000000e+00> : vector<31xf32>
    %557 = vector.multi_reduction <add>, %556, %cst_315 [1] : vector<31x64xf32> to vector<31xf32>
    %558 = vector.shape_cast %557 : vector<31xf32> to vector<31x1xf32>
    %cst_316 = arith.constant 6.400000e+01 : f32
    %559 = vector.broadcast %cst_316 : f32 to vector<31x1xf32>
    %560 = arith.divf %558, %559 : vector<31x1xf32>
    %561 = vector.broadcast %553 : vector<31x1xf32> to vector<31x64xf32>
    %562 = arith.subf %547, %561 : vector<31x64xf32>
    %cst_317 = arith.constant 9.99999974E-6 : f32
    %563 = vector.broadcast %cst_317 : f32 to vector<31x1xf32>
    %564 = arith.addf %560, %563 : vector<31x1xf32>
    %565 = math.rsqrt %564 : vector<31x1xf32>
    %566 = vector.broadcast %565 : vector<31x1xf32> to vector<31x64xf32>
    %567 = arith.mulf %562, %566 : vector<31x64xf32>
    %568 = vector.broadcast %548 : vector<1x64xf32> to vector<31x64xf32>
    %569 = arith.mulf %567, %568 : vector<31x64xf32>
    %570 = vector.broadcast %549 : vector<1x64xf32> to vector<31x64xf32>
    %571 = arith.addf %569, %570 : vector<31x64xf32>
    %572 = arith.truncf %571 : vector<31x64xf32> to vector<31x64xbf16>
    %c1_318 = arith.constant 1 : index
    %c0_319 = arith.constant 0 : index
    %c0_320 = arith.constant 0 : index
    %573 = vector.load %arg11[%c1_318, %c0_319, %c0_320] : memref<2x64x128xbf16, #tpu.memory_space<vmem>>, vector<1x64x128xbf16>
    %574 = vector.shape_cast %573 : vector<1x64x128xbf16> to vector<64x128xbf16>
    %cst_321 = arith.constant dense<0.000000e+00> : vector<31x128xf32>
    %575 = tpu.matmul %572, %574, %cst_321 {dimension_numbers = #tpu.dot_dimension_numbers<[1], [0], [0], [1], [0, 0, 1, 1], [], []>} : vector<31x64xbf16>, vector<64x128xbf16>, vector<31x128xf32> -> vector<31x128xf32>
    %c40 = arith.constant 40 : index
    %c0_322 = arith.constant 0 : index
    %576 = vector.load %arg2[%c40, %c0_322] : memref<44x128xf32, #tpu.memory_space<vmem>>, vector<1x128xf32>
    %577 = vector.broadcast %576 : vector<1x128xf32> to vector<31x128xf32>
    %578 = arith.addf %575, %577 : vector<31x128xf32>
    %cst_323 = arith.constant 5.000000e-01 : f32
    %579 = vector.broadcast %cst_323 : f32 to vector<31x128xf32>
    %580 = arith.mulf %579, %578 : vector<31x128xf32>
    %cst_324 = arith.constant 0.707106769 : f32
    %581 = vector.broadcast %cst_324 : f32 to vector<31x128xf32>
    %582 = arith.mulf %578, %581 : vector<31x128xf32>
    %583 = math.erf %582 : vector<31x128xf32>
    %cst_325 = arith.constant 1.000000e+00 : f32
    %584 = vector.broadcast %cst_325 : f32 to vector<31x128xf32>
    %585 = arith.addf %584, %583 : vector<31x128xf32>
    %586 = arith.mulf %580, %585 : vector<31x128xf32>
    %587 = arith.truncf %586 : vector<31x128xf32> to vector<31x128xbf16>
    %c1_326 = arith.constant 1 : index
    %c0_327 = arith.constant 0 : index
    %c0_328 = arith.constant 0 : index
    %588 = vector.load %arg12[%c1_326, %c0_327, %c0_328] : memref<2x128x64xbf16, #tpu.memory_space<vmem>>, vector<1x128x64xbf16>
    %589 = vector.shape_cast %588 : vector<1x128x64xbf16> to vector<128x64xbf16>
    %cst_329 = arith.constant dense<0.000000e+00> : vector<31x64xf32>
    %590 = tpu.matmul %587, %589, %cst_329 {dimension_numbers = #tpu.dot_dimension_numbers<[1], [0], [0], [1], [0, 0, 1, 1], [], []>} : vector<31x128xbf16>, vector<128x64xbf16>, vector<31x64xf32> -> vector<31x64xf32>
    %c41 = arith.constant 41 : index
    %c0_330 = arith.constant 0 : index
    %591 = vector.load %arg2[%c41, %c0_330] : memref<44x128xf32, #tpu.memory_space<vmem>>, vector<1x64xf32>
    %592 = vector.broadcast %591 : vector<1x64xf32> to vector<31x64xf32>
    %593 = arith.addf %590, %592 : vector<31x64xf32>
    %594 = arith.addf %571, %593 : vector<31x64xf32>
    %c42 = arith.constant 42 : index
    %c0_331 = arith.constant 0 : index
    %595 = vector.load %arg2[%c42, %c0_331] : memref<44x128xf32, #tpu.memory_space<vmem>>, vector<1x64xf32>
    %c43 = arith.constant 43 : index
    %c0_332 = arith.constant 0 : index
    %596 = vector.load %arg2[%c43, %c0_332] : memref<44x128xf32, #tpu.memory_space<vmem>>, vector<1x64xf32>
    %cst_333 = arith.constant dense<0.000000e+00> : vector<31xf32>
    %597 = vector.multi_reduction <add>, %594, %cst_333 [1] : vector<31x64xf32> to vector<31xf32>
    %598 = vector.shape_cast %597 : vector<31xf32> to vector<31x1xf32>
    %cst_334 = arith.constant 6.400000e+01 : f32
    %599 = vector.broadcast %cst_334 : f32 to vector<31x1xf32>
    %600 = arith.divf %598, %599 : vector<31x1xf32>
    %601 = vector.broadcast %600 : vector<31x1xf32> to vector<31x64xf32>
    %602 = arith.subf %594, %601 : vector<31x64xf32>
    %603 = arith.mulf %602, %602 : vector<31x64xf32>
    %cst_335 = arith.constant dense<0.000000e+00> : vector<31xf32>
    %604 = vector.multi_reduction <add>, %603, %cst_335 [1] : vector<31x64xf32> to vector<31xf32>
    %605 = vector.shape_cast %604 : vector<31xf32> to vector<31x1xf32>
    %cst_336 = arith.constant 6.400000e+01 : f32
    %606 = vector.broadcast %cst_336 : f32 to vector<31x1xf32>
    %607 = arith.divf %605, %606 : vector<31x1xf32>
    %608 = vector.broadcast %600 : vector<31x1xf32> to vector<31x64xf32>
    %609 = arith.subf %594, %608 : vector<31x64xf32>
    %cst_337 = arith.constant 9.99999974E-6 : f32
    %610 = vector.broadcast %cst_337 : f32 to vector<31x1xf32>
    %611 = arith.addf %607, %610 : vector<31x1xf32>
    %612 = math.rsqrt %611 : vector<31x1xf32>
    %613 = vector.broadcast %612 : vector<31x1xf32> to vector<31x64xf32>
    %614 = arith.mulf %609, %613 : vector<31x64xf32>
    %615 = vector.broadcast %595 : vector<1x64xf32> to vector<31x64xf32>
    %616 = arith.mulf %614, %615 : vector<31x64xf32>
    %617 = vector.broadcast %596 : vector<1x64xf32> to vector<31x64xf32>
    %618 = arith.addf %616, %617 : vector<31x64xf32>
    %c0_338 = arith.constant 0 : index
    %c1_339 = arith.constant 1 : index
    %c0_340 = arith.constant 0 : index
    %c0_341 = arith.constant 0 : index
    %619 = vector.load %arg13[%c0_338, %c1_339, %c0_340, %c0_341] : memref<1x2x31x64xf32, #tpu.memory_space<vmem>>, vector<1x1x31x64xf32>
    %620 = vector.shape_cast %619 : vector<1x1x31x64xf32> to vector<31x64xf32>
    %621 = vector.shape_cast %618 : vector<31x64xf32> to vector<1x1x31x64xf32>
    tpu.vector_store %arg13[%c0_338, %c1_339, %c0_340, %c0_341], %621 {strides = array<i32>} : memref<1x2x31x64xf32, #tpu.memory_space<vmem>>, vector<1x1x31x64xf32>,
    return
  }
  func.func @transform_0(%arg0: i32) -> (i32, i32, i32) {
    %c0_i32 = arith.constant 0 : i32
    %c0_i32_0 = arith.constant 0 : i32
    %c0_i32_1 = arith.constant 0 : i32
    return %arg0, %c0_i32, %c0_i32_0 : i32, i32, i32
  }
  func.func @transform_1(%arg0: i32) -> (i32, i32) {
    %c0_i32 = arith.constant 0 : i32
    %c0_i32_0 = arith.constant 0 : i32
    %c0_i32_1 = arith.constant 0 : i32
    return %c0_i32, %c0_i32_0 : i32, i32
  }
  func.func @transform_2(%arg0: i32) -> (i32, i32, i32) {
    %c0_i32 = arith.constant 0 : i32
    %c0_i32_0 = arith.constant 0 : i32
    %c0_i32_1 = arith.constant 0 : i32
    %c0_i32_2 = arith.constant 0 : i32
    return %c0_i32, %c0_i32_0, %c0_i32_1 : i32, i32, i32
  }
  func.func @transform_3(%arg0: i32) -> (i32, i32, i32) {
    %c0_i32 = arith.constant 0 : i32
    %c0_i32_0 = arith.constant 0 : i32
    %c0_i32_1 = arith.constant 0 : i32
    %c0_i32_2 = arith.constant 0 : i32
    return %c0_i32, %c0_i32_0, %c0_i32_1 : i32, i32, i32
  }
  func.func @transform_4(%arg0: i32) -> (i32, i32, i32) {
    %c0_i32 = arith.constant 0 : i32
    %c0_i32_0 = arith.constant 0 : i32
    %c0_i32_1 = arith.constant 0 : i32
    %c0_i32_2 = arith.constant 0 : i32
    return %c0_i32, %c0_i32_0, %c0_i32_1 : i32, i32, i32
  }
  func.func @transform_5(%arg0: i32) -> (i32, i32) {
    %c0_i32 = arith.constant 0 : i32
    %c0_i32_0 = arith.constant 0 : i32
    %c0_i32_1 = arith.constant 0 : i32
    return %c0_i32, %c0_i32_0 : i32, i32
  }
  func.func @transform_6(%arg0: i32) -> (i32, i32, i32) {
    %c0_i32 = arith.constant 0 : i32
    %c0_i32_0 = arith.constant 0 : i32
    %c0_i32_1 = arith.constant 0 : i32
    %c0_i32_2 = arith.constant 0 : i32
    return %c0_i32, %c0_i32_0, %c0_i32_1 : i32, i32, i32
  }
  func.func @transform_7(%arg0: i32) -> (i32, i32, i32) {
    %c0_i32 = arith.constant 0 : i32
    %c0_i32_0 = arith.constant 0 : i32
    %c0_i32_1 = arith.constant 0 : i32
    %c0_i32_2 = arith.constant 0 : i32
    return %c0_i32, %c0_i32_0, %c0_i32_1 : i32, i32, i32
  }
  func.func @transform_8(%arg0: i32) -> (i32, i32, i32) {
    %c0_i32 = arith.constant 0 : i32
    %c0_i32_0 = arith.constant 0 : i32
    %c0_i32_1 = arith.constant 0 : i32
    %c0_i32_2 = arith.constant 0 : i32
    return %c0_i32, %c0_i32_0, %c0_i32_1 : i32, i32, i32
  }
  func.func @transform_9(%arg0: i32) -> (i32, i32, i32) {
    %c0_i32 = arith.constant 0 : i32
    %c0_i32_0 = arith.constant 0 : i32
    %c0_i32_1 = arith.constant 0 : i32
    %c0_i32_2 = arith.constant 0 : i32
    return %c0_i32, %c0_i32_0, %c0_i32_1 : i32, i32, i32
  }
  func.func @transform_10(%arg0: i32) -> (i32, i32, i32) {
    %c0_i32 = arith.constant 0 : i32
    %c0_i32_0 = arith.constant 0 : i32
    %c0_i32_1 = arith.constant 0 : i32
    %c0_i32_2 = arith.constant 0 : i32
    return %c0_i32, %c0_i32_0, %c0_i32_1 : i32, i32, i32
  }
  func.func @transform_11(%arg0: i32) -> (i32, i32, i32) {
    %c0_i32 = arith.constant 0 : i32
    %c0_i32_0 = arith.constant 0 : i32
    %c0_i32_1 = arith.constant 0 : i32
    %c0_i32_2 = arith.constant 0 : i32
    return %c0_i32, %c0_i32_0, %c0_i32_1 : i32, i32, i32
  }
  func.func @transform_12(%arg0: i32) -> (i32, i32, i32, i32) {
    %c0_i32 = arith.constant 0 : i32
    %c0_i32_0 = arith.constant 0 : i32
    %c0_i32_1 = arith.constant 0 : i32
    %c0_i32_2 = arith.constant 0 : i32
    return %arg0, %c0_i32, %c0_i32_0, %c0_i32_1 : i32, i32, i32, i32
  }
}

</mosaic_0001>

<bundles_post_ra>
// kernel: tpu_custom_call.1
= control target key start
LH: loop header
LB: loop body
LE: loop exit
PB: predicated region body
PF: predicated region fallthrough
CT: control target
= control target key end

     0   :  { %s7571_s21 = smov 0   ;;  %s9541_s0 = inlined_call_operand.vmem [shape: f32[2,64,5], index: 0, kind: input, shape index: {}]   ;;  %s9542_s1 = inlined_call_operand.vmem [shape: f32[44,128], index: 1, kind: input, shape index: {}]   ;;  %s9543_s2 = inlined_call_operand.vmem [shape: bf16[2,5,64], index: 2, kind: input, shape index: {}]   ;;  %s9544_s3 = inlined_call_operand.vmem [shape: bf16[3,31,63], index: 3, kind: input, shape index: {}]   ;;  %s9545_s4 = inlined_call_operand.vmem [shape: bf16[3,64,64], index: 4, kind: input, shape index: {}]   ;;  %s9546_s5 = inlined_call_operand.vmem [shape: bf16[64,64], index: 5, kind: input, shape index: {}]   ;;  %s9547_s6 = inlined_call_operand.vmem [shape: bf16[4,31,31], index: 6, kind: input, shape index: {}]   ;;  %s9548_s7 = inlined_call_operand.vmem [shape: bf16[4,64,64], index: 7, kind: input, shape index: {}]   ;;  %s9549_s8 = inlined_call_operand.vmem [shape: bf16[24,64,16], index: 8, kind: input, shape index: {}]   ;;  %s9550_s9 = inlined_call_operand.vmem [shape: bf16[8,16,64], index: 9, kind: input, shape index: {}]   ;;  %s9551_s10 = inlined_call_operand.vmem [shape: bf16[2,64,128], index: 10, kind: input, shape index: {}]   ;;  %s9552_s11 = inlined_call_operand.vmem [shape: bf16[2,128,64], index: 11, kind: input, shape index: {}]   ;;  %s9553_s12 = inlined_call_operand.vmem [shape: f32[2,2,31,64], index: 12, kind: output, shape index: {}]  }
   0x1 LB: > { %s5894_s22 = sadd.s32 4294967295, %s7501_s21   ;;  %p5898_p0 = scmp.ge.s32.totalorder %s7501_s21, 1  ;;  %s7501_s21 = sphi %s7571_s21, %s22_s21  }
   0x2   : > { %p362_p1 = scmp.lt.s32.totalorder %s7501_s21, 3 }
   0x4   : > { %p363_p2 = pnand %p5898_p0, %p362_p1 }
   0x5   : > { %p404_p3 = scmp.lt.s32.totalorder (!%p363_p2), %s5894_s22, 1 }
   0x6   : > { %366 = sbr.rel (%p363_p2) target bundleno = 8324 (0x2084), region = 68 }
   0xb   : > { %v431_v0 = vld [vmem:[%s9543_s2] sm:$0x7]  ;;  %vm499_vm0 = vcmask 1041408   ;;  %vm500_vm1 = vcmask 1042432   ;;  %v7503_v1 = vmov 65535   ;;  %s9563_s22 = smov (!%p404_p3, %s5894_s22), 1 }
   0xc   : > { %v501_v2 = vsel %vm499_vm0, 4294967295, %v7503_v1  ;;  %v5903_v4 = vld [vmem:[%s9543_s2 + $0x4] sm:$0x7]  ;;  %s7036_s27 = sshll.u32 %s9563_s22, 6  ;;  %vm486_vm2 = vcmask 39936   ;;  %vm575_vm4 = vcmask 523264  }
   0xd   : > { %v502_v3 = vsel %vm500_vm1, %v501_v2, 0  ;;  %s7594_s30 = scalar_lea.vmem %s9541_s0, %s7036_s27  ;;  %vm454_vm3 = vsmask.f32 7424  ;;  %vm589_vm5 = vcmask 522240   ;;  %vm1060_vm10 = vcmask 1046528   ;;  %s8964_s20 = scalar_lea.vmem %s9553_s12, %s7036_s27 }
   0xe   : > { %v544_v5 = vand.u32 %v502_v3, %v431_v0  ;;  %v504_v6 = vand.u32 %v5903_v4, %v502_v3  ;;  %v415_v7 = vld [vmem:[%s7594_s30] sm:$0xff]  ;;  %v416_v8 = vld [vmem:[%s7594_s30 + $0x8] sm:$0xff]  ;;  %v417_v9 = vld [vmem:[%s7594_s30 + $0x10] sm:$0xff]  ;;  %vm1061_vm11 = vcmask 1047552  }
   0xf   : > { %v423_v10 = vpack.c.bf16 %v415_v7, %v415_v7  ;;  %v424_v11 = vpack.c.bf16 %v416_v8, %v416_v8  ;;  %v418_v12 = vld [vmem:[%s7594_s30 + $0x18] sm:$0xff]  ;;  %v425_v13 = vpack.c.bf16 %v417_v9, %v417_v9  ;;  %v419_v15 = vld [vmem:[%s7594_s30 + $0x20] sm:$0xff]  ;;  %v420_v16 = vld [vmem:[%s7594_s30 + $0x28] sm:$0xff]  ;;  %v7504_v9 = vmov 63.0  }
  0x10   : > { %553 = vmatpush.bf16.msra.mxu1 %v544_v5  ;;  %513 = vmatpush.bf16.msra.mxu0 %v504_v6  ;;  %v426_v14 = vpack.c.bf16 %v418_v12, %v418_v12  ;;  %v427_v25 = vpack.c.bf16 %v419_v15, %v419_v15  ;;  %v428_v26 = vpack.c.bf16 %v420_v16, %v420_v16  ;;  %v421_v37 = vld [vmem:[%s7594_s30 + $0x30] sm:$0xff]  ;;  %v422_v38 = vld [vmem:[%s7594_s30 + $0x38] sm:$0xff]  ;;  %7273 = vrcp.f32 %v7504_v9 }
  0x11   : > { %v442_v17 = vunpack.c.l.b16 %v423_v10  ;;  %v443_v18 = vunpack.c.l.b16 %v424_v11  ;;  %v444_v19 = vunpack.c.l.b16 %v425_v13  ;;  %v429_v41 = vpack.c.bf16 %v421_v37, %v421_v37 }
  0x12   : > { %v445_v20 = vunpack.c.l.b16 %v426_v14  ;;  %v446_v31 = vunpack.c.l.b16 %v427_v25  ;;  %v447_v32 = vunpack.c.l.b16 %v428_v26  ;;  %v430_v42 = vpack.c.bf16 %v422_v38, %v422_v38 }
  0x13   : > { %v450_v21 = vpack.c.b16 %v443_v18, %v442_v17  ;;  %v448_v44 = vunpack.c.l.b16 %v429_v41 }
  0x14   : > { %v451_v22 = vpack.c.b16 %v445_v20, %v444_v19  ;;  %v452_v34 = vpack.c.b16 %v447_v32, %v446_v31  ;;  %v449_v45 = vunpack.c.l.b16 %v430_v42 }
  0x15   : > { %v458_v23 = vshll.u32 %v450_v21, 16  ;;  %5908 = vmatmul.msk.bf16.vlgmr.msra.gmra.mxu1 %vm486_vm2, %v450_v21  ;;  %v456_v24 = vshrl.u32 %v450_v21, 16 }
  0x16   : > { %v463_v27 = vshll.u32 %v451_v22, 16  ;;  %v467_v35 = vshrl.u32 %v451_v22, 16  ;;  %v471_v36 = vshll.u32 %v452_v34, 16  ;;  %v453_v46 = vpack.c.b16 %v449_v45, %v448_v44  ;;  %v7274_v20 = vpop.eup %7273 }
  0x17   : > { %v460_v28 = vrot.slane %v458_v23, 1  ;;  %v475_v47 = vshrl.u32 %v452_v34, 16  ;;  %v599_v25 = vmul.f32 63.0, %v7274_v20  ;;  %vm603_vm6 = vweird.f32 %v7274_v20 }
  0x18   : > { %v465_v29 = vrot.slane %v463_v27, 1  ;;  %v473_v40 = vrot.slane %v471_v36, 1  ;;  %v479_v48 = vshll.u32 %v453_v46, 16  ;;  %v483_v52 = vshrl.u32 %v453_v46, 16 }
  0x19   : > { %v461_v30 = vor.u32 %v460_v28, %v456_v24  ;;  %v600_v32 = vsub.f32 1.0, %v599_v25 }
  0x1a   : > { %v469_v39 = vor.u32 %v467_v35, %v465_v29  ;;  %v477_v49 = vor.u32 %v475_v47, %v473_v40  ;;  %v481_v50 = vrot.slane %v479_v48, 1 }
  0x1b   : > { %v466_v33 = vsel %vm454_vm3, %v461_v30, %v465_v29  ;;  %v601_v35 = vmul.f32 %v7274_v20, %v600_v32 }
  0x1c   : > { %5904 = vmatmul.msk.bf16.vlgmr.msra.gmra.mxu0 %vm486_vm2, %v466_v33  ;;  %v474_v43 = vsel %vm454_vm3, %v469_v39, %v473_v40  ;;  %v482_v51 = vsel %vm454_vm3, %v477_v49, %v481_v50  ;;  %v485_v53 = vor.u32 %v483_v52, %v481_v50 }
  0x1d   : > { %v602_v38 = vadd.f32 %v7274_v20, %v601_v35 }
  0x1f   : > { %v604_v41 = vsel %vm603_vm6, %v7274_v20, %v602_v38 }
  0x25   : > { %5909 = vmatmul.msk.bf16.gmra.mxu1 %vm486_vm2, %v451_v22 }
  0x2c   : > { %5905 = vmatmul.msk.bf16.gmra.mxu0 %vm486_vm2, %v474_v43 }
  0x35   : > { %5910 = vmatmul.msk.bf16.gmra.mxu1 %vm486_vm2, %v452_v34 }
  0x3c   : > { %5906 = vmatmul.msk.bf16.gmra.mxu0 %vm486_vm2, %v482_v51 }
  0x45   : > { %5911 = vmatmul.msk.bf16.gmra.mxu1 %vm486_vm2, %v453_v46 }
  0x4c   : > { %5907 = vmatmul.msk.bf16.gmra.mxu0 %vm486_vm2, %v485_v53 }
  0x92   : > { %v555_v54 = vpop.f32.mrf.mxu1 }
  0x99   : > { %v515_v55 = vpop.f32.mrf.mxu0 }
  0x9a   : > { %v557_v56 = vpop.f32.mrf.mxu1  ;;  %v556_v4 = vadd.f32 %v555_v54, %v515_v55 }
  0x9c   : > { %v576_v10 = vsel %vm575_vm4, %v556_v4, 0.0 }
  0xa1   : > { %v517_v57 = vpop.f32.mrf.mxu0 }
  0xa2   : > { %v560_v58 = vpop.f32.mrf.mxu1  ;;  %v558_v3 = vadd.f32 %v557_v56, %v517_v57 }
  0xa4   : > { %v577_v6 = vsel %vm575_vm4, %v558_v3, 0.0 }
  0xa5   : > { %v578_v13 = vadd.f32 %v577_v6, %v576_v10 }
  0xa9   : > { %v520_v59 = vpop.f32.mrf.mxu0 }
  0xaa   : > { %v562_v60 = vpop.f32.mrf.mxu1  ;;  %v561_v5 = vadd.f32 %v560_v58, %v520_v59 }
  0xac   : > { %v579_v11 = vsel %vm575_vm4, %v561_v5, 0.0 }
  0xad   : > { %v580_v17 = vadd.f32 %v579_v11, %v578_v13 }
  0xb1   : > { %v522_v61 = vpop.f32.mrf.mxu0 }
  0xb2   : > { %v565_v62 = vpop.f32.mrf.mxu1  ;;  %v563_v7 = vadd.f32 %v562_v60, %v522_v61 }
  0xb4   : > { %v581_v15 = vsel %vm575_vm4, %v563_v7, 0.0 }
  0xb5   : > { %v582_v21 = vadd.f32 %v581_v15, %v580_v17 }
  0xb9   : > { %v525_v63 = vpop.f32.mrf.mxu0 }
  0xba   : > { %v567_v0 = vpop.f32.mrf.mxu1  ;;  %v566_v12 = vadd.f32 %v565_v62, %v525_v63 }
  0xbc   : > { %v583_v18 = vsel %vm575_vm4, %v566_v12, 0.0 }
  0xbd   : > { %v584_v23 = vadd.f32 %v583_v18, %v582_v21 }
  0xc1   : > { %v527_v2 = vpop.f32.mrf.mxu0 }
  0xc2   : > { %v570_v8 = vpop.f32.mrf.mxu1  ;;  %v568_v16 = vadd.f32 %v567_v0, %v527_v2 }
  0xc4   : > { %v585_v22 = vsel %vm575_vm4, %v568_v16, 0.0 }
  0xc5   : > { %v586_v26 = vadd.f32 %v585_v22, %v584_v23 }
  0xc9   : > { %v530_v14 = vpop.f32.mrf.mxu0 }
  0xca   : > { %v571_v19 = vadd.f32 %v570_v8, %v530_v14  ;;  %v572_v27 = vpop.f32.mrf.mxu1 }
  0xcc   : > { %v587_v24 = vsel %vm575_vm4, %v571_v19, 0.0 }
  0xcd   : > { %v588_v30 = vadd.f32 %v587_v24, %v586_v26  ;;  %v7650_v26 = vld [vmem:[%s9542_s1] ss:$0 sm:$0xff] }
  0xd1   : > { %v532_v28 = vpop.f32.mrf.mxu0 }
  0xd2   : > { %v573_v29 = vadd.f32 %v572_v27, %v532_v28 }
  0xd4   : > { %v590_v31 = vsel %vm589_vm5, %v573_v29, 0.0 }
  0xd5   : > { %v591_v33 = vadd.f32 %v590_v31, %v588_v30  ;;  %v7659_v30 = vld [vmem:[%s9542_s1 + $0x1] ss:$0 sm:$0xff] }
  0xd7   : > { %v592_v34 = vrot.slane %v591_v33, 4 }
  0xd9   : > { %v593_v36 = vadd.f32 %v592_v34, %v591_v33 }
  0xdb   : > { %v594_v37 = vrot.slane %v593_v36, 2 }
  0xdd   : > { %v595_v39 = vadd.f32 %v594_v37, %v593_v36 }
  0xdf   : > { %v596_v40 = vrot.slane %v595_v39, 1 }
  0xe1   : > { %v597_v42 = vadd.f32 %v596_v40, %v595_v39 }
  0xe3   : > { %v605_v43 = vmul.f32 %v604_v41, %v597_v42 }
  0xe5   : > { %v7623_v44 = vsub.f32 %v556_v4, %v605_v43  ;;  %v7625_v45 = vsub.f32 %v558_v3, %v605_v43  ;;  %v7627_v46 = vsub.f32 %v561_v5, %v605_v43  ;;  %v7629_v47 = vsub.f32 %v563_v7, %v605_v43 }
  0xe6   : > { %v610_v48 = vsub.f32 %v566_v12, %v605_v43  ;;  %v611_v52 = vsub.f32 %v568_v16, %v605_v43  ;;  %v612_v57 = vsub.f32 %v571_v19, %v605_v43  ;;  %v613_v61 = vsub.f32 %v573_v29, %v605_v43 }
  0xe7   : > { %v614_v49 = vmul.f32 %v7623_v44, %v7623_v44  ;;  %v615_v50 = vmul.f32 %v7625_v45, %v7625_v45  ;;  %v616_v51 = vmul.f32 %v7627_v46, %v7627_v46  ;;  %v617_v53 = vmul.f32 %v7629_v47, %v7629_v47 }
  0xe8   : > { %v618_v58 = vmul.f32 %v610_v48, %v610_v48  ;;  %v619_v62 = vmul.f32 %v611_v52, %v611_v52  ;;  %v620_v2 = vmul.f32 %v612_v57, %v612_v57  ;;  %v621_v5 = vmul.f32 %v613_v61, %v613_v61 }
  0xe9   : > { %v622_v54 = vsel %vm575_vm4, %v614_v49, 0.0  ;;  %v623_v55 = vsel %vm575_vm4, %v615_v50, 0.0  ;;  %v625_v59 = vsel %vm575_vm4, %v616_v51, 0.0  ;;  %v627_v63 = vsel %vm575_vm4, %v617_v53, 0.0 }
  0xea   : > { %v624_v56 = vadd.f32 %v623_v55, %v622_v54  ;;  %v629_v3 = vsel %vm575_vm4, %v618_v58, 0.0  ;;  %v631_v6 = vsel %vm575_vm4, %v619_v62, 0.0  ;;  %v633_v8 = vsel %vm575_vm4, %v620_v2, 0.0 }
  0xeb   : > { %v635_v10 = vsel %vm589_vm5, %v621_v5, 0.0 }
  0xec   : > { %v626_v60 = vadd.f32 %v625_v59, %v624_v56  ;;  %v7708_v56 = vsel %vm1060_vm10, 4294967295, %v7503_v1 }
  0xee   : > { %v628_v0 = vadd.f32 %v627_v63, %v626_v60 }
  0xf0   : > { %v630_v4 = vadd.f32 %v629_v3, %v628_v0 }
  0xf2   : > { %v632_v7 = vadd.f32 %v631_v6, %v630_v4 }
  0xf4   : > { %v634_v9 = vadd.f32 %v633_v8, %v632_v7 }
  0xf6   : > { %v636_v11 = vadd.f32 %v635_v10, %v634_v9 }
  0xf8   : > { %v637_v12 = vrot.slane %v636_v11, 4 }
  0xfa   : > { %v638_v13 = vadd.f32 %v637_v12, %v636_v11 }
  0xfc   : > { %v639_v14 = vrot.slane %v638_v13, 2 }
  0xfe   : > { %v640_v15 = vadd.f32 %v639_v14, %v638_v13 }
 0x100   : > { %v641_v16 = vrot.slane %v640_v15, 1 }
 0x102   : > { %v642_v17 = vadd.f32 %v641_v16, %v640_v15 }
 0x104   : > { %v643_v18 = vmul.f32 %v642_v17, %v604_v41 }
 0x106   : > { %v644_v19 = vadd.f32 1e-05, %v643_v18 }
 0x108   : > { %7275 = vrsqrt.f32 %v644_v19  ;;  %vm651_vm8 = vweird.f32 %v644_v19 }
 0x10e   : > { %v7276_v20 = vpop.eup %7275 }
 0x10f   : > { %v646_v21 = vmul.f32 %v7276_v20, %v644_v19  ;;  %vm652_vm7 = vweird.f32 %v7276_v20 }
 0x110   : > { %vm653_vm9 = vmor %vm651_vm8, %vm652_vm7 }
 0x111   : > { %v647_v22 = vmul.f32 %v7276_v20, %v646_v21 }
 0x113   : > { %v648_v23 = vmul.f32 0.5, %v647_v22 }
 0x115   : > { %v649_v24 = vsub.f32 1.5, %v648_v23 }
 0x117   : > { %v650_v25 = vmul.f32 %v7276_v20, %v649_v24 }
 0x119   : > { %v7652_v27 = vsel %vm653_vm9, %v7276_v20, %v650_v25 }
 0x11a   : > { %v661_v28 = vmul.f32 %v7652_v27, %v612_v57  ;;  %v662_v29 = vmul.f32 %v7652_v27, %v613_v61  ;;  %v659_v31 = vmul.f32 %v7652_v27, %v610_v48  ;;  %v660_v32 = vmul.f32 %v7652_v27, %v611_v52 }
 0x11b   : > { %v657_v49 = vmul.f32 %v7652_v27, %v7627_v46  ;;  %v658_v46 = vmul.f32 %v7652_v27, %v7629_v47  ;;  %v655_v24 = vmul.f32 %v7652_v27, %v7623_v44 }
 0x11c   : > { %v672_v33 = vmul.f32 %v7650_v26, %v662_v29  ;;  %v671_v34 = vmul.f32 %v7650_v26, %v661_v28  ;;  %v669_v35 = vmul.f32 %v7650_v26, %v659_v31  ;;  %v670_v36 = vmul.f32 %v7650_v26, %v660_v32 }
 0x11d   : > { %v667_v59 = vmul.f32 %v7650_v26, %v657_v49  ;;  %v668_v4 = vmul.f32 %v7650_v26, %v658_v46 }
 0x11e   : > { %v7668_v37 = vadd.f32 %v7659_v30, %v672_v33  ;;  %v7671_v38 = vadd.f32 %v7659_v30, %v671_v34  ;;  %v7674_v39 = vadd.f32 %v7659_v30, %v669_v35  ;;  %v7677_v40 = vadd.f32 %v7659_v30, %v670_v36 }
 0x11f   : > { %v7723_v8 = vadd.f32 %v7659_v30, %v667_v59  ;;  %v7734_v20 = vadd.f32 %v7659_v30, %v668_v4 }
 0x120   : > { %v7680_v41 = vmul.f32 0.70710677, %v7668_v37  ;;  %v7683_v42 = vmul.f32 0.70710677, %v7671_v38  ;;  %v7686_v43 = vmul.f32 0.70710677, %v7674_v39 }
 0x121   : > { %v7689_v48 = vmul.f32 0.70710677, %v7677_v40 }
 0x122   : > { %v979_v50 = vmul.f32 %v7680_v41, %v7680_v41  ;;  %v939_v51 = vmul.f32 %v7683_v42, %v7683_v42  ;;  %v859_v52 = vmul.f32 %v7686_v43, %v7686_v43 }
 0x123   : > { %v899_v53 = vmul.f32 %v7689_v48, %v7689_v48 }
 0x124   : > { %v7701_v54 = vmin.f32 %v979_v50, 16.0  ;;  %v7703_v55 = vmin.f32 %v939_v51, 16.0  ;;  %v7710_v57 = vmin.f32 %v859_v52, 16.0 }
 0x125   : > { %v7712_v58 = vmin.f32 %v899_v53, 16.0 }
 0x126   : > { %v981_v60 = vmul.f32 2.1237322e-06, %v7701_v54  ;;  %v941_v61 = vmul.f32 2.1237322e-06, %v7703_v55  ;;  %v952_v62 = vmul.f32 3.8918573e-05, %v7703_v55 }
 0x127   : > { %v992_v63 = vmul.f32 3.8918573e-05, %v7701_v54  ;;  %v861_v0 = vmul.f32 2.1237322e-06, %v7710_v57  ;;  %v872_v47 = vmul.f32 3.8918573e-05, %v7710_v57 }
 0x128   : > { %v982_v1 = vadd.f32 0.00028619796, %v981_v60  ;;  %v942_v2 = vadd.f32 0.00028619796, %v941_v61  ;;  %v953_v3 = vadd.f32 0.001143296, %v952_v62 }
 0x129   : > { %v993_v5 = vadd.f32 0.001143296, %v992_v63  ;;  %v862_v6 = vadd.f32 0.00028619796, %v861_v0  ;;  %v873_v7 = vadd.f32 0.001143296, %v872_v47 }
 0x12a   : > { %v983_v9 = vmul.f32 %v982_v1, %v7701_v54  ;;  %v943_v10 = vmul.f32 %v942_v2, %v7703_v55  ;;  %v954_v11 = vmul.f32 %v953_v3, %v7703_v55  ;;  %v901_v12 = vmul.f32 2.1237322e-06, %v7712_v58 }
 0x12b   : > { %v994_v13 = vmul.f32 %v993_v5, %v7701_v54  ;;  %v863_v14 = vmul.f32 %v862_v6, %v7710_v57  ;;  %v874_v15 = vmul.f32 %v873_v7, %v7710_v57  ;;  %v912_v16 = vmul.f32 3.8918573e-05, %v7712_v58 }
 0x12c   : > { %v984_v17 = vadd.f32 0.0036580483, %v983_v9  ;;  %v944_v18 = vadd.f32 0.0036580483, %v943_v10  ;;  %v955_v19 = vadd.f32 0.014752088, %v954_v11 }
 0x12d   : > { %v995_v21 = vadd.f32 0.014752088, %v994_v13  ;;  %v864_v22 = vadd.f32 0.0036580483, %v863_v14  ;;  %v875_v23 = vadd.f32 0.014752088, %v874_v15  ;;  %v656_v14 = vmul.f32 %v7652_v27, %v7625_v45 }
 0x12e   : > { %v985_v25 = vmul.f32 %v984_v17, %v7701_v54  ;;  %v945_v28 = vmul.f32 %v944_v18, %v7703_v55  ;;  %v956_v29 = vmul.f32 %v955_v19, %v7703_v55  ;;  %v902_v31 = vadd.f32 0.00028619796, %v901_v12 }
 0x12f   : > { %v996_v32 = vmul.f32 %v995_v21, %v7701_v54  ;;  %v865_v33 = vmul.f32 %v864_v22, %v7710_v57  ;;  %v876_v34 = vmul.f32 %v875_v23, %v7710_v57  ;;  %v913_v35 = vadd.f32 0.001143296, %v912_v16 }
 0x130   : > { %v986_v36 = vadd.f32 0.05243302, %v985_v25  ;;  %v946_v49 = vadd.f32 0.05243302, %v945_v28  ;;  %v957_v50 = vadd.f32 0.112945676, %v956_v29  ;;  %v903_v51 = vmul.f32 %v902_v31, %v7712_v58 }
 0x131   : > { %v997_v44 = vadd.f32 0.112945676, %v996_v32  ;;  %v866_v52 = vadd.f32 0.05243302, %v865_v33  ;;  %v877_v53 = vadd.f32 0.112945676, %v876_v34  ;;  %v914_v46 = vmul.f32 %v913_v35, %v7712_v58 }
 0x132   : > { %v987_v59 = vmul.f32 %v986_v36, %v7701_v54  ;;  %v947_v60 = vmul.f32 %v946_v49, %v7703_v55  ;;  %v958_v61 = vmul.f32 %v957_v50, %v7703_v55  ;;  %v904_v62 = vadd.f32 0.0036580483, %v903_v51 }
 0x133   : > { %v998_v63 = vmul.f32 %v997_v44, %v7701_v54  ;;  %v867_v0 = vmul.f32 %v866_v52, %v7710_v57  ;;  %v878_v47 = vmul.f32 %v877_v53, %v7710_v57  ;;  %v915_v1 = vadd.f32 0.014752088, %v914_v46 }
 0x134   : > { %v988_v2 = vadd.f32 0.18741608, %v987_v59  ;;  %v948_v3 = vadd.f32 0.18741608, %v947_v60  ;;  %v959_v4 = vadd.f32 0.4994258, %v958_v61  ;;  %v905_v5 = vmul.f32 %v904_v62, %v7712_v58 }
 0x135   : > { %v999_v6 = vadd.f32 0.4994258, %v998_v63  ;;  %v868_v7 = vadd.f32 0.18741608, %v867_v0  ;;  %v879_v9 = vadd.f32 0.4994258, %v878_v47  ;;  %v916_v10 = vmul.f32 %v915_v1, %v7712_v58 }
 0x136   : > { %v989_v11 = vmul.f32 %v988_v2, %v7701_v54  ;;  %v960_v12 = vmul.f32 %v959_v4, %v7703_v55  ;;  %v7757_v13 = vmul.f32 0.70710677, %v7723_v8  ;;  %v949_v15 = vmul.f32 %v948_v3, %v7703_v55 }
 0x137   : > { %v1000_v16 = vmul.f32 %v999_v6, %v7701_v54  ;;  %v880_v17 = vmul.f32 %v879_v9, %v7710_v57  ;;  %v917_v18 = vadd.f32 0.112945676, %v916_v10  ;;  %v7766_v19 = vsel %vm1061_vm11, %v7708_v56, 0 }
 0x138   : > { %v7768_v21 = vadd.f32 1.0, %v960_v12  ;;  %v869_v22 = vmul.f32 %v868_v7, %v7710_v57  ;;  %v906_v23 = vadd.f32 0.05243302, %v905_v5  ;;  %v7776_v45 = vmul.f32 0.70710677, %v7734_v20 }
 0x139   : > { %v7771_v25 = vadd.f32 1.0, %v1000_v16  ;;  %v7773_v28 = vadd.f32 1.0, %v880_v17  ;;  %v665_v27 = vmul.f32 %v7650_v26, %v655_v24  ;;  %v7780_v54 = vmul.f32 0.5, %v7668_v37 }
 0x13a   : > { %v990_v55 = vadd.f32 1.1283791, %v989_v11  ;;  %7277 = vrcp.f32 %v7768_v21  ;;  %v666_v56 = vmul.f32 %v7650_v26, %v656_v14  ;;  %v950_v29 = vadd.f32 1.1283791, %v949_v15 }
 0x13b   : > { %7279 = vrcp.f32 %v7771_v25  ;;  %v918_v57 = vmul.f32 %v917_v18, %v7712_v58  ;;  %v779_v31 = vmul.f32 %v7757_v13, %v7757_v13  ;;  %v973_v32 = vand.u32 2147483648, %v7768_v21 }
 0x13c   : > { %v870_v33 = vadd.f32 1.1283791, %v869_v22  ;;  %7281 = vrcp.f32 %v7773_v28  ;;  %v907_v37 = vmul.f32 %v906_v23, %v7712_v58  ;;  %v7792_v24 = vmul.f32 0.5, %v7671_v38 }
 0x13d   : > { %v971_v26 = vand.u32 2147483647, %v7768_v21  ;;  %v819_v34 = vmul.f32 %v7776_v45, %v7776_v45  ;;  %v7798_v35 = vadd.f32 %v7659_v30, %v665_v27  ;;  %v7801_v36 = vmul.f32 %v990_v55, %v7680_v41 }
 0x13e   : > { %v1011_v49 = vand.u32 2147483647, %v7771_v25  ;;  %v1013_v50 = vand.u32 2147483648, %v7771_v25  ;;  %v7806_v51 = vadd.f32 %v7659_v30, %v666_v56  ;;  %v951_v38 = vmul.f32 %v950_v29, %v7683_v42 }
 0x13f   : > { %vm967_vm12 = vweird.f32 %v7768_v21  ;;  %v919_v44 = vadd.f32 0.4994258, %v918_v57  ;;  %v7810_v52 = vmin.f32 %v779_v31, 16.0  ;;  %v974_v46 = vor.u32 1.1754944e-38, %v973_v32 }
 0x140   : > { %v7278_v53 = vpop.eup %7277  ;;  %vm1007_vm13 = vweird.f32 %v7771_v25  ;;  %v7814_v41 = vmul.f32 %v870_v33, %v7686_v43  ;;  %v908_v59 = vadd.f32 0.18741608, %v907_v37  ;;  %vm7817_vm14 = vcmp.eq.f32.partialorder %v971_v26, 8.507059e+37 }
 0x141   : > { %v7280_v60 = vpop.eup %7279  ;;  %v963_v61 = vmul.f32 %v7278_v53, %v7768_v21  ;;  %vm887_vm15 = vweird.f32 %v7773_v28  ;;  %v891_v42 = vand.u32 2147483647, %v7773_v28  ;;  %v920_v62 = vmul.f32 %v919_v44, %v7712_v58 }
 0x142   : > { %v781_v63 = vmul.f32 2.1237322e-06, %v7810_v52  ;;  %v7282_v0 = vpop.eup %7281  ;;  %v1003_v43 = vmul.f32 %v7280_v60, %v7771_v25  ;;  %vm7826_vm0 = vcmp.eq.f32.partialorder %v1011_v49, 8.507059e+37  ;;  %v1014_v1 = vor.u32 1.1754944e-38, %v1013_v50 }
 0x143   : > { %v893_v2 = vand.u32 2147483648, %v7773_v28  ;;  %v792_v3 = vmul.f32 3.8918573e-05, %v7810_v52  ;;  %v964_v4 = vsub.f32 1.0, %v963_v61  ;;  %v883_v5 = vmul.f32 %v7282_v0, %v7773_v28 }
 0x144   : > { %v7833_v6 = vadd.f32 1.0, %v920_v62  ;;  %v7835_v7 = vmin.f32 %v819_v34, 16.0  ;;  %v1004_v9 = vsub.f32 1.0, %v1003_v43  ;;  %v909_v10 = vmul.f32 %v908_v59, %v7712_v58 }
 0x145   : > { %v782_v11 = vadd.f32 0.00028619796, %v781_v63  ;;  %v793_v12 = vadd.f32 0.001143296, %v792_v3  ;;  %v965_v14 = vmul.f32 %v7278_v53, %v964_v4  ;;  %vm968_vm1 = vweird.f32 %v7278_v53 }
 0x146   : > { %v884_v15 = vsub.f32 1.0, %v883_v5  ;;  %7283 = vrcp.f32 %v7833_v6  ;;  %v1005_v16 = vmul.f32 %v7280_v60, %v1004_v9  ;;  %vm1008_vm2 = vweird.f32 %v7280_v60  ;;  %vm969_vm6 = vmor %vm967_vm12, %vm968_vm1 }
 0x147   : > { %vm888_vm3 = vweird.f32 %v7282_v0  ;;  %v783_v17 = vmul.f32 %v782_v11, %v7810_v52  ;;  %v966_v18 = vadd.f32 %v7278_v53, %v965_v14  ;;  %v794_v23 = vmul.f32 %v793_v12, %v7810_v52  ;;  %vm1009_vm8 = vmor %vm1007_vm13, %vm1008_vm2 }
 0x148   : > { %v885_v22 = vmul.f32 %v7282_v0, %v884_v15  ;;  %v821_v27 = vmul.f32 2.1237322e-06, %v7835_v7  ;;  %v1006_v58 = vadd.f32 %v7280_v60, %v1005_v16  ;;  %vm7844_vm7 = vcmp.eq.f32.partialorder %v891_v42, 8.507059e+37  ;;  %vm889_vm9 = vmor %vm887_vm15, %vm888_vm3 }
 0x149   : > { %v894_v56 = vor.u32 1.1754944e-38, %v893_v2  ;;  %v784_v29 = vadd.f32 0.0036580483, %v783_v17  ;;  %v970_v57 = vsel %vm969_vm6, %v7278_v53, %v966_v18  ;;  %v910_v32 = vadd.f32 1.1283791, %v909_v10 }
 0x14a   : > { %v886_v31 = vadd.f32 %v7282_v0, %v885_v22  ;;  %v795_v33 = vadd.f32 0.014752088, %v794_v23  ;;  %v975_v37 = vsel %vm7817_vm14, %v974_v46, %v970_v57  ;;  %v1010_v26 = vsel %vm1009_vm8, %v7280_v60, %v1006_v58 }
 0x14b   : > { %v822_v21 = vadd.f32 0.00028619796, %v821_v27  ;;  %v832_v34 = vmul.f32 3.8918573e-05, %v7835_v7  ;;  %v976_v50 = vmul.f32 %v975_v37, %v951_v38  ;;  %v1015_v25 = vsel %vm7826_vm0, %v1014_v1, %v1010_v26 }
 0x14c   : > { %v7284_v49 = vpop.eup %7283  ;;  %v890_v44 = vsel %vm889_vm9, %v7282_v0, %v886_v31  ;;  %v796_v53 = vmul.f32 %v795_v33, %v7810_v52  ;;  %v1016_v59 = vmul.f32 %v1015_v25, %v7801_v36  ;;  %v785_v28 = vmul.f32 %v784_v29, %v7810_v52 }
 0x14d   : > { %v895_v46 = vsel %vm7844_vm7, %v894_v56, %v890_v44  ;;  %v923_v60 = vmul.f32 %v7284_v49, %v7833_v6  ;;  %v5918_v61 = vclamps-f32 %v976_v50, 1.0  ;;  %v931_v30 = vand.u32 2147483647, %v7833_v6 }
 0x14e   : > { %v933_v38 = vand.u32 2147483648, %v7833_v6  ;;  %v797_v42 = vadd.f32 0.112945676, %v796_v53  ;;  %v5919_v62 = vclamps-f32 %v1016_v59, 1.0  ;;  %v896_v63 = vmul.f32 %v895_v46, %v7814_v41 }
 0x14f   : > { %v924_v0 = vsub.f32 1.0, %v923_v60  ;;  %v833_v43 = vadd.f32 0.001143296, %v832_v34  ;;  %v1025_v47 = vadd.f32 1.0, %v5918_v61  ;;  %vm928_vm10 = vweird.f32 %v7284_v49 }
 0x150   : > { %v798_v36 = vmul.f32 %v797_v42, %v7810_v52  ;;  %v823_v1 = vmul.f32 %v822_v21, %v7835_v7  ;;  %v1026_v2 = vadd.f32 1.0, %v5919_v62  ;;  %v786_v4 = vadd.f32 0.05243302, %v785_v28 }
 0x151   : > { %v925_v3 = vmul.f32 %v7284_v49, %v924_v0  ;;  %v834_v5 = vmul.f32 %v833_v43, %v7835_v7  ;;  %v1033_v9 = vmul.f32 %v1025_v47, %v7792_v24  ;;  %v911_v10 = vmul.f32 %v910_v32, %v7689_v48 }
 0x152   : > { %vm927_vm11 = vweird.f32 %v7833_v6  ;;  %v799_v41 = vadd.f32 0.4994258, %v798_v36  ;;  %v1034_v11 = vmul.f32 %v1026_v2, %v7780_v54  ;;  %v5916_v12 = vclamps-f32 %v896_v63, 1.0 }
 0x153   : > { %v926_v14 = vadd.f32 %v7284_v49, %v925_v3  ;;  %v835_v15 = vadd.f32 0.014752088, %v834_v5  ;;  %vm929_vm12 = vmor %vm927_vm11, %vm928_vm10  ;;  %vm932_vm13 = vcmp.eq.f32.partialorder %v931_v30, 8.507059e+37  ;;  %v934_v16 = vor.u32 1.1754944e-38, %v933_v38 }
 0x154   : > { %v800_v17 = vmul.f32 %v799_v41, %v7810_v52  ;;  %v824_v18 = vadd.f32 0.0036580483, %v823_v1  ;;  %v1038_v22 = vpack.c.bf16 %v1034_v11, %v1033_v9  ;;  %v787_v24 = vmul.f32 %v786_v4, %v7810_v52 }
 0x155   : > { %v930_v23 = vsel %vm929_vm12, %v7284_v49, %v926_v14  ;;  %v836_v48 = vmul.f32 %v835_v15, %v7835_v7  ;;  %v7881_v54 = vmul.f32 0.70710677, %v7798_v35  ;;  %v7884_v58 = vmul.f32 0.70710677, %v7806_v51 }
 0x156   : > { %v935_v6 = vsel %vm932_vm13, %v934_v16, %v930_v23  ;;  %v7878_v27 = vadd.f32 1.0, %v800_v17  ;;  %v7887_v55 = vand.u32 %v7766_v19, %v1038_v22  ;;  %v1023_v29 = vadd.f32 1.0, %v5916_v12 }
 0x157   : > { %v936_v56 = vmul.f32 %v935_v6, %v911_v10  ;;  %v837_v57 = vadd.f32 0.112945676, %v836_v48  ;;  %v825_v31 = vmul.f32 %v824_v18, %v7835_v7  ;;  %v687_v32 = vmul.f32 0.5, %v7674_v39 }
 0x158   : > { %7285 = vrcp.f32 %v7878_v27  ;;  %1071 = vmatpush.bf16.msra.mxu2 %v7887_v55  ;;  %1121 = vmatpush.bf16.msra.mxu3 %v7887_v55  ;;  %v688_v26 = vmul.f32 0.5, %v7677_v40  ;;  %v699_v21 = vmul.f32 %v7881_v54, %v7881_v54  ;;  %v739_v34 = vmul.f32 %v7884_v58, %v7884_v58 }
 0x159   : > { %v5917_v33 = vclamps-f32 %v936_v56, 1.0  ;;  %v838_v37 = vmul.f32 %v837_v57, %v7835_v7  ;;  %1270 = vmatpush.bf16.msrb.mxu0 %v7887_v55  ;;  %v1031_v50 = vmul.f32 %v1023_v29, %v687_v32  ;;  %v788_v25 = vadd.f32 0.18741608, %v787_v24 }
 0x15a   : > { %v826_v53 = vadd.f32 0.05243302, %v825_v31  ;;  %v7901_v59 = vmin.f32 %v699_v21, 16.0  ;;  %v7903_v39 = vmin.f32 %v739_v34, 16.0  ;;  %v813_v3 = vand.u32 2147483648, %v7878_v27 }
 0x15b   : > { %v1024_v49 = vadd.f32 1.0, %v5917_v33  ;;  %v839_v44 = vadd.f32 0.4994258, %v838_v37  ;;  %v789_v42 = vmul.f32 %v788_v25, %v7810_v52  ;;  %v811_v52 = vand.u32 2147483647, %v7878_v27 }
 0x15c   : > { %v701_v40 = vmul.f32 2.1237322e-06, %v7901_v59  ;;  %v712_v61 = vmul.f32 3.8918573e-05, %v7901_v59  ;;  %v741_v30 = vmul.f32 2.1237322e-06, %v7903_v39  ;;  %v827_v63 = vmul.f32 %v826_v53, %v7835_v7 }
 0x15d   : > { %v1032_v46 = vmul.f32 %v1024_v49, %v688_v26  ;;  %v840_v60 = vmul.f32 %v839_v44, %v7835_v7  ;;  %v752_v2 = vmul.f32 3.8918573e-05, %v7903_v39  ;;  %v790_v10 = vadd.f32 1.1283791, %v789_v42 }
 0x15e   : > { %v7286_v28 = vpop.eup %7285  ;;  %v702_v43 = vadd.f32 0.00028619796, %v701_v40  ;;  %v713_v47 = vadd.f32 0.001143296, %v712_v61  ;;  %v742_v1 = vadd.f32 0.00028619796, %v741_v30  ;;  %vm807_vm15 = vweird.f32 %v7878_v27 }
 0x15f   : > { %v7909_v38 = vpack.c.bf16 %v1032_v46, %v1031_v50  ;;  %v803_v62 = vmul.f32 %v7286_v28, %v7878_v27  ;;  %v7914_v0 = vadd.f32 1.0, %v840_v60  ;;  %vm808_vm14 = vweird.f32 %v7286_v28 }
 0x160   : > { %v703_v5 = vmul.f32 %v702_v43, %v7901_v59  ;;  %v714_v9 = vmul.f32 %v713_v47, %v7901_v59  ;;  %v828_v41 = vadd.f32 0.18741608, %v827_v63  ;;  %v753_v11 = vadd.f32 0.001143296, %v752_v2  ;;  %vm809_vm0 = vmor %vm807_vm15, %vm808_vm14 }
 0x161   : > { %1072 = vmatpush.bf16.msra.mxu2 %v7909_v38  ;;  %1122 = vmatpush.bf16.msra.mxu3 %v7909_v38  ;;  %v804_v36 = vsub.f32 1.0, %v803_v62  ;;  %7287 = vrcp.f32 %v7914_v0  ;;  %v743_v15 = vmul.f32 %v742_v1, %v7903_v39  ;;  %v814_v16 = vor.u32 1.1754944e-38, %v813_v3 }
 0x162   : > { %1271 = vmatpush.bf16.msrb.mxu0 %v7909_v38  ;;  %v715_v14 = vadd.f32 0.014752088, %v714_v9  ;;  %v754_v17 = vmul.f32 %v753_v11, %v7903_v39  ;;  %vm812_vm1 = vcmp.eq.f32.partialorder %v811_v52, 8.507059e+37  ;;  %v704_v22 = vadd.f32 0.0036580483, %v703_v5 }
 0x163   : > { %v805_v4 = vmul.f32 %v7286_v28, %v804_v36  ;;  %v829_v6 = vmul.f32 %v828_v41, %v7835_v7  ;;  %v791_v29 = vmul.f32 %v790_v10, %v7757_v13  ;;  %v744_v57 = vadd.f32 0.0036580483, %v743_v15 }
 0x164   : > { %v716_v23 = vmul.f32 %v715_v14, %v7901_v59  ;;  %v755_v56 = vadd.f32 0.014752088, %v754_v17  ;;  %v705_v26 = vmul.f32 %v704_v22, %v7901_v59  ;;  %v853_v34 = vand.u32 2147483648, %v7914_v0 }
 0x165   : > { %v806_v12 = vadd.f32 %v7286_v28, %v805_v4  ;;  %v830_v21 = vadd.f32 1.1283791, %v829_v6  ;;  %v851_v13 = vand.u32 2147483647, %v7914_v0  ;;  %v745_v25 = vmul.f32 %v744_v57, %v7903_v39 }
 0x166   : > { %v717_v31 = vadd.f32 0.112945676, %v716_v23  ;;  %v756_v32 = vmul.f32 %v755_v56, %v7903_v39  ;;  %vm847_vm3 = vweird.f32 %v7914_v0  ;;  %v854_v40 = vor.u32 1.1754944e-38, %v853_v34 }
 0x167   : > { %v810_v18 = vsel %vm809_vm0, %v7286_v28, %v806_v12  ;;  %v7288_v24 = vpop.eup %7287  ;;  %v706_v28 = vadd.f32 0.05243302, %v705_v26  ;;  %v831_v42 = vmul.f32 %v830_v21, %v7776_v45  ;;  %vm852_vm7 = vcmp.eq.f32.partialorder %v851_v13, 8.507059e+37 }
 0x168   : > { %v815_v48 = vsel %vm812_vm1, %v814_v16, %v810_v18  ;;  %v843_v27 = vmul.f32 %v7288_v24, %v7914_v0  ;;  %v718_v49 = vmul.f32 %v717_v31, %v7901_v59  ;;  %v757_v50 = vadd.f32 0.112945676, %v756_v32 }
 0x169   : > { %v816_v33 = vmul.f32 %v815_v48, %v791_v29  ;;  %vm848_vm2 = vweird.f32 %v7288_v24  ;;  %v746_v63 = vadd.f32 0.05243302, %v745_v25  ;;  %v707_v52 = vmul.f32 %v706_v28, %v7901_v59 }
 0x16a   : > { %v844_v37 = vsub.f32 1.0, %v843_v27  ;;  %v719_v44 = vadd.f32 0.4994258, %v718_v49  ;;  %v758_v53 = vmul.f32 %v757_v50, %v7903_v39  ;;  %vm849_vm6 = vmor %vm847_vm3, %vm848_vm2  ;;  %v685_v0 = vmul.f32 0.5, %v7723_v8 }
 0x16b   : > { %v5914_v46 = vclamps-f32 %v816_v33, 1.0  ;;  %v747_v4 = vmul.f32 %v746_v63, %v7903_v39  ;;  %v686_v45 = vmul.f32 0.5, %v7734_v20  ;;  %v708_v41 = vadd.f32 0.18741608, %v707_v52  ;;  %v7047_v63 = vld [vmem:[%s9545_s4 + $0x28] sm:$0xff]  ;;  %v7054_v52 = vld [vmem:[%s9545_s4 + $0x50] sm:$0xff] }
 0x16c   : > { %v845_v7 = vmul.f32 %v7288_v24, %v844_v37  ;;  %v720_v61 = vmul.f32 %v719_v44, %v7901_v59  ;;  %v759_v30 = vadd.f32 0.4994258, %v758_v53  ;;  %v683_v53 = vmul.f32 0.5, %v7798_v35  ;;  %v7044_v35 = vld [vmem:[%s9544_s3 + $0x10] sm:$0xff] }
 0x16d   : > { %v1021_v2 = vadd.f32 1.0, %v5914_v46  ;;  %v748_v12 = vadd.f32 0.18741608, %v747_v4  ;;  %v709_v16 = vmul.f32 %v708_v41, %v7901_v59  ;;  %vm1053_vm0 = vcmask 515072  }
 0x16e   : > { %v846_v60 = vadd.f32 %v7288_v24, %v845_v7  ;;  %v721_v47 = vadd.f32 1.0, %v720_v61  ;;  %v760_v36 = vmul.f32 %v759_v30, %v7903_v39  ;;  %v7049_v61 = vld [vmem:[%s9545_s4 + $0x38] sm:$0xff] }
 0x16f   : > { %v1029_v10 = vmul.f32 %v1021_v2, %v685_v0  ;;  %v749_v20 = vmul.f32 %v748_v12, %v7903_v39  ;;  %v7040_v2 = vld [vmem:[%s9545_s4] sm:$0xff]  ;;  %v7053_v0 = vld [vmem:[%s9545_s4 + $0x48] sm:$0xff] }
 0x170   : > { %v850_v62 = vsel %vm849_vm6, %v7288_v24, %v846_v60  ;;  %7289 = vrcp.f32 %v721_v47  ;;  %v761_v5 = vadd.f32 1.0, %v760_v36  ;;  %v733_v22 = vand.u32 2147483648, %v721_v47  ;;  %v7045_v36 = vld [vmem:[%s9544_s3 + $0x18] sm:$0xff] }
 0x171   : > { %v855_v43 = vsel %vm852_vm7, %v854_v40, %v850_v62  ;;  %v710_v24 = vadd.f32 1.1283791, %v709_v16  ;;  %v731_v6 = vand.u32 2147483647, %v721_v47  ;;  %vm727_vm9 = vweird.f32 %v721_v47  ;;  %v7048_v62 = vld [vmem:[%s9545_s4 + $0x30] sm:$0xff] }
 0x172   : > { %v856_v1 = vmul.f32 %v855_v43, %v831_v42  ;;  %7291 = vrcp.f32 %v761_v5  ;;  %v750_v59 = vadd.f32 1.1283791, %v749_v20  ;;  %v773_v27 = vand.u32 2147483648, %v761_v5  ;;  %v7038_v42 = vld [vmem:[%s9544_s3] sm:$0xff] }
 0x173   : > { %v734_v57 = vor.u32 1.1754944e-38, %v733_v22  ;;  %v771_v32 = vand.u32 2147483647, %v761_v5  ;;  %v711_v39 = vmul.f32 %v710_v24, %v7881_v54  ;;  %vm732_vm12 = vcmp.eq.f32.partialorder %v731_v6, 8.507059e+37  ;;  %v7046_v43 = vld [vmem:[%s9545_s4 + $0x20] sm:$0xff]  ;;  %v7051_v22 = vld [vmem:[%s9544_s3 + $0x28] sm:$0xff] }
 0x174   : > { %v5915_v3 = vclamps-f32 %v856_v1, 1.0  ;;  %vm767_vm13 = vweird.f32 %v761_v5  ;;  %v774_v34 = vor.u32 1.1754944e-38, %v773_v27  ;;  %v751_v49 = vmul.f32 %v750_v59, %v7884_v58  ;;  %v7043_v58 = vld [vmem:[%s9545_s4 + $0x18] sm:$0xff] }
 0x175   : > { %vm772_vm15 = vcmp.eq.f32.partialorder %v771_v32, 8.507059e+37  ;;  %v684_v54 = vmul.f32 0.5, %v7806_v51  ;;  %v7050_v51 = vld [vmem:[%s9544_s3 + $0x20] sm:$0xff]  ;;  %v7055_v1 = vld [vmem:[%s9545_s4 + $0x58] sm:$0xff] }
 0x176   : > { %v1022_v9 = vadd.f32 1.0, %v5915_v3  ;;  %v7290_v14 = vpop.eup %7289  ;;  %1330 = vmatpush.bf16.msrb.mxu1 %v7055_v1  ;;  %v7052_v3 = vld [vmem:[%s9545_s4 + $0x40] sm:$0xff] }
 0x177   : > { %v723_v17 = vmul.f32 %v7290_v14, %v721_v47  ;;  %vm728_vm8 = vweird.f32 %v7290_v14  ;;  %v7039_v47 = vld [vmem:[%s9544_s3 + $0x8] sm:$0xff] }
 0x178   : > { %v1030_v11 = vmul.f32 %v1022_v9, %v686_v45  ;;  %v7292_v18 = vpop.eup %7291  ;;  %vm729_vm10 = vmor %vm727_vm9, %vm728_vm8 }
 0x179   : > { %v724_v8 = vsub.f32 1.0, %v723_v17  ;;  %v763_v23 = vmul.f32 %v7292_v18, %v761_v5  ;;  %vm768_vm11 = vweird.f32 %v7292_v18 }
 0x17a   : > { %v7947_v15 = vpack.c.bf16 %v1030_v11, %v1029_v10  ;;  %vm769_vm14 = vmor %vm767_vm13, %vm768_vm11  ;;  %1331 = vmatpush.bf16.msrb.mxu1 %v7054_v52 }
 0x17b   : > { %v725_v48 = vmul.f32 %v7290_v14, %v724_v8  ;;  %v764_v56 = vsub.f32 1.0, %v763_v23 }
 0x17c   : > { %1073 = vmatpush.bf16.msra.mxu2 %v7947_v15  ;;  %1123 = vmatpush.bf16.msra.mxu3 %v7947_v15 }
 0x17d   : > { %1272 = vmatpush.bf16.msrb.mxu0 %v7947_v15  ;;  %v726_v29 = vadd.f32 %v7290_v14, %v725_v48  ;;  %v765_v31 = vmul.f32 %v7292_v18, %v764_v56 }
 0x17e   : > { %1332 = vmatpush.bf16.msrb.mxu1 %v7053_v0 }
 0x17f   : > { %v730_v33 = vsel %vm729_vm10, %v7290_v14, %v726_v29  ;;  %v766_v26 = vadd.f32 %v7292_v18, %v765_v31 }
 0x180   : > { %v735_v37 = vsel %vm732_vm12, %v734_v57, %v730_v33 }
 0x181   : > { %v736_v21 = vmul.f32 %v735_v37, %v711_v39  ;;  %v770_v50 = vsel %vm769_vm14, %v7292_v18, %v766_v26 }
 0x182   : > { %v775_v13 = vsel %vm772_vm15, %v774_v34, %v770_v50  ;;  %1333 = vmatpush.bf16.msrb.mxu1 %v7052_v3 }
 0x183   : > { %v5912_v7 = vclamps-f32 %v736_v21, 1.0  ;;  %v776_v25 = vmul.f32 %v775_v13, %v751_v49 }
 0x185   : > { %v1019_v44 = vadd.f32 1.0, %v5912_v7  ;;  %v5913_v46 = vclamps-f32 %v776_v25, 1.0 }
 0x187   : > { %v1020_v60 = vadd.f32 1.0, %v5913_v46  ;;  %v1027_v28 = vmul.f32 %v1019_v44, %v683_v53 }
 0x189   : > { %v1028_v40 = vmul.f32 %v1020_v60, %v684_v54 }
 0x18b   : > { %v1035_v30 = vpack.c.bf16 %v1028_v40, %v1027_v28 }
 0x18d   : > { %1074 = vmatpush.bf16.msra.mxu2 %v1035_v30  ;;  %1124 = vmatpush.bf16.msra.mxu3 %v1035_v30 }
 0x18e   : > { %1273 = vmatpush.bf16.msrb.mxu0 %v1035_v30 }
 0x190   : > { %5928 = vmatmul.msk.bf16.vlgmr.msra.gmra.mxu2 %vm1053_vm0, %v7038_v42  ;;  %5942 = vmatmul.msk.bf16.vlgmr.msra.gmra.mxu3 %vm1053_vm0, %v7044_v35 }
 0x191   : > { %1181 = vmatpush.bf16.msrb.mxu2 %v7049_v61  ;;  %1230 = vmatpush.bf16.msrb.mxu3 %v7043_v58 }
 0x192   : > { %6000 = vmatmul.msk.bf16.vlgmr.msrb.gmra.mxu0 %vm1053_vm0, %v7050_v51 }
 0x195   : > { %1182 = vmatpush.bf16.msrb.mxu2 %v7048_v62 }
 0x199   : > { %1183 = vmatpush.bf16.msrb.mxu2 %v7047_v63 }
 0x19d   : > { %1184 = vmatpush.bf16.msrb.mxu2 %v7046_v43 }
 0x1a0   : > { %5929 = vmatmul.msk.bf16.gmra.mxu2 %vm1053_vm0, %v7039_v47  ;;  %5943 = vmatmul.msk.bf16.gmra.mxu3 %vm1053_vm0, %v7045_v36 }
 0x1a1   : > { %7210 = vmatpush.bf16.msra.mxu2 %v7887_v55  ;;  %v7042_v55 = vld [vmem:[%s9545_s4 + $0x10] sm:$0xff] }
 0x1a2   : > { %1231 = vmatpush.bf16.msrb.mxu3 %v7042_v55 }
 0x1a5   : > { %7211 = vmatpush.bf16.msra.mxu2 %v7909_v38  ;;  %v7041_v38 = vld [vmem:[%s9545_s4 + $0x8] sm:$0xff] }
 0x1a6   : > { %1232 = vmatpush.bf16.msrb.mxu3 %v7041_v38 }
 0x1a9   : > { %7212 = vmatpush.bf16.msra.mxu2 %v7947_v15 }
 0x1aa   : > { %1233 = vmatpush.bf16.msrb.mxu3 %v7040_v2 }
 0x1ad   : > { %7213 = vmatpush.bf16.msra.mxu2 %v1035_v30 }
 0x1ae   : > { %7214 = vmatpush.bf16.msra.mxu3 %v7055_v1 }
 0x1b2   : > { %7215 = vmatpush.bf16.msra.mxu3 %v7054_v52 }
 0x1b6   : > { %7216 = vmatpush.bf16.msra.mxu3 %v7053_v0 }
 0x1ba   : > { %7217 = vmatpush.bf16.msra.mxu3 %v7052_v3 }
 0x20f   : > { %v1275_v4 = vpop.f32.mrf.mxu0 }
 0x213   : > { %v1076_v5 = vpop.f32.mrf.mxu2  ;;  %v1126_v45 = vpop.f32.mrf.mxu3 }
 0x217   : > { %v1277_v9 = vpop.f32.mrf.mxu0 }
 0x218   : > { %v1285_v10 = vpack.c.bf16 %v1277_v9, %v1275_v4 }
 0x21a   : > { %6026 = vmatmul.msk.bf16.vlgmr.msrb.gmra.mxu1 %vm575_vm4, %v1285_v10 }
 0x21b   : > { %v1078_v41 = vpop.f32.mrf.mxu2  ;;  %v1128_v11 = vpop.f32.mrf.mxu3 }
 0x21c   : > { %v1086_v12 = vpack.c.bf16 %v1078_v41, %v1076_v5  ;;  %v1136_v14 = vpack.c.bf16 %v1128_v11, %v1126_v45 }
 0x21e   : > { %5968 = vmatmul.msk.bf16.vlgmr.msrb.gmra.mxu2 %vm575_vm4, %v1136_v14  ;;  %5986 = vmatmul.msk.bf16.vlgmr.msrb.gmra.mxu3 %vm575_vm4, %v1086_v12 }
 0x223   : > { %v1081_v15 = vpop.f32.mrf.mxu2  ;;  %v1131_v16 = vpop.f32.mrf.mxu3 }
 0x22b   : > { %v1083_v17 = vpop.f32.mrf.mxu2  ;;  %v1133_v18 = vpop.f32.mrf.mxu3 }
 0x22c   : > { %v1087_v8 = vpack.c.bf16 %v1083_v17, %v1081_v15  ;;  %v1137_v20 = vpack.c.bf16 %v1133_v18, %v1131_v16 }
 0x22e   : > { %5969 = vmatmul.msk.bf16.gmra.mxu2 %vm575_vm4, %v1137_v20  ;;  %5987 = vmatmul.msk.bf16.gmra.mxu3 %vm575_vm4, %v1087_v8 }
 0x23e   : > { %6001 = vmatmul.msk.bf16.vlgmr.msra.gmra.mxu2 %vm1053_vm0, %v7051_v22 }
 0x297   : > { %v1335_v23 = vpop.f32.mrf.mxu1 }
 0x29f   : > { %v1337_v27 = vpop.f32.mrf.mxu1 }
 0x2a1   : > { %v1186_v24 = vpop.f32.mrf.mxu2  ;;  %v1235_v48 = vpop.f32.mrf.mxu3 }
 0x2a2   : > { %v1236_v6 = vadd.f32 %v1235_v48, %v1186_v24 }
 0x2a4   : > { %v8026_v56 = vadd.f32 %v1335_v23, %v1236_v6 }
 0x2a6   : > { %v8029_v29 = vmul.f32 0.70710677, %v8026_v56 }
 0x2a8   : > { %v1357_v59 = vmul.f32 %v8029_v29, %v8029_v29 }
 0x2a9   : > { %v1188_v57 = vpop.f32.mrf.mxu2  ;;  %v1237_v31 = vpop.f32.mrf.mxu3 }
 0x2aa   : > { %v1358_v32 = vmin.f32 %v1357_v59, 16.0  ;;  %v1238_v39 = vadd.f32 %v1237_v31, %v1188_v57 }
 0x2ac   : > { %v1359_v33 = vmul.f32 2.1237322e-06, %v1358_v32  ;;  %v8033_v37 = vadd.f32 %v1337_v27, %v1238_v39  ;;  %v1370_v26 = vmul.f32 3.8918573e-05, %v1358_v32 }
 0x2ae   : > { %v1360_v21 = vadd.f32 0.00028619796, %v1359_v33  ;;  %v8036_v34 = vmul.f32 0.70710677, %v8033_v37  ;;  %v1371_v49 = vadd.f32 0.001143296, %v1370_v26 }
 0x2b0   : > { %v1361_v50 = vmul.f32 %v1360_v21, %v1358_v32  ;;  %v1397_v7 = vmul.f32 %v8036_v34, %v8036_v34  ;;  %v1372_v25 = vmul.f32 %v1371_v49, %v1358_v32 }
 0x2b1   : > { %v8040_v13 = vpop.f32.mrf.mxu2 }
 0x2b2   : > { %v1398_v44 = vmin.f32 %v1397_v7, 16.0  ;;  %v1373_v53 = vadd.f32 0.014752088, %v1372_v25  ;;  %v1362_v46 = vadd.f32 0.0036580483, %v1361_v50 }
 0x2b4   : > { %v1399_v54 = vmul.f32 2.1237322e-06, %v1398_v44  ;;  %v1410_v60 = vmul.f32 3.8918573e-05, %v1398_v44  ;;  %v1374_v28 = vmul.f32 %v1373_v53, %v1358_v32  ;;  %v1363_v58 = vmul.f32 %v1362_v46, %v1358_v32 }
 0x2b6   : > { %v1400_v40 = vadd.f32 0.00028619796, %v1399_v54  ;;  %v1411_v61 = vadd.f32 0.001143296, %v1410_v60  ;;  %v1375_v30 = vadd.f32 0.112945676, %v1374_v28 }
 0x2b7   : > { %v1364_v36 = vadd.f32 0.05243302, %v1363_v58 }
 0x2b8   : > { %v1401_v42 = vmul.f32 %v1400_v40, %v1398_v44  ;;  %v1412_v35 = vmul.f32 %v1411_v61, %v1398_v44  ;;  %v1376_v62 = vmul.f32 %v1375_v30, %v1358_v32 }
 0x2b9   : > { %v8042_v51 = vpop.f32.mrf.mxu2  ;;  %v1365_v0 = vmul.f32 %v1364_v36, %v1358_v32 }
 0x2ba   : > { %v1413_v63 = vadd.f32 0.014752088, %v1412_v35  ;;  %v1402_v43 = vadd.f32 0.0036580483, %v1401_v42  ;;  %v1377_v47 = vadd.f32 0.4994258, %v1376_v62 }
 0x2bb   : > { %v1366_v9 = vadd.f32 0.18741608, %v1365_v0  ;;  %v1350_v42 = vmul.f32 0.5, %v8033_v37 }
 0x2bc   : > { %v1414_v55 = vmul.f32 %v1413_v63, %v1398_v44  ;;  %v1378_v1 = vmul.f32 %v1377_v47, %v1358_v32  ;;  %v1403_v2 = vmul.f32 %v1402_v43, %v1398_v44  ;;  %v7505_v63 = vmov 64.0   ;;  %v1240_v47 = vpop.f32.mrf.mxu3 }
 0x2bd   : > { %v1367_v14 = vmul.f32 %v1366_v9, %v1358_v32 }
 0x2be   : > { %v1415_v38 = vadd.f32 0.112945676, %v1414_v55  ;;  %v1379_v52 = vadd.f32 1.0, %v1378_v1  ;;  %v1404_v45 = vadd.f32 0.05243302, %v1403_v2 }
 0x2bf   : > { %v1368_v22 = vadd.f32 1.1283791, %v1367_v14 }
 0x2c0   : > { %v1416_v3 = vmul.f32 %v1415_v38, %v1398_v44  ;;  %7293 = vrcp.f32 %v1379_v52  ;;  %v1405_v12 = vmul.f32 %v1404_v45, %v1398_v44  ;;  %v1391_v20 = vand.u32 2147483648, %v1379_v52 }
 0x2c1   : > { %v1280_v4 = vpop.f32.mrf.mxu2  ;;  %v1389_v24 = vand.u32 2147483647, %v1379_v52  ;;  %vm1385_vm2 = vweird.f32 %v1379_v52  ;;  %v1369_v31 = vmul.f32 %v1368_v22, %v8029_v29 }
 0x2c2   : > { %v1417_v5 = vadd.f32 0.4994258, %v1416_v3  ;;  %v1406_v8 = vadd.f32 0.18741608, %v1405_v12  ;;  %v1392_v27 = vor.u32 1.1754944e-38, %v1391_v20 }
 0x2c3   : > { %vm1390_vm6 = vcmp.eq.f32.partialorder %v1389_v24, 8.507059e+37 }
 0x2c4   : > { %v1418_v10 = vmul.f32 %v1417_v5, %v1398_v44  ;;  %v1407_v59 = vmul.f32 %v1406_v8, %v1398_v44  ;;  %v1349_v44 = vmul.f32 0.5, %v8026_v56  ;;  %v1242_v1 = vpop.f32.mrf.mxu3 }
 0x2c6   : > { %v1419_v41 = vadd.f32 1.0, %v1418_v10  ;;  %v7294_v11 = vpop.eup %7293  ;;  %v1408_v49 = vadd.f32 1.1283791, %v1407_v59 }
 0x2c7   : > { %v1381_v15 = vmul.f32 %v7294_v11, %v1379_v52  ;;  %vm1386_vm1 = vweird.f32 %v7294_v11  ;;  %v1241_v52 = vadd.f32 %v1240_v47, %v8040_v13  ;;  %v1243_v13 = vadd.f32 %v1242_v1, %v8042_v51 }
 0x2c8   : > { %7295 = vrcp.f32 %v1419_v41  ;;  %vm1387_vm3 = vmor %vm1385_vm2, %vm1386_vm1  ;;  %v1431_v21 = vand.u32 2147483648, %v1419_v41  ;;  %v1429_v7 = vand.u32 2147483647, %v1419_v41  ;;  %vm1425_vm8 = vweird.f32 %v1419_v41 }
 0x2c9   : > { %v1282_v16 = vpop.f32.mrf.mxu2  ;;  %v1382_v18 = vsub.f32 1.0, %v1381_v15  ;;  %v1409_v29 = vmul.f32 %v1408_v49, %v8036_v34  ;;  %7297 = vrcp.f32 %v7505_v63 }
 0x2ca   : > { %v1286_v17 = vpack.c.bf16 %v1282_v16, %v1280_v4  ;;  %v1432_v54 = vor.u32 1.1754944e-38, %v1431_v21  ;;  %vm1430_vm10 = vcmp.eq.f32.partialorder %v1429_v7, 8.507059e+37 }
 0x2cb   : > { %v1383_v23 = vmul.f32 %v7294_v11, %v1382_v18 }
 0x2cc   : > { %6027 = vmatmul.msk.bf16.vlgmr.msra.gmra.mxu3 %vm575_vm4, %v1286_v17 }
 0x2cd   : > { %v1384_v6 = vadd.f32 %v7294_v11, %v1383_v23 }
 0x2ce   : > { %v7296_v48 = vpop.eup %7295 }
 0x2cf   : > { %v1421_v57 = vmul.f32 %v7296_v48, %v1419_v41  ;;  %v1388_v32 = vsel %vm1387_vm3, %v7294_v11, %v1384_v6  ;;  %vm1426_vm7 = vweird.f32 %v7296_v48  ;;  %v7298_v43 = vpop.eup %7297 }
 0x2d0   : > { %v1393_v39 = vsel %vm1390_vm6, %v1392_v27, %v1388_v32  ;;  %vm1427_vm9 = vmor %vm1425_vm8, %vm1426_vm7  ;;  %v1540_v34 = vmul.f32 64.0, %v7298_v43  ;;  %vm1544_vm11 = vweird.f32 %v7298_v43 }
 0x2d1   : > { %v1422_v33 = vsub.f32 1.0, %v1421_v57  ;;  %v1394_v26 = vmul.f32 %v1393_v39, %v1369_v31 }
 0x2d2   : > { %v1541_v36 = vsub.f32 1.0, %v1540_v34 }
 0x2d3   : > { %v1423_v50 = vmul.f32 %v7296_v48, %v1422_v33  ;;  %v6028_v25 = vclamps-f32 %v1394_v26, 1.0 }
 0x2d4   : > { %v1542_v55 = vmul.f32 %v7298_v43, %v1541_v36 }
 0x2d5   : > { %v1424_v53 = vadd.f32 %v7296_v48, %v1423_v50  ;;  %v1517_v46 = vadd.f32 1.0, %v6028_v25 }
 0x2d6   : > { %v1543_v38 = vadd.f32 %v7298_v43, %v1542_v55 }
 0x2d7   : > { %v1428_v60 = vsel %vm1427_vm9, %v7296_v48, %v1424_v53  ;;  %v1521_v28 = vmul.f32 %v1517_v46, %v1349_v44 }
 0x2d8   : > { %v1433_v40 = vsel %vm1430_vm10, %v1432_v54, %v1428_v60  ;;  %v8051_v2 = vsel %vm1544_vm11, %v7298_v43, %v1543_v38 }
 0x2d9   : > { %v1434_v61 = vmul.f32 %v1433_v40, %v1409_v29  ;;  %v1527_v30 = vsel %vm575_vm4, %v1521_v28, 0.0 }
 0x2da   : > { %1528 = vadd.xlane.f32.xlu0 %v1527_v30 }
 0x2db   : > { %v6029_v58 = vclamps-f32 %v1434_v61, 1.0 }
 0x2dd   : > { %v1518_v35 = vadd.f32 1.0, %v6029_v58 }
 0x2df   : > { %v1522_v62 = vmul.f32 %v1518_v35, %v1350_v42 }
 0x2e1   : > { %v1530_v56 = vsel %vm575_vm4, %v1522_v62, 0.0 }
 0x2e2   : > { %1531 = vadd.xlane.f32.xlu0 %v1530_v56 }
 0x34d   : > { %v1529_v37 = vpop.xlane.xlu0 %1528 }
 0x34e   : > { %v1546_v0 = vmul.f32 %v8051_v2, %v1529_v37 }
 0x34f   : > { %v1340_v3 = vpop.f32.mrf.mxu3 }
 0x350   : > { %v8055_v4 = vadd.f32 %v1340_v3, %v1241_v52  ;;  %v8057_v5 = vsub.f32 %v1521_v28, %v1546_v0 }
 0x352   : > { %v8060_v45 = vmul.f32 0.70710677, %v8055_v4  ;;  %v1554_v9 = vmul.f32 %v8057_v5, %v8057_v5 }
 0x354   : > { %v1437_v10 = vmul.f32 %v8060_v45, %v8060_v45  ;;  %v1558_v41 = vsel %vm575_vm4, %v1554_v9, 0.0 }
 0x355   : > { %1559 = vadd.xlane.f32.xlu2 %v1558_v41  ;;  %v1532_v12 = vpop.xlane.xlu0 %1531 }
 0x356   : > { %v1438_v11 = vmin.f32 %v1437_v10, 16.0  ;;  %v1547_v14 = vmul.f32 %v8051_v2, %v1532_v12 }
 0x357   : > { %v1342_v15 = vpop.f32.mrf.mxu3 }
 0x358   : > { %v1439_v16 = vmul.f32 2.1237322e-06, %v1438_v11  ;;  %v8069_v17 = vadd.f32 %v1342_v15, %v1243_v13  ;;  %v1450_v18 = vmul.f32 3.8918573e-05, %v1438_v11  ;;  %v8071_v8 = vsub.f32 %v1522_v62, %v1547_v14 }
 0x35a   : > { %v1440_v20 = vadd.f32 0.00028619796, %v1439_v16  ;;  %v8074_v22 = vmul.f32 0.70710677, %v8069_v17  ;;  %v1555_v23 = vmul.f32 %v8071_v8, %v8071_v8  ;;  %v1451_v51 = vadd.f32 0.001143296, %v1450_v18 }
 0x35c   : > { %v1441_v24 = vmul.f32 %v1440_v20, %v1438_v11  ;;  %v1477_v48 = vmul.f32 %v8074_v22, %v8074_v22  ;;  %v1561_v6 = vsel %vm575_vm4, %v1555_v23, 0.0  ;;  %v1452_v59 = vmul.f32 %v1451_v51, %v1438_v11 }
 0x35d   : > { %1562 = vadd.xlane.f32.xlu2 %v1561_v6 }
 0x35e   : > { %v1478_v27 = vmin.f32 %v1477_v48, 16.0  ;;  %v1453_v57 = vadd.f32 0.014752088, %v1452_v59  ;;  %v1442_v31 = vadd.f32 0.0036580483, %v1441_v24  ;;  %v1351_v59 = vmul.f32 0.5, %v8055_v4 }
 0x360   : > { %v1479_v32 = vmul.f32 2.1237322e-06, %v1478_v27  ;;  %v1490_v39 = vmul.f32 3.8918573e-05, %v1478_v27  ;;  %v1454_v33 = vmul.f32 %v1453_v57, %v1438_v11  ;;  %v1443_v50 = vmul.f32 %v1442_v31, %v1438_v11 }
 0x362   : > { %v1480_v26 = vadd.f32 0.00028619796, %v1479_v32  ;;  %v1491_v21 = vadd.f32 0.001143296, %v1490_v39  ;;  %v1455_v49 = vadd.f32 0.112945676, %v1454_v33 }
 0x363   : > { %v1444_v29 = vadd.f32 0.05243302, %v1443_v50 }
 0x364   : > { %v1481_v7 = vmul.f32 %v1480_v26, %v1478_v27  ;;  %v1492_v25 = vmul.f32 %v1491_v21, %v1478_v27  ;;  %v1456_v53 = vmul.f32 %v1455_v49, %v1438_v11  ;;  %v1352_v49 = vmul.f32 0.5, %v8069_v17 }
 0x365   : > { %v1445_v58 = vmul.f32 %v1444_v29, %v1438_v11  ;;  %v7057_v29 = vld [vmem:[%s9546_s5 + $0x8] sm:$0xff] }
 0x366   : > { %v1493_v44 = vadd.f32 0.014752088, %v1492_v25  ;;  %v1482_v46 = vadd.f32 0.0036580483, %v1481_v7  ;;  %v1457_v54 = vadd.f32 0.4994258, %v1456_v53 }
 0x367   : > { %v1446_v56 = vadd.f32 0.18741608, %v1445_v58 }
 0x368   : > { %v1494_v60 = vmul.f32 %v1493_v44, %v1478_v27  ;;  %v1458_v28 = vmul.f32 %v1457_v54, %v1438_v11  ;;  %v1483_v61 = vmul.f32 %v1482_v46, %v1478_v27  ;;  %v7059_v44 = vld [vmem:[%s9546_s5 + $0x18] sm:$0xff]  ;;  %v7058_v46 = vld [vmem:[%s9546_s5 + $0x10] sm:$0xff] }
 0x369   : > { %v1447_v36 = vmul.f32 %v1446_v56, %v1438_v11  ;;  %1678 = vmatpush.bf16.msrb.mxu2 %v7059_v44 }
 0x36a   : > { %v1495_v40 = vadd.f32 0.112945676, %v1494_v60  ;;  %v1459_v30 = vadd.f32 1.0, %v1458_v28  ;;  %v1484_v62 = vadd.f32 0.05243302, %v1483_v61  ;;  %v7056_v61 = vld [vmem:[%s9546_s5] sm:$0xff] }
 0x36b   : > { %v1448_v37 = vadd.f32 1.1283791, %v1447_v36  ;;  %v7231_v36 = vld [vmem:[%s9542_s1 + $0x2] ss:$0 sm:$0xff] }
 0x36c   : > { %v1496_v42 = vmul.f32 %v1495_v40, %v1478_v27  ;;  %7299 = vrcp.f32 %v1459_v30  ;;  %v1485_v47 = vmul.f32 %v1484_v62, %v1478_v27  ;;  %v1471_v52 = vand.u32 2147483648, %v1459_v30 }
 0x36d   : > { %v1469_v3 = vand.u32 2147483647, %v1459_v30  ;;  %vm1465_vm13 = vweird.f32 %v1459_v30  ;;  %v1449_v14 = vmul.f32 %v1448_v37, %v8060_v45  ;;  %1679 = vmatpush.bf16.msrb.mxu2 %v7058_v46 }
 0x36e   : > { %v1497_v35 = vadd.f32 0.4994258, %v1496_v42  ;;  %v1486_v38 = vadd.f32 0.18741608, %v1485_v47  ;;  %v1472_v13 = vor.u32 1.1754944e-38, %v1471_v52 }
 0x36f   : > { %vm1470_vm15 = vcmp.eq.f32.partialorder %v1469_v3, 8.507059e+37  ;;  %v7232_v52 = vld [vmem:[%s9542_s1 + $0x3] ss:$0 sm:$0xff] }
 0x370   : > { %v1498_v63 = vmul.f32 %v1497_v35, %v1478_v27  ;;  %v1487_v41 = vmul.f32 %v1486_v38, %v1478_v27 }
 0x371   : > { %1680 = vmatpush.bf16.msrb.mxu2 %v7057_v29 }
 0x372   : > { %v1499_v43 = vadd.f32 1.0, %v1498_v63  ;;  %v7300_v34 = vpop.eup %7299  ;;  %v1488_v23 = vadd.f32 1.1283791, %v1487_v41 }
 0x373   : > { %v1461_v55 = vmul.f32 %v7300_v34, %v1459_v30  ;;  %vm1466_vm12 = vweird.f32 %v7300_v34 }
 0x374   : > { %7301 = vrcp.f32 %v1499_v43  ;;  %vm1467_vm14 = vmor %vm1465_vm13, %vm1466_vm12  ;;  %v1511_v20 = vand.u32 2147483648, %v1499_v43  ;;  %v1509_v24 = vand.u32 2147483647, %v1499_v43  ;;  %vm1505_vm1 = vweird.f32 %v1499_v43 }
 0x375   : > { %v1462_v1 = vsub.f32 1.0, %v1461_v55  ;;  %v1489_v45 = vmul.f32 %v1488_v23, %v8074_v22  ;;  %1681 = vmatpush.bf16.msrb.mxu2 %v7056_v61  ;;  %v7233_v61 = vld [vmem:[%s9542_s1 + $0x4] ss:$0 sm:$0xff] }
 0x376   : > { %v1512_v57 = vor.u32 1.1754944e-38, %v1511_v20  ;;  %vm1510_vm3 = vcmp.eq.f32.partialorder %v1509_v24, 8.507059e+37 }
 0x377   : > { %v1463_v0 = vmul.f32 %v7300_v34, %v1462_v1 }
 0x379   : > { %v1464_v10 = vadd.f32 %v7300_v34, %v1463_v0 }
 0x37a   : > { %v7302_v9 = vpop.eup %7301 }
 0x37b   : > { %v1501_v12 = vmul.f32 %v7302_v9, %v1499_v43  ;;  %v1468_v15 = vsel %vm1467_vm14, %v7300_v34, %v1464_v10  ;;  %vm1506_vm0 = vweird.f32 %v7302_v9 }
 0x37c   : > { %v1473_v11 = vsel %vm1470_vm15, %v1472_v13, %v1468_v15  ;;  %vm1507_vm2 = vmor %vm1505_vm1, %vm1506_vm0 }
 0x37d   : > { %v1502_v16 = vsub.f32 1.0, %v1501_v12  ;;  %v1474_v18 = vmul.f32 %v1473_v11, %v1449_v14 }
 0x37f   : > { %v1503_v51 = vmul.f32 %v7302_v9, %v1502_v16  ;;  %v6030_v48 = vclamps-f32 %v1474_v18, 1.0 }
 0x381   : > { %v1504_v6 = vadd.f32 %v7302_v9, %v1503_v51  ;;  %v1519_v27 = vadd.f32 1.0, %v6030_v48 }
 0x383   : > { %v1508_v31 = vsel %vm1507_vm2, %v7302_v9, %v1504_v6  ;;  %v1523_v32 = vmul.f32 %v1519_v27, %v1351_v59  ;;  %vm1709_vm2 = vcmask 252928  }
 0x384   : > { %v1513_v39 = vsel %vm1510_vm3, %v1512_v57, %v1508_v31 }
 0x385   : > { %v1514_v33 = vmul.f32 %v1513_v39, %v1489_v45  ;;  %v1533_v26 = vsel %vm575_vm4, %v1523_v32, 0.0 }
 0x386   : > { %1534 = vadd.xlane.f32.xlu1 %v1533_v26 }
 0x387   : > { %v6031_v21 = vclamps-f32 %v1514_v33, 1.0 }
 0x389   : > { %v1520_v50 = vadd.f32 1.0, %v6031_v21 }
 0x38b   : > { %v1524_v7 = vmul.f32 %v1520_v50, %v1352_v49 }
 0x38d   : > { %v1536_v4 = vsel %vm589_vm5, %v1524_v7, 0.0 }
 0x38e   : > { %1537 = vadd.xlane.f32.xlu1 %v1536_v4 }
 0x3c8   : > { %v1560_v25 = vpop.xlane.xlu2 %1559 }
 0x3c9   : > { %v1570_v53 = vmul.f32 %v1560_v25, %v8051_v2 }
 0x3cb   : > { %v1574_v22 = vadd.f32 1e-05, %v1570_v53 }
 0x3cd   : > { %7303 = vrsqrt.f32 %v1574_v22  ;;  %vm1584_vm7 = vweird.f32 %v1574_v22 }
 0x3d0   : > { %v1563_v17 = vpop.xlane.xlu2 %1562 }
 0x3d1   : > { %v1571_v54 = vmul.f32 %v1563_v17, %v8051_v2 }
 0x3d3   : > { %v7304_v60 = vpop.eup %7303  ;;  %v1575_v28 = vadd.f32 1e-05, %v1571_v54 }
 0x3d4   : > { %v1579_v40 = vmul.f32 %v7304_v60, %v1574_v22  ;;  %vm1585_vm6 = vweird.f32 %v7304_v60 }
 0x3d5   : > { %7305 = vrsqrt.f32 %v1575_v28  ;;  %vm1586_vm8 = vmor %vm1584_vm7, %vm1585_vm6  ;;  %vm1594_vm10 = vweird.f32 %v1575_v28 }
 0x3d6   : > { %v1580_v30 = vmul.f32 %v7304_v60, %v1579_v40 }
 0x3d8   : > { %v1581_v58 = vmul.f32 0.5, %v1580_v30 }
 0x3da   : > { %v1582_v42 = vsub.f32 1.5, %v1581_v58 }
 0x3db   : > { %v7306_v35 = vpop.eup %7305 }
 0x3dc   : > { %v1583_v62 = vmul.f32 %v7304_v60, %v1582_v42  ;;  %v1589_v56 = vmul.f32 %v7306_v35, %v1575_v28  ;;  %vm1595_vm9 = vweird.f32 %v7306_v35 }
 0x3dd   : > { %vm1596_vm11 = vmor %vm1594_vm10, %vm1595_vm9 }
 0x3de   : > { %v1590_v63 = vmul.f32 %v7306_v35, %v1589_v56  ;;  %v1587_v43 = vsel %vm1586_vm8, %v7304_v60, %v1583_v62 }
 0x3df   : > { %v1618_v55 = vmul.f32 %v1587_v43, %v8057_v5  ;;  %v7075_v43 = vld [vmem:[%s9548_s7 + $0x58] sm:$0xff] }
 0x3e0   : > { %v1591_v34 = vmul.f32 0.5, %v1590_v63 }
 0x3e1   : > { %v1623_v37 = vmul.f32 %v7231_v36, %v1618_v55  ;;  %v7074_v55 = vld [vmem:[%s9548_s7 + $0x50] sm:$0xff] }
 0x3e2   : > { %v1592_v47 = vsub.f32 1.5, %v1591_v34 }
 0x3e3   : > { %v1628_v9 = vadd.f32 %v7232_v52, %v1623_v37  ;;  %v7067_v37 = vld [vmem:[%s9547_s6 + $0x18] sm:$0xff] }
 0x3e4   : > { %v1593_v1 = vmul.f32 %v7306_v35, %v1592_v47  ;;  %v7060_v47 = vld [vmem:[%s9547_s6] sm:$0xff] }
 0x3e6   : > { %v1597_v38 = vsel %vm1596_vm11, %v7306_v35, %v1593_v1  ;;  %v7073_v1 = vld [vmem:[%s9548_s7 + $0x48] sm:$0xff] }
 0x3e7   : > { %v1619_v0 = vmul.f32 %v1597_v38, %v8071_v8  ;;  %v7072_v38 = vld [vmem:[%s9548_s7 + $0x40] sm:$0xff] }
 0x3e9   : > { %v1624_v3 = vmul.f32 %v7231_v36, %v1619_v0  ;;  %v7071_v0 = vld [vmem:[%s9548_s7 + $0x38] sm:$0xff] }
 0x3ea   : > { %1833 = vmatpush.bf16.msra.mxu1 %v7071_v0 }
 0x3eb   : > { %v1629_v10 = vadd.f32 %v7232_v52, %v1624_v3  ;;  %v7076_v3 = vld [vmem:[%s9547_s6 + $0x30] sm:$0xff] }
 0x3ed   : > { %v1632_v41 = vpack.c.bf16 %v1629_v10, %v1628_v9  ;;  %v7077_v9 = vld [vmem:[%s9547_s6 + $0x38] sm:$0xff]  ;;  %v7070_v10 = vld [vmem:[%s9548_s7 + $0x30] sm:$0xff] }
 0x3ee   : > { %1834 = vmatpush.bf16.msra.mxu1 %v7070_v10 }
 0x3ef   : > { %6048 = vmatmul.msk.bf16.vlgmr.msrb.gmra.mxu2 %vm575_vm4, %v1632_v41  ;;  %v7065_v41 = vld [vmem:[%s9548_s7 + $0x18] sm:$0xff] }
 0x3f0   : > { %1882 = vmatpush.bf16.msra.mxu2 %v7065_v41 }
 0x3f9   : > { %v1535_v13 = vpop.xlane.xlu1 %1534 }
 0x3fa   : > { %v1548_v5 = vmul.f32 %v8051_v2, %v1535_v13  ;;  %v7069_v13 = vld [vmem:[%s9548_s7 + $0x28] sm:$0xff] }
 0x3fb   : > { %1835 = vmatpush.bf16.msra.mxu1 %v7069_v13 }
 0x3fc   : > { %v1552_v12 = vsub.f32 %v1523_v32, %v1548_v5  ;;  %v7064_v5 = vld [vmem:[%s9548_s7 + $0x10] sm:$0xff] }
 0x3fd   : > { %1883 = vmatpush.bf16.msra.mxu2 %v7064_v5 }
 0x3fe   : > { %v1556_v14 = vmul.f32 %v1552_v12, %v1552_v12 }
 0x400   : > { %v1564_v15 = vsel %vm575_vm4, %v1556_v14, 0.0  ;;  %v7063_v14 = vld [vmem:[%s9548_s7 + $0x8] sm:$0xff] }
 0x401   : > { %1565 = vadd.xlane.f32.xlu0 %v1564_v15  ;;  %v1538_v11 = vpop.xlane.xlu1 %1537  ;;  %1884 = vmatpush.bf16.msra.mxu2 %v7063_v14  ;;  %v7062_v15 = vld [vmem:[%s9548_s7] sm:$0xff] }
 0x402   : > { %v1549_v16 = vmul.f32 %v8051_v2, %v1538_v11  ;;  %v7081_v11 = vld [vmem:[%s9548_s7 + $0x78] sm:$0xff] }
 0x404   : > { %v1553_v18 = vsub.f32 %v1524_v7, %v1549_v16 }
 0x405   : > { %1885 = vmatpush.bf16.msra.mxu2 %v7062_v15 }
 0x406   : > { %v1557_v20 = vmul.f32 %v1553_v18, %v1553_v18 }
 0x408   : > { %v1567_v8 = vsel %vm589_vm5, %v1557_v20, 0.0  ;;  %v7079_v20 = vld [vmem:[%s9548_s7 + $0x68] sm:$0xff] }
 0x409   : > { %1568 = vadd.xlane.f32.xlu1 %v1567_v8 }
 0x472   : > { %v1683_v60 = vpop.f32.mrf.mxu2 }
 0x473   : > { %v8129_v63 = vadd.f32 %v7233_v61, %v1683_v60 }
 0x474   : > { %v1566_v23 = vpop.xlane.xlu0 %1565 }
 0x475   : > { %v1572_v51 = vmul.f32 %v1566_v23, %v8051_v2 }
 0x477   : > { %v1576_v24 = vadd.f32 1e-05, %v1572_v51 }
 0x479   : > { %7307 = vrsqrt.f32 %v1576_v24  ;;  %vm1604_vm13 = vweird.f32 %v1576_v24 }
 0x47a   : > { %v1685_v28 = vpop.f32.mrf.mxu2 }
 0x47b   : > { %v8126_v62 = vadd.f32 %v7233_v61, %v1685_v28 }
 0x47c   : > { %v1569_v48 = vpop.xlane.xlu1 %1568 }
 0x47d   : > { %v1573_v6 = vmul.f32 %v1569_v48, %v8051_v2  ;;  %v1693_v34 = vpack.c.bf16 %v8126_v62, %v8129_v63 }
 0x47f   : > { %v7308_v59 = vpop.eup %7307  ;;  %v1577_v27 = vadd.f32 1e-05, %v1573_v6 }
 0x480   : > { %v1599_v57 = vmul.f32 %v7308_v59, %v1576_v24  ;;  %vm1605_vm12 = vweird.f32 %v7308_v59  ;;  %v7078_v24 = vld [vmem:[%s9548_s7 + $0x60] sm:$0xff] }
 0x481   : > { %7309 = vrsqrt.f32 %v1577_v27  ;;  %vm1606_vm14 = vmor %vm1604_vm13, %vm1605_vm12  ;;  %vm1614_vm0 = vweird.f32 %v1577_v27 }
 0x482   : > { %v1600_v45 = vmul.f32 %v7308_v59, %v1599_v57 }
 0x484   : > { %v1601_v31 = vmul.f32 0.5, %v1600_v45 }
 0x486   : > { %v1602_v32 = vsub.f32 1.5, %v1601_v31 }
 0x487   : > { %v7310_v39 = vpop.eup %7309 }
 0x488   : > { %v1603_v33 = vmul.f32 %v7308_v59, %v1602_v32  ;;  %v1609_v26 = vmul.f32 %v7310_v39, %v1577_v27  ;;  %vm1615_vm15 = vweird.f32 %v7310_v39 }
 0x489   : > { %vm1616_vm1 = vmor %vm1614_vm0, %vm1615_vm15 }
 0x48a   : > { %v1610_v21 = vmul.f32 %v7310_v39, %v1609_v26  ;;  %v1607_v49 = vsel %vm1606_vm14, %v7308_v59, %v1603_v33 }
 0x48b   : > { %v1620_v4 = vmul.f32 %v1607_v49, %v1552_v12  ;;  %v7068_v12 = vld [vmem:[%s9548_s7 + $0x20] sm:$0xff] }
 0x48c   : > { %v1611_v50 = vmul.f32 0.5, %v1610_v21  ;;  %1836 = vmatpush.bf16.msra.mxu1 %v7068_v12 }
 0x48d   : > { %v1625_v44 = vmul.f32 %v7231_v36, %v1620_v4 }
 0x48e   : > { %v1612_v7 = vsub.f32 1.5, %v1611_v50 }
 0x48f   : > { %v1630_v17 = vadd.f32 %v7232_v52, %v1625_v44 }
 0x490   : > { %v1613_v25 = vmul.f32 %v7310_v39, %v1612_v7  ;;  %2043 = vmatpush.bf16.msrb.mxu1 %v7081_v11 }
 0x492   : > { %v1617_v53 = vsel %vm1616_vm1, %v7310_v39, %v1613_v25 }
 0x493   : > { %v1621_v22 = vmul.f32 %v1617_v53, %v1553_v18  ;;  %v7080_v18 = vld [vmem:[%s9548_s7 + $0x70] sm:$0xff] }
 0x494   : > { %2044 = vmatpush.bf16.msrb.mxu1 %v7080_v18 }
 0x495   : > { %v1626_v46 = vmul.f32 %v7231_v36, %v1621_v22  ;;  %v7066_v36 = vld [vmem:[%s9547_s6 + $0x10] sm:$0xff] }
 0x497   : > { %v1631_v54 = vadd.f32 %v7232_v52, %v1626_v46  ;;  %v7061_v52 = vld [vmem:[%s9547_s6 + $0x8] sm:$0xff] }
 0x498   : > { %2045 = vmatpush.bf16.msrb.mxu1 %v7079_v20 }
 0x499   : > { %v1633_v29 = vpack.c.bf16 %v1631_v54, %v1630_v17 }
 0x49b   : > { %6049 = vmatmul.msk.bf16.gmra.mxu2 %vm575_vm4, %v1633_v29  ;;  %v7234_v29 = vld [vmem:[%s9542_s1 + $0x5] ss:$0 sm:$0xff] }
 0x49c   : > { %2046 = vmatpush.bf16.msrb.mxu1 %v7078_v24 }
 0x51e   : > { %v1688_v40 = vpop.f32.mrf.mxu2 }
 0x51f   : > { %v8120_v58 = vadd.f32 %v7233_v61, %v1688_v40 }
 0x526   : > { %v1690_v30 = vpop.f32.mrf.mxu2 }
 0x527   : > { %v8122_v42 = vadd.f32 %v7233_v61, %v1690_v30 }
 0x529   : > { %v1694_v35 = vpack.c.bf16 %v8122_v42, %v8120_v58 }
 0x52b   : > { %v1717_v56 = vand.u32 %v1694_v35, %v7766_v19 }
 0x52d   : > { %1725 = vmatpush.bf16.msrb.mxu3 %v1717_v56  ;;  %1775 = vmatpush.bf16.msra.mxu0 %v1717_v56 }
 0x531   : > { %1726 = vmatpush.bf16.msrb.mxu3 %v1693_v34  ;;  %1776 = vmatpush.bf16.msra.mxu0 %v1693_v34 }
 0x534   : > { %6058 = vmatmul.msk.bf16.vlgmr.msrb.gmra.mxu3 %vm1709_vm2, %v7060_v47  ;;  %6072 = vmatmul.msk.bf16.vlgmr.msra.gmra.mxu0 %vm1709_vm2, %v7066_v36 }
 0x535   : > { %1985 = vmatpush.bf16.msrb.mxu0 %v1717_v56  ;;  %1939 = vmatpush.bf16.msra.mxu3 %v7075_v43 }
 0x539   : > { %1986 = vmatpush.bf16.msrb.mxu0 %v1693_v34  ;;  %1940 = vmatpush.bf16.msra.mxu3 %v7074_v55 }
 0x53d   : > { %1941 = vmatpush.bf16.msra.mxu3 %v7073_v1 }
 0x541   : > { %1942 = vmatpush.bf16.msra.mxu3 %v7072_v38 }
 0x544   : > { %6059 = vmatmul.msk.bf16.gmra.mxu3 %vm1709_vm2, %v7061_v52  ;;  %6073 = vmatmul.msk.bf16.gmra.mxu0 %vm1709_vm2, %v7067_v37 }
 0x554   : > { %6142 = vmatmul.msk.bf16.vlgmr.msra.gmra.mxu3 %vm575_vm4, %v1693_v34  ;;  %6156 = vmatmul.msk.bf16.vlgmr.msrb.gmra.mxu0 %vm1709_vm2, %v7076_v3 }
 0x564   : > { %6143 = vmatmul.msk.bf16.gmra.mxu3 %vm575_vm4, %v1694_v35  ;;  %6157 = vmatmul.msk.bf16.gmra.mxu0 %vm1709_vm2, %v7077_v9 }
 0x5b1   : > { %v1778_v16 = vpop.f32.mrf.mxu0 }
 0x5b7   : > { %v1728_v8 = vpop.f32.mrf.mxu3 }
 0x5b9   : > { %v1780_v23 = vpop.f32.mrf.mxu0 }
 0x5ba   : > { %v1788_v51 = vpack.c.bf16 %v1780_v23, %v1778_v16 }
 0x5bc   : > { %6098 = vmatmul.msk.bf16.vlgmr.msra.gmra.mxu1 %vm575_vm4, %v1788_v51 }
 0x5bf   : > { %v1730_v48 = vpop.f32.mrf.mxu3 }
 0x5c0   : > { %v1738_v6 = vpack.c.bf16 %v1730_v48, %v1728_v8 }
 0x5c1   : > { %v1783_v59 = vpop.f32.mrf.mxu0 }
 0x5c2   : > { %6116 = vmatmul.msk.bf16.vlgmr.msra.gmra.mxu2 %vm575_vm4, %v1738_v6 }
 0x5c7   : > { %v1733_v27 = vpop.f32.mrf.mxu3 }
 0x5c9   : > { %v1785_v57 = vpop.f32.mrf.mxu0 }
 0x5ca   : > { %v1789_v45 = vpack.c.bf16 %v1785_v57, %v1783_v59 }
 0x5cc   : > { %6099 = vmatmul.msk.bf16.gmra.mxu1 %vm575_vm4, %v1789_v45 }
 0x5cf   : > { %v1735_v31 = vpop.f32.mrf.mxu3 }
 0x5d0   : > { %v1739_v32 = vpack.c.bf16 %v1735_v31, %v1733_v27 }
 0x5d1   : > { %v1988_v39 = vpop.f32.mrf.mxu0 }
 0x5d2   : > { %6117 = vmatmul.msk.bf16.gmra.mxu2 %vm575_vm4, %v1739_v32 }
 0x5d7   : > { %v1944_v22 = vpop.f32.mrf.mxu3 }
 0x5d9   : > { %v1990_v33 = vpop.f32.mrf.mxu0 }
 0x5da   : > { %v1998_v26 = vpack.c.bf16 %v1990_v33, %v1988_v39 }
 0x5dc   : > { %6182 = vmatmul.msk.bf16.vlgmr.msrb.gmra.mxu1 %vm575_vm4, %v1998_v26 }
 0x5df   : > { %v1946_v40 = vpop.f32.mrf.mxu3 }
 0x5e1   : > { %v1993_v21 = vpop.f32.mrf.mxu0 }
 0x5e7   : > { %v1949_v0 = vpop.f32.mrf.mxu3 }
 0x5e9   : > { %v1995_v49 = vpop.f32.mrf.mxu0 }
 0x5ea   : > { %v1999_v50 = vpack.c.bf16 %v1995_v49, %v1993_v21 }
 0x5ec   : > { %6183 = vmatmul.msk.bf16.gmra.mxu1 %vm575_vm4, %v1999_v50 }
 0x5ef   : > { %v1951_v59 = vpop.f32.mrf.mxu3 }
 0x639   : > { %v1838_v7 = vpop.f32.mrf.mxu1 }
 0x641   : > { %v1840_v4 = vpop.f32.mrf.mxu1 }
 0x645   : > { %v1887_v53 = vpop.f32.mrf.mxu2 }
 0x646   : > { %v1888_v46 = vadd.f32 %v1887_v53, %v1838_v7 }
 0x648   : > { %v1954_v54 = vadd.f32 %v1944_v22, %v1888_v46 }
 0x649   : > { %v1843_v25 = vpop.f32.mrf.mxu1 }
 0x64d   : > { %v1889_v17 = vpop.f32.mrf.mxu2 }
 0x64e   : > { %v1890_v61 = vadd.f32 %v1889_v17, %v1840_v4 }
 0x650   : > { %v1955_v34 = vadd.f32 %v1946_v40, %v1890_v61 }
 0x651   : > { %v1845_v44 = vpop.f32.mrf.mxu1 }
 0x655   : > { %v1892_v56 = vpop.f32.mrf.mxu2 }
 0x656   : > { %v1893_v1 = vadd.f32 %v1892_v56, %v1843_v25 }
 0x658   : > { %v1956_v5 = vadd.f32 %v1949_v0, %v1893_v1  ;;  %v7093_v0 = vld [vmem:[%s9549_s8 + $0x118] sm:$0xff] }
 0x659   : > { %v2048_v60 = vpop.f32.mrf.mxu1  ;;  %2402 = vmatpush.bf16.msra.mxu0 %v7093_v0 }
 0x65a   : > { %v2058_v28 = vadd.f32 %v2048_v60, %v1954_v54 }
 0x65c   : > { %v8216_v30 = vadd.f32 %v7234_v29, %v2058_v28 }
 0x65d   : > { %v1894_v12 = vpop.f32.mrf.mxu2 }
 0x65e   : > { %v8219_v35 = vmul.f32 0.70710677, %v8216_v30  ;;  %v1895_v23 = vadd.f32 %v1894_v12, %v1845_v44 }
 0x660   : > { %v2076_v43 = vmul.f32 %v8219_v35, %v8219_v35  ;;  %v1957_v39 = vadd.f32 %v1951_v59, %v1895_v23  ;;  %v7092_v59 = vld [vmem:[%s9549_s8 + $0x110] sm:$0xff] }
 0x661   : > { %v2050_v47 = vpop.f32.mrf.mxu1  ;;  %2403 = vmatpush.bf16.msra.mxu0 %v7092_v59 }
 0x662   : > { %v8223_v36 = vmin.f32 %v2076_v43, 16.0  ;;  %v2059_v55 = vadd.f32 %v2050_v47, %v1955_v34 }
 0x664   : > { %v2078_v38 = vmul.f32 2.1237322e-06, %v8223_v36  ;;  %v2089_v52 = vmul.f32 3.8918573e-05, %v8223_v36  ;;  %v8227_v37 = vadd.f32 %v7234_v29, %v2059_v55 }
 0x666   : > { %v2079_v3 = vadd.f32 0.00028619796, %v2078_v38  ;;  %v2090_v9 = vadd.f32 0.001143296, %v2089_v52  ;;  %v8230_v10 = vmul.f32 0.70710677, %v8227_v37 }
 0x667   : > { %v7085_v38 = vld [vmem:[%s9549_s8 + $0x18] sm:$0xff] }
 0x668   : > { %v2080_v41 = vmul.f32 %v2079_v3, %v8223_v36  ;;  %v2091_v13 = vmul.f32 %v2090_v9, %v8223_v36  ;;  %v2116_v14 = vmul.f32 %v8230_v10, %v8230_v10  ;;  %v7089_v52 = vld [vmem:[%s9549_s8 + $0x98] sm:$0xff]  ;;  %2294 = vmatpush.bf16.msrb.mxu2 %v7085_v38 }
 0x669   : > { %v2053_v15 = vpop.f32.mrf.mxu1  ;;  %2348 = vmatpush.bf16.msrb.mxu3 %v7089_v52 }
 0x66a   : > { %v2092_v11 = vadd.f32 0.014752088, %v2091_v13  ;;  %v2060_v16 = vadd.f32 %v2053_v15, %v1956_v5  ;;  %v8236_v18 = vmin.f32 %v2116_v14, 16.0  ;;  %v2081_v20 = vadd.f32 0.0036580483, %v2080_v41 }
 0x66c   : > { %v2093_v8 = vmul.f32 %v2092_v11, %v8223_v36  ;;  %v8239_v51 = vadd.f32 %v7234_v29, %v2060_v16  ;;  %v2118_v24 = vmul.f32 2.1237322e-06, %v8236_v18  ;;  %v2129_v48 = vmul.f32 3.8918573e-05, %v8236_v18 }
 0x66d   : > { %v2082_v31 = vmul.f32 %v2081_v20, %v8223_v36 }
 0x66e   : > { %v2094_v6 = vadd.f32 0.112945676, %v2093_v8  ;;  %v2119_v27 = vadd.f32 0.00028619796, %v2118_v24  ;;  %v2130_v57 = vadd.f32 0.001143296, %v2129_v48 }
 0x66f   : > { %v8244_v45 = vmul.f32 0.70710677, %v8239_v51  ;;  %v2083_v22 = vadd.f32 0.05243302, %v2082_v31  ;;  %v7084_v48 = vld [vmem:[%s9549_s8 + $0x10] sm:$0xff] }
 0x670   : > { %v2095_v32 = vmul.f32 %v2094_v6, %v8223_v36  ;;  %v2120_v33 = vmul.f32 %v2119_v27, %v8236_v18  ;;  %v2131_v26 = vmul.f32 %v2130_v57, %v8236_v18  ;;  %v7088_v6 = vld [vmem:[%s9549_s8 + $0x90] sm:$0xff]  ;;  %2295 = vmatpush.bf16.msrb.mxu2 %v7084_v48 }
 0x671   : > { %v2156_v21 = vmul.f32 %v8244_v45, %v8244_v45  ;;  %v2055_v49 = vpop.f32.mrf.mxu1  ;;  %v2084_v34 = vmul.f32 %v2083_v22, %v8223_v36  ;;  %2349 = vmatpush.bf16.msrb.mxu3 %v7088_v6  ;;  %v7091_v22 = vld [vmem:[%s9549_s8 + $0x108] sm:$0xff] }
 0x672   : > { %v2096_v50 = vadd.f32 0.4994258, %v2095_v32  ;;  %v2061_v7 = vadd.f32 %v2055_v49, %v1957_v39  ;;  %v2121_v4 = vadd.f32 0.0036580483, %v2120_v33  ;;  %v2132_v25 = vadd.f32 0.014752088, %v2131_v26  ;;  %2404 = vmatpush.bf16.msra.mxu0 %v7091_v22 }
 0x673   : > { %v8252_v53 = vmin.f32 %v2156_v21, 16.0  ;;  %v2085_v41 = vadd.f32 0.18741608, %v2084_v34  ;;  %v7083_v49 = vld [vmem:[%s9549_s8 + $0x8] sm:$0xff]  ;;  %v2068_v22 = vmul.f32 0.5, %v8216_v30 }
 0x674   : > { %v2097_v44 = vmul.f32 %v2096_v50, %v8223_v36  ;;  %v8255_v46 = vadd.f32 %v7234_v29, %v2061_v7  ;;  %v2122_v17 = vmul.f32 %v2121_v4, %v8236_v18  ;;  %v2133_v54 = vmul.f32 %v2132_v25, %v8236_v18  ;;  %v7087_v25 = vld [vmem:[%s9549_s8 + $0x88] sm:$0xff]  ;;  %2296 = vmatpush.bf16.msrb.mxu2 %v7083_v49 }
 0x675   : > { %v2158_v60 = vmul.f32 2.1237322e-06, %v8252_v53  ;;  %v2169_v40 = vmul.f32 3.8918573e-05, %v8252_v53  ;;  %v2086_v27 = vmul.f32 %v2085_v41, %v8223_v36  ;;  %2350 = vmatpush.bf16.msrb.mxu3 %v7087_v25 }
 0x676   : > { %v8260_v28 = vadd.f32 1.0, %v2097_v44  ;;  %v8264_v61 = vmul.f32 0.70710677, %v8255_v46  ;;  %v2134_v56 = vadd.f32 0.112945676, %v2133_v54 }
 0x677   : > { %v2159_v43 = vadd.f32 0.00028619796, %v2158_v60  ;;  %v2123_v29 = vadd.f32 0.05243302, %v2122_v17  ;;  %v2170_v55 = vadd.f32 0.001143296, %v2169_v40 }
 0x678   : > { %7311 = vrcp.f32 %v8260_v28  ;;  %v2135_v47 = vmul.f32 %v2134_v56, %v8236_v18  ;;  %v2196_v1 = vmul.f32 %v8264_v61, %v8264_v61  ;;  %v2110_v33 = vand.u32 2147483648, %v8260_v28 }
 0x679   : > { %v2160_v9 = vmul.f32 %v2159_v43, %v8252_v53  ;;  %v2171_v13 = vmul.f32 %v2170_v55, %v8252_v53  ;;  %v2124_v15 = vmul.f32 %v2123_v29, %v8236_v18  ;;  %v2108_v50 = vand.u32 2147483647, %v8260_v28  ;;  %v7090_v55 = vld [vmem:[%s9549_s8 + $0x100] sm:$0xff] }
 0x67a   : > { %v2136_v3 = vadd.f32 0.4994258, %v2135_v47  ;;  %v8282_v5 = vmin.f32 %v2196_v1, 16.0  ;;  %v2087_v44 = vadd.f32 1.1283791, %v2086_v27  ;;  %vm2104_vm6 = vweird.f32 %v8260_v28  ;;  %v7086_v47 = vld [vmem:[%s9549_s8 + $0x80] sm:$0xff]  ;;  %2405 = vmatpush.bf16.msra.mxu0 %v7090_v55 }
 0x67b   : > { %v2172_v11 = vadd.f32 0.014752088, %v2171_v13  ;;  %v2161_v24 = vadd.f32 0.0036580483, %v2160_v9  ;;  %v2125_v26 = vadd.f32 0.18741608, %v2124_v15  ;;  %2351 = vmatpush.bf16.msrb.mxu3 %v7086_v47 }
 0x67c   : > { %v2137_v12 = vmul.f32 %v2136_v3, %v8236_v18  ;;  %v2198_v16 = vmul.f32 2.1237322e-06, %v8282_v5  ;;  %v2209_v20 = vmul.f32 3.8918573e-05, %v8282_v5  ;;  %v2111_v43 = vor.u32 1.1754944e-38, %v2110_v33 }
 0x67d   : > { %v2173_v57 = vmul.f32 %v2172_v11, %v8252_v53  ;;  %v2162_v7 = vmul.f32 %v2161_v24, %v8252_v53  ;;  %v2126_v34 = vmul.f32 %v2125_v26, %v8236_v18  ;;  %vm2109_vm8 = vcmp.eq.f32.partialorder %v2108_v50, 8.507059e+37 }
 0x67e   : > { %v7312_v14 = vpop.eup %7311  ;;  %v8289_v23 = vadd.f32 1.0, %v2137_v12  ;;  %v2199_v31 = vadd.f32 0.00028619796, %v2198_v16  ;;  %v2210_v32 = vadd.f32 0.001143296, %v2209_v20  ;;  %v2088_v0 = vmul.f32 %v2087_v44, %v8219_v35 }
 0x67f   : > { %v2100_v8 = vmul.f32 %v7312_v14, %v8260_v28  ;;  %vm2105_vm3 = vweird.f32 %v7312_v14  ;;  %v2174_v21 = vadd.f32 0.112945676, %v2173_v57  ;;  %v7082_v28 = vld [vmem:[%s9549_s8] sm:$0xff]  ;;  %v2163_v18 = vadd.f32 0.05243302, %v2162_v7 }
 0x680   : > { %7313 = vrcp.f32 %v8289_v23  ;;  %v2211_v4 = vmul.f32 %v2210_v32, %v8282_v5  ;;  %v2200_v54 = vmul.f32 %v2199_v31, %v8282_v5  ;;  %vm8320_vm7 = vmor %vm2104_vm6, %vm2105_vm3  ;;  %2297 = vmatpush.bf16.msrb.mxu2 %v7082_v28  ;;  %v2127_v11 = vadd.f32 1.1283791, %v2126_v34 }
 0x681   : > { %v2101_v39 = vsub.f32 1.0, %v2100_v8  ;;  %v2175_v17 = vmul.f32 %v2174_v21, %v8252_v53  ;;  %v2164_v20 = vmul.f32 %v2163_v18, %v8252_v53  ;;  %v2148_v48 = vand.u32 2147483647, %v8289_v23  ;;  %v7100_v18 = vld [vmem:[%s9549_s8 + $0xa8] sm:$0xff] }
 0x682   : > { %v2212_v56 = vadd.f32 0.014752088, %v2211_v4  ;;  %v2201_v41 = vadd.f32 0.0036580483, %v2200_v54  ;;  %vm2144_vm10 = vweird.f32 %v8289_v23  ;;  %v2128_v31 = vmul.f32 %v2127_v11, %v8230_v10  ;;  %v7098_v10 = vld [vmem:[%s9549_s8 + $0x38] sm:$0xff] }
 0x683   : > { %v2102_v36 = vmul.f32 %v7312_v14, %v2101_v39  ;;  %v2176_v29 = vadd.f32 0.4994258, %v2175_v17  ;;  %v2165_v39 = vadd.f32 0.18741608, %v2164_v20  ;;  %vm2149_vm12 = vcmp.eq.f32.partialorder %v2148_v48, 8.507059e+37  ;;  %2573 = vmatpush.bf16.msra.mxu3 %v7098_v10 }
 0x684   : > { %v2213_v52 = vmul.f32 %v2212_v56, %v8282_v5  ;;  %v2202_v6 = vmul.f32 %v2201_v41, %v8282_v5  ;;  %v2069_v56 = vmul.f32 0.5, %v8227_v37  ;;  %v7235_v10 = vld [vmem:[%s9542_s1 + $0xe] ss:$0 sm:$0xff] }
 0x685   : > { %v2103_v60 = vadd.f32 %v7312_v14, %v2102_v36  ;;  %v2177_v13 = vmul.f32 %v2176_v29, %v8252_v53  ;;  %v2166_v25 = vmul.f32 %v2165_v39, %v8252_v53  ;;  %v7097_v53 = vld [vmem:[%s9549_s8 + $0x30] sm:$0xff]  ;;  %v2070_v39 = vmul.f32 0.5, %v8239_v51 }
 0x686   : > { %v7314_v1 = vpop.eup %7313  ;;  %v2214_v12 = vadd.f32 0.112945676, %v2213_v52  ;;  %v2203_v26 = vadd.f32 0.05243302, %v2202_v6 }
 0x687   : > { %v2107_v38 = vsel %vm8320_vm7, %v7312_v14, %v2103_v60  ;;  %v2140_v9 = vmul.f32 %v7314_v1, %v8289_v23  ;;  %v2150_v14 = vand.u32 2147483648, %v8289_v23  ;;  %v2178_v8 = vadd.f32 1.0, %v2177_v13  ;;  %v7102_v23 = vld [vmem:[%s9549_s8 + $0xb8] sm:$0xff]  ;;  %v7101_v60 = vld [vmem:[%s9549_s8 + $0xb0] sm:$0xff]  ;;  %2574 = vmatpush.bf16.msra.mxu3 %v7097_v53  ;;  %v7237_v53 = vld [vmem:[%s9542_s1 + $0xa] ss:$0 sm:$0xff] }
 0x688   : > { %v2112_v3 = vsel %vm2109_vm8, %v2111_v43, %v2107_v38  ;;  %v2215_v35 = vmul.f32 %v2214_v12, %v8282_v5  ;;  %vm2145_vm9 = vweird.f32 %v7314_v1  ;;  %v2204_v54 = vmul.f32 %v2203_v26, %v8282_v5  ;;  %2627 = vmatpush.bf16.msrb.mxu0 %v7102_v23  ;;  %v7096_v38 = vld [vmem:[%s9549_s8 + $0x28] sm:$0xff] }
 0x689   : > { %v2113_v15 = vmul.f32 %v2112_v3, %v2088_v0  ;;  %v2141_v16 = vsub.f32 1.0, %v2140_v9  ;;  %7315 = vrcp.f32 %v2178_v8  ;;  %vm2146_vm11 = vmor %vm2144_vm10, %vm2145_vm9  ;;  %v2151_v32 = vor.u32 1.1754944e-38, %v2150_v14 }
 0x68a   : > { %v2216_v57 = vadd.f32 0.4994258, %v2215_v35  ;;  %v2167_v34 = vadd.f32 1.1283791, %v2166_v25  ;;  %v2188_v29 = vand.u32 2147483647, %v2178_v8  ;;  %vm2184_vm14 = vweird.f32 %v2178_v8 }
 0x68b   : > { %v2142_v24 = vmul.f32 %v7314_v1, %v2141_v16  ;;  %v6184_v59 = vclamps-f32 %v2113_v15, 1.0  ;;  %v2190_v28 = vand.u32 2147483648, %v2178_v8  ;;  %2575 = vmatpush.bf16.msra.mxu3 %v7096_v38  ;;  %vm2421_vm8 = vcmask 130048  }
 0x68c   : > { %v2217_v21 = vmul.f32 %v2216_v57, %v8282_v5  ;;  %2628 = vmatpush.bf16.msrb.mxu0 %v7101_v60  ;;  %v2168_v9 = vmul.f32 %v2167_v34, %v8244_v45  ;;  %vm2189_vm0 = vcmp.eq.f32.partialorder %v2188_v29, 8.507059e+37  ;;  %v7099_v45 = vld [vmem:[%s9549_s8 + $0xa0] sm:$0xff]  ;;  %vm2462_vm9 = vcmask 251904  }
 0x68d   : > { %v2143_v27 = vadd.f32 %v7314_v1, %v2142_v24  ;;  %v2236_v36 = vadd.f32 1.0, %v6184_v59  ;;  %v2191_v41 = vor.u32 1.1754944e-38, %v2190_v28 }
 0x68e   : > { %v8348_v7 = vadd.f32 1.0, %v2217_v21  ;;  %v2071_v21 = vmul.f32 0.5, %v8255_v46 }
 0x68f   : > { %v2147_v33 = vsel %vm2146_vm11, %v7314_v1, %v2143_v27  ;;  %v7316_v4 = vpop.eup %7315  ;;  %v2240_v40 = vmul.f32 %v2236_v36, %v2068_v22  ;;  %v2205_v1 = vadd.f32 0.18741608, %v2204_v54 }
 0x690   : > { %v2152_v49 = vsel %vm2149_vm12, %v2151_v32, %v2147_v33  ;;  %v2180_v17 = vmul.f32 %v7316_v4, %v2178_v8  ;;  %7317 = vrcp.f32 %v8348_v7  ;;  %vm2185_vm13 = vweird.f32 %v7316_v4  ;;  %2629 = vmatpush.bf16.msrb.mxu0 %v7100_v18 }
 0x691   : > { %v2153_v50 = vmul.f32 %v2152_v49, %v2128_v31  ;;  %v8374_v37 = vadd.f32 %v2240_v40, %v8129_v63  ;;  %vm2186_vm15 = vmor %vm2184_vm14, %vm2185_vm13  ;;  %v2206_v15 = vmul.f32 %v2205_v1, %v8282_v5  ;;  %v2230_v5 = vand.u32 2147483648, %v8348_v7 }
 0x692   : > { %v2181_v43 = vsub.f32 1.0, %v2180_v17  ;;  %v2228_v35 = vand.u32 2147483647, %v8348_v7  ;;  %vm2224_vm3 = vweird.f32 %v8348_v7 }
 0x693   : > { %v6185_v44 = vclamps-f32 %v2153_v50, 1.0  ;;  %v2207_v20 = vadd.f32 1.1283791, %v2206_v15  ;;  %v2231_v6 = vor.u32 1.1754944e-38, %v2230_v5  ;;  %v7103_v5 = vld [vmem:[%s9549_s8 + $0x120] sm:$0xff] }
 0x694   : > { %v2182_v55 = vmul.f32 %v7316_v4, %v2181_v43  ;;  %2630 = vmatpush.bf16.msrb.mxu0 %v7099_v45  ;;  %vm2229_vm7 = vcmp.eq.f32.partialorder %v2228_v35, 8.507059e+37 }
 0x695   : > { %v2237_v30 = vadd.f32 1.0, %v6185_v44  ;;  %v2208_v59 = vmul.f32 %v2207_v20, %v8264_v61  ;;  %v7238_v20 = vld [vmem:[%s9542_s1 + $0xb] ss:$0 sm:$0xff] }
 0x696   : > { %v2183_v0 = vadd.f32 %v7316_v4, %v2182_v55  ;;  %v7318_v3 = vpop.eup %7317 }
 0x697   : > { %v2241_v47 = vmul.f32 %v2237_v30, %v2069_v56  ;;  %v2220_v63 = vmul.f32 %v7318_v3, %v8348_v7  ;;  %vm2225_vm1 = vweird.f32 %v7318_v3 }
 0x698   : > { %v2187_v12 = vsel %vm2186_vm15, %v7316_v4, %v2183_v0  ;;  %vm2226_vm6 = vmor %vm2224_vm3, %vm2225_vm1 }
 0x699   : > { %v8377_v52 = vadd.f32 %v2241_v47, %v8126_v62  ;;  %v2192_v11 = vsel %vm2189_vm0, %v2191_v41, %v2187_v12  ;;  %v7095_v62 = vld [vmem:[%s9549_s8 + $0x20] sm:$0xff]  ;;  %v2221_v14 = vsub.f32 1.0, %v2220_v63  ;;  %v7105_v63 = vld [vmem:[%s9549_s8 + $0x130] sm:$0xff] }
 0x69a   : > { %v2193_v16 = vmul.f32 %v2192_v11, %v2168_v9  ;;  %2576 = vmatpush.bf16.msra.mxu3 %v7095_v62  ;;  %v7106_v9 = vld [vmem:[%s9549_s8 + $0x138] sm:$0xff]  ;;  %v7236_v41 = vld [vmem:[%s9542_s1 + $0x6] ss:$0 sm:$0xff] }
 0x69b   : > { %v8382_v13 = vpack.c.bf16 %v8377_v52, %v8374_v37  ;;  %v2222_v8 = vmul.f32 %v7318_v3, %v2221_v14  ;;  %v7104_v14 = vld [vmem:[%s9549_s8 + $0x128] sm:$0xff] }
 0x69c   : > { %v6186_v24 = vclamps-f32 %v2193_v16, 1.0 }
 0x69d   : > { %6204 = vmatmul.msk.bf16.vlgmr.msrb.gmra.mxu2 %vm575_vm4, %v8382_v13  ;;  %6230 = vmatmul.msk.bf16.vlgmr.msrb.gmra.mxu3 %vm575_vm4, %v8382_v13  ;;  %v2223_v48 = vadd.f32 %v7318_v3, %v2222_v8 }
 0x69e   : > { %6256 = vmatmul.msk.bf16.vlgmr.msra.gmra.mxu0 %vm575_vm4, %v8382_v13  ;;  %v2238_v31 = vadd.f32 1.0, %v6186_v24 }
 0x69f   : > { %v2227_v27 = vsel %vm2226_vm6, %v7318_v3, %v2223_v48 }
 0x6a0   : > { %v2232_v57 = vsel %vm2229_vm7, %v2231_v6, %v2227_v27  ;;  %v2242_v26 = vmul.f32 %v2238_v31, %v2070_v39 }
 0x6a1   : > { %v2233_v32 = vmul.f32 %v2232_v57, %v2208_v59 }
 0x6a2   : > { %v8405_v50 = vadd.f32 %v2242_v26, %v8120_v58 }
 0x6a3   : > { %v6187_v33 = vclamps-f32 %v2233_v32, 1.0 }
 0x6a5   : > { %v2239_v49 = vadd.f32 1.0, %v6187_v33 }
 0x6a7   : > { %v2243_v36 = vmul.f32 %v2239_v49, %v2071_v21 }
 0x6a9   : > { %v8408_v7 = vadd.f32 %v2243_v36, %v8122_v42 }
 0x6ab   : > { %v8412_v61 = vpack.c.bf16 %v8408_v7, %v8405_v50 }
 0x6ad   : > { %6205 = vmatmul.msk.bf16.gmra.mxu2 %vm575_vm4, %v8412_v61  ;;  %6231 = vmatmul.msk.bf16.gmra.mxu3 %vm575_vm4, %v8412_v61 }
 0x6ae   : > { %6257 = vmatmul.msk.bf16.gmra.mxu0 %vm575_vm4, %v8412_v61 }
 0x6bd   : > { %6286 = vmatmul.msk.bf16.vlgmr.msra.gmra.mxu3 %vm575_vm4, %v8382_v13 }
 0x6be   : > { %6312 = vmatmul.msk.bf16.vlgmr.msrb.gmra.mxu0 %vm575_vm4, %v8382_v13 }
 0x6cd   : > { %6287 = vmatmul.msk.bf16.gmra.mxu3 %vm575_vm4, %v8412_v61 }
 0x6ce   : > { %6313 = vmatmul.msk.bf16.gmra.mxu0 %vm575_vm4, %v8412_v61 }
 0x71b   : > { %v2407_v58 = vpop.f32.mrf.mxu0 }
 0x71c   : > { %v2408_v34 = vadd.f32 %v7235_v10, %v2407_v58 }
 0x720   : > { %v2353_v42 = vpop.f32.mrf.mxu3  ;;  %v2299_v17 = vpop.f32.mrf.mxu2 }
 0x721   : > { %v2354_v38 = vadd.f32 %v7237_v53, %v2353_v42  ;;  %v2300_v11 = vadd.f32 %v7236_v41, %v2299_v17 }
 0x723   : > { %v2409_v51 = vpop.f32.mrf.mxu0 }
 0x724   : > { %v2410_v60 = vadd.f32 %v7235_v10, %v2409_v51 }
 0x726   : > { %v2500_v47 = vpack.c.bf16 %v2410_v60, %v2408_v34 }
 0x728   : > { %v2355_v46 = vpop.f32.mrf.mxu3  ;;  %v2301_v18 = vpop.f32.mrf.mxu2 }
 0x729   : > { %v2356_v55 = vadd.f32 %v7237_v53, %v2355_v46  ;;  %v2302_v15 = vadd.f32 %v7236_v41, %v2301_v18 }
 0x72b   : > { %v2412_v4 = vpop.f32.mrf.mxu0  ;;  %v2419_v0 = vpack.c.bf16 %v2356_v55, %v2354_v38  ;;  %v2417_v45 = vpack.c.bf16 %v2302_v15, %v2300_v11 }
 0x72c   : > { %v2413_v22 = vadd.f32 %v7235_v10, %v2412_v4 }
 0x72d   : > { %v2429_v12 = vsel %vm2421_vm8, %v2419_v0, 0 }
 0x730   : > { %v2358_v25 = vpop.f32.mrf.mxu3  ;;  %v2304_v62 = vpop.f32.mrf.mxu2 }
 0x731   : > { %v2359_v30 = vadd.f32 %v7237_v53, %v2358_v25  ;;  %v2305_v31 = vadd.f32 %v7236_v41, %v2304_v62 }
 0x733   : > { %v2414_v23 = vpop.f32.mrf.mxu0 }
 0x734   : > { %v2415_v44 = vadd.f32 %v7235_v10, %v2414_v23 }
 0x736   : > { %v2501_v54 = vpack.c.bf16 %v2415_v44, %v2413_v22  ;;  %v7240_v22 = vld [vmem:[%s9542_s1 + $0xf] ss:$0 sm:$0xff] }
 0x738   : > { %v2509_v40 = vand.u32 %v2501_v54, %v7766_v19  ;;  %v2360_v56 = vpop.f32.mrf.mxu3  ;;  %v2306_v35 = vpop.f32.mrf.mxu2 }
 0x739   : > { %v2361_v43 = vadd.f32 %v7237_v53, %v2360_v56  ;;  %v2307_v59 = vadd.f32 %v7236_v41, %v2306_v35 }
 0x73a   : > { %2517 = vmatpush.bf16.msra.mxu2 %v2509_v40 }
 0x73b   : > { %v2420_v29 = vpack.c.bf16 %v2361_v43, %v2359_v30  ;;  %v2632_v28 = vpop.f32.mrf.mxu0  ;;  %v2418_v39 = vpack.c.bf16 %v2307_v59, %v2305_v31 }
 0x73c   : > { %v2633_v32 = vadd.f32 %v7238_v20, %v2632_v28 }
 0x73d   : > { %v2432_v1 = vsel %vm2421_vm8, %v2420_v29, 0 }
 0x73e   : > { %2518 = vmatpush.bf16.msra.mxu2 %v2500_v47  ;;  %2440 = vmatpush.bf16.xpose.msra.mxu1 %v2432_v1 }
 0x743   : > { %v2634_v3 = vpop.f32.mrf.mxu0 }
 0x744   : > { %v2635_v27 = vadd.f32 %v7238_v20, %v2634_v3 }
 0x746   : > { %2441 = vmatpush.bf16.xpose.msra.mxu1 %v2429_v12  ;;  %v2698_v33 = vpack.c.bf16 %v2635_v27, %v2633_v32 }
 0x748   : > { %v2707_v26 = vsel %vm2421_vm8, %v2698_v33, 0 }
 0x74b   : > { %v2637_v16 = vpop.f32.mrf.mxu0 }
 0x74c   : > { %v2638_v24 = vadd.f32 %v7238_v20, %v2637_v16 }
 0x74d   : > { %6258 = vmatmul.msk.bf16.vlgmr.msra.gmra.mxu1 %vm2421_vm8, %v2417_v45 }
 0x74e   : > { %2681 = vmatpush.bf16.msrb.mxu1 %v7106_v9 }
 0x752   : > { %2682 = vmatpush.bf16.msrb.mxu1 %v7105_v63 }
 0x753   : > { %v2639_v8 = vpop.f32.mrf.mxu0 }
 0x754   : > { %v2640_v48 = vadd.f32 %v7238_v20, %v2639_v8 }
 0x756   : > { %2683 = vmatpush.bf16.msrb.mxu1 %v7104_v14  ;;  %v2699_v6 = vpack.c.bf16 %v2640_v48, %v2638_v24 }
 0x758   : > { %v2710_v57 = vsel %vm2421_vm8, %v2699_v6, 0 }
 0x759   : > { %2718 = vmatpush.bf16.xpose.msrb.mxu2 %v2710_v57  ;;  %v2578_v57 = vpop.f32.mrf.mxu3 }
 0x75a   : > { %2684 = vmatpush.bf16.msrb.mxu1 %v7103_v5 }
 0x75d   : > { %6259 = vmatmul.msk.bf16.gmra.mxu1 %vm2421_vm8, %v2418_v39 }
 0x761   : > { %2719 = vmatpush.bf16.xpose.msrb.mxu2 %v2707_v26  ;;  %v7111_v26 = vld [vmem:[%s9549_s8 + $0x58] sm:$0xff] }
 0x76d   : > { %6338 = vmatmul.msk.bf16.vlgmr.msrb.gmra.mxu1 %vm575_vm4, %v8382_v13 }
 0x77d   : > { %6339 = vmatmul.msk.bf16.gmra.mxu1 %vm575_vm4, %v8412_v61 }
 0x7ca   : > { %v2443_v21 = vpop.f32.mrf.mxu1 }
 0x7cb   : > { %v2453_v49 = vsel %vm1709_vm2, %v2443_v21, -inf }
 0x7cc   : > { %2454 = vmax.xlane.f32.xlu2 %v2453_v49  ;;  %v2580_v49 = vpop.f32.mrf.mxu3 }
 0x7d2   : > { %v2445_v36 = vpop.f32.mrf.mxu1 }
 0x7d3   : > { %v2456_v58 = vsel %vm1709_vm2, %v2445_v36, -inf }
 0x7d4   : > { %2457 = vmax.xlane.f32.xlu0 %v2456_v58  ;;  %v7239_v58 = vld [vmem:[%s9542_s1 + $0x7] ss:$0 sm:$0xff] }
 0x7da   : > { %v2448_v42 = vpop.f32.mrf.mxu1 }
 0x7db   : > { %v2459_v51 = vsel %vm1709_vm2, %v2448_v42, -inf }
 0x7dc   : > { %2460 = vmax.xlane.f32.xlu1 %v2459_v51  ;;  %v7108_v51 = vld [vmem:[%s9549_s8 + $0x40] sm:$0xff] }
 0x7e2   : > { %v2450_v46 = vpop.f32.mrf.mxu1 }
 0x7e3   : > { %v2463_v4 = vsel %vm2462_vm9, %v2450_v46, -inf }
 0x7e4   : > { %2464 = vmax.xlane.f32.xlu2 %v2463_v4  ;;  %v2583_v4 = vpop.f32.mrf.mxu3 }
 0x7ea   : > { %v2686_v25 = vpop.f32.mrf.mxu1 }
 0x7eb   : > { %v2687_v56 = vadd.f32 %v7240_v22, %v2686_v25 }
 0x7f2   : > { %v2688_v10 = vpop.f32.mrf.mxu1 }
 0x7f3   : > { %v2689_v60 = vadd.f32 %v7240_v22, %v2688_v10  ;;  %v2585_v10 = vpop.f32.mrf.mxu3 }
 0x7f5   : > { %v2777_v30 = vpack.c.bf16 %v2689_v60, %v2687_v56 }
 0x7fa   : > { %v2691_v23 = vpop.f32.mrf.mxu1 }
 0x7fb   : > { %v2692_v17 = vadd.f32 %v7240_v22, %v2691_v23  ;;  %v2586_v23 = vadd.f32 %v7239_v58, %v2585_v10 }
 0x802   : > { %v2693_v44 = vpop.f32.mrf.mxu1 }
 0x803   : > { %v2694_v54 = vadd.f32 %v7240_v22, %v2693_v44  ;;  %v2584_v22 = vadd.f32 %v7239_v58, %v2583_v4 }
 0x805   : > { %v2778_v53 = vpack.c.bf16 %v2694_v54, %v2692_v17  ;;  %v2697_v44 = vpack.c.bf16 %v2586_v23, %v2584_v22  ;;  %v7094_v17 = vld [vmem:[%s9550_s9] sm:$0xff]  ;;  %v7107_v23 = vld [vmem:[%s9550_s9 + $0x8] sm:$0xff]  ;;  %v7119_v22 = vld [vmem:[%s9549_s8 + $0x158] sm:$0xff] }
 0x806   : > { %2862 = vmatpush.bf16.msra.mxu1 %v7094_v17  ;;  %2831 = vmatpush.bf16.msra.mxu0 %v7107_v23  ;;  %v7118_v17 = vld [vmem:[%s9549_s8 + $0x150] sm:$0xff] }
 0x807   : > { %v2786_v40 = vand.u32 %v2778_v53, %v7766_v19 }
 0x809   : > { %2794 = vmatpush.bf16.msrb.mxu3 %v2786_v40 }
 0x80a   : > { %3021 = vmatpush.bf16.msrb.mxu0 %v7119_v22 }
 0x80d   : > { %2795 = vmatpush.bf16.msrb.mxu3 %v2777_v30 }
 0x80e   : > { %3022 = vmatpush.bf16.msrb.mxu0 %v7118_v17 }
 0x83f   : > { %v2455_v43 = vpop.xlane.xlu2 %2454 }
 0x840   : > { %v2466_v34 = vsub.f32 %v2443_v21, %v2455_v43  ;;  %v7110_v21 = vld [vmem:[%s9549_s8 + $0x50] sm:$0xff] }
 0x842   : > { %v2470_v29 = vmul.f32 1.442695, %v2466_v34 }
 0x844   : > { %7319 = vpow2.f32 %v2470_v29 }
 0x847   : > { %v2458_v28 = vpop.xlane.xlu0 %2457 }
 0x848   : > { %v2467_v47 = vsub.f32 %v2445_v36, %v2458_v28  ;;  %v7109_v36 = vld [vmem:[%s9549_s8 + $0x48] sm:$0xff] }
 0x84a   : > { %v7320_v55 = vpop.eup %7319  ;;  %v2472_v1 = vmul.f32 1.442695, %v2467_v47 }
 0x84b   : > { %v2478_v38 = vsel %vm1709_vm2, %v7320_v55, 0.0 }
 0x84c   : > { %7321 = vpow2.f32 %v2472_v1  ;;  %2479 = vadd.xlane.f32.xlu0 %v2478_v38 }
 0x84f   : > { %v2461_v18 = vpop.xlane.xlu1 %2460 }
 0x850   : > { %v2468_v0 = vsub.f32 %v2448_v42, %v2461_v18  ;;  %v2581_v42 = vadd.f32 %v7239_v58, %v2580_v49 }
 0x852   : > { %v7322_v3 = vpop.eup %7321  ;;  %v2474_v9 = vmul.f32 1.442695, %v2468_v0 }
 0x853   : > { %v2481_v41 = vsel %vm1709_vm2, %v7322_v3, 0.0 }
 0x854   : > { %7323 = vpow2.f32 %v2474_v9  ;;  %2482 = vadd.xlane.f32.xlu1 %v2481_v41 }
 0x857   : > { %v2465_v12 = vpop.xlane.xlu2 %2464 }
 0x858   : > { %v2469_v15 = vsub.f32 %v2450_v46, %v2465_v12  ;;  %v2579_v46 = vadd.f32 %v7239_v58, %v2578_v57  ;;  %v7114_v57 = vld [vmem:[%s9549_s8 + $0xd0] sm:$0xff] }
 0x85a   : > { %v7324_v63 = vpop.eup %7323  ;;  %v2476_v11 = vmul.f32 1.442695, %v2469_v15  ;;  %v2696_v25 = vpack.c.bf16 %v2581_v42, %v2579_v46 }
 0x85b   : > { %v2484_v62 = vsel %vm1709_vm2, %v7324_v63, 0.0 }
 0x85c   : > { %7325 = vpow2.f32 %v2476_v11  ;;  %2485 = vadd.xlane.f32.xlu2 %v2484_v62 }
 0x862   : > { %v7326_v45 = vpop.eup %7325 }
 0x863   : > { %v2487_v16 = vsel %vm2462_vm9, %v7326_v45, 0.0 }
 0x864   : > { %2488 = vadd.xlane.f32.xlu0 %v2487_v16 }
 0x8bf   : > { %v2480_v14 = vpop.xlane.xlu0 %2479 }
 0x8c0   : > { %7327 = vrcp.f32 %v2480_v14 }
 0x8c6   : > { %v7328_v20 = vpop.eup %7327 }
 0x8c7   : > { %v2483_v5 = vpop.xlane.xlu1 %2482  ;;  %v2494_v35 = vmul.f32 %v7328_v20, %v7320_v55 }
 0x8c8   : > { %7329 = vrcp.f32 %v2483_v5 }
 0x8ce   : > { %v7330_v8 = vpop.eup %7329 }
 0x8cf   : > { %v2495_v24 = vmul.f32 %v7330_v8, %v7322_v3  ;;  %v2486_v6 = vpop.xlane.xlu2 %2485 }
 0x8d0   : > { %7331 = vrcp.f32 %v2486_v6 }
 0x8d1   : > { %v2498_v48 = vpack.c.bf16 %v2495_v24, %v2494_v35 }
 0x8d3   : > { %6260 = vmatmul.msk.bf16.vlgmr.msra.gmra.mxu2 %vm1709_vm2, %v2498_v48 }
 0x8d4   : > { %2913 = vmatpush.bf16.msra.mxu2 %v7111_v26 }
 0x8d6   : > { %v7332_v27 = vpop.eup %7331 }
 0x8d7   : > { %v2489_v59 = vpop.xlane.xlu0 %2488  ;;  %v2496_v32 = vmul.f32 %v7332_v27, %v7324_v63  ;;  %v7115_v27 = vld [vmem:[%s9549_s8 + $0xd8] sm:$0xff] }
 0x8d8   : > { %7333 = vrcp.f32 %v2489_v59  ;;  %2914 = vmatpush.bf16.msra.mxu2 %v7110_v21  ;;  %2967 = vmatpush.bf16.msra.mxu3 %v7115_v27 }
 0x8dc   : > { %2915 = vmatpush.bf16.msra.mxu2 %v7109_v36  ;;  %2968 = vmatpush.bf16.msra.mxu3 %v7114_v57 }
 0x8de   : > { %v7334_v31 = vpop.eup %7333 }
 0x8df   : > { %v2497_v39 = vmul.f32 %v7334_v31, %v7326_v45 }
 0x8e0   : > { %2916 = vmatpush.bf16.msra.mxu2 %v7108_v51 }
 0x8e1   : > { %v2499_v33 = vpack.c.bf16 %v2497_v39, %v2496_v32  ;;  %v7113_v32 = vld [vmem:[%s9549_s8 + $0xc8] sm:$0xff] }
 0x8e2   : > { %2969 = vmatpush.bf16.msra.mxu3 %v7113_v32 }
 0x8e3   : > { %6261 = vmatmul.msk.bf16.gmra.mxu2 %vm1709_vm2, %v2499_v33  ;;  %v7112_v33 = vld [vmem:[%s9549_s8 + $0xc0] sm:$0xff] }
 0x8e6   : > { %2970 = vmatpush.bf16.msra.mxu3 %v7112_v33 }
 0x8f3   : > { %6340 = vmatmul.msk.bf16.vlgmr.msrb.gmra.mxu2 %vm2421_vm8, %v2696_v25 }
 0x903   : > { %6341 = vmatmul.msk.bf16.gmra.mxu2 %vm2421_vm8, %v2697_v44 }
 0x913   : > { %6382 = vmatmul.msk.bf16.vlgmr.msra.gmra.mxu2 %vm575_vm4, %v8382_v13 }
 0x923   : > { %6383 = vmatmul.msk.bf16.gmra.mxu2 %vm575_vm4, %v8412_v61 }
 0x956   : > { %v2520_v54 = vpop.f32.mrf.mxu2 }
 0x95e   : > { %v2522_v53 = vpop.f32.mrf.mxu2 }
 0x95f   : > { %v2530_v60 = vpack.c.bf16 %v2522_v53, %v2520_v54  ;;  %v7117_v54 = vld [vmem:[%s9549_s8 + $0x148] sm:$0xff] }
 0x960   : > { %3023 = vmatpush.bf16.msrb.mxu0 %v7117_v54 }
 0x961   : > { %6356 = vmatmul.msk.bf16.vlgmr.msra.gmra.mxu1 %vm2421_vm8, %v2530_v60 }
 0x966   : > { %v2525_v40 = vpop.f32.mrf.mxu2 }
 0x96e   : > { %v2527_v56 = vpop.f32.mrf.mxu2 }
 0x96f   : > { %v2531_v30 = vpack.c.bf16 %v2527_v56, %v2525_v40  ;;  %v7116_v40 = vld [vmem:[%s9549_s8 + $0x140] sm:$0xff] }
 0x970   : > { %3024 = vmatpush.bf16.msrb.mxu0 %v7116_v40 }
 0x971   : > { %6357 = vmatmul.msk.bf16.gmra.mxu1 %vm2421_vm8, %v2531_v30 }
 0x976   : > { %v2721_v43 = vpop.f32.mrf.mxu2 }
 0x977   : > { %v2731_v34 = vsel %vm1709_vm2, %v2721_v43, -inf }
 0x978   : > { %2732 = vmax.xlane.f32.xlu1 %v2731_v34  ;;  %v7124_v34 = vld [vmem:[%s9549_s8 + $0x78] sm:$0xff] }
 0x97e   : > { %v2723_v29 = vpop.f32.mrf.mxu2 }
 0x97f   : > { %v2734_v28 = vsel %vm1709_vm2, %v2723_v29, -inf }
 0x980   : > { %2735 = vmax.xlane.f32.xlu2 %v2734_v28 }
 0x986   : > { %v2726_v47 = vpop.f32.mrf.mxu2 }
 0x987   : > { %v2737_v55 = vsel %vm1709_vm2, %v2726_v47, -inf }
 0x988   : > { %2738 = vmax.xlane.f32.xlu0 %v2737_v55  ;;  %v7121_v55 = vld [vmem:[%s9549_s8 + $0x60] sm:$0xff] }
 0x98e   : > { %v2728_v1 = vpop.f32.mrf.mxu2 }
 0x98f   : > { %v2740_v38 = vsel %vm2462_vm9, %v2728_v1, -inf }
 0x990   : > { %2741 = vmax.xlane.f32.xlu1 %v2740_v38 }
 0x9eb   : > { %v2733_v18 = vpop.xlane.xlu1 %2732 }
 0x9ec   : > { %v2743_v0 = vsub.f32 %v2721_v43, %v2733_v18  ;;  %v2918_v18 = vpop.f32.mrf.mxu2 }
 0x9ee   : > { %v2747_v3 = vmul.f32 1.442695, %v2743_v0  ;;  %v7242_v0 = vld [vmem:[%s9542_s1 + $0xc] ss:$0 sm:$0xff] }
 0x9f0   : > { %7335 = vpow2.f32 %v2747_v3 }
 0x9f3   : > { %v2736_v9 = vpop.xlane.xlu2 %2735 }
 0x9f4   : > { %v2744_v41 = vsub.f32 %v2723_v29, %v2736_v9  ;;  %v7123_v29 = vld [vmem:[%s9549_s8 + $0x70] sm:$0xff] }
 0x9f6   : > { %v7336_v12 = vpop.eup %7335  ;;  %v2749_v15 = vmul.f32 1.442695, %v2744_v41 }
 0x9f7   : > { %v2755_v63 = vsel %vm1709_vm2, %v7336_v12, 0.0 }
 0x9f8   : > { %7337 = vpow2.f32 %v2749_v15  ;;  %2756 = vadd.xlane.f32.xlu2 %v2755_v63 }
 0x9fb   : > { %v2739_v11 = vpop.xlane.xlu0 %2738 }
 0x9fc   : > { %v2745_v62 = vsub.f32 %v2726_v47, %v2739_v11  ;;  %v7122_v47 = vld [vmem:[%s9549_s8 + $0x68] sm:$0xff] }
 0x9fe   : > { %v7338_v45 = vpop.eup %7337  ;;  %v2751_v16 = vmul.f32 1.442695, %v2745_v62  ;;  %v2920_v62 = vpop.f32.mrf.mxu2 }
 0x9ff   : > { %v2758_v14 = vsel %vm1709_vm2, %v7338_v45, 0.0 }
 0xa00   : > { %7339 = vpow2.f32 %v2751_v16  ;;  %2759 = vadd.xlane.f32.xlu0 %v2758_v14  ;;  %v7128_v16 = vld [vmem:[%s9549_s8 + $0xf8] sm:$0xff]  ;;  %v7241_v14 = vld [vmem:[%s9542_s1 + $0x8] ss:$0 sm:$0xff] }
 0xa03   : > { %v2742_v5 = vpop.xlane.xlu1 %2741 }
 0xa04   : > { %v2746_v20 = vsub.f32 %v2728_v1, %v2742_v5 }
 0xa06   : > { %v7340_v8 = vpop.eup %7339  ;;  %v2753_v35 = vmul.f32 1.442695, %v2746_v20  ;;  %v2921_v20 = vadd.f32 %v7241_v14, %v2920_v62 }
 0xa07   : > { %v2761_v24 = vsel %vm1709_vm2, %v7340_v8, 0.0 }
 0xa08   : > { %7341 = vpow2.f32 %v2753_v35  ;;  %2762 = vadd.xlane.f32.xlu1 %v2761_v24  ;;  %v2919_v35 = vadd.f32 %v7241_v14, %v2918_v18  ;;  %v2923_v24 = vpop.f32.mrf.mxu2 }
 0xa0e   : > { %v7342_v48 = vpop.eup %7341 }
 0xa0f   : > { %v2764_v6 = vsel %vm2462_vm9, %v7342_v48, 0.0 }
 0xa10   : > { %2765 = vadd.xlane.f32.xlu2 %v2764_v6  ;;  %v7126_v6 = vld [vmem:[%s9549_s8 + $0xe8] sm:$0xff]  ;;  %v2925_v27 = vpop.f32.mrf.mxu2 }
 0xa11   : > { %v2926_v57 = vadd.f32 %v7241_v14, %v2925_v27 }
 0xa6b   : > { %v2757_v59 = vpop.xlane.xlu2 %2756 }
 0xa6c   : > { %7343 = vrcp.f32 %v2757_v59  ;;  %v7125_v59 = vld [vmem:[%s9549_s8 + $0xe0] sm:$0xff] }
 0xa72   : > { %v7344_v39 = vpop.eup %7343 }
 0xa73   : > { %v2760_v31 = vpop.xlane.xlu0 %2759  ;;  %v2771_v21 = vmul.f32 %v7344_v39, %v7336_v12 }
 0xa74   : > { %7345 = vrcp.f32 %v2760_v31  ;;  %v2924_v31 = vadd.f32 %v7241_v14, %v2923_v24 }
 0xa76   : > { %v3037_v32 = vpack.c.bf16 %v2926_v57, %v2924_v31 }
 0xa7a   : > { %v7346_v26 = vpop.eup %7345 }
 0xa7b   : > { %v2772_v49 = vmul.f32 %v7346_v26, %v7338_v45  ;;  %v2763_v58 = vpop.xlane.xlu1 %2762 }
 0xa7c   : > { %7347 = vrcp.f32 %v2763_v58 }
 0xa7d   : > { %v2775_v36 = vpack.c.bf16 %v2772_v49, %v2771_v21  ;;  %v8600_v49 = vpop.f32.mrf.mxu1 }
 0xa7f   : > { %6342 = vmatmul.msk.bf16.vlgmr.msrb.gmra.mxu3 %vm1709_vm2, %v2775_v36 }
 0xa82   : > { %v7348_v51 = vpop.eup %7347 }
 0xa83   : > { %v2766_v42 = vpop.xlane.xlu2 %2765  ;;  %v2773_v4 = vmul.f32 %v7348_v51, %v7340_v8  ;;  %v7127_v8 = vld [vmem:[%s9549_s8 + $0xf0] sm:$0xff] }
 0xa84   : > { %7349 = vrcp.f32 %v2766_v42 }
 0xa85   : > { %v8602_v58 = vpop.f32.mrf.mxu1 }
 0xa8a   : > { %v7350_v46 = vpop.eup %7349 }
 0xa8b   : > { %v2774_v25 = vmul.f32 %v7350_v46, %v7342_v48  ;;  %v3036_v48 = vpack.c.bf16 %v2921_v20, %v2919_v35 }
 0xa8d   : > { %v2776_v10 = vpack.c.bf16 %v2774_v25, %v2773_v4  ;;  %v8604_v51 = vpop.f32.mrf.mxu1  ;;  %v7243_v4 = vld [vmem:[%s9542_s1 + $0x10] ss:$0 sm:$0xff] }
 0xa8f   : > { %6343 = vmatmul.msk.bf16.gmra.mxu3 %vm1709_vm2, %v2776_v10 }
 0xa95   : > { %v8609_v22 = vpop.f32.mrf.mxu1 }
 0xa9f   : > { %6408 = vmatmul.msk.bf16.vlgmr.msra.gmra.mxu3 %vm575_vm4, %v8382_v13 }
 0xaaf   : > { %6409 = vmatmul.msk.bf16.gmra.mxu3 %vm575_vm4, %v8412_v61 }
 0xb02   : > { %v2797_v44 = vpop.f32.mrf.mxu3 }
 0xb0a   : > { %v2799_v53 = vpop.f32.mrf.mxu3 }
 0xb0b   : > { %v2807_v60 = vpack.c.bf16 %v2799_v53, %v2797_v44 }
 0xb0d   : > { %6350 = vmatmul.msk.bf16.vlgmr.msra.gmra.mxu0 %vm2421_vm8, %v2807_v60 }
 0xb0e   : > { %3226 = vmatpush.bf16.msra.mxu0 %v7124_v34 }
 0xb12   : > { %v2802_v56 = vpop.f32.mrf.mxu3  ;;  %3227 = vmatpush.bf16.msra.mxu0 %v7123_v29 }
 0xb16   : > { %3228 = vmatpush.bf16.msra.mxu0 %v7122_v47 }
 0xb1a   : > { %v2804_v30 = vpop.f32.mrf.mxu3  ;;  %3229 = vmatpush.bf16.msra.mxu0 %v7121_v55  ;;  %v7120_v55 = vld [vmem:[%s9550_s9 + $0x10] sm:$0xff] }
 0xb1b   : > { %v2808_v43 = vpack.c.bf16 %v2804_v30, %v2802_v56  ;;  %3171 = vmatpush.bf16.msrb.mxu3 %v7120_v55 }
 0xb1d   : > { %6351 = vmatmul.msk.bf16.gmra.mxu0 %vm2421_vm8, %v2808_v43 }
 0xb22   : > { %v2972_v28 = vpop.f32.mrf.mxu3 }
 0xb23   : > { %v2973_v11 = vadd.f32 %v7242_v0, %v2972_v28 }
 0xb2a   : > { %v2974_v1 = vpop.f32.mrf.mxu3 }
 0xb2b   : > { %v2975_v15 = vadd.f32 %v7242_v0, %v2974_v1 }
 0xb2d   : > { %6434 = vmatmul.msk.bf16.vlgmr.msrb.gmra.mxu0 %vm575_vm4, %v8382_v13  ;;  %v3038_v45 = vpack.c.bf16 %v2975_v15, %v2973_v11 }
 0xb2f   : > { %v3047_v5 = vsel %vm2421_vm8, %v3038_v45, 0 }
 0xb32   : > { %v2977_v38 = vpop.f32.mrf.mxu3 }
 0xb33   : > { %v2978_v9 = vadd.f32 %v7242_v0, %v2977_v38 }
 0xb3a   : > { %v2979_v3 = vpop.f32.mrf.mxu3 }
 0xb3b   : > { %v2980_v41 = vadd.f32 %v7242_v0, %v2979_v3  ;;  %v7245_v0 = vld [vmem:[%s9542_s1 + $0xd] ss:$0 sm:$0xff] }
 0xb3d   : > { %v3039_v12 = vpack.c.bf16 %v2980_v41, %v2978_v9  ;;  %6435 = vmatmul.msk.bf16.gmra.mxu0 %vm575_vm4, %v8412_v61 }
 0xb3f   : > { %v3050_v63 = vsel %vm2421_vm8, %v3039_v12, 0 }
 0xb40   : > { %3058 = vmatpush.bf16.xpose.msrb.mxu1 %v3050_v63 }
 0xb48   : > { %3059 = vmatpush.bf16.xpose.msrb.mxu1 %v3047_v5 }
 0xb4d   : > { %6472 = vmatmul.msk.bf16.vlgmr.msra.gmra.mxu0 %vm575_vm4, %v8382_v13 }
 0xb4f   : > { %6436 = vmatmul.msk.bf16.vlgmr.msrb.gmra.mxu1 %vm2421_vm8, %v3036_v48 }
 0xb50   : > { %3280 = vmatpush.bf16.msra.mxu1 %v7128_v16 }
 0xb54   : > { %3281 = vmatpush.bf16.msra.mxu1 %v7127_v8 }
 0xb58   : > { %3282 = vmatpush.bf16.msra.mxu1 %v7126_v6 }
 0xb5c   : > { %3283 = vmatpush.bf16.msra.mxu1 %v7125_v59 }
 0xb5d   : > { %6473 = vmatmul.msk.bf16.gmra.mxu0 %vm575_vm4, %v8412_v61 }
 0xb5f   : > { %6437 = vmatmul.msk.bf16.gmra.mxu1 %vm2421_vm8, %v3037_v32 }
 0xb6f   : > { %6498 = vmatmul.msk.bf16.vlgmr.msra.gmra.mxu1 %vm575_vm4, %v8382_v13 }
 0xb7f   : > { %6499 = vmatmul.msk.bf16.gmra.mxu1 %vm575_vm4, %v8412_v61 }
 0xb8a   : > { %v8592_v39 = vpop.f32.mrf.mxu0 }
 0xb92   : > { %v8594_v33 = vpop.f32.mrf.mxu0 }
 0xb9a   : > { %v8596_v26 = vpop.f32.mrf.mxu0 }
 0xba2   : > { %v8598_v21 = vpop.f32.mrf.mxu0 }
 0xbaa   : > { %v3026_v36 = vpop.f32.mrf.mxu0 }
 0xbab   : > { %v3027_v53 = vadd.f32 %v7243_v4, %v3026_v36 }
 0xbb2   : > { %v3028_v42 = vpop.f32.mrf.mxu0 }
 0xbb3   : > { %v3029_v17 = vadd.f32 %v7243_v4, %v3028_v42 }
 0xbb5   : > { %v3117_v60 = vpack.c.bf16 %v3029_v17, %v3027_v53  ;;  %v7131_v17 = vld [vmem:[%s9549_s8 + $0x170] sm:$0xff]  ;;  %v7130_v53 = vld [vmem:[%s9549_s8 + $0x168] sm:$0xff] }
 0xbba   : > { %v3031_v46 = vpop.f32.mrf.mxu0 }
 0xbbb   : > { %v3032_v10 = vadd.f32 %v7243_v4, %v3031_v46 }
 0xbc2   : > { %v3033_v25 = vpop.f32.mrf.mxu0 }
 0xbc3   : > { %v3034_v23 = vadd.f32 %v7243_v4, %v3033_v25 }
 0xbc5   : > { %v3118_v44 = vpack.c.bf16 %v3034_v23, %v3032_v10 }
 0xbc7   : > { %v3126_v54 = vand.u32 %v3118_v44, %v7766_v19  ;;  %v7132_v44 = vld [vmem:[%s9549_s8 + $0x178] sm:$0xff] }
 0xbc9   : > { %3134 = vmatpush.bf16.msrb.mxu2 %v3126_v54 }
 0xbcc   : > { %v3061_v40 = vpop.f32.mrf.mxu1 }
 0xbcd   : > { %3135 = vmatpush.bf16.msrb.mxu2 %v3117_v60  ;;  %v3071_v56 = vsel %vm1709_vm2, %v3061_v40, -inf }
 0xbce   : > { %3072 = vmax.xlane.f32.xlu0 %v3071_v56 }
 0xbd1   : > { %3334 = vmatpush.bf16.msra.mxu2 %v7132_v44  ;;  %v2870_v44 = vadd.f32 %v8604_v51, %v8596_v26 }
 0xbd4   : > { %v3063_v30 = vpop.f32.mrf.mxu1 }
 0xbd5   : > { %v3074_v43 = vsel %vm1709_vm2, %v3063_v30, -inf  ;;  %3335 = vmatpush.bf16.msra.mxu2 %v7131_v17 }
 0xbd6   : > { %3075 = vmax.xlane.f32.xlu1 %v3074_v43 }
 0xbd9   : > { %3336 = vmatpush.bf16.msra.mxu2 %v7130_v53 }
 0xbdc   : > { %v3066_v34 = vpop.f32.mrf.mxu1 }
 0xbdd   : > { %v3077_v29 = vsel %vm1709_vm2, %v3066_v34, -inf }
 0xbde   : > { %3078 = vmax.xlane.f32.xlu2 %v3077_v29 }
 0xbe4   : > { %v3068_v28 = vpop.f32.mrf.mxu1 }
 0xbe5   : > { %v3080_v47 = vsel %vm2462_vm9, %v3068_v28, -inf }
 0xbe6   : > { %3081 = vmax.xlane.f32.xlu0 %v3080_v47 }
 0xbec   : > { %v3285_v1 = vpop.f32.mrf.mxu1 }
 0xbed   : > { %v3286_v11 = vadd.f32 %v7245_v0, %v3285_v1 }
 0xbf4   : > { %v3287_v38 = vpop.f32.mrf.mxu1 }
 0xbf5   : > { %v3288_v15 = vadd.f32 %v7245_v0, %v3287_v38 }
 0xbf7   : > { %v3351_v62 = vpack.c.bf16 %v3288_v15, %v3286_v11 }
 0xbf9   : > { %v3360_v45 = vsel %vm2421_vm8, %v3351_v62, 0 }
 0xbfc   : > { %v3290_v18 = vpop.f32.mrf.mxu1 }
 0xbfd   : > { %v3291_v9 = vadd.f32 %v7245_v0, %v3290_v18 }
 0xc04   : > { %v3292_v3 = vpop.f32.mrf.mxu1 }
 0xc05   : > { %v3293_v41 = vadd.f32 %v7245_v0, %v3292_v3 }
 0xc07   : > { %v3352_v12 = vpack.c.bf16 %v3293_v41, %v3291_v9 }
 0xc09   : > { %v3363_v63 = vsel %vm2421_vm8, %v3352_v12, 0  ;;  %v3231_v12 = vpop.f32.mrf.mxu0 }
 0xc0a   : > { %3371 = vmatpush.bf16.xpose.msra.mxu3 %v3363_v63 }
 0xc11   : > { %v3233_v11 = vpop.f32.mrf.mxu0 }
 0xc12   : > { %3372 = vmatpush.bf16.xpose.msra.mxu3 %v3360_v45 }
 0xc41   : > { %v3073_v16 = vpop.xlane.xlu0 %3072 }
 0xc42   : > { %v3083_v14 = vsub.f32 %v3061_v40, %v3073_v16  ;;  %v7129_v40 = vld [vmem:[%s9549_s8 + $0x160] sm:$0xff] }
 0xc43   : > { %3337 = vmatpush.bf16.msra.mxu2 %v7129_v40 }
 0xc44   : > { %v3087_v5 = vmul.f32 1.442695, %v3083_v14 }
 0xc46   : > { %7351 = vpow2.f32 %v3087_v5 }
 0xc49   : > { %v3076_v20 = vpop.xlane.xlu1 %3075 }
 0xc4a   : > { %v3084_v8 = vsub.f32 %v3063_v30, %v3076_v20 }
 0xc4c   : > { %v7352_v35 = vpop.eup %7351  ;;  %v3089_v24 = vmul.f32 1.442695, %v3084_v8 }
 0xc4d   : > { %v3095_v48 = vsel %vm1709_vm2, %v7352_v35, 0.0 }
 0xc4e   : > { %7353 = vpow2.f32 %v3089_v24  ;;  %3096 = vadd.xlane.f32.xlu1 %v3095_v48  ;;  %v7246_v48 = vld [vmem:[%s9542_s1 + $0x11] ss:$0 sm:$0xff] }
 0xc51   : > { %v3079_v6 = vpop.xlane.xlu2 %3078 }
 0xc52   : > { %v3085_v59 = vsub.f32 %v3066_v34, %v3079_v6 }
 0xc54   : > { %v7354_v27 = vpop.eup %7353  ;;  %v3091_v57 = vmul.f32 1.442695, %v3085_v59 }
 0xc55   : > { %v3098_v31 = vsel %vm1709_vm2, %v7354_v27, 0.0 }
 0xc56   : > { %7355 = vpow2.f32 %v3091_v57  ;;  %3099 = vadd.xlane.f32.xlu2 %v3098_v31 }
 0xc59   : > { %v3082_v32 = vpop.xlane.xlu0 %3081 }
 0xc5a   : > { %v3086_v36 = vsub.f32 %v3068_v28, %v3082_v32 }
 0xc5c   : > { %v7356_v42 = vpop.eup %7355  ;;  %v3093_v46 = vmul.f32 1.442695, %v3086_v36 }
 0xc5d   : > { %v3101_v4 = vsel %vm1709_vm2, %v7356_v42, 0.0 }
 0xc5e   : > { %7357 = vpow2.f32 %v3093_v46  ;;  %3102 = vadd.xlane.f32.xlu0 %v3101_v4  ;;  %v2865_v4 = vadd.f32 %v8600_v49, %v8592_v39 }
 0xc64   : > { %v7358_v25 = vpop.eup %7357 }
 0xc65   : > { %v3104_v10 = vsel %vm2462_vm9, %v7358_v25, 0.0 }
 0xc66   : > { %3105 = vadd.xlane.f32.xlu1 %v3104_v10 }
 0xcc1   : > { %v3097_v23 = vpop.xlane.xlu1 %3096 }
 0xcc2   : > { %7359 = vrcp.f32 %v3097_v23 }
 0xcc8   : > { %v7360_v60 = vpop.eup %7359 }
 0xcc9   : > { %v3100_v54 = vpop.xlane.xlu2 %3099  ;;  %v3111_v30 = vmul.f32 %v7360_v60, %v7352_v35 }
 0xcca   : > { %7361 = vrcp.f32 %v3100_v54 }
 0xcd0   : > { %v7362_v56 = vpop.eup %7361 }
 0xcd1   : > { %v3112_v43 = vmul.f32 %v7362_v56, %v7354_v27  ;;  %v3103_v29 = vpop.xlane.xlu0 %3102 }
 0xcd2   : > { %7363 = vrcp.f32 %v3103_v29 }
 0xcd3   : > { %v3115_v34 = vpack.c.bf16 %v3112_v43, %v3111_v30 }
 0xcd5   : > { %6438 = vmatmul.msk.bf16.vlgmr.msrb.gmra.mxu2 %vm1709_vm2, %v3115_v34 }
 0xcd8   : > { %v7364_v47 = vpop.eup %7363 }
 0xcd9   : > { %v3106_v28 = vpop.xlane.xlu1 %3105  ;;  %v3113_v1 = vmul.f32 %v7364_v47, %v7356_v42 }
 0xcda   : > { %7365 = vrcp.f32 %v3106_v28 }
 0xce0   : > { %v7366_v55 = vpop.eup %7365 }
 0xce1   : > { %v3114_v38 = vmul.f32 %v7366_v55, %v7358_v25 }
 0xce3   : > { %v3116_v18 = vpack.c.bf16 %v3114_v38, %v3113_v1 }
 0xce5   : > { %6439 = vmatmul.msk.bf16.gmra.mxu2 %vm1709_vm2, %v3116_v18 }
 0xcf5   : > { %6524 = vmatmul.msk.bf16.vlgmr.msra.gmra.mxu2 %vm575_vm4, %v8382_v13  ;;  %v7244_v13 = vld [vmem:[%s9542_s1 + $0x9] ss:$0 sm:$0xff] }
 0xcf6   : > { %v3234_v45 = vadd.f32 %v7244_v13, %v3233_v11  ;;  %v3232_v16 = vadd.f32 %v7244_v13, %v3231_v12 }
 0xcf8   : > { %v3349_v5 = vpack.c.bf16 %v3234_v45, %v3232_v16 }
 0xd05   : > { %6525 = vmatmul.msk.bf16.gmra.mxu2 %vm575_vm4, %v8412_v61  ;;  %v3236_v61 = vpop.f32.mrf.mxu0 }
 0xd06   : > { %v3237_v24 = vadd.f32 %v7244_v13, %v3236_v61  ;;  %v7133_v61 = vld [vmem:[%s9550_s9 + $0x18] sm:$0xff] }
 0xd07   : > { %3484 = vmatpush.bf16.msrb.mxu1 %v7133_v61 }
 0xd0d   : > { %v3238_v8 = vpop.f32.mrf.mxu0 }
 0xd0e   : > { %v3239_v35 = vadd.f32 %v7244_v13, %v3238_v8 }
 0xd10   : > { %v3350_v59 = vpack.c.bf16 %v3239_v35, %v3237_v24 }
 0xd58   : > { %v3137_v0 = vpop.f32.mrf.mxu2 }
 0xd60   : > { %v3139_v3 = vpop.f32.mrf.mxu2 }
 0xd61   : > { %v3147_v9 = vpack.c.bf16 %v3139_v3, %v3137_v0 }
 0xd63   : > { %6446 = vmatmul.msk.bf16.vlgmr.msrb.gmra.mxu3 %vm2421_vm8, %v3147_v9 }
 0xd68   : > { %v3142_v41 = vpop.f32.mrf.mxu2 }
 0xd70   : > { %v3144_v15 = vpop.f32.mrf.mxu2 }
 0xd71   : > { %v3148_v63 = vpack.c.bf16 %v3144_v15, %v3142_v41 }
 0xd73   : > { %6447 = vmatmul.msk.bf16.gmra.mxu3 %vm2421_vm8, %v3148_v63 }
 0xd78   : > { %v3339_v62 = vpop.f32.mrf.mxu2 }
 0xd79   : > { %v3340_v42 = vadd.f32 %v7246_v48, %v3339_v62 }
 0xd80   : > { %v3341_v14 = vpop.f32.mrf.mxu2 }
 0xd81   : > { %v3342_v32 = vadd.f32 %v7246_v48, %v3341_v14 }
 0xd83   : > { %6526 = vmatmul.msk.bf16.vlgmr.msra.gmra.mxu3 %vm2421_vm8, %v3349_v5  ;;  %v3430_v46 = vpack.c.bf16 %v3342_v32, %v3340_v42 }
 0xd88   : > { %v3344_v20 = vpop.f32.mrf.mxu2 }
 0xd89   : > { %v3345_v27 = vadd.f32 %v7246_v48, %v3344_v20 }
 0xd90   : > { %v3346_v6 = vpop.f32.mrf.mxu2 }
 0xd91   : > { %v3347_v57 = vadd.f32 %v7246_v48, %v3346_v6 }
 0xd93   : > { %v3431_v31 = vpack.c.bf16 %v3347_v57, %v3345_v27  ;;  %6527 = vmatmul.msk.bf16.gmra.mxu3 %vm2421_vm8, %v3350_v59 }
 0xd95   : > { %v3439_v36 = vand.u32 %v3431_v31, %v7766_v19 }
 0xd97   : > { %3447 = vmatpush.bf16.msrb.mxu0 %v3439_v36 }
 0xd9b   : > { %3448 = vmatpush.bf16.msrb.mxu0 %v3430_v46 }
 0xde6   : > { %v3173_v25 = vpop.f32.mrf.mxu3 }
 0xde7   : > { %v8659_v10 = vadd.f32 %v3173_v25, %v2865_v4 }
 0xdee   : > { %v8661_v23 = vpop.f32.mrf.mxu3 }
 0xdf6   : > { %v3178_v17 = vpop.f32.mrf.mxu3 }
 0xdf7   : > { %v8665_v54 = vadd.f32 %v3178_v17, %v2870_v44  ;;  %v7247_v17 = vld [vmem:[%s9542_s1 + $0x12] ss:$0 sm:$0xff] }
 0xdfe   : > { %v8667_v53 = vpop.f32.mrf.mxu3 }
 0xe06   : > { %v3374_v60 = vpop.f32.mrf.mxu3 }
 0xe07   : > { %v3384_v40 = vsel %vm1709_vm2, %v3374_v60, -inf }
 0xe08   : > { %3385 = vmax.xlane.f32.xlu2 %v3384_v40 }
 0xe0e   : > { %v3376_v56 = vpop.f32.mrf.mxu3 }
 0xe0f   : > { %v3387_v39 = vsel %vm1709_vm2, %v3376_v56, -inf }
 0xe10   : > { %3388 = vmax.xlane.f32.xlu0 %v3387_v39  ;;  %v2867_v39 = vadd.f32 %v8602_v58, %v8594_v33 }
 0xe16   : > { %v3379_v49 = vpop.f32.mrf.mxu3 }
 0xe17   : > { %v3390_v30 = vsel %vm1709_vm2, %v3379_v49, -inf }
 0xe18   : > { %3391 = vmax.xlane.f32.xlu1 %v3390_v30  ;;  %v3184_v30 = vadd.f32 %v8661_v23, %v2867_v39 }
 0xe1e   : > { %v3381_v43 = vpop.f32.mrf.mxu3 }
 0xe1f   : > { %v3393_v26 = vsel %vm2462_vm9, %v3381_v43, -inf }
 0xe20   : > { %3394 = vmax.xlane.f32.xlu2 %v3393_v26 }
 0xe7b   : > { %v3386_v51 = vpop.xlane.xlu2 %3385 }
 0xe7c   : > { %v3396_v34 = vsub.f32 %v3374_v60, %v3386_v51 }
 0xe7e   : > { %v3400_v29 = vmul.f32 1.442695, %v3396_v34 }
 0xe80   : > { %7367 = vpow2.f32 %v3400_v29 }
 0xe83   : > { %v3389_v28 = vpop.xlane.xlu0 %3388 }
 0xe84   : > { %v3397_v47 = vsub.f32 %v3376_v56, %v3389_v28 }
 0xe86   : > { %v7368_v55 = vpop.eup %7367  ;;  %v3402_v1 = vmul.f32 1.442695, %v3397_v47 }
 0xe87   : > { %v3408_v38 = vsel %vm1709_vm2, %v7368_v55, 0.0 }
 0xe88   : > { %7369 = vpow2.f32 %v3402_v1  ;;  %3409 = vadd.xlane.f32.xlu0 %v3408_v38 }
 0xe8b   : > { %v3392_v18 = vpop.xlane.xlu1 %3391 }
 0xe8c   : > { %v3398_v0 = vsub.f32 %v3379_v49, %v3392_v18 }
 0xe8e   : > { %v7370_v3 = vpop.eup %7369  ;;  %v3404_v9 = vmul.f32 1.442695, %v3398_v0 }
 0xe8f   : > { %v3411_v41 = vsel %vm1709_vm2, %v7370_v3, 0.0 }
 0xe90   : > { %7371 = vpow2.f32 %v3404_v9  ;;  %3412 = vadd.xlane.f32.xlu1 %v3411_v41 }
 0xe93   : > { %v3395_v12 = vpop.xlane.xlu2 %3394 }
 0xe94   : > { %v3399_v15 = vsub.f32 %v3381_v43, %v3395_v12 }
 0xe96   : > { %v7372_v63 = vpop.eup %7371  ;;  %v3406_v11 = vmul.f32 1.442695, %v3399_v15 }
 0xe97   : > { %v3414_v62 = vsel %vm1709_vm2, %v7372_v63, 0.0 }
 0xe98   : > { %7373 = vpow2.f32 %v3406_v11  ;;  %3415 = vadd.xlane.f32.xlu2 %v3414_v62 }
 0xe9e   : > { %v7374_v13 = vpop.eup %7373 }
 0xe9f   : > { %v3417_v45 = vsel %vm2462_vm9, %v7374_v13, 0.0 }
 0xea0   : > { %3418 = vadd.xlane.f32.xlu0 %v3417_v45 }
 0xefb   : > { %v3410_v16 = vpop.xlane.xlu0 %3409 }
 0xefc   : > { %7375 = vrcp.f32 %v3410_v16 }
 0xf02   : > { %v7376_v5 = vpop.eup %7375 }
 0xf03   : > { %v3413_v14 = vpop.xlane.xlu1 %3412  ;;  %v3424_v8 = vmul.f32 %v7376_v5, %v7368_v55 }
 0xf04   : > { %7377 = vrcp.f32 %v3413_v14 }
 0xf0a   : > { %v7378_v20 = vpop.eup %7377 }
 0xf0b   : > { %v3425_v35 = vmul.f32 %v7378_v20, %v7370_v3  ;;  %v3416_v48 = vpop.xlane.xlu2 %3415  ;;  %v7137_v20 = vld [vmem:[%s9551_s10 + $0x18] sm:$0xff] }
 0xf0c   : > { %7379 = vrcp.f32 %v3416_v48  ;;  %3656 = vmatpush.bf16.msrb.mxu2 %v7137_v20  ;;  %v7136_v48 = vld [vmem:[%s9551_s10 + $0x10] sm:$0xff] }
 0xf0d   : > { %v3428_v24 = vpack.c.bf16 %v3425_v35, %v3424_v8 }
 0xf0f   : > { %6528 = vmatmul.msk.bf16.vlgmr.msrb.gmra.mxu0 %vm1709_vm2, %v3428_v24 }
 0xf10   : > { %3657 = vmatpush.bf16.msrb.mxu2 %v7136_v48 }
 0xf12   : > { %v7380_v59 = vpop.eup %7379 }
 0xf13   : > { %v3419_v6 = vpop.xlane.xlu0 %3418  ;;  %v3426_v57 = vmul.f32 %v7380_v59, %v7372_v63 }
 0xf14   : > { %7381 = vrcp.f32 %v3419_v6  ;;  %v7135_v6 = vld [vmem:[%s9551_s10 + $0x8] sm:$0xff] }
 0xf15   : > { %3658 = vmatpush.bf16.msrb.mxu2 %v7135_v6  ;;  %v7145_v6 = vld [vmem:[%s9552_s11 + $0x38] sm:$0xff] }
 0xf16   : > { %3915 = vmatpush.bf16.msrb.mxu3 %v7145_v6 }
 0xf1a   : > { %v7382_v27 = vpop.eup %7381 }
 0xf1b   : > { %v3427_v31 = vmul.f32 %v7382_v27, %v7374_v13 }
 0xf1d   : > { %v3429_v32 = vpack.c.bf16 %v3427_v31, %v3426_v57 }
 0xf1f   : > { %6529 = vmatmul.msk.bf16.gmra.mxu0 %vm1709_vm2, %v3429_v32  ;;  %v7134_v32 = vld [vmem:[%s9551_s10] sm:$0xff] }
 0xf20   : > { %3659 = vmatpush.bf16.msrb.mxu2 %v7134_v32 }
 0xf8c   : > { %v3450_v36 = vpop.f32.mrf.mxu0 }
 0xf94   : > { %v3452_v42 = vpop.f32.mrf.mxu0 }
 0xf95   : > { %v3460_v46 = vpack.c.bf16 %v3452_v42, %v3450_v36 }
 0xf97   : > { %6536 = vmatmul.msk.bf16.vlgmr.msrb.gmra.mxu1 %vm2421_vm8, %v3460_v46 }
 0xf9c   : > { %v3455_v4 = vpop.f32.mrf.mxu0 }
 0xfa4   : > { %v3457_v25 = vpop.f32.mrf.mxu0 }
 0xfa5   : > { %v3461_v44 = vpack.c.bf16 %v3457_v25, %v3455_v4 }
 0xfa7   : > { %6537 = vmatmul.msk.bf16.gmra.mxu1 %vm2421_vm8, %v3461_v44 }
0x1014   : > { %v3486_v60 = vpop.f32.mrf.mxu1 }
0x1015   : > { %v3496_v40 = vadd.f32 %v3486_v60, %v8659_v10 }
0x1017   : > { %v3502_v56 = vadd.f32 %v7247_v17, %v3496_v40 }
0x1019   : > { %v3506_v49 = vadd.f32 %v3502_v56, %v8374_v37  ;;  %v2872_v37 = vadd.f32 %v8609_v22, %v8598_v21 }
0x101b   : > { %v3512_v43 = vsel %vm575_vm4, %v3506_v49, 0.0  ;;  %v3186_v58 = vadd.f32 %v8667_v53, %v2872_v37 }
0x101c   : > { %3513 = vadd.xlane.f32.xlu1 %v3512_v43  ;;  %v3488_v26 = vpop.f32.mrf.mxu1 }
0x101d   : > { %v3497_v51 = vadd.f32 %v3488_v26, %v3184_v30 }
0x101f   : > { %v3503_v34 = vadd.f32 %v7247_v17, %v3497_v51 }
0x1021   : > { %v3507_v29 = vadd.f32 %v3503_v34, %v8377_v52 }
0x1023   : > { %v3515_v28 = vsel %vm575_vm4, %v3507_v29, 0.0 }
0x1024   : > { %3516 = vadd.xlane.f32.xlu2 %v3515_v28  ;;  %v3491_v10 = vpop.f32.mrf.mxu1 }
0x1025   : > { %v3498_v47 = vadd.f32 %v3491_v10, %v8665_v54 }
0x1027   : > { %v3504_v55 = vadd.f32 %v7247_v17, %v3498_v47 }
0x1029   : > { %v3508_v33 = vadd.f32 %v3504_v55, %v8405_v50 }
0x102b   : > { %v3518_v23 = vsel %vm575_vm4, %v3508_v33, 0.0 }
0x102c   : > { %v3493_v1 = vpop.f32.mrf.mxu1  ;;  %3519 = vadd.xlane.f32.xlu0 %v3518_v23 }
0x102d   : > { %v3499_v38 = vadd.f32 %v3493_v1, %v3186_v58  ;;  %v7249_v58 = vld [vmem:[%s9542_s1 + $0x14] ss:$0 sm:$0xff] }
0x102f   : > { %v3505_v52 = vadd.f32 %v7247_v17, %v3499_v38 }
0x1031   : > { %v3509_v18 = vadd.f32 %v3505_v52, %v8408_v7 }
0x1033   : > { %v3521_v0 = vsel %vm589_vm5, %v3509_v18, 0.0 }
0x1034   : > { %3522 = vadd.xlane.f32.xlu1 %v3521_v0 }
0x108f   : > { %v3514_v54 = vpop.xlane.xlu1 %3513 }
0x1090   : > { %v3524_v3 = vmul.f32 %v3514_v54, %v8051_v2 }
0x1092   : > { %v3528_v9 = vsub.f32 %v3506_v49, %v3524_v3 }
0x1094   : > { %v3532_v21 = vmul.f32 %v3528_v9, %v3528_v9 }
0x1096   : > { %v3536_v50 = vsel %vm575_vm4, %v3532_v21, 0.0 }
0x1097   : > { %3537 = vadd.xlane.f32.xlu2 %v3536_v50  ;;  %v3517_v22 = vpop.xlane.xlu2 %3516 }
0x1098   : > { %v3525_v53 = vmul.f32 %v3517_v22, %v8051_v2 }
0x109a   : > { %v8706_v41 = vsub.f32 %v3507_v29, %v3525_v53  ;;  %v7248_v29 = vld [vmem:[%s9542_s1 + $0x13] ss:$0 sm:$0xff] }
0x109c   : > { %v3533_v12 = vmul.f32 %v8706_v41, %v8706_v41 }
0x109e   : > { %v3539_v7 = vsel %vm575_vm4, %v3533_v12, 0.0 }
0x109f   : > { %3540 = vadd.xlane.f32.xlu0 %v3539_v7  ;;  %v3520_v15 = vpop.xlane.xlu0 %3519 }
0x10a0   : > { %v3526_v63 = vmul.f32 %v3520_v15, %v8051_v2 }
0x10a2   : > { %v8712_v11 = vsub.f32 %v3508_v33, %v3526_v63 }
0x10a4   : > { %v3534_v62 = vmul.f32 %v8712_v11, %v8712_v11 }
0x10a6   : > { %v3542_v13 = vsel %vm575_vm4, %v3534_v62, 0.0 }
0x10a7   : > { %v3523_v45 = vpop.xlane.xlu1 %3522  ;;  %3543 = vadd.xlane.f32.xlu1 %v3542_v13 }
0x10a8   : > { %v3527_v16 = vmul.f32 %v3523_v45, %v8051_v2 }
0x10aa   : > { %v8718_v61 = vsub.f32 %v3509_v18, %v3527_v16 }
0x10ac   : > { %v3535_v14 = vmul.f32 %v8718_v61, %v8718_v61 }
0x10ae   : > { %v3545_v5 = vsel %vm589_vm5, %v3535_v14, 0.0 }
0x10af   : > { %3546 = vadd.xlane.f32.xlu2 %v3545_v5 }
0x110a   : > { %v3538_v8 = vpop.xlane.xlu2 %3537 }
0x110b   : > { %v3548_v35 = vmul.f32 %v3538_v8, %v8051_v2 }
0x110d   : > { %v3552_v24 = vadd.f32 1e-05, %v3548_v35 }
0x110f   : > { %7383 = vrsqrt.f32 %v3552_v24  ;;  %vm3562_vm11 = vweird.f32 %v3552_v24 }
0x1112   : > { %v3541_v59 = vpop.xlane.xlu0 %3540 }
0x1113   : > { %v3549_v27 = vmul.f32 %v3541_v59, %v8051_v2 }
0x1115   : > { %v7384_v57 = vpop.eup %7383  ;;  %v3553_v31 = vadd.f32 1e-05, %v3549_v27 }
0x1116   : > { %v3557_v36 = vmul.f32 %v7384_v57, %v3552_v24  ;;  %vm3563_vm10 = vweird.f32 %v7384_v57 }
0x1117   : > { %7385 = vrsqrt.f32 %v3553_v31  ;;  %vm3564_vm12 = vmor %vm3562_vm11, %vm3563_vm10  ;;  %vm3572_vm14 = vweird.f32 %v3553_v31 }
0x1118   : > { %v3558_v42 = vmul.f32 %v7384_v57, %v3557_v36 }
0x111a   : > { %v3559_v46 = vmul.f32 0.5, %v3558_v42  ;;  %v3544_v4 = vpop.xlane.xlu1 %3543  ;;  %v7144_v42 = vld [vmem:[%s9552_s11 + $0x30] sm:$0xff] }
0x111b   : > { %v3550_v25 = vmul.f32 %v3544_v4, %v8051_v2  ;;  %3916 = vmatpush.bf16.msrb.mxu3 %v7144_v42 }
0x111c   : > { %v3560_v44 = vsub.f32 1.5, %v3559_v46 }
0x111d   : > { %v7386_v17 = vpop.eup %7385  ;;  %v3554_v60 = vadd.f32 1e-05, %v3550_v25 }
0x111e   : > { %v3561_v40 = vmul.f32 %v7384_v57, %v3560_v44  ;;  %v3567_v56 = vmul.f32 %v7386_v17, %v3553_v31  ;;  %vm3573_vm13 = vweird.f32 %v7386_v17 }
0x111f   : > { %7387 = vrsqrt.f32 %v3554_v60  ;;  %vm3574_vm15 = vmor %vm3572_vm14, %vm3573_vm13  ;;  %vm3582_vm1 = vweird.f32 %v3554_v60 }
0x1120   : > { %v3568_v39 = vmul.f32 %v7386_v17, %v3567_v56  ;;  %v3565_v49 = vsel %vm3564_vm12, %v7384_v57, %v3561_v40  ;;  %v7143_v40 = vld [vmem:[%s9552_s11 + $0x28] sm:$0xff] }
0x1121   : > { %v3596_v28 = vmul.f32 %v3565_v49, %v3528_v9  ;;  %3917 = vmatpush.bf16.msrb.mxu3 %v7143_v40 }
0x1122   : > { %v3569_v30 = vmul.f32 0.5, %v3568_v39  ;;  %v3547_v43 = vpop.xlane.xlu2 %3546 }
0x1123   : > { %v3551_v26 = vmul.f32 %v3547_v43, %v8051_v2  ;;  %v3601_v23 = vmul.f32 %v7248_v29, %v3596_v28 }
0x1124   : > { %v3570_v51 = vsub.f32 1.5, %v3569_v30 }
0x1125   : > { %v7388_v34 = vpop.eup %7387  ;;  %v3555_v10 = vadd.f32 1e-05, %v3551_v26  ;;  %v8746_v54 = vadd.f32 %v7249_v58, %v3601_v23 }
0x1126   : > { %v3571_v47 = vmul.f32 %v7386_v17, %v3570_v51  ;;  %v3577_v55 = vmul.f32 %v7388_v34, %v3554_v60  ;;  %vm3583_vm0 = vweird.f32 %v7388_v34 }
0x1127   : > { %7389 = vrsqrt.f32 %v3555_v10  ;;  %vm3584_vm3 = vmor %vm3582_vm1, %vm3583_vm0  ;;  %vm3592_vm7 = vweird.f32 %v3555_v10 }
0x1128   : > { %v3575_v37 = vsel %vm3574_vm15, %v7386_v17, %v3571_v47  ;;  %v3578_v33 = vmul.f32 %v7388_v34, %v3577_v55 }
0x1129   : > { %v3597_v1 = vmul.f32 %v3575_v37, %v8706_v41 }
0x112a   : > { %v3579_v38 = vmul.f32 0.5, %v3578_v33 }
0x112b   : > { %v3602_v52 = vmul.f32 %v7248_v29, %v3597_v1 }
0x112c   : > { %v3580_v18 = vsub.f32 1.5, %v3579_v38 }
0x112d   : > { %v7390_v0 = vpop.eup %7389  ;;  %v8748_v3 = vadd.f32 %v7249_v58, %v3602_v52 }
0x112e   : > { %v3581_v9 = vmul.f32 %v7388_v34, %v3580_v18  ;;  %v3587_v21 = vmul.f32 %v7390_v0, %v3555_v10  ;;  %vm3593_vm6 = vweird.f32 %v7390_v0  ;;  %v7142_v10 = vld [vmem:[%s9552_s11 + $0x20] sm:$0xff]  ;;  %v7141_v18 = vld [vmem:[%s9552_s11 + $0x18] sm:$0xff] }
0x112f   : > { %v3610_v50 = vpack.c.bf16 %v8748_v3, %v8746_v54  ;;  %vm3594_vm10 = vmor %vm3592_vm7, %vm3593_vm6  ;;  %3918 = vmatpush.bf16.msrb.mxu3 %v7142_v10 }
0x1130   : > { %v3588_v22 = vmul.f32 %v7390_v0, %v3587_v21  ;;  %v3585_v53 = vsel %vm3584_vm3, %v7388_v34, %v3581_v9 }
0x1131   : > { %6554 = vmatmul.msk.bf16.vlgmr.msrb.gmra.mxu2 %vm575_vm4, %v3610_v50  ;;  %v3598_v7 = vmul.f32 %v3585_v53, %v8712_v11  ;;  %v7250_v11 = vld [vmem:[%s9542_s1 + $0x15] ss:$0 sm:$0xff] }
0x1132   : > { %v3589_v41 = vmul.f32 0.5, %v3588_v22 }
0x1133   : > { %v3603_v13 = vmul.f32 %v7248_v29, %v3598_v7  ;;  %3919 = vmatpush.bf16.msrb.mxu3 %v7141_v18 }
0x1134   : > { %v3590_v12 = vsub.f32 1.5, %v3589_v41 }
0x1135   : > { %v8755_v16 = vadd.f32 %v7249_v58, %v3603_v13 }
0x1136   : > { %v3591_v15 = vmul.f32 %v7390_v0, %v3590_v12 }
0x1138   : > { %v3595_v63 = vsel %vm3594_vm10, %v7390_v0, %v3591_v15 }
0x1139   : > { %v3599_v62 = vmul.f32 %v3595_v63, %v8718_v61  ;;  %v7140_v63 = vld [vmem:[%s9552_s11 + $0x10] sm:$0xff] }
0x113a   : > { %3920 = vmatpush.bf16.msrb.mxu3 %v7140_v63 }
0x113b   : > { %v3604_v45 = vmul.f32 %v7248_v29, %v3599_v62 }
0x113d   : > { %v8757_v14 = vadd.f32 %v7249_v58, %v3604_v45 }
0x113f   : > { %v3611_v5 = vpack.c.bf16 %v8757_v14, %v8755_v16 }
0x1141   : > { %6555 = vmatmul.msk.bf16.gmra.mxu2 %vm575_vm4, %v3611_v5 }
0x11b4   : > { %v3661_v20 = vpop.f32.mrf.mxu2 }
0x11b5   : > { %v8765_v8 = vadd.f32 %v7250_v11, %v3661_v20 }
0x11b7   : > { %v8768_v61 = vmul.f32 0.70710677, %v8765_v8 }
0x11b9   : > { %v3679_v35 = vmul.f32 %v8768_v61, %v8768_v61 }
0x11bb   : > { %v8772_v24 = vmin.f32 %v3679_v35, 16.0 }
0x11bc   : > { %v3663_v48 = vpop.f32.mrf.mxu2 }
0x11bd   : > { %v3681_v59 = vmul.f32 2.1237322e-06, %v8772_v24  ;;  %v3692_v27 = vmul.f32 3.8918573e-05, %v8772_v24  ;;  %v8779_v57 = vadd.f32 %v7250_v11, %v3663_v48  ;;  %v7139_v48 = vld [vmem:[%s9552_s11 + $0x8] sm:$0xff] }
0x11be   : > { %3921 = vmatpush.bf16.msrb.mxu3 %v7139_v48 }
0x11bf   : > { %v3682_v31 = vadd.f32 0.00028619796, %v3681_v59  ;;  %v3693_v32 = vadd.f32 0.001143296, %v3692_v27  ;;  %v8782_v36 = vmul.f32 0.70710677, %v8779_v57 }
0x11c1   : > { %v3694_v46 = vmul.f32 %v3693_v32, %v8772_v24  ;;  %v3683_v4 = vmul.f32 %v3682_v31, %v8772_v24  ;;  %v3719_v25 = vmul.f32 %v8782_v36, %v8782_v36 }
0x11c3   : > { %v3695_v44 = vadd.f32 0.014752088, %v3694_v46  ;;  %v8791_v17 = vmin.f32 %v3719_v25, 16.0  ;;  %v3684_v49 = vadd.f32 0.0036580483, %v3683_v4 }
0x11c4   : > { %v3666_v60 = vpop.f32.mrf.mxu2 }
0x11c5   : > { %v3696_v56 = vmul.f32 %v3695_v44, %v8772_v24  ;;  %v8797_v39 = vadd.f32 %v7250_v11, %v3666_v60  ;;  %v3721_v30 = vmul.f32 2.1237322e-06, %v8791_v17  ;;  %v3732_v43 = vmul.f32 3.8918573e-05, %v8791_v17 }
0x11c6   : > { %v3685_v47 = vmul.f32 %v3684_v49, %v8772_v24 }
0x11c7   : > { %v3697_v26 = vadd.f32 0.112945676, %v3696_v56  ;;  %v3722_v51 = vadd.f32 0.00028619796, %v3721_v30  ;;  %v3733_v34 = vadd.f32 0.001143296, %v3732_v43 }
0x11c8   : > { %v8802_v29 = vmul.f32 0.70710677, %v8797_v39  ;;  %v3686_v21 = vadd.f32 0.05243302, %v3685_v47  ;;  %v7138_v56 = vld [vmem:[%s9552_s11] sm:$0xff] }
0x11c9   : > { %v3698_v28 = vmul.f32 %v3697_v26, %v8772_v24  ;;  %v3723_v55 = vmul.f32 %v3722_v51, %v8791_v17  ;;  %v3734_v37 = vmul.f32 %v3733_v34, %v8791_v17  ;;  %3922 = vmatpush.bf16.msrb.mxu3 %v7138_v56 }
0x11ca   : > { %v3759_v33 = vmul.f32 %v8802_v29, %v8802_v29  ;;  %v3687_v62 = vmul.f32 %v3686_v21, %v8772_v24 }
0x11cb   : > { %v3699_v58 = vadd.f32 0.4994258, %v3698_v28  ;;  %v3724_v23 = vadd.f32 0.0036580483, %v3723_v55  ;;  %v3735_v1 = vadd.f32 0.014752088, %v3734_v37 }
0x11cc   : > { %v8813_v38 = vmin.f32 %v3759_v33, 16.0  ;;  %v3668_v52 = vpop.f32.mrf.mxu2  ;;  %v3688_v27 = vadd.f32 0.18741608, %v3687_v62 }
0x11cd   : > { %v3700_v0 = vmul.f32 %v3699_v58, %v8772_v24  ;;  %v8819_v9 = vadd.f32 %v7250_v11, %v3668_v52  ;;  %v3725_v50 = vmul.f32 %v3724_v23, %v8791_v17  ;;  %v3736_v22 = vmul.f32 %v3735_v1, %v8791_v17 }
0x11ce   : > { %v3761_v53 = vmul.f32 2.1237322e-06, %v8813_v38  ;;  %v3772_v12 = vmul.f32 3.8918573e-05, %v8813_v38  ;;  %v3689_v34 = vmul.f32 %v3688_v27, %v8772_v24 }
0x11cf   : > { %v3701_v41 = vadd.f32 1.0, %v3700_v0  ;;  %v8826_v7 = vmul.f32 0.70710677, %v8819_v9  ;;  %v3737_v15 = vadd.f32 0.112945676, %v3736_v22 }
0x11d0   : > { %v3726_v13 = vadd.f32 0.05243302, %v3725_v50  ;;  %v3762_v5 = vadd.f32 0.00028619796, %v3761_v53  ;;  %v3773_v11 = vadd.f32 0.001143296, %v3772_v12 }
0x11d1   : > { %7391 = vrcp.f32 %v3701_v41  ;;  %v3738_v45 = vmul.f32 %v3737_v15, %v8791_v17  ;;  %v3799_v20 = vmul.f32 %v8826_v7, %v8826_v7  ;;  %v3713_v51 = vand.u32 2147483648, %v3701_v41 }
0x11d2   : > { %v3774_v6 = vmul.f32 %v3773_v11, %v8813_v38  ;;  %v3727_v31 = vmul.f32 %v3726_v13, %v8791_v17  ;;  %v3763_v46 = vmul.f32 %v3762_v5, %v8813_v38  ;;  %v3711_v58 = vand.u32 2147483647, %v3701_v41 }
0x11d3   : > { %v3739_v35 = vadd.f32 0.4994258, %v3738_v45  ;;  %v8839_v59 = vmin.f32 %v3799_v20, 16.0  ;;  %vm3707_vm12 = vweird.f32 %v3701_v41  ;;  %v3690_v18 = vadd.f32 1.1283791, %v3689_v34 }
0x11d4   : > { %v3775_v4 = vadd.f32 0.014752088, %v3774_v6  ;;  %v3728_v28 = vadd.f32 0.18741608, %v3727_v31  ;;  %v3764_v10 = vadd.f32 0.0036580483, %v3763_v46 }
0x11d5   : > { %v3740_v32 = vmul.f32 %v3739_v35, %v8791_v17  ;;  %v3801_v25 = vmul.f32 2.1237322e-06, %v8839_v59  ;;  %v3812_v44 = vmul.f32 3.8918573e-05, %v8839_v59  ;;  %v3714_v53 = vor.u32 1.1754944e-38, %v3713_v51 }
0x11d6   : > { %v3776_v49 = vmul.f32 %v3775_v4, %v8813_v38  ;;  %v3729_v24 = vmul.f32 %v3728_v28, %v8791_v17  ;;  %v3765_v0 = vmul.f32 %v3764_v10, %v8813_v38  ;;  %vm3712_vm14 = vcmp.eq.f32.partialorder %v3711_v58, 8.507059e+37 }
0x11d7   : > { %v7392_v42 = vpop.eup %7391  ;;  %v3741_v40 = vadd.f32 1.0, %v3740_v32  ;;  %v3802_v30 = vadd.f32 0.00028619796, %v3801_v25  ;;  %v3813_v43 = vadd.f32 0.001143296, %v3812_v44  ;;  %v3691_v45 = vmul.f32 %v3690_v18, %v8768_v61 }
0x11d8   : > { %v3703_v60 = vmul.f32 %v7392_v42, %v3701_v41  ;;  %v3777_v47 = vadd.f32 0.112945676, %v3776_v49  ;;  %vm3708_vm11 = vweird.f32 %v7392_v42  ;;  %v3730_v5 = vadd.f32 1.1283791, %v3729_v24 }
0x11d9   : > { %7393 = vrcp.f32 %v3741_v40  ;;  %v3803_v37 = vmul.f32 %v3802_v30, %v8839_v59  ;;  %v3814_v33 = vmul.f32 %v3813_v43, %v8839_v59  ;;  %vm3709_vm13 = vmor %vm3707_vm12, %vm3708_vm11  ;;  %v3766_v17 = vadd.f32 0.05243302, %v3765_v0 }
0x11da   : > { %v3704_v26 = vsub.f32 1.0, %v3703_v60  ;;  %v3778_v23 = vmul.f32 %v3777_v47, %v8813_v38  ;;  %v3753_v20 = vand.u32 2147483648, %v3741_v40  ;;  %v3751_v32 = vand.u32 2147483647, %v3741_v40 }
0x11db   : > { %v3815_v52 = vadd.f32 0.014752088, %v3814_v33  ;;  %v3804_v12 = vadd.f32 0.0036580483, %v3803_v37  ;;  %vm3747_vm0 = vweird.f32 %v3741_v40  ;;  %v3767_v46 = vmul.f32 %v3766_v17, %v8813_v38 }
0x11dc   : > { %v3705_v55 = vmul.f32 %v7392_v42, %v3704_v26  ;;  %v3779_v21 = vadd.f32 0.4994258, %v3778_v23  ;;  %v3731_v61 = vmul.f32 %v3730_v5, %v8782_v36  ;;  %v3754_v25 = vor.u32 1.1754944e-38, %v3753_v20 }
0x11dd   : > { %v3816_v15 = vmul.f32 %v3815_v52, %v8839_v59  ;;  %v3805_v48 = vmul.f32 %v3804_v12, %v8839_v59  ;;  %vm3752_vm3 = vcmp.eq.f32.partialorder %v3751_v32, 8.507059e+37  ;;  %v3768_v26 = vadd.f32 0.18741608, %v3767_v46 }
0x11de   : > { %v3706_v1 = vadd.f32 %v7392_v42, %v3705_v55  ;;  %v3780_v13 = vmul.f32 %v3779_v21, %v8813_v38  ;;  %v3671_v36 = vmul.f32 0.5, %v8765_v8  ;;  %v3672_v55 = vmul.f32 0.5, %v8779_v57 }
0x11df   : > { %v7394_v50 = vpop.eup %7393  ;;  %v3817_v41 = vadd.f32 0.112945676, %v3816_v15  ;;  %v3806_v44 = vadd.f32 0.05243302, %v3805_v48  ;;  %v3769_v33 = vmul.f32 %v3768_v26, %v8813_v38  ;;  %v3673_v32 = vmul.f32 0.5, %v8797_v39 }
0x11e0   : > { %v3710_v22 = vsel %vm3709_vm13, %v7392_v42, %v3706_v1  ;;  %v3743_v63 = vmul.f32 %v7394_v50, %v3741_v40  ;;  %v3781_v35 = vadd.f32 1.0, %v3780_v13  ;;  %vm3748_vm15 = vweird.f32 %v7394_v50 }
0x11e1   : > { %v3715_v62 = vsel %vm3712_vm14, %v3714_v53, %v3710_v22  ;;  %v3818_v6 = vmul.f32 %v3817_v41, %v8839_v59  ;;  %vm3749_vm1 = vmor %vm3747_vm0, %vm3748_vm15  ;;  %v3807_v40 = vmul.f32 %v3806_v44, %v8839_v59  ;;  %v7251_v44 = vld [vmem:[%s9542_s1 + $0x16] ss:$0 sm:$0xff] }
0x11e2   : > { %v3744_v11 = vsub.f32 1.0, %v3743_v63  ;;  %v3716_v27 = vmul.f32 %v3715_v62, %v3691_v45  ;;  %7395 = vrcp.f32 %v3781_v35  ;;  %v3791_v23 = vand.u32 2147483647, %v3781_v35 }
0x11e3   : > { %v3819_v4 = vadd.f32 0.4994258, %v3818_v6  ;;  %v3793_v1 = vand.u32 2147483648, %v3781_v35  ;;  %v3808_v52 = vadd.f32 0.18741608, %v3807_v40  ;;  %vm3787_vm7 = vweird.f32 %v3781_v35 }
0x11e4   : > { %v3745_v31 = vmul.f32 %v7394_v50, %v3744_v11  ;;  %v6556_v60 = vclamps-f32 %v3716_v27, 1.0  ;;  %vm3792_vm11 = vcmp.eq.f32.partialorder %v3791_v23, 8.507059e+37 }
0x11e5   : > { %v3820_v49 = vmul.f32 %v3819_v4, %v8839_v59  ;;  %v3794_v8 = vor.u32 1.1754944e-38, %v3793_v1  ;;  %v3809_v57 = vmul.f32 %v3808_v52, %v8839_v59 }
0x11e6   : > { %v3746_v42 = vadd.f32 %v7394_v50, %v3745_v31  ;;  %v3839_v28 = vadd.f32 1.0, %v6556_v60 }
0x11e7   : > { %v3821_v51 = vadd.f32 1.0, %v3820_v49  ;;  %v3810_v13 = vadd.f32 1.1283791, %v3809_v57 }
0x11e8   : > { %v3750_v56 = vsel %vm3749_vm1, %v7394_v50, %v3746_v42  ;;  %v7396_v34 = vpop.eup %7395  ;;  %v3843_v18 = vmul.f32 %v3839_v28, %v3671_v36  ;;  %v3770_v50 = vadd.f32 1.1283791, %v3769_v33  ;;  %v3674_v42 = vmul.f32 0.5, %v8819_v9 }
0x11e9   : > { %v3755_v30 = vsel %vm3752_vm3, %v3754_v25, %v3750_v56  ;;  %v3783_v47 = vmul.f32 %v7396_v34, %v3781_v35  ;;  %7397 = vrcp.f32 %v3821_v51  ;;  %vm3788_vm6 = vweird.f32 %v7396_v34 }
0x11ea   : > { %v3756_v43 = vmul.f32 %v3755_v30, %v3731_v61  ;;  %vm3789_vm10 = vmor %vm3787_vm7, %vm3788_vm6  ;;  %v3771_v63 = vmul.f32 %v3770_v50, %v8802_v29  ;;  %v3833_v41 = vand.u32 2147483648, %v3821_v51  ;;  %v3831_v11 = vand.u32 2147483647, %v3821_v51 }
0x11eb   : > { %v3784_v58 = vsub.f32 1.0, %v3783_v47  ;;  %vm3827_vm13 = vweird.f32 %v3821_v51  ;;  %v3811_v59 = vmul.f32 %v3810_v13, %v8826_v7  ;;  %v7148_v13 = vld [vmem:[%s9549_s8 + $0x190] sm:$0xff] }
0x11ec   : > { %v6557_v10 = vclamps-f32 %v3756_v43, 1.0  ;;  %v3834_v20 = vor.u32 1.1754944e-38, %v3833_v41  ;;  %vm3832_vm15 = vcmp.eq.f32.partialorder %v3831_v11, 8.507059e+37  ;;  %v7152_v41 = vld [vmem:[%s9549_s8 + $0x210] sm:$0xff]  ;;  %v7147_v11 = vld [vmem:[%s9549_s8 + $0x188] sm:$0xff] }
0x11ed   : > { %v3785_v0 = vmul.f32 %v7396_v34, %v3784_v58 }
0x11ee   : > { %v3840_v37 = vadd.f32 1.0, %v6557_v10 }
0x11ef   : > { %v3786_v22 = vadd.f32 %v7396_v34, %v3785_v0  ;;  %v7398_v53 = vpop.eup %7397 }
0x11f0   : > { %v3844_v24 = vmul.f32 %v3840_v37, %v3672_v55  ;;  %v3823_v38 = vmul.f32 %v7398_v53, %v3821_v51  ;;  %vm3828_vm12 = vweird.f32 %v7398_v53 }
0x11f1   : > { %v3790_v12 = vsel %vm3789_vm10, %v7396_v34, %v3786_v22  ;;  %vm3829_vm14 = vmor %vm3827_vm13, %vm3828_vm12 }
0x11f2   : > { %v3847_v21 = vpack.c.bf16 %v3844_v24, %v3843_v18  ;;  %v3795_v15 = vsel %vm3792_vm11, %v3794_v8, %v3790_v12  ;;  %v3824_v62 = vsub.f32 1.0, %v3823_v38  ;;  %v7149_v12 = vld [vmem:[%s9549_s8 + $0x198] sm:$0xff] }
0x11f3   : > { %v3796_v45 = vmul.f32 %v3795_v15, %v3771_v63  ;;  %v7153_v38 = vld [vmem:[%s9549_s8 + $0x218] sm:$0xff]  ;;  %4089 = vmatpush.bf16.msra.mxu0 %v7149_v12 }
0x11f4   : > { %3923 = vmatmul.bf16.vlgmr.msrb.gmra.mxu3 %v3847_v21  ;;  %v3825_v5 = vmul.f32 %v7398_v53, %v3824_v62  ;;  %v7157_v15 = vld [vmem:[%s9549_s8 + $0x298] sm:$0xff]  ;;  %4143 = vmatpush.bf16.msra.mxu1 %v7153_v38 }
0x11f5   : > { %v6558_v35 = vclamps-f32 %v3796_v45, 1.0  ;;  %4197 = vmatpush.bf16.msra.mxu2 %v7157_v15  ;;  %v7156_v45 = vld [vmem:[%s9549_s8 + $0x290] sm:$0xff] }
0x11f6   : > { %v3826_v17 = vadd.f32 %v7398_v53, %v3825_v5 }
0x11f7   : > { %v3841_v31 = vadd.f32 1.0, %v6558_v35  ;;  %4090 = vmatpush.bf16.msra.mxu0 %v7148_v13 }
0x11f8   : > { %v3830_v48 = vsel %vm3829_vm14, %v7398_v53, %v3826_v17  ;;  %4144 = vmatpush.bf16.msra.mxu1 %v7152_v41  ;;  %v7151_v17 = vld [vmem:[%s9549_s8 + $0x208] sm:$0xff] }
0x11f9   : > { %v3835_v6 = vsel %vm3832_vm15, %v3834_v20, %v3830_v48  ;;  %v3845_v4 = vmul.f32 %v3841_v31, %v3673_v32  ;;  %4198 = vmatpush.bf16.msra.mxu2 %v7156_v45  ;;  %v7155_v20 = vld [vmem:[%s9549_s8 + $0x288] sm:$0xff]  ;;  %v7146_v48 = vld [vmem:[%s9549_s8 + $0x180] sm:$0xff] }
0x11fa   : > { %v3836_v27 = vmul.f32 %v3835_v6, %v3811_v59  ;;  %v7150_v6 = vld [vmem:[%s9549_s8 + $0x200] sm:$0xff] }
0x11fb   : > { %4091 = vmatpush.bf16.msra.mxu0 %v7147_v11 }
0x11fc   : > { %v6559_v29 = vclamps-f32 %v3836_v27, 1.0  ;;  %4145 = vmatpush.bf16.msra.mxu1 %v7151_v17  ;;  %v7154_v27 = vld [vmem:[%s9549_s8 + $0x280] sm:$0xff] }
0x11fd   : > { %4199 = vmatpush.bf16.msra.mxu2 %v7155_v20 }
0x11fe   : > { %v3842_v46 = vadd.f32 1.0, %v6559_v29 }
0x11ff   : > { %4092 = vmatpush.bf16.msra.mxu0 %v7146_v48 }
0x1200   : > { %v3846_v61 = vmul.f32 %v3842_v46, %v3674_v42  ;;  %4146 = vmatpush.bf16.msra.mxu1 %v7150_v6 }
0x1201   : > { %4200 = vmatpush.bf16.msra.mxu2 %v7154_v27 }
0x1202   : > { %v3848_v25 = vpack.c.bf16 %v3846_v61, %v3845_v4 }
0x1204   : > { %3928 = vmatmul.bf16.gmra.mxu3 %v3848_v25 }
0x1277   : > { %v3924_v7 = vpop.f32.mrf.mxu3 }
0x1278   : > { %v3925_v60 = vadd.f32 %v7251_v44, %v3924_v7 }
0x127a   : > { %v3934_v56 = vadd.f32 %v3925_v60, %v8746_v54  ;;  %v8949_v60 = vld [vmem:[%s9542_s1 + $0x17] ss:$0 sm:$0xff] }
0x127c   : > { %v3940_v49 = vsel %vm575_vm4, %v3934_v56, 0.0 }
0x127d   : > { %3941 = vadd.xlane.f32.xlu0 %v3940_v49 }
0x127f   : > { %v3926_v30 = vpop.f32.mrf.mxu3 }
0x1280   : > { %v3927_v39 = vadd.f32 %v7251_v44, %v3926_v30 }
0x1282   : > { %v3935_v9 = vadd.f32 %v3927_v39, %v8748_v3  ;;  %v8955_v39 = vld [vmem:[%s9542_s1 + $0x18] ss:$0 sm:$0xff] }
0x1284   : > { %v3943_v43 = vsel %vm575_vm4, %v3935_v9, 0.0 }
0x1285   : > { %3944 = vadd.xlane.f32.xlu1 %v3943_v43 }
0x1287   : > { %v3929_v26 = vpop.f32.mrf.mxu3 }
0x1288   : > { %v3930_v51 = vadd.f32 %v7251_v44, %v3929_v26 }
0x128a   : > { %v3936_v34 = vadd.f32 %v3930_v51, %v8755_v16 }
0x128c   : > { %v3946_v40 = vsel %vm575_vm4, %v3936_v34, 0.0 }
0x128d   : > { %3947 = vadd.xlane.f32.xlu2 %v3946_v40 }
0x128f   : > { %v3931_v28 = vpop.f32.mrf.mxu3 }
0x1290   : > { %v3932_v10 = vadd.f32 %v7251_v44, %v3931_v28 }
0x1292   : > { %v3937_v54 = vadd.f32 %v3932_v10, %v8757_v14 }
0x1294   : > { %v3949_v47 = vsel %vm589_vm5, %v3937_v54, 0.0 }
0x1295   : > { %3950 = vadd.xlane.f32.xlu0 %v3949_v47  ;;  %v7166_v47 = vld [vmem:[%s9549_s8 + $0x238] sm:$0xff] }
0x1296   : > { %4421 = vmatpush.bf16.msrb.mxu2 %v7166_v47 }
0x12f0   : > { %v3942_v36 = vpop.xlane.xlu0 %3941 }
0x12f1   : > { %v3952_v3 = vmul.f32 %v3942_v36, %v8051_v2 }
0x12f3   : > { %v8885_v55 = vsub.f32 %v3934_v56, %v3952_v3 }
0x12f5   : > { %v3960_v37 = vmul.f32 %v8885_v55, %v8885_v55 }
0x12f7   : > { %v3964_v16 = vsel %vm575_vm4, %v3960_v37, 0.0  ;;  %v7165_v37 = vld [vmem:[%s9549_s8 + $0x230] sm:$0xff] }
0x12f8   : > { %v3945_v33 = vpop.xlane.xlu1 %3944  ;;  %3965 = vadd.xlane.f32.xlu1 %v3964_v16  ;;  %4422 = vmatpush.bf16.msrb.mxu2 %v7165_v37  ;;  %v7169_v37 = vld [vmem:[%s9549_s8 + $0x2b0] sm:$0xff] }
0x12f9   : > { %v3953_v58 = vmul.f32 %v3945_v33, %v8051_v2 }
0x12fb   : > { %v8891_v23 = vsub.f32 %v3935_v9, %v3953_v58 }
0x12fd   : > { %v3961_v14 = vmul.f32 %v8891_v23, %v8891_v23 }
0x12ff   : > { %v3967_v1 = vsel %vm575_vm4, %v3961_v14, 0.0 }
0x1300   : > { %3968 = vadd.xlane.f32.xlu2 %v3967_v1  ;;  %v3948_v52 = vpop.xlane.xlu2 %3947 }
0x1301   : > { %v3954_v18 = vmul.f32 %v3948_v52, %v8051_v2 }
0x1303   : > { %v8897_v24 = vsub.f32 %v3936_v34, %v3954_v18  ;;  %v7160_v18 = vld [vmem:[%s9549_s8 + $0x1a8] sm:$0xff] }
0x1305   : > { %v3962_v0 = vmul.f32 %v8897_v24, %v8897_v24 }
0x1307   : > { %v3970_v21 = vsel %vm575_vm4, %v3962_v0, 0.0  ;;  %v7164_v0 = vld [vmem:[%s9549_s8 + $0x228] sm:$0xff] }
0x1308   : > { %3971 = vadd.xlane.f32.xlu0 %v3970_v21  ;;  %v3951_v50 = vpop.xlane.xlu0 %3950  ;;  %4423 = vmatpush.bf16.msrb.mxu2 %v7164_v0 }
0x1309   : > { %v3955_v22 = vmul.f32 %v3951_v50, %v8051_v2 }
0x130b   : > { %v8903_v53 = vsub.f32 %v3937_v54, %v3955_v22  ;;  %v7162_v54 = vld [vmem:[%s9549_s8 + $0x1b8] sm:$0xff] }
0x130c   : > { %4367 = vmatpush.bf16.msrb.mxu1 %v7162_v54  ;;  %v7254_v54 = vld [vmem:[%s9542_s1 + $0x19] ss:$0 sm:$0xff] }
0x130d   : > { %v3963_v8 = vmul.f32 %v8903_v53, %v8903_v53 }
0x130f   : > { %v3973_v57 = vsel %vm589_vm5, %v3963_v8, 0.0  ;;  %v7159_v8 = vld [vmem:[%s9549_s8 + $0x1a0] sm:$0xff] }
0x1310   : > { %3974 = vadd.xlane.f32.xlu1 %v3973_v57  ;;  %v7163_v57 = vld [vmem:[%s9549_s8 + $0x220] sm:$0xff] }
0x1311   : > { %4424 = vmatpush.bf16.msrb.mxu2 %v7163_v57 }
0x136b   : > { %v3966_v63 = vpop.xlane.xlu1 %3965 }
0x136c   : > { %v3976_v62 = vmul.f32 %v3966_v63, %v8051_v2 }
0x136e   : > { %v3980_v5 = vadd.f32 1e-05, %v3976_v62 }
0x1370   : > { %7399 = vrsqrt.f32 %v3980_v5  ;;  %vm3990_vm1 = vweird.f32 %v3980_v5 }
0x1373   : > { %v3969_v35 = vpop.xlane.xlu2 %3968 }
0x1374   : > { %v3977_v59 = vmul.f32 %v3969_v35, %v8051_v2 }
0x1376   : > { %v7400_v31 = vpop.eup %7399  ;;  %v3981_v29 = vadd.f32 1e-05, %v3977_v59 }
0x1377   : > { %v3985_v32 = vmul.f32 %v7400_v31, %v3980_v5  ;;  %vm3991_vm0 = vweird.f32 %v7400_v31 }
0x1378   : > { %7401 = vrsqrt.f32 %v3981_v29  ;;  %vm3992_vm3 = vmor %vm3990_vm1, %vm3991_vm0  ;;  %vm4000_vm7 = vweird.f32 %v3981_v29 }
0x1379   : > { %v3986_v42 = vmul.f32 %v7400_v31, %v3985_v32 }
0x137b   : > { %v3987_v46 = vmul.f32 0.5, %v3986_v42  ;;  %v3972_v7 = vpop.xlane.xlu0 %3971  ;;  %v7255_v42 = vld [vmem:[%s9542_s1 + $0x1d] ss:$0 sm:$0xff] }
0x137c   : > { %v3978_v56 = vmul.f32 %v3972_v7, %v8051_v2 }
0x137d   : > { %v3988_v4 = vsub.f32 1.5, %v3987_v46 }
0x137e   : > { %v7402_v61 = vpop.eup %7401  ;;  %v3982_v43 = vadd.f32 1e-05, %v3978_v56  ;;  %v7256_v56 = vld [vmem:[%s9542_s1 + $0x21] ss:$0 sm:$0xff] }
0x137f   : > { %v3989_v25 = vmul.f32 %v7400_v31, %v3988_v4  ;;  %v3995_v44 = vmul.f32 %v7402_v61, %v3981_v29  ;;  %vm4001_vm6 = vweird.f32 %v7402_v61 }
0x1380   : > { %7403 = vrsqrt.f32 %v3982_v43  ;;  %vm4002_vm10 = vmor %vm4000_vm7, %vm4001_vm6  ;;  %vm4010_vm12 = vweird.f32 %v3982_v43 }
0x1381   : > { %v3993_v49 = vsel %vm3992_vm3, %v7400_v31, %v3989_v25  ;;  %v3996_v30 = vmul.f32 %v7402_v61, %v3995_v44 }
0x1382   : > { %v4024_v9 = vmul.f32 %v3993_v49, %v8885_v55  ;;  %v7161_v55 = vld [vmem:[%s9549_s8 + $0x1b0] sm:$0xff] }
0x1383   : > { %v3997_v26 = vmul.f32 0.5, %v3996_v30  ;;  %v3975_v10 = vpop.xlane.xlu1 %3974  ;;  %4368 = vmatpush.bf16.msrb.mxu1 %v7161_v55 }
0x1384   : > { %v4029_v51 = vmul.f32 %v8949_v60, %v4024_v9  ;;  %v3979_v36 = vmul.f32 %v3975_v10, %v8051_v2 }
0x1385   : > { %v3998_v34 = vsub.f32 1.5, %v3997_v26 }
0x1386   : > { %v8967_v40 = vadd.f32 %v8955_v39, %v4029_v51  ;;  %v7404_v16 = vpop.eup %7403  ;;  %v3983_v58 = vadd.f32 1e-05, %v3979_v36 }
0x1387   : > { %v3999_v28 = vmul.f32 %v7402_v61, %v3998_v34  ;;  %v4005_v14 = vmul.f32 %v7404_v16, %v3982_v43  ;;  %vm4011_vm11 = vweird.f32 %v7404_v16  ;;  %4369 = vmatpush.bf16.msrb.mxu1 %v7160_v18  ;;  %v7170_v34 = vld [vmem:[%s9549_s8 + $0x2b8] sm:$0xff]  ;;  %v7167_v18 = vld [vmem:[%s9549_s8 + $0x2a0] sm:$0xff] }
0x1388   : > { %4038 = vst.msk [vmem:[%s8964_s20] sm:$0xff] %vm575_vm4, %v8967_v40  ;;  %7405 = vrsqrt.f32 %v3983_v58  ;;  %vm4012_vm13 = vmor %vm4010_vm12, %vm4011_vm11  ;;  %vm4020_vm15 = vweird.f32 %v3983_v58 }
0x1389   : > { %v4003_v3 = vsel %vm4002_vm10, %v7402_v61, %v3999_v28  ;;  %v4006_v52 = vmul.f32 %v7404_v16, %v4005_v14 }
0x138a   : > { %v4025_v33 = vmul.f32 %v4003_v3, %v8891_v23 }
0x138b   : > { %v4007_v23 = vmul.f32 0.5, %v4006_v52  ;;  %4370 = vmatpush.bf16.msrb.mxu1 %v7159_v8 }
0x138c   : > { %v4030_v1 = vmul.f32 %v8949_v60, %v4025_v33 }
0x138d   : > { %v4008_v22 = vsub.f32 1.5, %v4007_v23 }
0x138e   : > { %v8994_v21 = vadd.f32 %v8955_v39, %v4030_v1  ;;  %v7406_v12 = vpop.eup %7405  ;;  %v7168_v1 = vld [vmem:[%s9549_s8 + $0x2a8] sm:$0xff] }
0x138f   : > { %v4009_v38 = vmul.f32 %v7404_v16, %v4008_v22  ;;  %v4015_v15 = vmul.f32 %v7406_v12, %v3983_v58  ;;  %vm4021_vm14 = vweird.f32 %v7406_v12 }
0x1390   : > { %4039 = vst.msk [vmem:[%s8964_s20 + $0x8] sm:$0xff] %vm575_vm4, %v8994_v21  ;;  %v9001_v50 = vpack.c.bf16 %v8994_v21, %v8967_v40  ;;  %vm4022_vm0 = vmor %vm4020_vm15, %vm4021_vm14 }
0x1391   : > { %v4013_v63 = vsel %vm4012_vm13, %v7404_v16, %v4009_v38  ;;  %v4016_v62 = vmul.f32 %v7406_v12, %v4015_v15 }
0x1392   : > { %6616 = vmatmul.msk.bf16.vlgmr.msra.gmra.mxu0 %vm575_vm4, %v9001_v50  ;;  %6642 = vmatmul.msk.bf16.vlgmr.msra.gmra.mxu1 %vm575_vm4, %v9001_v50  ;;  %v4026_v13 = vmul.f32 %v4013_v63, %v8897_v24 }
0x1393   : > { %6668 = vmatmul.msk.bf16.vlgmr.msra.gmra.mxu2 %vm575_vm4, %v9001_v50  ;;  %v4017_v41 = vmul.f32 0.5, %v4016_v62 }
0x1394   : > { %v4031_v45 = vmul.f32 %v8949_v60, %v4026_v13 }
0x1395   : > { %v4018_v5 = vsub.f32 1.5, %v4017_v41 }
0x1396   : > { %v9018_v11 = vadd.f32 %v8955_v39, %v4031_v45 }
0x1397   : > { %v4019_v17 = vmul.f32 %v7406_v12, %v4018_v5 }
0x1398   : > { %4040 = vst.msk [vmem:[%s8964_s20 + $0x10] sm:$0xff] %vm575_vm4, %v9018_v11 }
0x1399   : > { %v4023_v20 = vsel %vm4022_vm0, %v7406_v12, %v4019_v17  ;;  %v7258_v12 = vld [vmem:[%s9542_s1 + $0x1e] ss:$0 sm:$0xff] }
0x139a   : > { %v4027_v35 = vmul.f32 %v4023_v20, %v8903_v53 }
0x139c   : > { %v4032_v59 = vmul.f32 %v8949_v60, %v4027_v35 }
0x139e   : > { %v9026_v24 = vadd.f32 %v8955_v39, %v4032_v59 }
0x13a0   : > { %4041 = vst.msk [vmem:[%s8964_s20 + $0x18] sm:$0x7f] %vm589_vm5, %v9026_v24  ;;  %v9033_v48 = vpack.c.bf16 %v9026_v24, %v9018_v11 }
0x13a2   : > { %6617 = vmatmul.msk.bf16.gmra.mxu0 %vm575_vm4, %v9033_v48  ;;  %6643 = vmatmul.msk.bf16.gmra.mxu1 %vm575_vm4, %v9033_v48 }
0x13a3   : > { %6669 = vmatmul.msk.bf16.gmra.mxu2 %vm575_vm4, %v9033_v48 }
0x13b2   : > { %6700 = vmatmul.msk.bf16.vlgmr.msrb.gmra.mxu1 %vm575_vm4, %v9001_v50 }
0x13b3   : > { %6726 = vmatmul.msk.bf16.vlgmr.msrb.gmra.mxu2 %vm575_vm4, %v9001_v50 }
0x13c2   : > { %6701 = vmatmul.msk.bf16.gmra.mxu1 %vm575_vm4, %v9033_v48 }
0x13c3   : > { %6727 = vmatmul.msk.bf16.gmra.mxu2 %vm575_vm4, %v9033_v48 }
0x140f   : > { %v4148_v53 = vpop.f32.mrf.mxu1  ;;  %v4094_v32 = vpop.f32.mrf.mxu0 }
0x1410   : > { %v4149_v49 = vadd.f32 %v7255_v42, %v4148_v53  ;;  %v4095_v33 = vadd.f32 %v7254_v54, %v4094_v32 }
0x1416   : > { %v4202_v6 = vpop.f32.mrf.mxu2 }
0x1417   : > { %v4150_v27 = vpop.f32.mrf.mxu1  ;;  %v4096_v39 = vpop.f32.mrf.mxu0  ;;  %v4203_v36 = vadd.f32 %v7256_v56, %v4202_v6 }
0x1418   : > { %v4151_v7 = vadd.f32 %v7255_v42, %v4150_v27  ;;  %v4097_v3 = vadd.f32 %v7254_v54, %v4096_v39 }
0x141a   : > { %v4214_v26 = vpack.c.bf16 %v4151_v7, %v4149_v49  ;;  %v4212_v14 = vpack.c.bf16 %v4097_v3, %v4095_v33 }
0x141c   : > { %v4223_v47 = vsel %vm2421_vm8, %v4214_v26, 0 }
0x141e   : > { %v4204_v31 = vpop.f32.mrf.mxu2 }
0x141f   : > { %v4153_v29 = vpop.f32.mrf.mxu1  ;;  %v4205_v28 = vadd.f32 %v7256_v56, %v4204_v31  ;;  %v4099_v58 = vpop.f32.mrf.mxu0 }
0x1420   : > { %v4154_v61 = vadd.f32 %v7255_v42, %v4153_v29  ;;  %v4100_v8 = vadd.f32 %v7254_v54, %v4099_v58 }
0x1421   : > { %v4293_v16 = vpack.c.bf16 %v4205_v28, %v4203_v36 }
0x1426   : > { %v4207_v46 = vpop.f32.mrf.mxu2 }
0x1427   : > { %v4155_v4 = vpop.f32.mrf.mxu1  ;;  %v4208_v9 = vadd.f32 %v7256_v56, %v4207_v46  ;;  %v4101_v0 = vpop.f32.mrf.mxu0 }
0x1428   : > { %v4156_v25 = vadd.f32 %v7255_v42, %v4155_v4  ;;  %v4102_v23 = vadd.f32 %v7254_v54, %v4101_v0  ;;  %v7259_v4 = vld [vmem:[%s9542_s1 + $0x22] ss:$0 sm:$0xff] }
0x142a   : > { %v4215_v44 = vpack.c.bf16 %v4156_v25, %v4154_v61  ;;  %v4213_v57 = vpack.c.bf16 %v4102_v23, %v4100_v8 }
0x142c   : > { %v4226_v60 = vsel %vm2421_vm8, %v4215_v44, 0 }
0x142d   : > { %4234 = vmatpush.bf16.xpose.msra.mxu3 %v4226_v60 }
0x142e   : > { %v4209_v30 = vpop.f32.mrf.mxu2 }
0x142f   : > { %v4210_v43 = vadd.f32 %v7256_v56, %v4209_v30 }
0x1431   : > { %v4294_v51 = vpack.c.bf16 %v4210_v43, %v4208_v9 }
0x1433   : > { %v4302_v10 = vand.u32 %v4294_v51, %v7766_v19 }
0x1435   : > { %4310 = vmatpush.bf16.msrb.mxu0 %v4302_v10  ;;  %4235 = vmatpush.bf16.xpose.msra.mxu3 %v4223_v47 }
0x1436   : > { %v4426_v55 = vpop.f32.mrf.mxu2 }
0x1437   : > { %v4427_v45 = vadd.f32 %v7258_v12, %v4426_v55 }
0x1439   : > { %4311 = vmatpush.bf16.msrb.mxu0 %v4293_v16 }
0x143c   : > { %6670 = vmatmul.msk.bf16.vlgmr.msra.gmra.mxu3 %vm2421_vm8, %v4212_v14 }
0x143d   : > { %4475 = vmatpush.bf16.msrb.mxu3 %v7170_v34 }
0x143e   : > { %v4428_v52 = vpop.f32.mrf.mxu2 }
0x143f   : > { %v4429_v13 = vadd.f32 %v7258_v12, %v4428_v52 }
0x1441   : > { %4476 = vmatpush.bf16.msrb.mxu3 %v7169_v37  ;;  %v4492_v5 = vpack.c.bf16 %v4429_v13, %v4427_v45 }
0x1443   : > { %v4501_v17 = vsel %vm2421_vm8, %v4492_v5, 0 }
0x1445   : > { %4477 = vmatpush.bf16.msrb.mxu3 %v7168_v1 }
0x1446   : > { %v4431_v22 = vpop.f32.mrf.mxu2 }
0x1447   : > { %v4432_v15 = vadd.f32 %v7258_v12, %v4431_v22 }
0x1449   : > { %4478 = vmatpush.bf16.msrb.mxu3 %v7167_v18 }
0x144c   : > { %6671 = vmatmul.msk.bf16.gmra.mxu3 %vm2421_vm8, %v4213_v57 }
0x144e   : > { %v4433_v38 = vpop.f32.mrf.mxu2 }
0x144f   : > { %v4434_v63 = vadd.f32 %v7258_v12, %v4433_v38 }
0x1451   : > { %v4493_v62 = vpack.c.bf16 %v4434_v63, %v4432_v15 }
0x1453   : > { %v4504_v41 = vsel %vm2421_vm8, %v4493_v62, 0  ;;  %v4372_v62 = vpop.f32.mrf.mxu1 }
0x1454   : > { %4512 = vmatpush.bf16.xpose.msra.mxu0 %v4504_v41 }
0x145c   : > { %4513 = vmatpush.bf16.xpose.msra.mxu0 %v4501_v17  ;;  %6752 = vmatmul.msk.bf16.vlgmr.msrb.gmra.mxu3 %vm575_vm4, %v9001_v50  ;;  %v7175_v17 = vld [vmem:[%s9549_s8 + $0x1d8] sm:$0xff] }
0x146c   : > { %6753 = vmatmul.msk.bf16.gmra.mxu3 %vm575_vm4, %v9033_v48 }
0x14bf   : > { %v4237_v20 = vpop.f32.mrf.mxu3 }
0x14c0   : > { %v4247_v35 = vsel %vm1709_vm2, %v4237_v20, -inf }
0x14c1   : > { %4248 = vmax.xlane.f32.xlu2 %v4247_v35  ;;  %v4374_v35 = vpop.f32.mrf.mxu1 }
0x14c7   : > { %v4239_v59 = vpop.f32.mrf.mxu3 }
0x14c8   : > { %v4250_v53 = vsel %vm1709_vm2, %v4239_v59, -inf }
0x14c9   : > { %4251 = vmax.xlane.f32.xlu0 %v4250_v53  ;;  %v7257_v53 = vld [vmem:[%s9542_s1 + $0x1a] ss:$0 sm:$0xff] }
0x14cf   : > { %v4242_v6 = vpop.f32.mrf.mxu3 }
0x14d0   : > { %v4253_v27 = vsel %vm1709_vm2, %v4242_v6, -inf }
0x14d1   : > { %4254 = vmax.xlane.f32.xlu1 %v4253_v27  ;;  %v7172_v27 = vld [vmem:[%s9549_s8 + $0x1c0] sm:$0xff] }
0x14d7   : > { %v4244_v31 = vpop.f32.mrf.mxu3 }
0x14d8   : > { %v4256_v29 = vsel %vm2462_vm9, %v4244_v31, -inf }
0x14d9   : > { %4257 = vmax.xlane.f32.xlu2 %v4256_v29  ;;  %v4377_v29 = vpop.f32.mrf.mxu1 }
0x14df   : > { %v4480_v32 = vpop.f32.mrf.mxu3 }
0x14e0   : > { %v4481_v49 = vadd.f32 %v7259_v4, %v4480_v32 }
0x14e7   : > { %v4482_v42 = vpop.f32.mrf.mxu3 }
0x14e8   : > { %v4483_v60 = vadd.f32 %v7259_v4, %v4482_v42  ;;  %v4379_v42 = vpop.f32.mrf.mxu1 }
0x14ea   : > { %v4571_v30 = vpack.c.bf16 %v4483_v60, %v4481_v49 }
0x14ef   : > { %v4485_v46 = vpop.f32.mrf.mxu3 }
0x14f0   : > { %v4486_v25 = vadd.f32 %v7259_v4, %v4485_v46  ;;  %v4380_v46 = vadd.f32 %v7257_v53, %v4379_v42 }
0x14f7   : > { %v4487_v61 = vpop.f32.mrf.mxu3 }
0x14f8   : > { %v4488_v44 = vadd.f32 %v7259_v4, %v4487_v61  ;;  %v4378_v4 = vadd.f32 %v7257_v53, %v4377_v29 }
0x14fa   : > { %v4572_v7 = vpack.c.bf16 %v4488_v44, %v4486_v25  ;;  %v4491_v61 = vpack.c.bf16 %v4380_v46, %v4378_v4  ;;  %v7158_v25 = vld [vmem:[%s9550_s9 + $0x20] sm:$0xff]  ;;  %v7171_v46 = vld [vmem:[%s9550_s9 + $0x28] sm:$0xff]  ;;  %v7183_v4 = vld [vmem:[%s9549_s8 + $0x2d8] sm:$0xff] }
0x14fb   : > { %4656 = vmatpush.bf16.msra.mxu3 %v7158_v25  ;;  %4625 = vmatpush.bf16.msra.mxu2 %v7171_v46  ;;  %v7182_v25 = vld [vmem:[%s9549_s8 + $0x2d0] sm:$0xff] }
0x14fc   : > { %v4580_v56 = vand.u32 %v4572_v7, %v7766_v19 }
0x14fe   : > { %4588 = vmatpush.bf16.msra.mxu1 %v4580_v56 }
0x14ff   : > { %4815 = vmatpush.bf16.msrb.mxu2 %v7183_v4 }
0x1502   : > { %4589 = vmatpush.bf16.msra.mxu1 %v4571_v30 }
0x1503   : > { %4816 = vmatpush.bf16.msrb.mxu2 %v7182_v25 }
0x1534   : > { %v4249_v39 = vpop.xlane.xlu2 %4248 }
0x1535   : > { %v4259_v9 = vsub.f32 %v4237_v20, %v4249_v39  ;;  %v7174_v20 = vld [vmem:[%s9549_s8 + $0x1d0] sm:$0xff] }
0x1537   : > { %v4263_v43 = vmul.f32 1.442695, %v4259_v9 }
0x1539   : > { %7407 = vpow2.f32 %v4263_v43 }
0x153c   : > { %v4252_v26 = vpop.xlane.xlu0 %4251 }
0x153d   : > { %v4260_v51 = vsub.f32 %v4239_v59, %v4252_v26  ;;  %v7173_v59 = vld [vmem:[%s9549_s8 + $0x1c8] sm:$0xff] }
0x153f   : > { %v7408_v34 = vpop.eup %7407  ;;  %v4265_v28 = vmul.f32 1.442695, %v4260_v51 }
0x1540   : > { %v4271_v10 = vsel %vm1709_vm2, %v7408_v34, 0.0 }
0x1541   : > { %7409 = vpow2.f32 %v4265_v28  ;;  %4272 = vadd.xlane.f32.xlu0 %v4271_v10 }
0x1544   : > { %v4255_v54 = vpop.xlane.xlu1 %4254 }
0x1545   : > { %v4261_v47 = vsub.f32 %v4242_v6, %v4255_v54  ;;  %v4375_v6 = vadd.f32 %v7257_v53, %v4374_v35 }
0x1547   : > { %v7410_v36 = vpop.eup %7409  ;;  %v4267_v3 = vmul.f32 1.442695, %v4261_v47 }
0x1548   : > { %v4274_v55 = vsel %vm1709_vm2, %v7410_v36, 0.0 }
0x1549   : > { %7411 = vpow2.f32 %v4267_v3  ;;  %4275 = vadd.xlane.f32.xlu1 %v4274_v55 }
0x154c   : > { %v4258_v37 = vpop.xlane.xlu2 %4257 }
0x154d   : > { %v4262_v16 = vsub.f32 %v4244_v31, %v4258_v37  ;;  %v4373_v31 = vadd.f32 %v7257_v53, %v4372_v62  ;;  %v7178_v62 = vld [vmem:[%s9549_s8 + $0x250] sm:$0xff] }
0x154f   : > { %v7412_v33 = vpop.eup %7411  ;;  %v4269_v58 = vmul.f32 1.442695, %v4262_v16  ;;  %v4490_v32 = vpack.c.bf16 %v4375_v6, %v4373_v31 }
0x1550   : > { %v4277_v14 = vsel %vm1709_vm2, %v7412_v33, 0.0 }
0x1551   : > { %7413 = vpow2.f32 %v4269_v58  ;;  %4278 = vadd.xlane.f32.xlu2 %v4277_v14 }
0x1557   : > { %v7414_v1 = vpop.eup %7413 }
0x1558   : > { %v4280_v52 = vsel %vm2462_vm9, %v7414_v1, 0.0 }
0x1559   : > { %4281 = vadd.xlane.f32.xlu0 %v4280_v52 }
0x15b4   : > { %v4273_v18 = vpop.xlane.xlu0 %4272 }
0x15b5   : > { %7415 = vrcp.f32 %v4273_v18 }
0x15bb   : > { %v7416_v23 = vpop.eup %7415 }
0x15bc   : > { %v4276_v0 = vpop.xlane.xlu1 %4275  ;;  %v4287_v8 = vmul.f32 %v7416_v23, %v7408_v34 }
0x15bd   : > { %7417 = vrcp.f32 %v4276_v0 }
0x15c3   : > { %v7418_v22 = vpop.eup %7417 }
0x15c4   : > { %v4288_v57 = vmul.f32 %v7418_v22, %v7410_v36  ;;  %v4279_v38 = vpop.xlane.xlu2 %4278 }
0x15c5   : > { %7419 = vrcp.f32 %v4279_v38 }
0x15c6   : > { %v4291_v12 = vpack.c.bf16 %v4288_v57, %v4287_v8 }
0x15c8   : > { %6672 = vmatmul.msk.bf16.vlgmr.msrb.gmra.mxu0 %vm1709_vm2, %v4291_v12 }
0x15c9   : > { %4707 = vmatpush.bf16.msrb.mxu0 %v7175_v17 }
0x15cb   : > { %v7420_v63 = vpop.eup %7419 }
0x15cc   : > { %v4282_v15 = vpop.xlane.xlu0 %4281  ;;  %v4289_v41 = vmul.f32 %v7420_v63, %v7412_v33  ;;  %v7179_v63 = vld [vmem:[%s9549_s8 + $0x258] sm:$0xff] }
0x15cd   : > { %7421 = vrcp.f32 %v4282_v15  ;;  %4708 = vmatpush.bf16.msrb.mxu0 %v7174_v20  ;;  %4761 = vmatpush.bf16.msrb.mxu1 %v7179_v63 }
0x15d1   : > { %4709 = vmatpush.bf16.msrb.mxu0 %v7173_v59  ;;  %4762 = vmatpush.bf16.msrb.mxu1 %v7178_v62 }
0x15d3   : > { %v7422_v13 = vpop.eup %7421 }
0x15d4   : > { %v4290_v45 = vmul.f32 %v7422_v13, %v7414_v1 }
0x15d5   : > { %4710 = vmatpush.bf16.msrb.mxu0 %v7172_v27 }
0x15d6   : > { %v4292_v5 = vpack.c.bf16 %v4290_v45, %v4289_v41  ;;  %v7177_v41 = vld [vmem:[%s9549_s8 + $0x248] sm:$0xff] }
0x15d7   : > { %4763 = vmatpush.bf16.msrb.mxu1 %v7177_v41 }
0x15d8   : > { %6673 = vmatmul.msk.bf16.gmra.mxu0 %vm1709_vm2, %v4292_v5  ;;  %v7176_v5 = vld [vmem:[%s9549_s8 + $0x240] sm:$0xff] }
0x15db   : > { %4764 = vmatpush.bf16.msrb.mxu1 %v7176_v5 }
0x15e8   : > { %6754 = vmatmul.msk.bf16.vlgmr.msra.gmra.mxu0 %vm2421_vm8, %v4490_v32 }
0x15f8   : > { %6755 = vmatmul.msk.bf16.gmra.mxu0 %vm2421_vm8, %v4491_v61 }
0x1608   : > { %6796 = vmatmul.msk.bf16.vlgmr.msrb.gmra.mxu0 %vm575_vm4, %v9001_v50 }
0x1618   : > { %6797 = vmatmul.msk.bf16.gmra.mxu0 %vm575_vm4, %v9033_v48 }
0x1645   : > { %v4313_v44 = vpop.f32.mrf.mxu0 }
0x164d   : > { %v4315_v7 = vpop.f32.mrf.mxu0 }
0x164e   : > { %v4323_v60 = vpack.c.bf16 %v4315_v7, %v4313_v44  ;;  %v7181_v44 = vld [vmem:[%s9549_s8 + $0x2c8] sm:$0xff] }
0x164f   : > { %4817 = vmatpush.bf16.msrb.mxu2 %v7181_v44 }
0x1650   : > { %6770 = vmatmul.msk.bf16.vlgmr.msra.gmra.mxu3 %vm2421_vm8, %v4323_v60 }
0x1655   : > { %v4318_v56 = vpop.f32.mrf.mxu0 }
0x165d   : > { %v4320_v49 = vpop.f32.mrf.mxu0 }
0x165e   : > { %v4324_v30 = vpack.c.bf16 %v4320_v49, %v4318_v56  ;;  %v7180_v56 = vld [vmem:[%s9549_s8 + $0x2c0] sm:$0xff] }
0x165f   : > { %4818 = vmatpush.bf16.msrb.mxu2 %v7180_v56 }
0x1660   : > { %6771 = vmatmul.msk.bf16.gmra.mxu3 %vm2421_vm8, %v4324_v30 }
0x1665   : > { %v4515_v39 = vpop.f32.mrf.mxu0 }
0x1666   : > { %v4525_v9 = vsel %vm1709_vm2, %v4515_v39, -inf }
0x1667   : > { %4526 = vmax.xlane.f32.xlu1 %v4525_v9  ;;  %v7188_v9 = vld [vmem:[%s9549_s8 + $0x1f8] sm:$0xff] }
0x166d   : > { %v4517_v43 = vpop.f32.mrf.mxu0 }
0x166e   : > { %v4528_v26 = vsel %vm1709_vm2, %v4517_v43, -inf }
0x166f   : > { %4529 = vmax.xlane.f32.xlu2 %v4528_v26 }
0x1675   : > { %v4520_v51 = vpop.f32.mrf.mxu0 }
0x1676   : > { %v4531_v34 = vsel %vm1709_vm2, %v4520_v51, -inf }
0x1677   : > { %4532 = vmax.xlane.f32.xlu0 %v4531_v34  ;;  %v7185_v34 = vld [vmem:[%s9549_s8 + $0x1e0] sm:$0xff] }
0x167d   : > { %v4522_v28 = vpop.f32.mrf.mxu0 }
0x167e   : > { %v4534_v10 = vsel %vm2462_vm9, %v4522_v28, -inf }
0x167f   : > { %4535 = vmax.xlane.f32.xlu1 %v4534_v10 }
0x16da   : > { %v4527_v54 = vpop.xlane.xlu1 %4526 }
0x16db   : > { %v4537_v47 = vsub.f32 %v4515_v39, %v4527_v54  ;;  %v4712_v54 = vpop.f32.mrf.mxu0 }
0x16dd   : > { %v4541_v36 = vmul.f32 1.442695, %v4537_v47  ;;  %v7261_v47 = vld [vmem:[%s9542_s1 + $0x1f] ss:$0 sm:$0xff] }
0x16df   : > { %7423 = vpow2.f32 %v4541_v36 }
0x16e2   : > { %v4530_v3 = vpop.xlane.xlu2 %4529 }
0x16e3   : > { %v4538_v55 = vsub.f32 %v4517_v43, %v4530_v3  ;;  %v7187_v43 = vld [vmem:[%s9549_s8 + $0x1f0] sm:$0xff] }
0x16e5   : > { %v7424_v37 = vpop.eup %7423  ;;  %v4543_v16 = vmul.f32 1.442695, %v4538_v55 }
0x16e6   : > { %v4549_v33 = vsel %vm1709_vm2, %v7424_v37, 0.0 }
0x16e7   : > { %7425 = vpow2.f32 %v4543_v16  ;;  %4550 = vadd.xlane.f32.xlu2 %v4549_v33 }
0x16ea   : > { %v4533_v58 = vpop.xlane.xlu0 %4532 }
0x16eb   : > { %v4539_v14 = vsub.f32 %v4520_v51, %v4533_v58  ;;  %v7186_v51 = vld [vmem:[%s9549_s8 + $0x1e8] sm:$0xff] }
0x16ed   : > { %v7426_v1 = vpop.eup %7425  ;;  %v4545_v52 = vmul.f32 1.442695, %v4539_v14  ;;  %v4714_v14 = vpop.f32.mrf.mxu0 }
0x16ee   : > { %v4552_v18 = vsel %vm1709_vm2, %v7426_v1, 0.0 }
0x16ef   : > { %7427 = vpow2.f32 %v4545_v52  ;;  %4553 = vadd.xlane.f32.xlu0 %v4552_v18  ;;  %v7192_v52 = vld [vmem:[%s9549_s8 + $0x278] sm:$0xff] }
0x16f0   : > { %v7260_v18 = vld [vmem:[%s9542_s1 + $0x1b] ss:$0 sm:$0xff] }
0x16f2   : > { %v4536_v0 = vpop.xlane.xlu1 %4535 }
0x16f3   : > { %v4540_v23 = vsub.f32 %v4522_v28, %v4536_v0 }
0x16f5   : > { %v7428_v22 = vpop.eup %7427  ;;  %v4547_v8 = vmul.f32 1.442695, %v4540_v23  ;;  %v4715_v23 = vadd.f32 %v7260_v18, %v4714_v14 }
0x16f6   : > { %v4555_v57 = vsel %vm1709_vm2, %v7428_v22, 0.0 }
0x16f7   : > { %7429 = vpow2.f32 %v4547_v8  ;;  %4556 = vadd.xlane.f32.xlu1 %v4555_v57  ;;  %v4713_v8 = vadd.f32 %v7260_v18, %v4712_v54  ;;  %v4717_v57 = vpop.f32.mrf.mxu0 }
0x16fd   : > { %v7430_v12 = vpop.eup %7429 }
0x16fe   : > { %v4558_v38 = vsel %vm2462_vm9, %v7430_v12, 0.0 }
0x16ff   : > { %4559 = vadd.xlane.f32.xlu2 %v4558_v38  ;;  %v7190_v38 = vld [vmem:[%s9549_s8 + $0x268] sm:$0xff]  ;;  %v4719_v63 = vpop.f32.mrf.mxu0 }
0x1700   : > { %v4720_v62 = vadd.f32 %v7260_v18, %v4719_v63 }
0x175a   : > { %v4551_v15 = vpop.xlane.xlu2 %4550 }
0x175b   : > { %7431 = vrcp.f32 %v4551_v15  ;;  %v7189_v15 = vld [vmem:[%s9549_s8 + $0x260] sm:$0xff] }
0x1761   : > { %v7432_v45 = vpop.eup %7431 }
0x1762   : > { %v4554_v13 = vpop.xlane.xlu0 %4553  ;;  %v4565_v20 = vmul.f32 %v7432_v45, %v7424_v37  ;;  %v9213_v45 = vpop.f32.mrf.mxu3 }
0x1763   : > { %7433 = vrcp.f32 %v4554_v13  ;;  %v4718_v13 = vadd.f32 %v7260_v18, %v4717_v57 }
0x1765   : > { %v4831_v41 = vpack.c.bf16 %v4720_v62, %v4718_v13 }
0x1769   : > { %v7434_v17 = vpop.eup %7433 }
0x176a   : > { %v4566_v35 = vmul.f32 %v7434_v17, %v7426_v1  ;;  %v4557_v53 = vpop.xlane.xlu1 %4556  ;;  %v9217_v17 = vpop.f32.mrf.mxu3 }
0x176b   : > { %7435 = vrcp.f32 %v4557_v53 }
0x176c   : > { %v4569_v59 = vpack.c.bf16 %v4566_v35, %v4565_v20 }
0x176e   : > { %6756 = vmatmul.msk.bf16.vlgmr.msra.gmra.mxu1 %vm1709_vm2, %v4569_v59 }
0x1771   : > { %v7436_v27 = vpop.eup %7435 }
0x1772   : > { %v4560_v6 = vpop.xlane.xlu2 %4559  ;;  %v4567_v29 = vmul.f32 %v7436_v27, %v7428_v22  ;;  %v7191_v22 = vld [vmem:[%s9549_s8 + $0x270] sm:$0xff]  ;;  %v9221_v35 = vpop.f32.mrf.mxu3 }
0x1773   : > { %7437 = vrcp.f32 %v4560_v6 }
0x1779   : > { %v7438_v31 = vpop.eup %7437 }
0x177a   : > { %v4568_v32 = vmul.f32 %v7438_v31, %v7430_v12  ;;  %v4830_v12 = vpack.c.bf16 %v4715_v23, %v4713_v8  ;;  %v4665_v53 = vpop.f32.mrf.mxu3 }
0x177c   : > { %v4570_v42 = vpack.c.bf16 %v4568_v32, %v4567_v29 }
0x177e   : > { %6757 = vmatmul.msk.bf16.gmra.mxu1 %vm1709_vm2, %v4570_v42  ;;  %v7262_v42 = vld [vmem:[%s9542_s1 + $0x23] ss:$0 sm:$0xff] }
0x178e   : > { %6822 = vmatmul.msk.bf16.vlgmr.msrb.gmra.mxu1 %vm575_vm4, %v9001_v50 }
0x179e   : > { %6823 = vmatmul.msk.bf16.gmra.mxu1 %vm575_vm4, %v9033_v48 }
0x17eb   : > { %v4591_v61 = vpop.f32.mrf.mxu1 }
0x17f3   : > { %v4593_v7 = vpop.f32.mrf.mxu1 }
0x17f4   : > { %v4601_v60 = vpack.c.bf16 %v4593_v7, %v4591_v61 }
0x17f6   : > { %6764 = vmatmul.msk.bf16.vlgmr.msra.gmra.mxu2 %vm2421_vm8, %v4601_v60 }
0x17f7   : > { %5020 = vmatpush.bf16.msra.mxu2 %v7188_v9 }
0x17fb   : > { %v4596_v49 = vpop.f32.mrf.mxu1  ;;  %5021 = vmatpush.bf16.msra.mxu2 %v7187_v43 }
0x17ff   : > { %5022 = vmatpush.bf16.msra.mxu2 %v7186_v51 }
0x1803   : > { %v4598_v30 = vpop.f32.mrf.mxu1  ;;  %5023 = vmatpush.bf16.msra.mxu2 %v7185_v34 }
0x1804   : > { %v4602_v39 = vpack.c.bf16 %v4598_v30, %v4596_v49 }
0x1806   : > { %6765 = vmatmul.msk.bf16.gmra.mxu2 %vm2421_vm8, %v4602_v39 }
0x180b   : > { %v4766_v26 = vpop.f32.mrf.mxu1 }
0x180c   : > { %v4767_v58 = vadd.f32 %v7261_v47, %v4766_v26 }
0x1813   : > { %v4768_v28 = vpop.f32.mrf.mxu1 }
0x1814   : > { %v4769_v16 = vadd.f32 %v7261_v47, %v4768_v28  ;;  %v7184_v28 = vld [vmem:[%s9550_s9 + $0x30] sm:$0xff] }
0x1815   : > { %4965 = vmatpush.bf16.msra.mxu1 %v7184_v28 }
0x1816   : > { %6848 = vmatmul.msk.bf16.vlgmr.msrb.gmra.mxu2 %vm575_vm4, %v9001_v50  ;;  %v4832_v1 = vpack.c.bf16 %v4769_v16, %v4767_v58 }
0x1818   : > { %v4841_v0 = vsel %vm2421_vm8, %v4832_v1, 0 }
0x181b   : > { %v4771_v10 = vpop.f32.mrf.mxu1 }
0x181c   : > { %v4772_v3 = vadd.f32 %v7261_v47, %v4771_v10 }
0x1823   : > { %v4773_v36 = vpop.f32.mrf.mxu1 }
0x1824   : > { %v4774_v55 = vadd.f32 %v7261_v47, %v4773_v36  ;;  %v7264_v36 = vld [vmem:[%s9542_s1 + $0x20] ss:$0 sm:$0xff] }
0x1826   : > { %v4833_v37 = vpack.c.bf16 %v4774_v55, %v4772_v3  ;;  %6849 = vmatmul.msk.bf16.gmra.mxu2 %vm575_vm4, %v9033_v48 }
0x1828   : > { %v4844_v33 = vsel %vm2421_vm8, %v4833_v37, 0 }
0x1829   : > { %4852 = vmatpush.bf16.xpose.msrb.mxu3 %v4844_v33 }
0x1831   : > { %4853 = vmatpush.bf16.xpose.msrb.mxu3 %v4841_v0 }
0x1836   : > { %6886 = vmatmul.msk.bf16.vlgmr.msra.gmra.mxu2 %vm575_vm4, %v9001_v50 }
0x1838   : > { %6850 = vmatmul.msk.bf16.vlgmr.msrb.gmra.mxu3 %vm2421_vm8, %v4830_v12 }
0x1839   : > { %5074 = vmatpush.bf16.msra.mxu3 %v7192_v52 }
0x183d   : > { %5075 = vmatpush.bf16.msra.mxu3 %v7191_v22 }
0x1841   : > { %5076 = vmatpush.bf16.msra.mxu3 %v7190_v38 }
0x1845   : > { %5077 = vmatpush.bf16.msra.mxu3 %v7189_v15 }
0x1846   : > { %6887 = vmatmul.msk.bf16.gmra.mxu2 %vm575_vm4, %v9033_v48 }
0x1848   : > { %6851 = vmatmul.msk.bf16.gmra.mxu3 %vm2421_vm8, %v4831_v41 }
0x1858   : > { %6912 = vmatmul.msk.bf16.vlgmr.msra.gmra.mxu3 %vm575_vm4, %v9001_v50 }
0x1868   : > { %6913 = vmatmul.msk.bf16.gmra.mxu3 %vm575_vm4, %v9033_v48 }
0x1879   : > { %v9215_v5 = vpop.f32.mrf.mxu2 }
0x1881   : > { %v9219_v20 = vpop.f32.mrf.mxu2 }
0x1889   : > { %v9223_v59 = vpop.f32.mrf.mxu2 }
0x1891   : > { %v4634_v6 = vpop.f32.mrf.mxu2 }
0x1892   : > { %v9225_v27 = vadd.f32 %v4665_v53, %v4634_v6 }
0x1899   : > { %v4820_v31 = vpop.f32.mrf.mxu2 }
0x189a   : > { %v4821_v60 = vadd.f32 %v7262_v42, %v4820_v31 }
0x18a1   : > { %v4822_v29 = vpop.f32.mrf.mxu2 }
0x18a2   : > { %v4823_v44 = vadd.f32 %v7262_v42, %v4822_v29 }
0x18a4   : > { %v4911_v56 = vpack.c.bf16 %v4823_v44, %v4821_v60 }
0x18a9   : > { %v4825_v32 = vpop.f32.mrf.mxu2 }
0x18aa   : > { %v4826_v4 = vadd.f32 %v7262_v42, %v4825_v32 }
0x18b1   : > { %v4827_v46 = vpop.f32.mrf.mxu2 }
0x18b2   : > { %v4828_v61 = vadd.f32 %v7262_v42, %v4827_v46 }
0x18b4   : > { %v4912_v25 = vpack.c.bf16 %v4828_v61, %v4826_v4  ;;  %v7196_v61 = vld [vmem:[%s9549_s8 + $0x2f8] sm:$0xff] }
0x18b6   : > { %v4920_v7 = vand.u32 %v4912_v25, %v7766_v19  ;;  %v7195_v25 = vld [vmem:[%s9549_s8 + $0x2f0] sm:$0xff] }
0x18b8   : > { %4928 = vmatpush.bf16.msra.mxu0 %v4920_v7  ;;  %v7194_v7 = vld [vmem:[%s9549_s8 + $0x2e8] sm:$0xff] }
0x18bb   : > { %v4855_v49 = vpop.f32.mrf.mxu3 }
0x18bc   : > { %4929 = vmatpush.bf16.msra.mxu0 %v4911_v56  ;;  %v4865_v30 = vsel %vm1709_vm2, %v4855_v49, -inf  ;;  %v7193_v56 = vld [vmem:[%s9549_s8 + $0x2e0] sm:$0xff] }
0x18bd   : > { %4866 = vmax.xlane.f32.xlu0 %v4865_v30 }
0x18c0   : > { %5128 = vmatpush.bf16.msrb.mxu0 %v7196_v61 }
0x18c3   : > { %v4857_v39 = vpop.f32.mrf.mxu3 }
0x18c4   : > { %v4868_v9 = vsel %vm1709_vm2, %v4857_v39, -inf  ;;  %5129 = vmatpush.bf16.msrb.mxu0 %v7195_v25  ;;  %v4664_v25 = vadd.f32 %v9221_v35, %v9223_v59 }
0x18c5   : > { %4869 = vmax.xlane.f32.xlu1 %v4868_v9 }
0x18c8   : > { %5130 = vmatpush.bf16.msrb.mxu0 %v7194_v7 }
0x18cb   : > { %v4860_v43 = vpop.f32.mrf.mxu3 }
0x18cc   : > { %v4871_v26 = vsel %vm1709_vm2, %v4860_v43, -inf  ;;  %5131 = vmatpush.bf16.msrb.mxu0 %v7193_v56 }
0x18cd   : > { %4872 = vmax.xlane.f32.xlu2 %v4871_v26 }
0x18d3   : > { %v4862_v51 = vpop.f32.mrf.mxu3 }
0x18d4   : > { %v4874_v34 = vsel %vm2462_vm9, %v4862_v51, -inf }
0x18d5   : > { %4875 = vmax.xlane.f32.xlu0 %v4874_v34 }
0x18db   : > { %v5079_v10 = vpop.f32.mrf.mxu3 }
0x18dc   : > { %v5080_v14 = vadd.f32 %v7264_v36, %v5079_v10 }
0x18e3   : > { %v5081_v54 = vpop.f32.mrf.mxu3 }
0x18e4   : > { %v5082_v33 = vadd.f32 %v7264_v36, %v5081_v54 }
0x18e6   : > { %v5145_v1 = vpack.c.bf16 %v5082_v33, %v5080_v14 }
0x18e8   : > { %v5154_v52 = vsel %vm2421_vm8, %v5145_v1, 0 }
0x18eb   : > { %v5084_v47 = vpop.f32.mrf.mxu3 }
0x18ec   : > { %v5085_v55 = vadd.f32 %v7264_v36, %v5084_v47 }
0x18f3   : > { %v5086_v3 = vpop.f32.mrf.mxu3 }
0x18f4   : > { %v5087_v37 = vadd.f32 %v7264_v36, %v5086_v3 }
0x18f6   : > { %v5146_v16 = vpack.c.bf16 %v5087_v37, %v5085_v55  ;;  %v5025_v37 = vpop.f32.mrf.mxu2 }
0x18f8   : > { %v5157_v58 = vsel %vm2421_vm8, %v5146_v16, 0 }
0x18f9   : > { %5165 = vmatpush.bf16.xpose.msrb.mxu1 %v5157_v58 }
0x18fe   : > { %v5027_v58 = vpop.f32.mrf.mxu2 }
0x1901   : > { %5166 = vmatpush.bf16.xpose.msrb.mxu1 %v5154_v52 }
0x1930   : > { %v4867_v18 = vpop.xlane.xlu0 %4866 }
0x1931   : > { %v4877_v0 = vsub.f32 %v4855_v49, %v4867_v18 }
0x1933   : > { %v4881_v23 = vmul.f32 1.442695, %v4877_v0 }
0x1935   : > { %7439 = vpow2.f32 %v4881_v23 }
0x1938   : > { %v4870_v22 = vpop.xlane.xlu1 %4869 }
0x1939   : > { %v4878_v8 = vsub.f32 %v4857_v39, %v4870_v22 }
0x193b   : > { %v7440_v57 = vpop.eup %7439  ;;  %v4883_v12 = vmul.f32 1.442695, %v4878_v8 }
0x193c   : > { %v4889_v38 = vsel %vm1709_vm2, %v7440_v57, 0.0 }
0x193d   : > { %7441 = vpow2.f32 %v4883_v12  ;;  %4890 = vadd.xlane.f32.xlu1 %v4889_v38  ;;  %v7265_v12 = vld [vmem:[%s9542_s1 + $0x24] ss:$0 sm:$0xff] }
0x1940   : > { %v4873_v15 = vpop.xlane.xlu2 %4872 }
0x1941   : > { %v4879_v63 = vsub.f32 %v4860_v43, %v4873_v15 }
0x1943   : > { %v7442_v62 = vpop.eup %7441  ;;  %v4885_v13 = vmul.f32 1.442695, %v4879_v63 }
0x1944   : > { %v4892_v41 = vsel %vm1709_vm2, %v7442_v62, 0.0 }
0x1945   : > { %7443 = vpow2.f32 %v4885_v13  ;;  %4893 = vadd.xlane.f32.xlu2 %v4892_v41 }
0x1948   : > { %v4876_v53 = vpop.xlane.xlu0 %4875 }
0x1949   : > { %v4880_v6 = vsub.f32 %v4862_v51, %v4876_v53 }
0x194b   : > { %v7444_v31 = vpop.eup %7443  ;;  %v4887_v29 = vmul.f32 1.442695, %v4880_v6 }
0x194c   : > { %v4895_v32 = vsel %vm1709_vm2, %v7444_v31, 0.0 }
0x194d   : > { %7445 = vpow2.f32 %v4887_v29  ;;  %4896 = vadd.xlane.f32.xlu0 %v4895_v32  ;;  %v4659_v29 = vadd.f32 %v9213_v45, %v9215_v5 }
0x1953   : > { %v7446_v42 = vpop.eup %7445 }
0x1954   : > { %v4898_v46 = vsel %vm2462_vm9, %v7446_v42, 0.0 }
0x1955   : > { %4899 = vadd.xlane.f32.xlu1 %v4898_v46  ;;  %v4661_v46 = vadd.f32 %v9217_v17, %v9219_v20 }
0x19b0   : > { %v4891_v4 = vpop.xlane.xlu1 %4890 }
0x19b1   : > { %7447 = vrcp.f32 %v4891_v4 }
0x19b7   : > { %v7448_v60 = vpop.eup %7447 }
0x19b8   : > { %v4894_v44 = vpop.xlane.xlu2 %4893  ;;  %v4905_v30 = vmul.f32 %v7448_v60, %v7440_v57 }
0x19b9   : > { %7449 = vrcp.f32 %v4894_v44 }
0x19bf   : > { %v7450_v49 = vpop.eup %7449 }
0x19c0   : > { %v4906_v39 = vmul.f32 %v7450_v49, %v7442_v62  ;;  %v4897_v43 = vpop.xlane.xlu0 %4896 }
0x19c1   : > { %7451 = vrcp.f32 %v4897_v43 }
0x19c2   : > { %v4909_v9 = vpack.c.bf16 %v4906_v39, %v4905_v30 }
0x19c4   : > { %6852 = vmatmul.msk.bf16.vlgmr.msra.gmra.mxu0 %vm1709_vm2, %v4909_v9 }
0x19c7   : > { %v7452_v51 = vpop.eup %7451 }
0x19c8   : > { %v4900_v26 = vpop.xlane.xlu1 %4899  ;;  %v4907_v28 = vmul.f32 %v7452_v51, %v7444_v31 }
0x19c9   : > { %7453 = vrcp.f32 %v4900_v26 }
0x19cf   : > { %v7454_v34 = vpop.eup %7453 }
0x19d0   : > { %v4908_v10 = vmul.f32 %v7454_v34, %v7446_v42 }
0x19d2   : > { %v4910_v54 = vpack.c.bf16 %v4908_v10, %v4907_v28 }
0x19d4   : > { %6853 = vmatmul.msk.bf16.gmra.mxu0 %vm1709_vm2, %v4910_v54 }
0x19e4   : > { %6938 = vmatmul.msk.bf16.vlgmr.msrb.gmra.mxu0 %vm575_vm4, %v9001_v50  ;;  %v7263_v50 = vld [vmem:[%s9542_s1 + $0x1c] ss:$0 sm:$0xff] }
0x19e5   : > { %v5028_v1 = vadd.f32 %v7263_v50, %v5027_v58  ;;  %v5026_v52 = vadd.f32 %v7263_v50, %v5025_v37 }
0x19e7   : > { %v5143_v0 = vpack.c.bf16 %v5028_v1, %v5026_v52  ;;  %v7197_v1 = vld [vmem:[%s9550_s9 + $0x38] sm:$0xff] }
0x19e8   : > { %5278 = vmatpush.bf16.msrb.mxu3 %v7197_v1 }
0x19f4   : > { %6939 = vmatmul.msk.bf16.gmra.mxu0 %vm575_vm4, %v9033_v48  ;;  %v5030_v48 = vpop.f32.mrf.mxu2 }
0x19f5   : > { %v5031_v57 = vadd.f32 %v7263_v50, %v5030_v48 }
0x19fc   : > { %v5032_v22 = vpop.f32.mrf.mxu2 }
0x19fd   : > { %v5033_v8 = vadd.f32 %v7263_v50, %v5032_v22 }
0x19ff   : > { %v5144_v15 = vpack.c.bf16 %v5033_v8, %v5031_v57 }
0x1a41   : > { %v4931_v47 = vpop.f32.mrf.mxu0 }
0x1a49   : > { %v4933_v36 = vpop.f32.mrf.mxu0 }
0x1a4a   : > { %v4941_v3 = vpack.c.bf16 %v4933_v36, %v4931_v47 }
0x1a4c   : > { %6860 = vmatmul.msk.bf16.vlgmr.msra.gmra.mxu1 %vm2421_vm8, %v4941_v3 }
0x1a51   : > { %v4936_v55 = vpop.f32.mrf.mxu0 }
0x1a59   : > { %v4938_v16 = vpop.f32.mrf.mxu0 }
0x1a5a   : > { %v4942_v33 = vpack.c.bf16 %v4938_v16, %v4936_v55 }
0x1a5c   : > { %6861 = vmatmul.msk.bf16.gmra.mxu1 %vm2421_vm8, %v4942_v33 }
0x1a61   : > { %v5133_v14 = vpop.f32.mrf.mxu0 }
0x1a62   : > { %v5134_v6 = vadd.f32 %v7265_v12, %v5133_v14 }
0x1a69   : > { %v5135_v18 = vpop.f32.mrf.mxu0 }
0x1a6a   : > { %v5136_v41 = vadd.f32 %v7265_v12, %v5135_v18 }
0x1a6c   : > { %6940 = vmatmul.msk.bf16.vlgmr.msrb.gmra.mxu1 %vm2421_vm8, %v5143_v0  ;;  %v5224_v31 = vpack.c.bf16 %v5136_v41, %v5134_v6 }
0x1a71   : > { %v5138_v23 = vpop.f32.mrf.mxu0 }
0x1a72   : > { %v5139_v63 = vadd.f32 %v7265_v12, %v5138_v23 }
0x1a79   : > { %v5140_v38 = vpop.f32.mrf.mxu0 }
0x1a7a   : > { %v5141_v62 = vadd.f32 %v7265_v12, %v5140_v38 }
0x1a7c   : > { %v5225_v13 = vpack.c.bf16 %v5141_v62, %v5139_v63  ;;  %6941 = vmatmul.msk.bf16.gmra.mxu1 %vm2421_vm8, %v5144_v15 }
0x1a7e   : > { %v5233_v53 = vand.u32 %v5225_v13, %v7766_v19 }
0x1a80   : > { %5241 = vmatpush.bf16.msrb.mxu2 %v5233_v53 }
0x1a84   : > { %5242 = vmatpush.bf16.msrb.mxu2 %v5224_v31 }
0x1ac9   : > { %v4967_v32 = vpop.f32.mrf.mxu1 }
0x1aca   : > { %v9278_v42 = vadd.f32 %v4967_v32, %v4659_v29  ;;  %v7266_v32 = vld [vmem:[%s9542_s1 + $0x25] ss:$0 sm:$0xff] }
0x1ad1   : > { %v4969_v4 = vpop.f32.mrf.mxu1 }
0x1ad2   : > { %v9282_v61 = vadd.f32 %v4969_v4, %v4661_v46 }
0x1ad9   : > { %v4972_v19 = vpop.f32.mrf.mxu1 }
0x1ada   : > { %v9286_v44 = vadd.f32 %v4972_v19, %v4664_v25 }
0x1ae1   : > { %v4974_v7 = vpop.f32.mrf.mxu1 }
0x1ae2   : > { %v9289_v60 = vadd.f32 %v4974_v7, %v9225_v27 }
0x1ae9   : > { %v5168_v45 = vpop.f32.mrf.mxu1 }
0x1aea   : > { %v5178_v5 = vsel %vm1709_vm2, %v5168_v45, -inf }
0x1aeb   : > { %5179 = vmax.xlane.f32.xlu2 %v5178_v5 }
0x1af1   : > { %v5170_v56 = vpop.f32.mrf.mxu1 }
0x1af2   : > { %v5181_v17 = vsel %vm1709_vm2, %v5170_v56, -inf }
0x1af3   : > { %5182 = vmax.xlane.f32.xlu0 %v5181_v17 }
0x1af9   : > { %v5173_v20 = vpop.f32.mrf.mxu1 }
0x1afa   : > { %v5184_v49 = vsel %vm1709_vm2, %v5173_v20, -inf }
0x1afb   : > { %5185 = vmax.xlane.f32.xlu1 %v5184_v49 }
0x1b01   : > { %v5175_v35 = vpop.f32.mrf.mxu1 }
0x1b02   : > { %v5187_v59 = vsel %vm2462_vm9, %v5175_v35, -inf }
0x1b03   : > { %5188 = vmax.xlane.f32.xlu2 %v5187_v59 }
0x1b5e   : > { %v5180_v30 = vpop.xlane.xlu2 %5179 }
0x1b5f   : > { %v5190_v39 = vsub.f32 %v5168_v45, %v5180_v30 }
0x1b61   : > { %v5194_v27 = vmul.f32 1.442695, %v5190_v39 }
0x1b63   : > { %7455 = vpow2.f32 %v5194_v27 }
0x1b66   : > { %v5183_v9 = vpop.xlane.xlu0 %5182 }
0x1b67   : > { %v5191_v43 = vsub.f32 %v5170_v56, %v5183_v9 }
0x1b69   : > { %v7456_v26 = vpop.eup %7455  ;;  %v5196_v51 = vmul.f32 1.442695, %v5191_v43 }
0x1b6a   : > { %v5202_v34 = vsel %vm1709_vm2, %v7456_v26, 0.0 }
0x1b6b   : > { %7457 = vpow2.f32 %v5196_v51  ;;  %5203 = vadd.xlane.f32.xlu0 %v5202_v34 }
0x1b6e   : > { %v5186_v28 = vpop.xlane.xlu1 %5185 }
0x1b6f   : > { %v5192_v10 = vsub.f32 %v5173_v20, %v5186_v28 }
0x1b71   : > { %v7458_v54 = vpop.eup %7457  ;;  %v5198_v47 = vmul.f32 1.442695, %v5192_v10 }
0x1b72   : > { %v5205_v36 = vsel %vm1709_vm2, %v7458_v54, 0.0 }
0x1b73   : > { %7459 = vpow2.f32 %v5198_v47  ;;  %5206 = vadd.xlane.f32.xlu1 %v5205_v36 }
0x1b76   : > { %v5189_v3 = vpop.xlane.xlu2 %5188 }
0x1b77   : > { %v5193_v55 = vsub.f32 %v5175_v35, %v5189_v3 }
0x1b79   : > { %v7460_v37 = vpop.eup %7459  ;;  %v5200_v16 = vmul.f32 1.442695, %v5193_v55 }
0x1b7a   : > { %v5208_v33 = vsel %vm1709_vm2, %v7460_v37, 0.0 }
0x1b7b   : > { %7461 = vpow2.f32 %v5200_v16  ;;  %5209 = vadd.xlane.f32.xlu2 %v5208_v33 }
0x1b81   : > { %v7462_v58 = vpop.eup %7461 }
0x1b82   : > { %v5211_v14 = vsel %vm2462_vm9, %v7462_v58, 0.0 }
0x1b83   : > { %5212 = vadd.xlane.f32.xlu0 %v5211_v14  ;;  %v7201_v14 = vld [vmem:[%s9551_s10 + $0x38] sm:$0xff] }
0x1b84   : > { %5451 = vmatpush.bf16.msra.mxu0 %v7201_v14 }
0x1bde   : > { %v5204_v50 = vpop.xlane.xlu0 %5203 }
0x1bdf   : > { %7463 = vrcp.f32 %v5204_v50  ;;  %v7200_v50 = vld [vmem:[%s9551_s10 + $0x30] sm:$0xff] }
0x1be0   : > { %5452 = vmatpush.bf16.msra.mxu0 %v7200_v50 }
0x1be5   : > { %v7464_v48 = vpop.eup %7463 }
0x1be6   : > { %v5207_v52 = vpop.xlane.xlu1 %5206  ;;  %v5218_v0 = vmul.f32 %v7464_v48, %v7456_v26  ;;  %v7199_v48 = vld [vmem:[%s9551_s10 + $0x28] sm:$0xff] }
0x1be7   : > { %7465 = vrcp.f32 %v5207_v52  ;;  %5453 = vmatpush.bf16.msra.mxu0 %v7199_v48 }
0x1bed   : > { %v7466_v18 = vpop.eup %7465 }
0x1bee   : > { %v5219_v23 = vmul.f32 %v7466_v18, %v7458_v54  ;;  %v5210_v8 = vpop.xlane.xlu2 %5209 }
0x1bef   : > { %7467 = vrcp.f32 %v5210_v8 }
0x1bf0   : > { %v5222_v22 = vpack.c.bf16 %v5219_v23, %v5218_v0  ;;  %v7198_v0 = vld [vmem:[%s9551_s10 + $0x20] sm:$0xff] }
0x1bf1   : > { %5454 = vmatpush.bf16.msra.mxu0 %v7198_v0 }
0x1bf2   : > { %6942 = vmatmul.msk.bf16.vlgmr.msrb.gmra.mxu2 %vm1709_vm2, %v5222_v22 }
0x1bf5   : > { %v7468_v12 = vpop.eup %7467 }
0x1bf6   : > { %v5213_v57 = vpop.xlane.xlu0 %5212  ;;  %v5220_v15 = vmul.f32 %v7468_v12, %v7460_v37 }
0x1bf7   : > { %7469 = vrcp.f32 %v5213_v57 }
0x1bfd   : > { %v7470_v38 = vpop.eup %7469 }
0x1bfe   : > { %v5221_v63 = vmul.f32 %v7470_v38, %v7462_v58 }
0x1c00   : > { %v5223_v62 = vpack.c.bf16 %v5221_v63, %v5220_v15 }
0x1c02   : > { %6943 = vmatmul.msk.bf16.gmra.mxu2 %vm1709_vm2, %v5223_v62 }
0x1c75   : > { %v5244_v13 = vpop.f32.mrf.mxu2 }
0x1c7d   : > { %v5246_v41 = vpop.f32.mrf.mxu2 }
0x1c7e   : > { %v5254_v53 = vpack.c.bf16 %v5246_v41, %v5244_v13 }
0x1c80   : > { %6950 = vmatmul.msk.bf16.vlgmr.msrb.gmra.mxu3 %vm2421_vm8, %v5254_v53 }
0x1c85   : > { %v5249_v6 = vpop.f32.mrf.mxu2 }
0x1c8d   : > { %v5251_v31 = vpop.f32.mrf.mxu2 }
0x1c8e   : > { %v5255_v29 = vpack.c.bf16 %v5251_v31, %v5249_v6 }
0x1c90   : > { %6951 = vmatmul.msk.bf16.gmra.mxu3 %vm2421_vm8, %v5255_v29 }
0x1d03   : > { %v5280_v46 = vpop.f32.mrf.mxu3 }
0x1d04   : > { %v5290_v4 = vadd.f32 %v5280_v46, %v9278_v42 }
0x1d06   : > { %v5296_v25 = vadd.f32 %v7266_v32, %v5290_v4 }
0x1d08   : > { %v5300_v19 = vadd.f32 %v5296_v25, %v8967_v40 }
0x1d0a   : > { %v5306_v7 = vsel %vm575_vm4, %v5300_v19, 0.0 }
0x1d0b   : > { %5307 = vadd.xlane.f32.xlu1 %v5306_v7  ;;  %v5282_v45 = vpop.f32.mrf.mxu3 }
0x1d0c   : > { %v5291_v5 = vadd.f32 %v5282_v45, %v9282_v61  ;;  %v7267_v45 = vld [vmem:[%s9542_s1 + $0x26] ss:$0 sm:$0xff] }
0x1d0e   : > { %v5297_v56 = vadd.f32 %v7266_v32, %v5291_v5 }
0x1d10   : > { %v5301_v17 = vadd.f32 %v5297_v56, %v8994_v21 }
0x1d12   : > { %v5309_v20 = vsel %vm575_vm4, %v5301_v17, 0.0 }
0x1d13   : > { %5310 = vadd.xlane.f32.xlu2 %v5309_v20  ;;  %v5285_v49 = vpop.f32.mrf.mxu3 }
0x1d14   : > { %v5292_v35 = vadd.f32 %v5285_v49, %v9286_v44 }
0x1d16   : > { %v5298_v59 = vadd.f32 %v7266_v32, %v5292_v35 }
0x1d18   : > { %v5302_v42 = vadd.f32 %v5298_v59, %v9018_v11  ;;  %v7268_v59 = vld [vmem:[%s9542_s1 + $0x27] ss:$0 sm:$0xff] }
0x1d1a   : > { %v5312_v40 = vsel %vm575_vm4, %v5302_v42, 0.0 }
0x1d1b   : > { %v5287_v30 = vpop.f32.mrf.mxu3  ;;  %5313 = vadd.xlane.f32.xlu0 %v5312_v40 }
0x1d1c   : > { %v5293_v39 = vadd.f32 %v5287_v30, %v9289_v60 }
0x1d1e   : > { %v5299_v27 = vadd.f32 %v7266_v32, %v5293_v39 }
0x1d20   : > { %v5303_v61 = vadd.f32 %v5299_v27, %v9026_v24 }
0x1d22   : > { %v5315_v21 = vsel %vm589_vm5, %v5303_v61, 0.0 }
0x1d23   : > { %5316 = vadd.xlane.f32.xlu1 %v5315_v21 }
0x1d7e   : > { %v5308_v9 = vpop.xlane.xlu1 %5307 }
0x1d7f   : > { %v5318_v43 = vmul.f32 %v5308_v9, %v8051_v2 }
0x1d81   : > { %v5322_v26 = vsub.f32 %v5300_v19, %v5318_v43 }
0x1d83   : > { %v5326_v44 = vmul.f32 %v5322_v26, %v5322_v26 }
0x1d85   : > { %v5330_v51 = vsel %vm575_vm4, %v5326_v44, 0.0 }
0x1d86   : > { %5331 = vadd.xlane.f32.xlu2 %v5330_v51  ;;  %v5311_v11 = vpop.xlane.xlu2 %5310 }
0x1d87   : > { %v5319_v34 = vmul.f32 %v5311_v11, %v8051_v2 }
0x1d89   : > { %v9324_v28 = vsub.f32 %v5301_v17, %v5319_v34 }
0x1d8b   : > { %v5327_v60 = vmul.f32 %v9324_v28, %v9324_v28 }
0x1d8d   : > { %v5333_v24 = vsel %vm575_vm4, %v5327_v60, 0.0 }
0x1d8e   : > { %5334 = vadd.xlane.f32.xlu0 %v5333_v24  ;;  %v5314_v10 = vpop.xlane.xlu0 %5313 }
0x1d8f   : > { %v5320_v54 = vmul.f32 %v5314_v10, %v8051_v2 }
0x1d91   : > { %v9330_v47 = vsub.f32 %v5302_v42, %v5320_v54 }
0x1d93   : > { %v5328_v36 = vmul.f32 %v9330_v47, %v9330_v47 }
0x1d95   : > { %v5336_v3 = vsel %vm575_vm4, %v5328_v36, 0.0 }
0x1d96   : > { %v5317_v55 = vpop.xlane.xlu1 %5316  ;;  %5337 = vadd.xlane.f32.xlu1 %v5336_v3 }
0x1d97   : > { %v5321_v37 = vmul.f32 %v5317_v55, %v8051_v2 }
0x1d99   : > { %v9336_v16 = vsub.f32 %v5303_v61, %v5321_v37 }
0x1d9b   : > { %v5329_v33 = vmul.f32 %v9336_v16, %v9336_v16 }
0x1d9d   : > { %v5339_v58 = vsel %vm589_vm5, %v5329_v33, 0.0 }
0x1d9e   : > { %5340 = vadd.xlane.f32.xlu2 %v5339_v58 }
0x1df9   : > { %v5332_v1 = vpop.xlane.xlu2 %5331 }
0x1dfa   : > { %v5342_v52 = vmul.f32 %v5332_v1, %v8051_v2  ;;  %v7209_v1 = vld [vmem:[%s9552_s11 + $0x78] sm:$0xff] }
0x1dfb   : > { %5711 = vmatpush.bf16.msra.mxu1 %v7209_v1 }
0x1dfc   : > { %v5346_v18 = vadd.f32 1e-05, %v5342_v52 }
0x1dfe   : > { %7471 = vrsqrt.f32 %v5346_v18  ;;  %vm5356_vm8 = vweird.f32 %v5346_v18 }
0x1e01   : > { %v5335_v23 = vpop.xlane.xlu0 %5334 }
0x1e02   : > { %v5343_v22 = vmul.f32 %v5335_v23, %v8051_v2 }
0x1e04   : > { %v7472_v8 = vpop.eup %7471  ;;  %v5347_v57 = vadd.f32 1e-05, %v5343_v22  ;;  %v7208_v22 = vld [vmem:[%s9552_s11 + $0x70] sm:$0xff] }
0x1e05   : > { %v5351_v12 = vmul.f32 %v7472_v8, %v5346_v18  ;;  %vm5357_vm2 = vweird.f32 %v7472_v8  ;;  %5712 = vmatpush.bf16.msra.mxu1 %v7208_v22 }
0x1e06   : > { %7473 = vrsqrt.f32 %v5347_v57  ;;  %vm5358_vm9 = vmor %vm5356_vm8, %vm5357_vm2  ;;  %vm5366_vm3 = vweird.f32 %v5347_v57 }
0x1e07   : > { %v5352_v38 = vmul.f32 %v7472_v8, %v5351_v12 }
0x1e09   : > { %v5353_v15 = vmul.f32 0.5, %v5352_v38  ;;  %v5338_v63 = vpop.xlane.xlu1 %5337 }
0x1e0a   : > { %v5344_v62 = vmul.f32 %v5338_v63, %v8051_v2 }
0x1e0b   : > { %v5354_v13 = vsub.f32 1.5, %v5353_v15  ;;  %v7207_v15 = vld [vmem:[%s9552_s11 + $0x68] sm:$0xff] }
0x1e0c   : > { %v7474_v41 = vpop.eup %7473  ;;  %v5348_v53 = vadd.f32 1e-05, %v5344_v62  ;;  %5713 = vmatpush.bf16.msra.mxu1 %v7207_v15 }
0x1e0d   : > { %v5355_v6 = vmul.f32 %v7472_v8, %v5354_v13  ;;  %v5361_v31 = vmul.f32 %v7474_v41, %v5347_v57  ;;  %vm5367_vm1 = vweird.f32 %v7474_v41 }
0x1e0e   : > { %7475 = vrsqrt.f32 %v5348_v53  ;;  %vm5368_vm6 = vmor %vm5366_vm3, %vm5367_vm1  ;;  %vm5376_vm10 = vweird.f32 %v5348_v53 }
0x1e0f   : > { %v5362_v29 = vmul.f32 %v7474_v41, %v5361_v31  ;;  %v5359_v32 = vsel %vm5358_vm9, %v7472_v8, %v5355_v6 }
0x1e10   : > { %v5390_v5 = vmul.f32 %v5359_v32, %v5322_v26 }
0x1e11   : > { %v5363_v46 = vmul.f32 0.5, %v5362_v29  ;;  %v5341_v4 = vpop.xlane.xlu2 %5340  ;;  %v7206_v29 = vld [vmem:[%s9552_s11 + $0x60] sm:$0xff] }
0x1e12   : > { %v5345_v25 = vmul.f32 %v5341_v4, %v8051_v2  ;;  %v5395_v42 = vmul.f32 %v7267_v45, %v5390_v5  ;;  %5714 = vmatpush.bf16.msra.mxu1 %v7206_v29 }
0x1e13   : > { %v5364_v19 = vsub.f32 1.5, %v5363_v46 }
0x1e14   : > { %v7476_v7 = vpop.eup %7475  ;;  %v5349_v56 = vadd.f32 1e-05, %v5345_v25  ;;  %v9364_v21 = vadd.f32 %v7268_v59, %v5395_v42 }
0x1e15   : > { %v5365_v17 = vmul.f32 %v7474_v41, %v5364_v19  ;;  %v5371_v20 = vmul.f32 %v7476_v7, %v5348_v53  ;;  %vm5377_vm7 = vweird.f32 %v7476_v7 }
0x1e16   : > { %7477 = vrsqrt.f32 %v5349_v56  ;;  %vm5378_vm11 = vmor %vm5376_vm10, %vm5377_vm7  ;;  %vm5386_vm13 = vweird.f32 %v5349_v56 }
0x1e17   : > { %v5369_v49 = vsel %vm5368_vm6, %v7474_v41, %v5365_v17  ;;  %v5372_v35 = vmul.f32 %v7476_v7, %v5371_v20 }
0x1e18   : > { %v5391_v40 = vmul.f32 %v5369_v49, %v9324_v28 }
0x1e19   : > { %v5373_v30 = vmul.f32 0.5, %v5372_v35 }
0x1e1a   : > { %v5396_v39 = vmul.f32 %v7267_v45, %v5391_v40 }
0x1e1b   : > { %v5374_v27 = vsub.f32 1.5, %v5373_v30 }
0x1e1c   : > { %v7478_v61 = vpop.eup %7477  ;;  %v9366_v9 = vadd.f32 %v7268_v59, %v5396_v39 }
0x1e1d   : > { %v5375_v43 = vmul.f32 %v7476_v7, %v5374_v27  ;;  %v5381_v26 = vmul.f32 %v7478_v61, %v5349_v56  ;;  %vm5387_vm12 = vweird.f32 %v7478_v61  ;;  %v7205_v56 = vld [vmem:[%s9552_s11 + $0x58] sm:$0xff] }
0x1e1e   : > { %v5404_v44 = vpack.c.bf16 %v9366_v9, %v9364_v21  ;;  %vm5388_vm14 = vmor %vm5386_vm13, %vm5387_vm12  ;;  %5715 = vmatpush.bf16.msra.mxu1 %v7205_v56 }
0x1e1f   : > { %v5382_v51 = vmul.f32 %v7478_v61, %v5381_v26  ;;  %v5379_v11 = vsel %vm5378_vm11, %v7476_v7, %v5375_v43  ;;  %v7204_v43 = vld [vmem:[%s9552_s11 + $0x50] sm:$0xff] }
0x1e20   : > { %6976 = vmatmul.msk.bf16.vlgmr.msra.gmra.mxu0 %vm575_vm4, %v5404_v44  ;;  %v5392_v60 = vmul.f32 %v5379_v11, %v9330_v47  ;;  %v7269_v47 = vld [vmem:[%s9542_s1 + $0x28] ss:$0 sm:$0xff] }
0x1e21   : > { %v5383_v34 = vmul.f32 0.5, %v5382_v51 }
0x1e22   : > { %v5397_v36 = vmul.f32 %v7267_v45, %v5392_v60  ;;  %5716 = vmatpush.bf16.msra.mxu1 %v7204_v43 }
0x1e23   : > { %v5384_v28 = vsub.f32 1.5, %v5383_v34 }
0x1e24   : > { %v9373_v55 = vadd.f32 %v7268_v59, %v5397_v36 }
0x1e25   : > { %v5385_v24 = vmul.f32 %v7478_v61, %v5384_v28 }
0x1e27   : > { %v5389_v10 = vsel %vm5388_vm14, %v7478_v61, %v5385_v24 }
0x1e28   : > { %v5393_v54 = vmul.f32 %v5389_v10, %v9336_v16  ;;  %v7203_v10 = vld [vmem:[%s9552_s11 + $0x48] sm:$0xff] }
0x1e29   : > { %5717 = vmatpush.bf16.msra.mxu1 %v7203_v10 }
0x1e2a   : > { %v5398_v3 = vmul.f32 %v7267_v45, %v5393_v54 }
0x1e2c   : > { %v9375_v37 = vadd.f32 %v7268_v59, %v5398_v3 }
0x1e2e   : > { %v5405_v33 = vpack.c.bf16 %v9375_v37, %v9373_v55 }
0x1e30   : > { %6977 = vmatmul.msk.bf16.gmra.mxu0 %vm575_vm4, %v5405_v33 }
0x1e9d   : > { %v5456_v58 = vpop.f32.mrf.mxu0 }
0x1e9e   : > { %v9383_v14 = vadd.f32 %v7269_v47, %v5456_v58 }
0x1ea0   : > { %v9386_v16 = vmul.f32 0.70710677, %v9383_v14 }
0x1ea2   : > { %v5474_v50 = vmul.f32 %v9386_v16, %v9386_v16 }
0x1ea4   : > { %v9393_v52 = vmin.f32 %v5474_v50, 16.0 }
0x1ea5   : > { %v5458_v48 = vpop.f32.mrf.mxu0 }
0x1ea6   : > { %v5476_v18 = vmul.f32 2.1237322e-06, %v9393_v52  ;;  %v5487_v0 = vmul.f32 3.8918573e-05, %v9393_v52  ;;  %v9397_v23 = vadd.f32 %v7269_v47, %v5458_v48 }
0x1ea8   : > { %v5477_v8 = vadd.f32 0.00028619796, %v5476_v18  ;;  %v5488_v57 = vadd.f32 0.001143296, %v5487_v0  ;;  %v9403_v12 = vmul.f32 0.70710677, %v9397_v23 }
0x1ea9   : > { %v7202_v18 = vld [vmem:[%s9552_s11 + $0x40] sm:$0xff] }
0x1eaa   : > { %v5489_v38 = vmul.f32 %v5488_v57, %v9393_v52  ;;  %v5478_v63 = vmul.f32 %v5477_v8, %v9393_v52  ;;  %v5514_v62 = vmul.f32 %v9403_v12, %v9403_v12  ;;  %5718 = vmatpush.bf16.msra.mxu1 %v7202_v18 }
0x1eac   : > { %v5490_v13 = vadd.f32 0.014752088, %v5489_v38  ;;  %v9412_v41 = vmin.f32 %v5514_v62, 16.0  ;;  %v5479_v32 = vadd.f32 0.0036580483, %v5478_v63 }
0x1ead   : > { %v5461_v53 = vpop.f32.mrf.mxu0 }
0x1eae   : > { %v5491_v6 = vmul.f32 %v5490_v13, %v9393_v52  ;;  %v9415_v31 = vadd.f32 %v7269_v47, %v5461_v53  ;;  %v5516_v46 = vmul.f32 2.1237322e-06, %v9412_v41  ;;  %v5527_v4 = vmul.f32 3.8918573e-05, %v9412_v41 }
0x1eaf   : > { %v5480_v17 = vmul.f32 %v5479_v32, %v9393_v52 }
0x1eb0   : > { %v5492_v25 = vadd.f32 0.112945676, %v5491_v6  ;;  %v5517_v19 = vadd.f32 0.00028619796, %v5516_v46  ;;  %v5528_v7 = vadd.f32 0.001143296, %v5527_v4 }
0x1eb1   : > { %v9423_v45 = vmul.f32 0.70710677, %v9415_v31  ;;  %v5481_v26 = vadd.f32 0.05243302, %v5480_v17 }
0x1eb2   : > { %v5493_v5 = vmul.f32 %v5492_v25, %v9393_v52  ;;  %v5518_v20 = vmul.f32 %v5517_v19, %v9412_v41  ;;  %v5529_v49 = vmul.f32 %v5528_v7, %v9412_v41 }
0x1eb3   : > { %v5554_v35 = vmul.f32 %v9423_v45, %v9423_v45  ;;  %v5482_v54 = vmul.f32 %v5481_v26, %v9393_v52 }
0x1eb4   : > { %v5494_v59 = vadd.f32 0.4994258, %v5493_v5  ;;  %v5519_v42 = vadd.f32 0.0036580483, %v5518_v20  ;;  %v5530_v40 = vadd.f32 0.014752088, %v5529_v49 }
0x1eb5   : > { %v9434_v30 = vmin.f32 %v5554_v35, 16.0  ;;  %v5463_v39 = vpop.f32.mrf.mxu0  ;;  %v5483_v0 = vadd.f32 0.18741608, %v5482_v54 }
0x1eb6   : > { %v5495_v27 = vmul.f32 %v5494_v59, %v9393_v52  ;;  %v9437_v61 = vadd.f32 %v7269_v47, %v5463_v39  ;;  %v5520_v44 = vmul.f32 %v5519_v42, %v9412_v41  ;;  %v5531_v51 = vmul.f32 %v5530_v40, %v9412_v41 }
0x1eb7   : > { %v5556_v11 = vmul.f32 2.1237322e-06, %v9434_v30  ;;  %v5567_v28 = vmul.f32 3.8918573e-05, %v9434_v30  ;;  %v5484_v25 = vmul.f32 %v5483_v0, %v9393_v52 }
0x1eb8   : > { %v5496_v34 = vadd.f32 1.0, %v5495_v27  ;;  %v9447_v60 = vmul.f32 0.70710677, %v9437_v61  ;;  %v5532_v24 = vadd.f32 0.112945676, %v5531_v51 }
0x1eb9   : > { %v5521_v36 = vadd.f32 0.05243302, %v5520_v44  ;;  %v5557_v33 = vadd.f32 0.00028619796, %v5556_v11  ;;  %v5568_v47 = vadd.f32 0.001143296, %v5567_v28 }
0x1eba   : > { %7479 = vrcp.f32 %v5496_v34  ;;  %v5533_v3 = vmul.f32 %v5532_v24, %v9412_v41  ;;  %v5594_v58 = vmul.f32 %v9447_v60, %v9447_v60  ;;  %v5508_v4 = vand.u32 2147483648, %v5496_v34 }
0x1ebb   : > { %v5569_v1 = vmul.f32 %v5568_v47, %v9434_v30  ;;  %v5522_v22 = vmul.f32 %v5521_v36, %v9412_v41  ;;  %v5558_v38 = vmul.f32 %v5557_v33, %v9434_v30  ;;  %v5506_v49 = vand.u32 2147483647, %v5496_v34 }
0x1ebc   : > { %v5534_v50 = vadd.f32 0.4994258, %v5533_v3  ;;  %v9457_v48 = vmin.f32 %v5594_v58, 16.0  ;;  %vm5502_vm0 = vweird.f32 %v5496_v34  ;;  %v5485_v40 = vadd.f32 1.1283791, %v5484_v25 }
0x1ebd   : > { %v5570_v15 = vadd.f32 0.014752088, %v5569_v1  ;;  %v5523_v19 = vadd.f32 0.18741608, %v5522_v22  ;;  %v5559_v7 = vadd.f32 0.0036580483, %v5558_v38 }
0x1ebe   : > { %v5535_v8 = vmul.f32 %v5534_v50, %v9412_v41  ;;  %v5596_v63 = vmul.f32 2.1237322e-06, %v9457_v48  ;;  %v5607_v62 = vmul.f32 3.8918573e-05, %v9457_v48  ;;  %v5509_v44 = vor.u32 1.1754944e-38, %v5508_v4 }
0x1ebf   : > { %v5571_v6 = vmul.f32 %v5570_v15, %v9434_v30  ;;  %v5524_v39 = vmul.f32 %v5523_v19, %v9412_v41  ;;  %v5560_v52 = vmul.f32 %v5559_v7, %v9434_v30  ;;  %vm5507_vm8 = vcmp.eq.f32.partialorder %v5506_v49, 8.507059e+37 }
0x1ec0   : > { %v7480_v57 = vpop.eup %7479  ;;  %v5536_v53 = vadd.f32 1.0, %v5535_v8  ;;  %v5597_v29 = vadd.f32 0.00028619796, %v5596_v63  ;;  %v5608_v32 = vadd.f32 0.001143296, %v5607_v62  ;;  %v5486_v54 = vmul.f32 %v5485_v40, %v9386_v16 }
0x1ec1   : > { %v5498_v13 = vmul.f32 %v7480_v57, %v5496_v34  ;;  %v5572_v5 = vadd.f32 0.112945676, %v5571_v6  ;;  %vm5503_vm15 = vweird.f32 %v7480_v57  ;;  %v5525_v36 = vadd.f32 1.1283791, %v5524_v39 }
0x1ec2   : > { %7481 = vrcp.f32 %v5536_v53  ;;  %v5598_v17 = vmul.f32 %v5597_v29, %v9457_v48  ;;  %v5609_v20 = vmul.f32 %v5608_v32, %v9457_v48  ;;  %vm5504_vm2 = vmor %vm5502_vm0, %vm5503_vm15  ;;  %v5561_v41 = vadd.f32 0.05243302, %v5560_v52 }
0x1ec3   : > { %v5499_v46 = vsub.f32 1.0, %v5498_v13  ;;  %v5573_v35 = vmul.f32 %v5572_v5, %v9434_v30  ;;  %v5548_v33 = vand.u32 2147483648, %v5536_v53  ;;  %v5546_v0 = vand.u32 2147483647, %v5536_v53 }
0x1ec4   : > { %v5610_v42 = vadd.f32 0.014752088, %v5609_v20  ;;  %v5599_v51 = vadd.f32 0.0036580483, %v5598_v17  ;;  %vm5542_vm1 = vweird.f32 %v5536_v53  ;;  %v5562_v8 = vmul.f32 %v5561_v41, %v9434_v30 }
0x1ec5   : > { %v5500_v56 = vmul.f32 %v7480_v57, %v5499_v46  ;;  %v5574_v27 = vadd.f32 0.4994258, %v5573_v35  ;;  %v5526_v16 = vmul.f32 %v5525_v36, %v9403_v12  ;;  %v5549_v38 = vor.u32 1.1754944e-38, %v5548_v33 }
0x1ec6   : > { %v5611_v11 = vmul.f32 %v5610_v42, %v9457_v48  ;;  %v5600_v58 = vmul.f32 %v5599_v51, %v9457_v48  ;;  %vm5547_vm6 = vcmp.eq.f32.partialorder %v5546_v0, 8.507059e+37  ;;  %v5563_v32 = vadd.f32 0.18741608, %v5562_v8 }
0x1ec7   : > { %v5501_v59 = vadd.f32 %v7480_v57, %v5500_v56  ;;  %v5575_v10 = vmul.f32 %v5574_v27, %v9434_v30  ;;  %v5466_v12 = vmul.f32 0.5, %v9383_v14  ;;  %v5467_v5 = vmul.f32 0.5, %v9397_v23 }
0x1ec8   : > { %v7482_v43 = vpop.eup %7481  ;;  %v5612_v34 = vadd.f32 0.112945676, %v5611_v11  ;;  %v5601_v15 = vadd.f32 0.05243302, %v5600_v58  ;;  %v5564_v17 = vmul.f32 %v5563_v32, %v9434_v30  ;;  %v5469_v0 = vmul.f32 0.5, %v9437_v61 }
0x1ec9   : > { %v5505_v26 = vsel %vm5504_vm2, %v7480_v57, %v5501_v59  ;;  %v5538_v28 = vmul.f32 %v7482_v43, %v5536_v53  ;;  %v5576_v47 = vadd.f32 1.0, %v5575_v10  ;;  %vm5543_vm9 = vweird.f32 %v7482_v43 }
0x1eca   : > { %v5510_v24 = vsel %vm5507_vm8, %v5509_v44, %v5505_v26  ;;  %v5613_v50 = vmul.f32 %v5612_v34, %v9457_v48  ;;  %vm5544_vm3 = vmor %vm5542_vm1, %vm5543_vm9  ;;  %v5602_v53 = vmul.f32 %v5601_v15, %v9457_v48  ;;  %v5565_v27 = vadd.f32 1.1283791, %v5564_v17 }
0x1ecb   : > { %v5539_v3 = vsub.f32 1.0, %v5538_v28  ;;  %v5511_v1 = vmul.f32 %v5510_v24, %v5486_v54  ;;  %7483 = vrcp.f32 %v5576_v47  ;;  %v5586_v49 = vand.u32 2147483647, %v5576_v47 }
0x1ecc   : > { %v5614_v57 = vadd.f32 0.4994258, %v5613_v50  ;;  %v5588_v35 = vand.u32 2147483648, %v5576_v47  ;;  %v5603_v59 = vadd.f32 0.18741608, %v5602_v53  ;;  %vm5582_vm10 = vweird.f32 %v5576_v47 }
0x1ecd   : > { %v5540_v18 = vmul.f32 %v7482_v43, %v5539_v3  ;;  %v6978_v63 = vclamps-f32 %v5511_v1, 1.0  ;;  %vm5587_vm12 = vcmp.eq.f32.partialorder %v5586_v49, 8.507059e+37  ;;  %v5566_v11 = vmul.f32 %v5565_v27, %v9423_v45 }
0x1ece   : > { %v5615_v13 = vmul.f32 %v5614_v57, %v9457_v48  ;;  %v5589_v14 = vor.u32 1.1754944e-38, %v5588_v35  ;;  %v5604_v23 = vmul.f32 %v5603_v59, %v9457_v48 }
0x1ecf   : > { %v5541_v22 = vadd.f32 %v7482_v43, %v5540_v18  ;;  %v5634_v25 = vadd.f32 1.0, %v6978_v63  ;;  %v5468_v18 = vmul.f32 0.5, %v9415_v31 }
0x1ed0   : > { %v5616_v46 = vadd.f32 1.0, %v5615_v13  ;;  %v5605_v24 = vadd.f32 1.1283791, %v5604_v23 }
0x1ed1   : > { %v5545_v62 = vsel %vm5544_vm3, %v7482_v43, %v5541_v22  ;;  %v7484_v4 = vpop.eup %7483  ;;  %v5638_v42 = vmul.f32 %v5634_v25, %v5466_v12 }
0x1ed2   : > { %v5550_v6 = vsel %vm5547_vm6, %v5549_v38, %v5545_v62  ;;  %v5578_v7 = vmul.f32 %v7484_v4, %v5576_v47  ;;  %7485 = vrcp.f32 %v5616_v46  ;;  %vm5583_vm7 = vweird.f32 %v7484_v4  ;;  %v7270_v38 = vld [vmem:[%s9542_s1 + $0x29] ss:$0 sm:$0xff] }
0x1ed3   : > { %v5551_v29 = vmul.f32 %v5550_v6, %v5526_v16  ;;  %vm5584_vm11 = vmor %vm5582_vm10, %vm5583_vm7  ;;  %v5628_v10 = vand.u32 2147483648, %v5616_v46  ;;  %v5626_v36 = vand.u32 2147483647, %v5616_v46  ;;  %vm5622_vm14 = vweird.f32 %v5616_v46 }
0x1ed4   : > { %v5579_v20 = vsub.f32 1.0, %v5578_v7  ;;  %v5606_v48 = vmul.f32 %v5605_v24, %v9447_v60 }
0x1ed5   : > { %v6979_v19 = vclamps-f32 %v5551_v29, 1.0  ;;  %v5629_v41 = vor.u32 1.1754944e-38, %v5628_v10  ;;  %vm5627_vm0 = vcmp.eq.f32.partialorder %v5626_v36, 8.507059e+37 }
0x1ed6   : > { %v5580_v39 = vmul.f32 %v7484_v4, %v5579_v20 }
0x1ed7   : > { %v5635_v56 = vadd.f32 1.0, %v6979_v19 }
0x1ed8   : > { %v5581_v43 = vadd.f32 %v7484_v4, %v5580_v39  ;;  %v7486_v26 = vpop.eup %7485 }
0x1ed9   : > { %v5639_v40 = vmul.f32 %v5635_v56, %v5467_v5  ;;  %v5618_v30 = vmul.f32 %v7486_v26, %v5616_v46  ;;  %vm5623_vm13 = vweird.f32 %v7486_v26 }
0x1eda   : > { %v5585_v44 = vsel %vm5584_vm11, %v7484_v4, %v5581_v43  ;;  %vm5624_vm15 = vmor %vm5622_vm14, %vm5623_vm13 }
0x1edb   : > { %v5642_v52 = vpack.c.bf16 %v5639_v40, %v5638_v42  ;;  %v5590_v51 = vsel %vm5587_vm12, %v5589_v14, %v5585_v44  ;;  %v5619_v28 = vsub.f32 1.0, %v5618_v30 }
0x1edc   : > { %v5591_v34 = vmul.f32 %v5590_v51, %v5566_v11 }
0x1edd   : > { %5719 = vmatmul.bf16.vlgmr.msra.gmra.mxu1 %v5642_v52  ;;  %v5620_v54 = vmul.f32 %v7486_v26, %v5619_v28 }
0x1ede   : > { %v6980_v33 = vclamps-f32 %v5591_v34, 1.0 }
0x1edf   : > { %v5621_v3 = vadd.f32 %v7486_v26, %v5620_v54 }
0x1ee0   : > { %v5636_v1 = vadd.f32 1.0, %v6980_v33 }
0x1ee1   : > { %v5625_v47 = vsel %vm5624_vm15, %v7486_v26, %v5621_v3 }
0x1ee2   : > { %v5630_v58 = vsel %vm5627_vm0, %v5629_v41, %v5625_v47  ;;  %v5640_v8 = vmul.f32 %v5636_v1, %v5468_v18  ;;  %v7271_v47 = vld [vmem:[%s9542_s1 + $0x2a] ss:$0 sm:$0xff] }
0x1ee3   : > { %v5631_v50 = vmul.f32 %v5630_v58, %v5606_v48 }
0x1ee5   : > { %v6981_v45 = vclamps-f32 %v5631_v50, 1.0 }
0x1ee7   : > { %v5637_v22 = vadd.f32 1.0, %v6981_v45  ;;  %v7272_v45 = vld [vmem:[%s9542_s1 + $0x2b] ss:$0 sm:$0xff] }
0x1ee9   : > { %v5641_v57 = vmul.f32 %v5637_v22, %v5469_v0 }
0x1eeb   : > { %v5643_v16 = vpack.c.bf16 %v5641_v57, %v5640_v8 }
0x1eed   : > { %5724 = vmatmul.bf16.gmra.mxu1 %v5643_v16 }
0x1f5a   : > { %v5720_v60 = vpop.f32.mrf.mxu1 }
0x1f5b   : > { %v5721_v15 = vadd.f32 %v7270_v38, %v5720_v60 }
0x1f5d   : > { %v5730_v63 = vadd.f32 %v5721_v15, %v9364_v21 }
0x1f5f   : > { %v5736_v62 = vsel %vm575_vm4, %v5730_v63, 0.0 }
0x1f60   : > { %5737 = vadd.xlane.f32.xlu0 %v5736_v62 }
0x1f62   : > { %v5722_v13 = vpop.f32.mrf.mxu1 }
0x1f63   : > { %v5723_v31 = vadd.f32 %v7270_v38, %v5722_v13 }
0x1f65   : > { %v5731_v61 = vadd.f32 %v5723_v31, %v9366_v9 }
0x1f67   : > { %v5739_v6 = vsel %vm575_vm4, %v5731_v61, 0.0 }
0x1f68   : > { %5740 = vadd.xlane.f32.xlu1 %v5739_v6 }
0x1f6a   : > { %v5725_v29 = vpop.f32.mrf.mxu1 }
0x1f6b   : > { %v5726_v32 = vadd.f32 %v7270_v38, %v5725_v29 }
0x1f6d   : > { %v5732_v46 = vadd.f32 %v5726_v32, %v9373_v55 }
0x1f6f   : > { %v5742_v4 = vsel %vm575_vm4, %v5732_v46, 0.0 }
0x1f70   : > { %5743 = vadd.xlane.f32.xlu2 %v5742_v4 }
0x1f72   : > { %v5727_v53 = vpop.f32.mrf.mxu1 }
0x1f73   : > { %v5728_v25 = vadd.f32 %v7270_v38, %v5727_v53 }
0x1f75   : > { %v5733_v21 = vadd.f32 %v5728_v25, %v9375_v37 }
0x1f77   : > { %v5745_v19 = vsel %vm589_vm5, %v5733_v21, 0.0 }
0x1f78   : > { %5746 = vadd.xlane.f32.xlu0 %v5745_v19 }
0x1fd3   : > { %v5738_v7 = vpop.xlane.xlu0 %5737 }
0x1fd4   : > { %v5748_v9 = vmul.f32 %v5738_v7, %v8051_v2 }
0x1fd6   : > { %v5752_v12 = vsub.f32 %v5730_v63, %v5748_v9 }
0x1fd8   : > { %v5756_v5 = vmul.f32 %v5752_v12, %v5752_v12 }
0x1fda   : > { %v5760_v56 = vsel %vm575_vm4, %v5756_v5, 0.0 }
0x1fdb   : > { %v5741_v17 = vpop.xlane.xlu1 %5740  ;;  %5761 = vadd.xlane.f32.xlu1 %v5760_v56 }
0x1fdc   : > { %v5749_v55 = vmul.f32 %v5741_v17, %v8051_v2 }
0x1fde   : > { %v5753_v20 = vsub.f32 %v5731_v61, %v5749_v55 }
0x1fe0   : > { %v5757_v49 = vmul.f32 %v5753_v20, %v5753_v20 }
0x1fe2   : > { %v5763_v35 = vsel %vm575_vm4, %v5757_v49, 0.0 }
0x1fe3   : > { %5764 = vadd.xlane.f32.xlu2 %v5763_v35  ;;  %v5744_v37 = vpop.xlane.xlu2 %5743 }
0x1fe4   : > { %v5750_v59 = vmul.f32 %v5744_v37, %v8051_v2 }
0x1fe6   : > { %v9507_v42 = vsub.f32 %v5732_v46, %v5750_v59 }
0x1fe8   : > { %v5758_v40 = vmul.f32 %v9507_v42, %v9507_v42 }
0x1fea   : > { %v5766_v39 = vsel %vm575_vm4, %v5758_v40, 0.0 }
0x1feb   : > { %5767 = vadd.xlane.f32.xlu0 %v5766_v39  ;;  %v5747_v52 = vpop.xlane.xlu0 %5746 }
0x1fec   : > { %v5751_v27 = vmul.f32 %v5747_v52, %v8051_v2 }
0x1fee   : > { %v9513_v43 = vsub.f32 %v5733_v21, %v5751_v27 }
0x1ff0   : > { %v5759_v26 = vmul.f32 %v9513_v43, %v9513_v43 }
0x1ff2   : > { %v5769_v14 = vsel %vm589_vm5, %v5759_v26, 0.0 }
0x1ff3   : > { %5770 = vadd.xlane.f32.xlu1 %v5769_v14 }
0x204e   : > { %v5762_v23 = vpop.xlane.xlu1 %5761 }
0x204f   : > { %v5772_v44 = vmul.f32 %v5762_v23, %v8051_v2 }
0x2051   : > { %v5776_v30 = vadd.f32 1e-05, %v5772_v44 }
0x2053   : > { %7487 = vrsqrt.f32 %v5776_v30  ;;  %vm5786_vm8 = vweird.f32 %v5776_v30 }
0x2056   : > { %v5765_v51 = vpop.xlane.xlu2 %5764 }
0x2057   : > { %v5773_v11 = vmul.f32 %v5765_v51, %v8051_v2 }
0x2059   : > { %v7488_v28 = vpop.eup %7487  ;;  %v5777_v24 = vadd.f32 1e-05, %v5773_v11 }
0x205a   : > { %v5781_v10 = vmul.f32 %v7488_v28, %v5776_v30  ;;  %vm5787_vm2 = vweird.f32 %v7488_v28 }
0x205b   : > { %7489 = vrsqrt.f32 %v5777_v24  ;;  %vm5788_vm9 = vmor %vm5786_vm8, %vm5787_vm2  ;;  %vm5796_vm3 = vweird.f32 %v5777_v24 }
0x205c   : > { %v5782_v34 = vmul.f32 %v7488_v28, %v5781_v10 }
0x205e   : > { %v5783_v54 = vmul.f32 0.5, %v5782_v34  ;;  %v5768_v48 = vpop.xlane.xlu0 %5767 }
0x205f   : > { %v5774_v58 = vmul.f32 %v5768_v48, %v8051_v2 }
0x2060   : > { %v5784_v36 = vsub.f32 1.5, %v5783_v54 }
0x2061   : > { %v7490_v3 = vpop.eup %7489  ;;  %v5778_v0 = vadd.f32 1e-05, %v5774_v58 }
0x2062   : > { %v5785_v41 = vmul.f32 %v7488_v28, %v5784_v36  ;;  %v5791_v33 = vmul.f32 %v7490_v3, %v5777_v24  ;;  %vm5797_vm1 = vweird.f32 %v7490_v3 }
0x2063   : > { %7491 = vrsqrt.f32 %v5778_v0  ;;  %vm5798_vm6 = vmor %vm5796_vm3, %vm5797_vm1  ;;  %vm5806_vm10 = vweird.f32 %v5778_v0 }
0x2064   : > { %v5789_v50 = vsel %vm5788_vm9, %v7488_v28, %v5785_v41  ;;  %v5792_v1 = vmul.f32 %v7490_v3, %v5791_v33 }
0x2065   : > { %v5820_v18 = vmul.f32 %v5789_v50, %v5752_v12 }
0x2066   : > { %v5793_v22 = vmul.f32 0.5, %v5792_v1  ;;  %v5771_v60 = vpop.xlane.xlu1 %5770 }
0x2067   : > { %v5825_v8 = vmul.f32 %v7271_v47, %v5820_v18  ;;  %v5775_v15 = vmul.f32 %v5771_v60, %v8051_v2 }
0x2068   : > { %v5794_v57 = vsub.f32 1.5, %v5793_v22 }
0x2069   : > { %v5830_v16 = vadd.f32 %v7272_v45, %v5825_v8  ;;  %v7492_v62 = vpop.eup %7491  ;;  %v5779_v31 = vadd.f32 1e-05, %v5775_v15 }
0x206a   : > { %v5795_v38 = vmul.f32 %v7490_v3, %v5794_v57  ;;  %v5801_v61 = vmul.f32 %v7492_v62, %v5778_v0  ;;  %vm5807_vm7 = vweird.f32 %v7492_v62 }
0x206b   : > { %7030 = vst.msk [vmem:[%s8964_s20 + $0x20] sm:$0xff] %vm575_vm4, %v5830_v16  ;;  %7493 = vrsqrt.f32 %v5779_v31  ;;  %vm5808_vm11 = vmor %vm5806_vm10, %vm5807_vm7  ;;  %vm5816_vm13 = vweird.f32 %v5779_v31 }
0x206c   : > { %v5799_v63 = vsel %vm5798_vm6, %v7490_v3, %v5795_v38  ;;  %v5802_v29 = vmul.f32 %v7492_v62, %v5801_v61 }
0x206d   : > { %v5821_v13 = vmul.f32 %v5799_v63, %v5753_v20 }
0x206e   : > { %v5803_v46 = vmul.f32 0.5, %v5802_v29 }
0x206f   : > { %v5826_v6 = vmul.f32 %v7271_v47, %v5821_v13 }
0x2070   : > { %v5804_v4 = vsub.f32 1.5, %v5803_v46 }
0x2071   : > { %v5831_v32 = vadd.f32 %v7272_v45, %v5826_v6  ;;  %v7494_v53 = vpop.eup %7493 }
0x2072   : > { %v5805_v25 = vmul.f32 %v7492_v62, %v5804_v4  ;;  %v5811_v21 = vmul.f32 %v7494_v53, %v5779_v31  ;;  %vm5817_vm12 = vweird.f32 %v7494_v53 }
0x2073   : > { %7031 = vst.msk [vmem:[%s8964_s20 + $0x28] sm:$0xff] %vm575_vm4, %v5831_v32  ;;  %vm5818_vm14 = vmor %vm5816_vm13, %vm5817_vm12 }
0x2074   : > { %v5809_v2 = vsel %vm5808_vm11, %v7492_v62, %v5805_v25  ;;  %v5812_v19 = vmul.f32 %v7494_v53, %v5811_v21 }
0x2075   : > { %v5822_v7 = vmul.f32 %v5809_v2, %v9507_v42 }
0x2076   : > { %v5813_v9 = vmul.f32 0.5, %v5812_v19 }
0x2077   : > { %v5827_v12 = vmul.f32 %v7271_v47, %v5822_v7 }
0x2078   : > { %v5814_v5 = vsub.f32 1.5, %v5813_v9 }
0x2079   : > { %v5832_v56 = vadd.f32 %v7272_v45, %v5827_v12 }
0x207a   : > { %v5815_v17 = vmul.f32 %v7494_v53, %v5814_v5 }
0x207b   : > { %7032 = vst.msk [vmem:[%s8964_s20 + $0x30] sm:$0xff] %vm575_vm4, %v5832_v56 }
0x207c   : > { %v5819_v55 = vsel %vm5818_vm14, %v7494_v53, %v5815_v17 }
0x207d   : > { %v5823_v20 = vmul.f32 %v5819_v55, %v9513_v43 }
0x207f   : > { %v5828_v49 = vmul.f32 %v7271_v47, %v5823_v20 }
0x2081   : > { %v5833_v35 = vadd.f32 %v7272_v45, %v5828_v49 }
0x2083   : > { %7033 = vst.msk [vmem:[%s8964_s20 + $0x38] sm:$0x7f] %vm589_vm5, %v5833_v35 }
0x2084 PF: > { %s22_s21 = sadd.s32 1, %s7501_s21  }
0x2085   : > { %p19_p4 = scmp.ge.s32.totalorder %s22_s21, 4  }
0x2087   :  { %21 = sbr.rel (!%p19_p4) target bundleno = 1 (0x1), region = 141 }

</bundles_post_ra>
